<compile_context>
chip_gen: v7x
topology: tpu7x:2x2x1
jax: 0.10.0
libtpu: 0.0.40
codegen_flags: <defaults>
</compile_context>

<pallas_src>
import jax
import jax.numpy as jnp
from jax.experimental import pallas as pl
from jax.experimental.pallas import tpu as pltpu


# Set to jnp.bfloat16 on v6e/v7x for MXU-native matmul inputs (accumulation
# stays f32 via preferred_element_type). f32 keeps exact parity with the ref.
MXU_DTYPE = jnp.float32


# ---------------------------------------------------------------------------
# Fused Pallas kernel: embedded input -> 4x biLSTM -> Linear -> LogSoftmax
# ---------------------------------------------------------------------------
def fused_rnn_classifier_kernel(
    x_ref,          # (T, B, E)          time-major embedded, batch-padded input
    wih0_ref,       # (2, E, 8H)         layer-0 fused input->gate weights (fwd/bwd cols)
    wih_rest_ref,   # (L-1, 2, 2H, 8H)   layers 1..L-1 fused input->gate weights
    whh_ref,        # (L, 2H, 8H)        fused block-diagonal hidden->gate weights
    bias_ref,       # (L, 1, 8H)         fused combined biases (b_ih + b_hh, both dirs)
    gen_w_ref,      # (2H, C)            classifier weight (transposed)
    gen_b_ref,      # (1, C)             classifier bias
    out_ref,        # (B, C)             log-probs
    seq_a, seq_b,   # (T, B, 2H)         time-aligned hidden-seq ping-pong buffers
    gxa, gxb,       # (T, B, 8H)         hoisted input-projection gate buffers
):
    T, B, E = x_ref.shape
    H2 = seq_a.shape[2]            # 2H  (fused state width)
    H = H2 // 2
    H8 = gxa.shape[2]              # 8H  (fused gate width)
    n_layers = whh_ref.shape[0]
    unroll = True if T <= 32 else 8   # partial unroll for long sequences

    seqs = (seq_a, seq_b)

    for layer in range(n_layers):                  # static unroll over layers
        cur = seqs[layer % 2]

        # ---- hoisted input projection (one pass per direction, off the
        #      serial path; fused-column weights -> no interleave needed) ----
        if layer == 0:
            a_flat = x_ref[...].reshape(T * B, E).astype(MXU_DTYPE)
            w_f = wih0_ref[0].astype(MXU_DTYPE)
            w_b = wih0_ref[1].astype(MXU_DTYPE)
        else:
            prev = seqs[(layer - 1) % 2]
            a_flat = prev[...].reshape(T * B, H2).astype(MXU_DTYPE)
            w_f = wih_rest_ref[layer - 1, 0].astype(MXU_DTYPE)
            w_b = wih_rest_ref[layer - 1, 1].astype(MXU_DTYPE)

        gxa[...] = (jnp.dot(a_flat, w_f, preferred_element_type=jnp.float32)
                    + bias_ref[layer]).reshape(T, B, H8)
        gxb[...] = jnp.dot(a_flat, w_b,
                           preferred_element_type=jnp.float32).reshape(T, B, H8)

        whh = whh_ref[layer].astype(MXU_DTYPE)     # (2H, 8H), hoisted

        # ---- serial recurrence: fwd time s and bwd time T-1-s in ONE cell ----
        def step(s, carry):
            h, c = carry                           # (B, 2H) each, in vregs
            t_rev = T - 1 - s
            gates = (jnp.dot(h.astype(MXU_DTYPE), whh,
                             preferred_element_type=jnp.float32)
                     + gxa[s] + gxb[t_rev])        # (B, 8H)
            sg = jax.nn.sigmoid(gates[:, 0:6 * H])   # [i_f i_b | f_f f_b | o_f o_b]
            g = jnp.tanh(gates[:, 6 * H:H8])         # [g_f g_b]
            i = sg[:, 0:H2]
            f = sg[:, H2:2 * H2]
            o = sg[:, 2 * H2:3 * H2]
            c = f * c + i * g
            h = o * jnp.tanh(c)
            cur[s, :, 0:H] = h[:, 0:H]             # h_fwd(s)
            cur[t_rev, :, H:H2] = h[:, H:H2]       # h_bwd(T-1-s) -> time-aligned
            return (h, c)

        init = (jnp.zeros((B, H2), jnp.float32), jnp.zeros((B, H2), jnp.float32))
        jax.lax.fori_loop(0, T, step, init, unroll=unroll)

    # ---- generator: Linear + LogSoftmax on output[:, -1] = [h_f(T-1)|h_b(T-1)]
    last = seqs[(n_layers - 1) % 2][T - 1]         # (B, 2H), already time-aligned
    z = (jnp.dot(last.astype(MXU_DTYPE), gen_w_ref[...].astype(MXU_DTYPE),
                 preferred_element_type=jnp.float32) + gen_b_ref[...])
    m = jnp.max(z, axis=-1, keepdims=True)
    sh = z - m
    lse = jnp.log(jnp.sum(jnp.exp(sh), axis=-1, keepdims=True))
    out_ref[...] = sh - lse


# ---------------------------------------------------------------------------
# Weight repacking: torch-layout params -> fused kernel layout
# ---------------------------------------------------------------------------
def pack_kernel_params(params):
    """Fused gate column order (8H): [i_f,i_b | f_f,f_b | o_f,o_b | g_f,g_b].

    Sigmoid gates occupy the first 6H columns, tanh gates the last 2H; the fwd
    direction takes the first H of each 2H block and the bwd the second H.
    Whh becomes block-diagonal (2H, 8H); per-direction input weights are zero
    padded into the 8H fused column space so no column interleave is needed in
    the kernel.
    """
    H = params["whh"].shape[2]
    L = params["whh"].shape[0]
    assert L >= 2, "kernel packing assumes n_layers >= 2"

    def place(w, d):
        # w: (D_in, 4H) in torch gate order [i, f, g, o] -> (D_in, 8H) fused cols
        i = w[:, 0:H]
        f = w[:, H:2 * H]
        g = w[:, 2 * H:3 * H]
        o = w[:, 3 * H:4 * H]
        out = jnp.zeros((w.shape[0], 8 * H), w.dtype)
        out = out.at[:, 0 * 2 * H + d * H:0 * 2 * H + (d + 1) * H].set(i)
        out = out.at[:, 1 * 2 * H + d * H:1 * 2 * H + (d + 1) * H].set(f)
        out = out.at[:, 2 * 2 * H + d * H:2 * 2 * H + (d + 1) * H].set(o)
        out = out.at[:, 3 * 2 * H + d * H:3 * 2 * H + (d + 1) * H].set(g)
        return out

    packed = {"emb": params["emb"]}
    packed["wih0"] = jnp.stack([place(params["wih0"][0], 0),
                                place(params["wih0"][1], 1)])          # (2, E, 8H)
    packed["wih_rest"] = jnp.stack([
        jnp.stack([place(params["wih_rest"][l, 0], 0),
                   place(params["wih_rest"][l, 1], 1)])
        for l in range(L - 1)])                                        # (L-1, 2, 2H, 8H)
    packed["whh"] = jnp.stack([
        jnp.concatenate([place(params["whh"][l, 0], 0),
                         place(params["whh"][l, 1], 1)], axis=0)
        for l in range(L)])                                            # (L, 2H, 8H)
    packed["bias"] = jnp.stack([
        place(params["bias"][l, 0], 0) + place(params["bias"][l, 1], 1)
        for l in range(L)])                                            # (L, 1, 8H)
    packed["gen_w_t"] = params["gen_w_t"]                              # (2H, C)
    packed["gen_b"] = params["gen_b"].reshape(1, -1)                   # (1, C)
    return packed


# ---------------------------------------------------------------------------
# Wrapper
# ---------------------------------------------------------------------------
def rnn_classifier_forward(packed, tokens):
    """tokens: int32 (B, T). Returns log-probs (B, n_classes)."""
    B, T = tokens.shape
    H2 = packed["whh"].shape[1]           # 2H
    H = H2 // 2
    C = packed["gen_w_t"].shape[1]

    # Embedding gather stays in plain JAX glue, produced time-major directly.
    # TODO(synk): fuse the gather into the kernel via scalar-prefetched ids.
    x = jnp.take(packed["emb"], tokens.T, axis=0).astype(jnp.float32)  # (T, B, E)

    # Pad batch to a sublane multiple (8).
    B_pad = max(8, ((B + 7) // 8) * 8)
    if B_pad != B:
        x = jnp.pad(x, ((0, 0), (0, B_pad - B), (0, 0)))

    # Size the scoped-VMEM limit to the actual residency (with headroom).
    scratch_bytes = 4 * (2 * T * B_pad * 2 * H + 2 * T * B_pad * 8 * H)
    io_bytes = 4 * (x.size + packed["wih0"].size + packed["wih_rest"].size
                    + packed["whh"].size + packed["bias"].size
                    + packed["gen_w_t"].size + packed["gen_b"].size + B_pad * C)
    vmem_limit = int(max(32 << 20, 2 * (scratch_bytes + io_bytes)))

    vmem = pl.BlockSpec(memory_space=pltpu.MemorySpace.VMEM)
    out = pl.pallas_call(
        fused_rnn_classifier_kernel,
        out_shape=jax.ShapeDtypeStruct((B_pad, C), jnp.float32),
        in_specs=[vmem] * 7,
        out_specs=vmem,
        scratch_shapes=[
            pltpu.VMEM((T, B_pad, 2 * H), jnp.float32),   # seq_a
            pltpu.VMEM((T, B_pad, 2 * H), jnp.float32),   # seq_b
            pltpu.VMEM((T, B_pad, 8 * H), jnp.float32),   # gxa (fwd cols + bias)
            pltpu.VMEM((T, B_pad, 8 * H), jnp.float32),   # gxb (bwd cols)
        ],
        compiler_params=pltpu.CompilerParams(vmem_limit_bytes=vmem_limit),
    )(
        x,
        packed["wih0"],
        packed["wih_rest"],
        packed["whh"],
        packed["bias"],
        packed["gen_w_t"],
        packed["gen_b"],
    )
    return out[:B]


# ---------------------------------------------------------------------------
# Parameters (torch-layout: gate order [i, f, g, o] per direction)
# ---------------------------------------------------------------------------
def init_params(key, input_size, word_vec_size, hidden_size, n_classes, n_layers):
    H = hidden_size
    k = 1.0 / jnp.sqrt(H)
    params = {}

    key, k_emb = jax.random.split(key)
    params["emb"] = jax.random.normal(k_emb, (input_size, word_vec_size), jnp.float32)

    wih0 = None
    wih_rest, whh, bias = [], [], []
    for layer in range(n_layers):
        d_in = word_vec_size if layer == 0 else 2 * H
        w_dirs, wh_dirs, b_dirs = [], [], []
        for _direction in range(2):
            key, k1, k2, k3, k4 = jax.random.split(key, 5)
            w_dirs.append(jax.random.uniform(k1, (d_in, 4 * H), jnp.float32, -k, k))
            wh_dirs.append(jax.random.uniform(k2, (H, 4 * H), jnp.float32, -k, k))
            b_ih = jax.random.uniform(k3, (4 * H,), jnp.float32, -k, k)
            b_hh = jax.random.uniform(k4, (4 * H,), jnp.float32, -k, k)
            b_dirs.append((b_ih + b_hh).reshape(1, 4 * H))
        if layer == 0:
            wih0 = jnp.stack(w_dirs)                   # (2, E, 4H)
        else:
            wih_rest.append(jnp.stack(w_dirs))         # (2, 2H, 4H)
        whh.append(jnp.stack(wh_dirs))                 # (2, H, 4H)
        bias.append(jnp.stack(b_dirs))                 # (2, 1, 4H)

    params["wih0"] = wih0
    params["wih_rest"] = jnp.stack(wih_rest)           # (L-1, 2, 2H, 4H)
    params["whh"] = jnp.stack(whh)                     # (L, 2, H, 4H)
    params["bias"] = jnp.stack(bias)                   # (L, 2, 1, 4H)

    key, k_w, k_b = jax.random.split(key, 3)
    kg = 1.0 / jnp.sqrt(2 * H)
    params["gen_w_t"] = jax.random.uniform(k_w, (2 * H, n_classes), jnp.float32, -kg, kg)
    params["gen_b"] = jax.random.uniform(k_b, (n_classes,), jnp.float32, -kg, kg)
    return params


# ---------------------------------------------------------------------------
# Pure-JAX reference for correctness checking
# ---------------------------------------------------------------------------
def lstm_layer_ref(x_tbd, wih_t, whh_t, bias):
    T, B, _ = x_tbd.shape
    H = whh_t.shape[0]

    def step(carry, x_t):
        h, c = carry
        gates = x_t @ wih_t + h @ whh_t + bias
        i_g = jax.nn.sigmoid(gates[:, 0:H])
        f_g = jax.nn.sigmoid(gates[:, H:2 * H])
        g_g = jnp.tanh(gates[:, 2 * H:3 * H])
        o_g = jax.nn.sigmoid(gates[:, 3 * H:4 * H])
        c = f_g * c + i_g * g_g
        h = o_g * jnp.tanh(c)
        return (h, c), h

    init = (jnp.zeros((B, H), jnp.float32), jnp.zeros((B, H), jnp.float32))
    _, hs = jax.lax.scan(step, init, x_tbd)
    return hs


def rnn_classifier_ref(params, tokens):
    emb = jnp.take(params["emb"], tokens, axis=0)
    x = jnp.transpose(emb, (1, 0, 2)).astype(jnp.float32)
    n_layers = params["whh"].shape[0]
    for layer in range(n_layers):
        wih = params["wih0"] if layer == 0 else params["wih_rest"][layer - 1]
        fwd = lstm_layer_ref(x, wih[0], params["whh"][layer, 0], params["bias"][layer, 0])
        bwd = lstm_layer_ref(x[::-1], wih[1], params["whh"][layer, 1],
                             params["bias"][layer, 1])[::-1]
        x = jnp.concatenate([fwd, bwd], axis=-1)
    z = x[-1] @ params["gen_w_t"] + params["gen_b"]
    return jax.nn.log_softmax(z, axis=-1)


# ---------------------------------------------------------------------------
if __name__ == "__main__":
    INPUT_SIZE = 100     # vocab
    WORD_VEC = 32
    HIDDEN = 64          # 2H = 128 -> lane-dense fused state / seq rows
    N_CLASSES = 5
    N_LAYERS = 4
    B, T = 2, 8

    key = jax.random.PRNGKey(0)
    k_params, k_tokens = jax.random.split(key)
    params = init_params(k_params, INPUT_SIZE, WORD_VEC, HIDDEN, N_CLASSES, N_LAYERS)
    tokens = jax.random.randint(k_tokens, (B, T), 0, INPUT_SIZE, dtype=jnp.int32)

    packed = pack_kernel_params(params)
    out = jax.block_until_ready(rnn_classifier_forward(packed, tokens))
    ref = jax.block_until_ready(rnn_classifier_ref(params, tokens))

    assert out.shape == (B, N_CLASSES)
    err = float(jnp.max(jnp.abs(out - ref)))
    assert err < 2e-3, f"max abs err {err}:\n{out}\nvs\n{ref}"
    print("KERNEL_OK")
</pallas_src>

<mosaic_0001>
module attributes {stable_mosaic.version = 11 : i64} {
  func.func @fused_rnn_classifier_kernel(%arg0: memref<8x8x32xf32, #tpu.memory_space<vmem>>, %arg1: memref<2x32x512xf32, #tpu.memory_space<vmem>>, %arg2: memref<3x2x128x512xf32, #tpu.memory_space<vmem>>, %arg3: memref<4x128x512xf32, #tpu.memory_space<vmem>>, %arg4: memref<4x1x512xf32, #tpu.memory_space<vmem>>, %arg5: memref<128x5xf32, #tpu.memory_space<vmem>>, %arg6: memref<1x5xf32, #tpu.memory_space<vmem>>, %arg7: memref<8x5xf32, #tpu.memory_space<vmem>>, %arg8: memref<8x8x128xf32, #tpu.memory_space<vmem>>, %arg9: memref<8x8x128xf32, #tpu.memory_space<vmem>>, %arg10: memref<8x8x512xf32, #tpu.memory_space<vmem>>, %arg11: memref<8x8x512xf32, #tpu.memory_space<vmem>>) attributes {dimension_semantics = [], scalar_prefetch = 0 : i64, scratch_operands = 4 : i64, tpu.core_type = #tpu.core_type<tc>} {
    %c0 = arith.constant 0 : index
    %c0_0 = arith.constant 0 : index
    %c0_1 = arith.constant 0 : index
    %0 = vector.load %arg0[%c0, %c0_0, %c0_1] : memref<8x8x32xf32, #tpu.memory_space<vmem>>, vector<8x8x32xf32>
    %1 = vector.shape_cast %0 : vector<8x8x32xf32> to vector<64x32xf32>
    %c0_2 = arith.constant 0 : index
    %c0_3 = arith.constant 0 : index
    %c0_4 = arith.constant 0 : index
    %2 = vector.load %arg1[%c0_2, %c0_3, %c0_4] : memref<2x32x512xf32, #tpu.memory_space<vmem>>, vector<1x32x512xf32>
    %3 = vector.shape_cast %2 : vector<1x32x512xf32> to vector<32x512xf32>
    %c1 = arith.constant 1 : index
    %c0_5 = arith.constant 0 : index
    %c0_6 = arith.constant 0 : index
    %4 = vector.load %arg1[%c1, %c0_5, %c0_6] : memref<2x32x512xf32, #tpu.memory_space<vmem>>, vector<1x32x512xf32>
    %5 = vector.shape_cast %4 : vector<1x32x512xf32> to vector<32x512xf32>
    %cst = arith.constant dense<0.000000e+00> : vector<64x512xf32>
    %6 = tpu.matmul %1, %3, %cst {dimension_numbers = #tpu.dot_dimension_numbers<[1], [0], [0], [1], [0, 0, 1, 1], [], []>} : vector<64x32xf32>, vector<32x512xf32>, vector<64x512xf32> -> vector<64x512xf32>
    %c0_7 = arith.constant 0 : index
    %c0_8 = arith.constant 0 : index
    %c0_9 = arith.constant 0 : index
    %7 = vector.load %arg4[%c0_7, %c0_8, %c0_9] : memref<4x1x512xf32, #tpu.memory_space<vmem>>, vector<1x1x512xf32>
    %8 = vector.shape_cast %7 : vector<1x1x512xf32> to vector<1x512xf32>
    %9 = vector.broadcast %8 : vector<1x512xf32> to vector<64x512xf32>
    %10 = arith.addf %6, %9 : vector<64x512xf32>
    %11 = vector.shape_cast %10 : vector<64x512xf32> to vector<8x8x512xf32>
    %c0_10 = arith.constant 0 : index
    %c0_11 = arith.constant 0 : index
    %c0_12 = arith.constant 0 : index
    %12 = vector.load %arg10[%c0_10, %c0_11, %c0_12] : memref<8x8x512xf32, #tpu.memory_space<vmem>>, vector<8x8x512xf32>
    tpu.vector_store %arg10[%c0_10, %c0_11, %c0_12], %11 {strides = array<i32>} : memref<8x8x512xf32, #tpu.memory_space<vmem>>, vector<8x8x512xf32>,
    %cst_13 = arith.constant dense<0.000000e+00> : vector<64x512xf32>
    %13 = tpu.matmul %1, %5, %cst_13 {dimension_numbers = #tpu.dot_dimension_numbers<[1], [0], [0], [1], [0, 0, 1, 1], [], []>} : vector<64x32xf32>, vector<32x512xf32>, vector<64x512xf32> -> vector<64x512xf32>
    %14 = vector.shape_cast %13 : vector<64x512xf32> to vector<8x8x512xf32>
    %c0_14 = arith.constant 0 : index
    %c0_15 = arith.constant 0 : index
    %c0_16 = arith.constant 0 : index
    %15 = vector.load %arg11[%c0_14, %c0_15, %c0_16] : memref<8x8x512xf32, #tpu.memory_space<vmem>>, vector<8x8x512xf32>
    tpu.vector_store %arg11[%c0_14, %c0_15, %c0_16], %14 {strides = array<i32>} : memref<8x8x512xf32, #tpu.memory_space<vmem>>, vector<8x8x512xf32>,
    %c0_17 = arith.constant 0 : index
    %c0_18 = arith.constant 0 : index
    %c0_19 = arith.constant 0 : index
    %16 = vector.load %arg3[%c0_17, %c0_18, %c0_19] : memref<4x128x512xf32, #tpu.memory_space<vmem>>, vector<1x128x512xf32>
    %17 = vector.shape_cast %16 : vector<1x128x512xf32> to vector<128x512xf32>
    %cst_20 = arith.constant 0.000000e+00 : f32
    %18 = vector.broadcast %cst_20 : f32 to vector<8x128xf32>
    %cst_21 = arith.constant 0.000000e+00 : f32
    %19 = vector.broadcast %cst_21 : f32 to vector<8x128xf32>
    %c0_i32 = arith.constant 0 : i32
    %c7_i32 = arith.constant 7 : i32
    %20 = arith.subi %c7_i32, %c0_i32 : i32
    %cst_22 = arith.constant dense<0.000000e+00> : vector<8x512xf32>
    %21 = tpu.matmul %18, %17, %cst_22 {dimension_numbers = #tpu.dot_dimension_numbers<[1], [0], [0], [1], [0, 0, 1, 1], [], []>} : vector<8x128xf32>, vector<128x512xf32>, vector<8x512xf32> -> vector<8x512xf32>
    %22 = arith.index_cast %c0_i32 : i32 to index
    %c0_23 = arith.constant 0 : index
    %c0_24 = arith.constant 0 : index
    %23 = vector.load %arg10[%22, %c0_23, %c0_24] : memref<8x8x512xf32, #tpu.memory_space<vmem>>, vector<1x8x512xf32>
    %24 = vector.shape_cast %23 : vector<1x8x512xf32> to vector<8x512xf32>
    %25 = arith.addf %21, %24 : vector<8x512xf32>
    %26 = arith.index_cast %20 : i32 to index
    %c0_25 = arith.constant 0 : index
    %c0_26 = arith.constant 0 : index
    %27 = vector.load %arg11[%26, %c0_25, %c0_26] : memref<8x8x512xf32, #tpu.memory_space<vmem>>, vector<1x8x512xf32>
    %28 = vector.shape_cast %27 : vector<1x8x512xf32> to vector<8x512xf32>
    %29 = arith.addf %25, %28 : vector<8x512xf32>
    %30 = vector.extract_strided_slice %29 {offsets = [0, 0], sizes = [8, 384], strides = [1, 1]} : vector<8x512xf32> to vector<8x384xf32>
    %31 = arith.negf %30 : vector<8x384xf32>
    %32 = math.exp %31 : vector<8x384xf32>
    %cst_27 = arith.constant 1.000000e+00 : f32
    %33 = vector.broadcast %cst_27 : f32 to vector<8x384xf32>
    %34 = arith.addf %33, %32 : vector<8x384xf32>
    %35 = arith.divf %33, %34 : vector<8x384xf32>
    %36 = vector.extract_strided_slice %29 {offsets = [0, 384], sizes = [8, 128], strides = [1, 1]} : vector<8x512xf32> to vector<8x128xf32>
    %37 = math.tanh %36 : vector<8x128xf32>
    %38 = vector.extract_strided_slice %35 {offsets = [0, 0], sizes = [8, 128], strides = [1, 1]} : vector<8x384xf32> to vector<8x128xf32>
    %39 = vector.extract_strided_slice %35 {offsets = [0, 128], sizes = [8, 128], strides = [1, 1]} : vector<8x384xf32> to vector<8x128xf32>
    %40 = vector.extract_strided_slice %35 {offsets = [0, 256], sizes = [8, 128], strides = [1, 1]} : vector<8x384xf32> to vector<8x128xf32>
    %41 = arith.mulf %39, %19 : vector<8x128xf32>
    %42 = arith.mulf %38, %37 : vector<8x128xf32>
    %43 = arith.addf %41, %42 : vector<8x128xf32>
    %44 = math.tanh %43 : vector<8x128xf32>
    %45 = arith.mulf %40, %44 : vector<8x128xf32>
    %46 = vector.extract_strided_slice %45 {offsets = [0, 0], sizes = [8, 64], strides = [1, 1]} : vector<8x128xf32> to vector<8x64xf32>
    %47 = arith.index_cast %c0_i32 : i32 to index
    %c0_28 = arith.constant 0 : index
    %c0_29 = arith.constant 0 : index
    %48 = vector.load %arg8[%47, %c0_28, %c0_29] : memref<8x8x128xf32, #tpu.memory_space<vmem>>, vector<1x8x64xf32>
    %49 = vector.shape_cast %48 : vector<1x8x64xf32> to vector<8x64xf32>
    %50 = vector.shape_cast %46 : vector<8x64xf32> to vector<1x8x64xf32>
    tpu.vector_store %arg8[%47, %c0_28, %c0_29], %50 {strides = array<i32>} : memref<8x8x128xf32, #tpu.memory_space<vmem>>, vector<1x8x64xf32>,
    %51 = vector.extract_strided_slice %45 {offsets = [0, 64], sizes = [8, 64], strides = [1, 1]} : vector<8x128xf32> to vector<8x64xf32>
    %52 = arith.index_cast %20 : i32 to index
    %c0_30 = arith.constant 0 : index
    %c64 = arith.constant 64 : index
    %53 = vector.load %arg8[%52, %c0_30, %c64] : memref<8x8x128xf32, #tpu.memory_space<vmem>>, vector<1x8x64xf32>
    %54 = vector.shape_cast %53 : vector<1x8x64xf32> to vector<8x64xf32>
    %55 = vector.shape_cast %51 : vector<8x64xf32> to vector<1x8x64xf32>
    tpu.vector_store %arg8[%52, %c0_30, %c64], %55 {strides = array<i32>} : memref<8x8x128xf32, #tpu.memory_space<vmem>>, vector<1x8x64xf32>,
    %c1_i32 = arith.constant 1 : i32
    %c7_i32_31 = arith.constant 7 : i32
    %56 = arith.subi %c7_i32_31, %c1_i32 : i32
    %cst_32 = arith.constant dense<0.000000e+00> : vector<8x512xf32>
    %57 = tpu.matmul %45, %17, %cst_32 {dimension_numbers = #tpu.dot_dimension_numbers<[1], [0], [0], [1], [0, 0, 1, 1], [], []>} : vector<8x128xf32>, vector<128x512xf32>, vector<8x512xf32> -> vector<8x512xf32>
    %58 = arith.index_cast %c1_i32 : i32 to index
    %c0_33 = arith.constant 0 : index
    %c0_34 = arith.constant 0 : index
    %59 = vector.load %arg10[%58, %c0_33, %c0_34] : memref<8x8x512xf32, #tpu.memory_space<vmem>>, vector<1x8x512xf32>
    %60 = vector.shape_cast %59 : vector<1x8x512xf32> to vector<8x512xf32>
    %61 = arith.addf %57, %60 : vector<8x512xf32>
    %62 = arith.index_cast %56 : i32 to index
    %c0_35 = arith.constant 0 : index
    %c0_36 = arith.constant 0 : index
    %63 = vector.load %arg11[%62, %c0_35, %c0_36] : memref<8x8x512xf32, #tpu.memory_space<vmem>>, vector<1x8x512xf32>
    %64 = vector.shape_cast %63 : vector<1x8x512xf32> to vector<8x512xf32>
    %65 = arith.addf %61, %64 : vector<8x512xf32>
    %66 = vector.extract_strided_slice %65 {offsets = [0, 0], sizes = [8, 384], strides = [1, 1]} : vector<8x512xf32> to vector<8x384xf32>
    %67 = arith.negf %66 : vector<8x384xf32>
    %68 = math.exp %67 : vector<8x384xf32>
    %cst_37 = arith.constant 1.000000e+00 : f32
    %69 = vector.broadcast %cst_37 : f32 to vector<8x384xf32>
    %70 = arith.addf %69, %68 : vector<8x384xf32>
    %71 = arith.divf %69, %70 : vector<8x384xf32>
    %72 = vector.extract_strided_slice %65 {offsets = [0, 384], sizes = [8, 128], strides = [1, 1]} : vector<8x512xf32> to vector<8x128xf32>
    %73 = math.tanh %72 : vector<8x128xf32>
    %74 = vector.extract_strided_slice %71 {offsets = [0, 0], sizes = [8, 128], strides = [1, 1]} : vector<8x384xf32> to vector<8x128xf32>
    %75 = vector.extract_strided_slice %71 {offsets = [0, 128], sizes = [8, 128], strides = [1, 1]} : vector<8x384xf32> to vector<8x128xf32>
    %76 = vector.extract_strided_slice %71 {offsets = [0, 256], sizes = [8, 128], strides = [1, 1]} : vector<8x384xf32> to vector<8x128xf32>
    %77 = arith.mulf %75, %43 : vector<8x128xf32>
    %78 = arith.mulf %74, %73 : vector<8x128xf32>
    %79 = arith.addf %77, %78 : vector<8x128xf32>
    %80 = math.tanh %79 : vector<8x128xf32>
    %81 = arith.mulf %76, %80 : vector<8x128xf32>
    %82 = vector.extract_strided_slice %81 {offsets = [0, 0], sizes = [8, 64], strides = [1, 1]} : vector<8x128xf32> to vector<8x64xf32>
    %83 = arith.index_cast %c1_i32 : i32 to index
    %c0_38 = arith.constant 0 : index
    %c0_39 = arith.constant 0 : index
    %84 = vector.load %arg8[%83, %c0_38, %c0_39] : memref<8x8x128xf32, #tpu.memory_space<vmem>>, vector<1x8x64xf32>
    %85 = vector.shape_cast %84 : vector<1x8x64xf32> to vector<8x64xf32>
    %86 = vector.shape_cast %82 : vector<8x64xf32> to vector<1x8x64xf32>
    tpu.vector_store %arg8[%83, %c0_38, %c0_39], %86 {strides = array<i32>} : memref<8x8x128xf32, #tpu.memory_space<vmem>>, vector<1x8x64xf32>,
    %87 = vector.extract_strided_slice %81 {offsets = [0, 64], sizes = [8, 64], strides = [1, 1]} : vector<8x128xf32> to vector<8x64xf32>
    %88 = arith.index_cast %56 : i32 to index
    %c0_40 = arith.constant 0 : index
    %c64_41 = arith.constant 64 : index
    %89 = vector.load %arg8[%88, %c0_40, %c64_41] : memref<8x8x128xf32, #tpu.memory_space<vmem>>, vector<1x8x64xf32>
    %90 = vector.shape_cast %89 : vector<1x8x64xf32> to vector<8x64xf32>
    %91 = vector.shape_cast %87 : vector<8x64xf32> to vector<1x8x64xf32>
    tpu.vector_store %arg8[%88, %c0_40, %c64_41], %91 {strides = array<i32>} : memref<8x8x128xf32, #tpu.memory_space<vmem>>, vector<1x8x64xf32>,
    %c2_i32 = arith.constant 2 : i32
    %c7_i32_42 = arith.constant 7 : i32
    %92 = arith.subi %c7_i32_42, %c2_i32 : i32
    %cst_43 = arith.constant dense<0.000000e+00> : vector<8x512xf32>
    %93 = tpu.matmul %81, %17, %cst_43 {dimension_numbers = #tpu.dot_dimension_numbers<[1], [0], [0], [1], [0, 0, 1, 1], [], []>} : vector<8x128xf32>, vector<128x512xf32>, vector<8x512xf32> -> vector<8x512xf32>
    %94 = arith.index_cast %c2_i32 : i32 to index
    %c0_44 = arith.constant 0 : index
    %c0_45 = arith.constant 0 : index
    %95 = vector.load %arg10[%94, %c0_44, %c0_45] : memref<8x8x512xf32, #tpu.memory_space<vmem>>, vector<1x8x512xf32>
    %96 = vector.shape_cast %95 : vector<1x8x512xf32> to vector<8x512xf32>
    %97 = arith.addf %93, %96 : vector<8x512xf32>
    %98 = arith.index_cast %92 : i32 to index
    %c0_46 = arith.constant 0 : index
    %c0_47 = arith.constant 0 : index
    %99 = vector.load %arg11[%98, %c0_46, %c0_47] : memref<8x8x512xf32, #tpu.memory_space<vmem>>, vector<1x8x512xf32>
    %100 = vector.shape_cast %99 : vector<1x8x512xf32> to vector<8x512xf32>
    %101 = arith.addf %97, %100 : vector<8x512xf32>
    %102 = vector.extract_strided_slice %101 {offsets = [0, 0], sizes = [8, 384], strides = [1, 1]} : vector<8x512xf32> to vector<8x384xf32>
    %103 = arith.negf %102 : vector<8x384xf32>
    %104 = math.exp %103 : vector<8x384xf32>
    %cst_48 = arith.constant 1.000000e+00 : f32
    %105 = vector.broadcast %cst_48 : f32 to vector<8x384xf32>
    %106 = arith.addf %105, %104 : vector<8x384xf32>
    %107 = arith.divf %105, %106 : vector<8x384xf32>
    %108 = vector.extract_strided_slice %101 {offsets = [0, 384], sizes = [8, 128], strides = [1, 1]} : vector<8x512xf32> to vector<8x128xf32>
    %109 = math.tanh %108 : vector<8x128xf32>
    %110 = vector.extract_strided_slice %107 {offsets = [0, 0], sizes = [8, 128], strides = [1, 1]} : vector<8x384xf32> to vector<8x128xf32>
    %111 = vector.extract_strided_slice %107 {offsets = [0, 128], sizes = [8, 128], strides = [1, 1]} : vector<8x384xf32> to vector<8x128xf32>
    %112 = vector.extract_strided_slice %107 {offsets = [0, 256], sizes = [8, 128], strides = [1, 1]} : vector<8x384xf32> to vector<8x128xf32>
    %113 = arith.mulf %111, %79 : vector<8x128xf32>
    %114 = arith.mulf %110, %109 : vector<8x128xf32>
    %115 = arith.addf %113, %114 : vector<8x128xf32>
    %116 = math.tanh %115 : vector<8x128xf32>
    %117 = arith.mulf %112, %116 : vector<8x128xf32>
    %118 = vector.extract_strided_slice %117 {offsets = [0, 0], sizes = [8, 64], strides = [1, 1]} : vector<8x128xf32> to vector<8x64xf32>
    %119 = arith.index_cast %c2_i32 : i32 to index
    %c0_49 = arith.constant 0 : index
    %c0_50 = arith.constant 0 : index
    %120 = vector.load %arg8[%119, %c0_49, %c0_50] : memref<8x8x128xf32, #tpu.memory_space<vmem>>, vector<1x8x64xf32>
    %121 = vector.shape_cast %120 : vector<1x8x64xf32> to vector<8x64xf32>
    %122 = vector.shape_cast %118 : vector<8x64xf32> to vector<1x8x64xf32>
    tpu.vector_store %arg8[%119, %c0_49, %c0_50], %122 {strides = array<i32>} : memref<8x8x128xf32, #tpu.memory_space<vmem>>, vector<1x8x64xf32>,
    %123 = vector.extract_strided_slice %117 {offsets = [0, 64], sizes = [8, 64], strides = [1, 1]} : vector<8x128xf32> to vector<8x64xf32>
    %124 = arith.index_cast %92 : i32 to index
    %c0_51 = arith.constant 0 : index
    %c64_52 = arith.constant 64 : index
    %125 = vector.load %arg8[%124, %c0_51, %c64_52] : memref<8x8x128xf32, #tpu.memory_space<vmem>>, vector<1x8x64xf32>
    %126 = vector.shape_cast %125 : vector<1x8x64xf32> to vector<8x64xf32>
    %127 = vector.shape_cast %123 : vector<8x64xf32> to vector<1x8x64xf32>
    tpu.vector_store %arg8[%124, %c0_51, %c64_52], %127 {strides = array<i32>} : memref<8x8x128xf32, #tpu.memory_space<vmem>>, vector<1x8x64xf32>,
    %c3_i32 = arith.constant 3 : i32
    %c7_i32_53 = arith.constant 7 : i32
    %128 = arith.subi %c7_i32_53, %c3_i32 : i32
    %cst_54 = arith.constant dense<0.000000e+00> : vector<8x512xf32>
    %129 = tpu.matmul %117, %17, %cst_54 {dimension_numbers = #tpu.dot_dimension_numbers<[1], [0], [0], [1], [0, 0, 1, 1], [], []>} : vector<8x128xf32>, vector<128x512xf32>, vector<8x512xf32> -> vector<8x512xf32>
    %130 = arith.index_cast %c3_i32 : i32 to index
    %c0_55 = arith.constant 0 : index
    %c0_56 = arith.constant 0 : index
    %131 = vector.load %arg10[%130, %c0_55, %c0_56] : memref<8x8x512xf32, #tpu.memory_space<vmem>>, vector<1x8x512xf32>
    %132 = vector.shape_cast %131 : vector<1x8x512xf32> to vector<8x512xf32>
    %133 = arith.addf %129, %132 : vector<8x512xf32>
    %134 = arith.index_cast %128 : i32 to index
    %c0_57 = arith.constant 0 : index
    %c0_58 = arith.constant 0 : index
    %135 = vector.load %arg11[%134, %c0_57, %c0_58] : memref<8x8x512xf32, #tpu.memory_space<vmem>>, vector<1x8x512xf32>
    %136 = vector.shape_cast %135 : vector<1x8x512xf32> to vector<8x512xf32>
    %137 = arith.addf %133, %136 : vector<8x512xf32>
    %138 = vector.extract_strided_slice %137 {offsets = [0, 0], sizes = [8, 384], strides = [1, 1]} : vector<8x512xf32> to vector<8x384xf32>
    %139 = arith.negf %138 : vector<8x384xf32>
    %140 = math.exp %139 : vector<8x384xf32>
    %cst_59 = arith.constant 1.000000e+00 : f32
    %141 = vector.broadcast %cst_59 : f32 to vector<8x384xf32>
    %142 = arith.addf %141, %140 : vector<8x384xf32>
    %143 = arith.divf %141, %142 : vector<8x384xf32>
    %144 = vector.extract_strided_slice %137 {offsets = [0, 384], sizes = [8, 128], strides = [1, 1]} : vector<8x512xf32> to vector<8x128xf32>
    %145 = math.tanh %144 : vector<8x128xf32>
    %146 = vector.extract_strided_slice %143 {offsets = [0, 0], sizes = [8, 128], strides = [1, 1]} : vector<8x384xf32> to vector<8x128xf32>
    %147 = vector.extract_strided_slice %143 {offsets = [0, 128], sizes = [8, 128], strides = [1, 1]} : vector<8x384xf32> to vector<8x128xf32>
    %148 = vector.extract_strided_slice %143 {offsets = [0, 256], sizes = [8, 128], strides = [1, 1]} : vector<8x384xf32> to vector<8x128xf32>
    %149 = arith.mulf %147, %115 : vector<8x128xf32>
    %150 = arith.mulf %146, %145 : vector<8x128xf32>
    %151 = arith.addf %149, %150 : vector<8x128xf32>
    %152 = math.tanh %151 : vector<8x128xf32>
    %153 = arith.mulf %148, %152 : vector<8x128xf32>
    %154 = vector.extract_strided_slice %153 {offsets = [0, 0], sizes = [8, 64], strides = [1, 1]} : vector<8x128xf32> to vector<8x64xf32>
    %155 = arith.index_cast %c3_i32 : i32 to index
    %c0_60 = arith.constant 0 : index
    %c0_61 = arith.constant 0 : index
    %156 = vector.load %arg8[%155, %c0_60, %c0_61] : memref<8x8x128xf32, #tpu.memory_space<vmem>>, vector<1x8x64xf32>
    %157 = vector.shape_cast %156 : vector<1x8x64xf32> to vector<8x64xf32>
    %158 = vector.shape_cast %154 : vector<8x64xf32> to vector<1x8x64xf32>
    tpu.vector_store %arg8[%155, %c0_60, %c0_61], %158 {strides = array<i32>} : memref<8x8x128xf32, #tpu.memory_space<vmem>>, vector<1x8x64xf32>,
    %159 = vector.extract_strided_slice %153 {offsets = [0, 64], sizes = [8, 64], strides = [1, 1]} : vector<8x128xf32> to vector<8x64xf32>
    %160 = arith.index_cast %128 : i32 to index
    %c0_62 = arith.constant 0 : index
    %c64_63 = arith.constant 64 : index
    %161 = vector.load %arg8[%160, %c0_62, %c64_63] : memref<8x8x128xf32, #tpu.memory_space<vmem>>, vector<1x8x64xf32>
    %162 = vector.shape_cast %161 : vector<1x8x64xf32> to vector<8x64xf32>
    %163 = vector.shape_cast %159 : vector<8x64xf32> to vector<1x8x64xf32>
    tpu.vector_store %arg8[%160, %c0_62, %c64_63], %163 {strides = array<i32>} : memref<8x8x128xf32, #tpu.memory_space<vmem>>, vector<1x8x64xf32>,
    %c4_i32 = arith.constant 4 : i32
    %c7_i32_64 = arith.constant 7 : i32
    %164 = arith.subi %c7_i32_64, %c4_i32 : i32
    %cst_65 = arith.constant dense<0.000000e+00> : vector<8x512xf32>
    %165 = tpu.matmul %153, %17, %cst_65 {dimension_numbers = #tpu.dot_dimension_numbers<[1], [0], [0], [1], [0, 0, 1, 1], [], []>} : vector<8x128xf32>, vector<128x512xf32>, vector<8x512xf32> -> vector<8x512xf32>
    %166 = arith.index_cast %c4_i32 : i32 to index
    %c0_66 = arith.constant 0 : index
    %c0_67 = arith.constant 0 : index
    %167 = vector.load %arg10[%166, %c0_66, %c0_67] : memref<8x8x512xf32, #tpu.memory_space<vmem>>, vector<1x8x512xf32>
    %168 = vector.shape_cast %167 : vector<1x8x512xf32> to vector<8x512xf32>
    %169 = arith.addf %165, %168 : vector<8x512xf32>
    %170 = arith.index_cast %164 : i32 to index
    %c0_68 = arith.constant 0 : index
    %c0_69 = arith.constant 0 : index
    %171 = vector.load %arg11[%170, %c0_68, %c0_69] : memref<8x8x512xf32, #tpu.memory_space<vmem>>, vector<1x8x512xf32>
    %172 = vector.shape_cast %171 : vector<1x8x512xf32> to vector<8x512xf32>
    %173 = arith.addf %169, %172 : vector<8x512xf32>
    %174 = vector.extract_strided_slice %173 {offsets = [0, 0], sizes = [8, 384], strides = [1, 1]} : vector<8x512xf32> to vector<8x384xf32>
    %175 = arith.negf %174 : vector<8x384xf32>
    %176 = math.exp %175 : vector<8x384xf32>
    %cst_70 = arith.constant 1.000000e+00 : f32
    %177 = vector.broadcast %cst_70 : f32 to vector<8x384xf32>
    %178 = arith.addf %177, %176 : vector<8x384xf32>
    %179 = arith.divf %177, %178 : vector<8x384xf32>
    %180 = vector.extract_strided_slice %173 {offsets = [0, 384], sizes = [8, 128], strides = [1, 1]} : vector<8x512xf32> to vector<8x128xf32>
    %181 = math.tanh %180 : vector<8x128xf32>
    %182 = vector.extract_strided_slice %179 {offsets = [0, 0], sizes = [8, 128], strides = [1, 1]} : vector<8x384xf32> to vector<8x128xf32>
    %183 = vector.extract_strided_slice %179 {offsets = [0, 128], sizes = [8, 128], strides = [1, 1]} : vector<8x384xf32> to vector<8x128xf32>
    %184 = vector.extract_strided_slice %179 {offsets = [0, 256], sizes = [8, 128], strides = [1, 1]} : vector<8x384xf32> to vector<8x128xf32>
    %185 = arith.mulf %183, %151 : vector<8x128xf32>
    %186 = arith.mulf %182, %181 : vector<8x128xf32>
    %187 = arith.addf %185, %186 : vector<8x128xf32>
    %188 = math.tanh %187 : vector<8x128xf32>
    %189 = arith.mulf %184, %188 : vector<8x128xf32>
    %190 = vector.extract_strided_slice %189 {offsets = [0, 0], sizes = [8, 64], strides = [1, 1]} : vector<8x128xf32> to vector<8x64xf32>
    %191 = arith.index_cast %c4_i32 : i32 to index
    %c0_71 = arith.constant 0 : index
    %c0_72 = arith.constant 0 : index
    %192 = vector.load %arg8[%191, %c0_71, %c0_72] : memref<8x8x128xf32, #tpu.memory_space<vmem>>, vector<1x8x64xf32>
    %193 = vector.shape_cast %192 : vector<1x8x64xf32> to vector<8x64xf32>
    %194 = vector.shape_cast %190 : vector<8x64xf32> to vector<1x8x64xf32>
    tpu.vector_store %arg8[%191, %c0_71, %c0_72], %194 {strides = array<i32>} : memref<8x8x128xf32, #tpu.memory_space<vmem>>, vector<1x8x64xf32>,
    %195 = vector.extract_strided_slice %189 {offsets = [0, 64], sizes = [8, 64], strides = [1, 1]} : vector<8x128xf32> to vector<8x64xf32>
    %196 = arith.index_cast %164 : i32 to index
    %c0_73 = arith.constant 0 : index
    %c64_74 = arith.constant 64 : index
    %197 = vector.load %arg8[%196, %c0_73, %c64_74] : memref<8x8x128xf32, #tpu.memory_space<vmem>>, vector<1x8x64xf32>
    %198 = vector.shape_cast %197 : vector<1x8x64xf32> to vector<8x64xf32>
    %199 = vector.shape_cast %195 : vector<8x64xf32> to vector<1x8x64xf32>
    tpu.vector_store %arg8[%196, %c0_73, %c64_74], %199 {strides = array<i32>} : memref<8x8x128xf32, #tpu.memory_space<vmem>>, vector<1x8x64xf32>,
    %c5_i32 = arith.constant 5 : i32
    %c7_i32_75 = arith.constant 7 : i32
    %200 = arith.subi %c7_i32_75, %c5_i32 : i32
    %cst_76 = arith.constant dense<0.000000e+00> : vector<8x512xf32>
    %201 = tpu.matmul %189, %17, %cst_76 {dimension_numbers = #tpu.dot_dimension_numbers<[1], [0], [0], [1], [0, 0, 1, 1], [], []>} : vector<8x128xf32>, vector<128x512xf32>, vector<8x512xf32> -> vector<8x512xf32>
    %202 = arith.index_cast %c5_i32 : i32 to index
    %c0_77 = arith.constant 0 : index
    %c0_78 = arith.constant 0 : index
    %203 = vector.load %arg10[%202, %c0_77, %c0_78] : memref<8x8x512xf32, #tpu.memory_space<vmem>>, vector<1x8x512xf32>
    %204 = vector.shape_cast %203 : vector<1x8x512xf32> to vector<8x512xf32>
    %205 = arith.addf %201, %204 : vector<8x512xf32>
    %206 = arith.index_cast %200 : i32 to index
    %c0_79 = arith.constant 0 : index
    %c0_80 = arith.constant 0 : index
    %207 = vector.load %arg11[%206, %c0_79, %c0_80] : memref<8x8x512xf32, #tpu.memory_space<vmem>>, vector<1x8x512xf32>
    %208 = vector.shape_cast %207 : vector<1x8x512xf32> to vector<8x512xf32>
    %209 = arith.addf %205, %208 : vector<8x512xf32>
    %210 = vector.extract_strided_slice %209 {offsets = [0, 0], sizes = [8, 384], strides = [1, 1]} : vector<8x512xf32> to vector<8x384xf32>
    %211 = arith.negf %210 : vector<8x384xf32>
    %212 = math.exp %211 : vector<8x384xf32>
    %cst_81 = arith.constant 1.000000e+00 : f32
    %213 = vector.broadcast %cst_81 : f32 to vector<8x384xf32>
    %214 = arith.addf %213, %212 : vector<8x384xf32>
    %215 = arith.divf %213, %214 : vector<8x384xf32>
    %216 = vector.extract_strided_slice %209 {offsets = [0, 384], sizes = [8, 128], strides = [1, 1]} : vector<8x512xf32> to vector<8x128xf32>
    %217 = math.tanh %216 : vector<8x128xf32>
    %218 = vector.extract_strided_slice %215 {offsets = [0, 0], sizes = [8, 128], strides = [1, 1]} : vector<8x384xf32> to vector<8x128xf32>
    %219 = vector.extract_strided_slice %215 {offsets = [0, 128], sizes = [8, 128], strides = [1, 1]} : vector<8x384xf32> to vector<8x128xf32>
    %220 = vector.extract_strided_slice %215 {offsets = [0, 256], sizes = [8, 128], strides = [1, 1]} : vector<8x384xf32> to vector<8x128xf32>
    %221 = arith.mulf %219, %187 : vector<8x128xf32>
    %222 = arith.mulf %218, %217 : vector<8x128xf32>
    %223 = arith.addf %221, %222 : vector<8x128xf32>
    %224 = math.tanh %223 : vector<8x128xf32>
    %225 = arith.mulf %220, %224 : vector<8x128xf32>
    %226 = vector.extract_strided_slice %225 {offsets = [0, 0], sizes = [8, 64], strides = [1, 1]} : vector<8x128xf32> to vector<8x64xf32>
    %227 = arith.index_cast %c5_i32 : i32 to index
    %c0_82 = arith.constant 0 : index
    %c0_83 = arith.constant 0 : index
    %228 = vector.load %arg8[%227, %c0_82, %c0_83] : memref<8x8x128xf32, #tpu.memory_space<vmem>>, vector<1x8x64xf32>
    %229 = vector.shape_cast %228 : vector<1x8x64xf32> to vector<8x64xf32>
    %230 = vector.shape_cast %226 : vector<8x64xf32> to vector<1x8x64xf32>
    tpu.vector_store %arg8[%227, %c0_82, %c0_83], %230 {strides = array<i32>} : memref<8x8x128xf32, #tpu.memory_space<vmem>>, vector<1x8x64xf32>,
    %231 = vector.extract_strided_slice %225 {offsets = [0, 64], sizes = [8, 64], strides = [1, 1]} : vector<8x128xf32> to vector<8x64xf32>
    %232 = arith.index_cast %200 : i32 to index
    %c0_84 = arith.constant 0 : index
    %c64_85 = arith.constant 64 : index
    %233 = vector.load %arg8[%232, %c0_84, %c64_85] : memref<8x8x128xf32, #tpu.memory_space<vmem>>, vector<1x8x64xf32>
    %234 = vector.shape_cast %233 : vector<1x8x64xf32> to vector<8x64xf32>
    %235 = vector.shape_cast %231 : vector<8x64xf32> to vector<1x8x64xf32>
    tpu.vector_store %arg8[%232, %c0_84, %c64_85], %235 {strides = array<i32>} : memref<8x8x128xf32, #tpu.memory_space<vmem>>, vector<1x8x64xf32>,
    %c6_i32 = arith.constant 6 : i32
    %c7_i32_86 = arith.constant 7 : i32
    %236 = arith.subi %c7_i32_86, %c6_i32 : i32
    %cst_87 = arith.constant dense<0.000000e+00> : vector<8x512xf32>
    %237 = tpu.matmul %225, %17, %cst_87 {dimension_numbers = #tpu.dot_dimension_numbers<[1], [0], [0], [1], [0, 0, 1, 1], [], []>} : vector<8x128xf32>, vector<128x512xf32>, vector<8x512xf32> -> vector<8x512xf32>
    %238 = arith.index_cast %c6_i32 : i32 to index
    %c0_88 = arith.constant 0 : index
    %c0_89 = arith.constant 0 : index
    %239 = vector.load %arg10[%238, %c0_88, %c0_89] : memref<8x8x512xf32, #tpu.memory_space<vmem>>, vector<1x8x512xf32>
    %240 = vector.shape_cast %239 : vector<1x8x512xf32> to vector<8x512xf32>
    %241 = arith.addf %237, %240 : vector<8x512xf32>
    %242 = arith.index_cast %236 : i32 to index
    %c0_90 = arith.constant 0 : index
    %c0_91 = arith.constant 0 : index
    %243 = vector.load %arg11[%242, %c0_90, %c0_91] : memref<8x8x512xf32, #tpu.memory_space<vmem>>, vector<1x8x512xf32>
    %244 = vector.shape_cast %243 : vector<1x8x512xf32> to vector<8x512xf32>
    %245 = arith.addf %241, %244 : vector<8x512xf32>
    %246 = vector.extract_strided_slice %245 {offsets = [0, 0], sizes = [8, 384], strides = [1, 1]} : vector<8x512xf32> to vector<8x384xf32>
    %247 = arith.negf %246 : vector<8x384xf32>
    %248 = math.exp %247 : vector<8x384xf32>
    %cst_92 = arith.constant 1.000000e+00 : f32
    %249 = vector.broadcast %cst_92 : f32 to vector<8x384xf32>
    %250 = arith.addf %249, %248 : vector<8x384xf32>
    %251 = arith.divf %249, %250 : vector<8x384xf32>
    %252 = vector.extract_strided_slice %245 {offsets = [0, 384], sizes = [8, 128], strides = [1, 1]} : vector<8x512xf32> to vector<8x128xf32>
    %253 = math.tanh %252 : vector<8x128xf32>
    %254 = vector.extract_strided_slice %251 {offsets = [0, 0], sizes = [8, 128], strides = [1, 1]} : vector<8x384xf32> to vector<8x128xf32>
    %255 = vector.extract_strided_slice %251 {offsets = [0, 128], sizes = [8, 128], strides = [1, 1]} : vector<8x384xf32> to vector<8x128xf32>
    %256 = vector.extract_strided_slice %251 {offsets = [0, 256], sizes = [8, 128], strides = [1, 1]} : vector<8x384xf32> to vector<8x128xf32>
    %257 = arith.mulf %255, %223 : vector<8x128xf32>
    %258 = arith.mulf %254, %253 : vector<8x128xf32>
    %259 = arith.addf %257, %258 : vector<8x128xf32>
    %260 = math.tanh %259 : vector<8x128xf32>
    %261 = arith.mulf %256, %260 : vector<8x128xf32>
    %262 = vector.extract_strided_slice %261 {offsets = [0, 0], sizes = [8, 64], strides = [1, 1]} : vector<8x128xf32> to vector<8x64xf32>
    %263 = arith.index_cast %c6_i32 : i32 to index
    %c0_93 = arith.constant 0 : index
    %c0_94 = arith.constant 0 : index
    %264 = vector.load %arg8[%263, %c0_93, %c0_94] : memref<8x8x128xf32, #tpu.memory_space<vmem>>, vector<1x8x64xf32>
    %265 = vector.shape_cast %264 : vector<1x8x64xf32> to vector<8x64xf32>
    %266 = vector.shape_cast %262 : vector<8x64xf32> to vector<1x8x64xf32>
    tpu.vector_store %arg8[%263, %c0_93, %c0_94], %266 {strides = array<i32>} : memref<8x8x128xf32, #tpu.memory_space<vmem>>, vector<1x8x64xf32>,
    %267 = vector.extract_strided_slice %261 {offsets = [0, 64], sizes = [8, 64], strides = [1, 1]} : vector<8x128xf32> to vector<8x64xf32>
    %268 = arith.index_cast %236 : i32 to index
    %c0_95 = arith.constant 0 : index
    %c64_96 = arith.constant 64 : index
    %269 = vector.load %arg8[%268, %c0_95, %c64_96] : memref<8x8x128xf32, #tpu.memory_space<vmem>>, vector<1x8x64xf32>
    %270 = vector.shape_cast %269 : vector<1x8x64xf32> to vector<8x64xf32>
    %271 = vector.shape_cast %267 : vector<8x64xf32> to vector<1x8x64xf32>
    tpu.vector_store %arg8[%268, %c0_95, %c64_96], %271 {strides = array<i32>} : memref<8x8x128xf32, #tpu.memory_space<vmem>>, vector<1x8x64xf32>,
    %c7_i32_97 = arith.constant 7 : i32
    %c7_i32_98 = arith.constant 7 : i32
    %272 = arith.subi %c7_i32_98, %c7_i32_97 : i32
    %cst_99 = arith.constant dense<0.000000e+00> : vector<8x512xf32>
    %273 = tpu.matmul %261, %17, %cst_99 {dimension_numbers = #tpu.dot_dimension_numbers<[1], [0], [0], [1], [0, 0, 1, 1], [], []>} : vector<8x128xf32>, vector<128x512xf32>, vector<8x512xf32> -> vector<8x512xf32>
    %274 = arith.index_cast %c7_i32_97 : i32 to index
    %c0_100 = arith.constant 0 : index
    %c0_101 = arith.constant 0 : index
    %275 = vector.load %arg10[%274, %c0_100, %c0_101] : memref<8x8x512xf32, #tpu.memory_space<vmem>>, vector<1x8x512xf32>
    %276 = vector.shape_cast %275 : vector<1x8x512xf32> to vector<8x512xf32>
    %277 = arith.addf %273, %276 : vector<8x512xf32>
    %278 = arith.index_cast %272 : i32 to index
    %c0_102 = arith.constant 0 : index
    %c0_103 = arith.constant 0 : index
    %279 = vector.load %arg11[%278, %c0_102, %c0_103] : memref<8x8x512xf32, #tpu.memory_space<vmem>>, vector<1x8x512xf32>
    %280 = vector.shape_cast %279 : vector<1x8x512xf32> to vector<8x512xf32>
    %281 = arith.addf %277, %280 : vector<8x512xf32>
    %282 = vector.extract_strided_slice %281 {offsets = [0, 0], sizes = [8, 384], strides = [1, 1]} : vector<8x512xf32> to vector<8x384xf32>
    %283 = arith.negf %282 : vector<8x384xf32>
    %284 = math.exp %283 : vector<8x384xf32>
    %cst_104 = arith.constant 1.000000e+00 : f32
    %285 = vector.broadcast %cst_104 : f32 to vector<8x384xf32>
    %286 = arith.addf %285, %284 : vector<8x384xf32>
    %287 = arith.divf %285, %286 : vector<8x384xf32>
    %288 = vector.extract_strided_slice %281 {offsets = [0, 384], sizes = [8, 128], strides = [1, 1]} : vector<8x512xf32> to vector<8x128xf32>
    %289 = math.tanh %288 : vector<8x128xf32>
    %290 = vector.extract_strided_slice %287 {offsets = [0, 0], sizes = [8, 128], strides = [1, 1]} : vector<8x384xf32> to vector<8x128xf32>
    %291 = vector.extract_strided_slice %287 {offsets = [0, 128], sizes = [8, 128], strides = [1, 1]} : vector<8x384xf32> to vector<8x128xf32>
    %292 = vector.extract_strided_slice %287 {offsets = [0, 256], sizes = [8, 128], strides = [1, 1]} : vector<8x384xf32> to vector<8x128xf32>
    %293 = arith.mulf %291, %259 : vector<8x128xf32>
    %294 = arith.mulf %290, %289 : vector<8x128xf32>
    %295 = arith.addf %293, %294 : vector<8x128xf32>
    %296 = math.tanh %295 : vector<8x128xf32>
    %297 = arith.mulf %292, %296 : vector<8x128xf32>
    %298 = vector.extract_strided_slice %297 {offsets = [0, 0], sizes = [8, 64], strides = [1, 1]} : vector<8x128xf32> to vector<8x64xf32>
    %299 = arith.index_cast %c7_i32_97 : i32 to index
    %c0_105 = arith.constant 0 : index
    %c0_106 = arith.constant 0 : index
    %300 = vector.load %arg8[%299, %c0_105, %c0_106] : memref<8x8x128xf32, #tpu.memory_space<vmem>>, vector<1x8x64xf32>
    %301 = vector.shape_cast %300 : vector<1x8x64xf32> to vector<8x64xf32>
    %302 = vector.shape_cast %298 : vector<8x64xf32> to vector<1x8x64xf32>
    tpu.vector_store %arg8[%299, %c0_105, %c0_106], %302 {strides = array<i32>} : memref<8x8x128xf32, #tpu.memory_space<vmem>>, vector<1x8x64xf32>,
    %303 = vector.extract_strided_slice %297 {offsets = [0, 64], sizes = [8, 64], strides = [1, 1]} : vector<8x128xf32> to vector<8x64xf32>
    %304 = arith.index_cast %272 : i32 to index
    %c0_107 = arith.constant 0 : index
    %c64_108 = arith.constant 64 : index
    %305 = vector.load %arg8[%304, %c0_107, %c64_108] : memref<8x8x128xf32, #tpu.memory_space<vmem>>, vector<1x8x64xf32>
    %306 = vector.shape_cast %305 : vector<1x8x64xf32> to vector<8x64xf32>
    %307 = vector.shape_cast %303 : vector<8x64xf32> to vector<1x8x64xf32>
    tpu.vector_store %arg8[%304, %c0_107, %c64_108], %307 {strides = array<i32>} : memref<8x8x128xf32, #tpu.memory_space<vmem>>, vector<1x8x64xf32>,
    %c8_i32 = arith.constant 8 : i32
    %c0_109 = arith.constant 0 : index
    %c0_110 = arith.constant 0 : index
    %c0_111 = arith.constant 0 : index
    %308 = vector.load %arg8[%c0_109, %c0_110, %c0_111] : memref<8x8x128xf32, #tpu.memory_space<vmem>>, vector<8x8x128xf32>
    %309 = vector.shape_cast %308 : vector<8x8x128xf32> to vector<64x128xf32>
    %c0_112 = arith.constant 0 : index
    %c0_113 = arith.constant 0 : index
    %c0_114 = arith.constant 0 : index
    %c0_115 = arith.constant 0 : index
    %310 = vector.load %arg2[%c0_112, %c0_113, %c0_114, %c0_115] : memref<3x2x128x512xf32, #tpu.memory_space<vmem>>, vector<1x1x128x512xf32>
    %311 = vector.shape_cast %310 : vector<1x1x128x512xf32> to vector<128x512xf32>
    %c0_116 = arith.constant 0 : index
    %c1_117 = arith.constant 1 : index
    %c0_118 = arith.constant 0 : index
    %c0_119 = arith.constant 0 : index
    %312 = vector.load %arg2[%c0_116, %c1_117, %c0_118, %c0_119] : memref<3x2x128x512xf32, #tpu.memory_space<vmem>>, vector<1x1x128x512xf32>
    %313 = vector.shape_cast %312 : vector<1x1x128x512xf32> to vector<128x512xf32>
    %cst_120 = arith.constant dense<0.000000e+00> : vector<64x512xf32>
    %314 = tpu.matmul %309, %311, %cst_120 {dimension_numbers = #tpu.dot_dimension_numbers<[1], [0], [0], [1], [0, 0, 1, 1], [], []>} : vector<64x128xf32>, vector<128x512xf32>, vector<64x512xf32> -> vector<64x512xf32>
    %c1_121 = arith.constant 1 : index
    %c0_122 = arith.constant 0 : index
    %c0_123 = arith.constant 0 : index
    %315 = vector.load %arg4[%c1_121, %c0_122, %c0_123] : memref<4x1x512xf32, #tpu.memory_space<vmem>>, vector<1x1x512xf32>
    %316 = vector.shape_cast %315 : vector<1x1x512xf32> to vector<1x512xf32>
    %317 = vector.broadcast %316 : vector<1x512xf32> to vector<64x512xf32>
    %318 = arith.addf %314, %317 : vector<64x512xf32>
    %319 = vector.shape_cast %318 : vector<64x512xf32> to vector<8x8x512xf32>
    %c0_124 = arith.constant 0 : index
    %c0_125 = arith.constant 0 : index
    %c0_126 = arith.constant 0 : index
    %320 = vector.load %arg10[%c0_124, %c0_125, %c0_126] : memref<8x8x512xf32, #tpu.memory_space<vmem>>, vector<8x8x512xf32>
    tpu.vector_store %arg10[%c0_124, %c0_125, %c0_126], %319 {strides = array<i32>} : memref<8x8x512xf32, #tpu.memory_space<vmem>>, vector<8x8x512xf32>,
    %cst_127 = arith.constant dense<0.000000e+00> : vector<64x512xf32>
    %321 = tpu.matmul %309, %313, %cst_127 {dimension_numbers = #tpu.dot_dimension_numbers<[1], [0], [0], [1], [0, 0, 1, 1], [], []>} : vector<64x128xf32>, vector<128x512xf32>, vector<64x512xf32> -> vector<64x512xf32>
    %322 = vector.shape_cast %321 : vector<64x512xf32> to vector<8x8x512xf32>
    %c0_128 = arith.constant 0 : index
    %c0_129 = arith.constant 0 : index
    %c0_130 = arith.constant 0 : index
    %323 = vector.load %arg11[%c0_128, %c0_129, %c0_130] : memref<8x8x512xf32, #tpu.memory_space<vmem>>, vector<8x8x512xf32>
    tpu.vector_store %arg11[%c0_128, %c0_129, %c0_130], %322 {strides = array<i32>} : memref<8x8x512xf32, #tpu.memory_space<vmem>>, vector<8x8x512xf32>,
    %c1_131 = arith.constant 1 : index
    %c0_132 = arith.constant 0 : index
    %c0_133 = arith.constant 0 : index
    %324 = vector.load %arg3[%c1_131, %c0_132, %c0_133] : memref<4x128x512xf32, #tpu.memory_space<vmem>>, vector<1x128x512xf32>
    %325 = vector.shape_cast %324 : vector<1x128x512xf32> to vector<128x512xf32>
    %cst_134 = arith.constant 0.000000e+00 : f32
    %326 = vector.broadcast %cst_134 : f32 to vector<8x128xf32>
    %cst_135 = arith.constant 0.000000e+00 : f32
    %327 = vector.broadcast %cst_135 : f32 to vector<8x128xf32>
    %c0_i32_136 = arith.constant 0 : i32
    %c7_i32_137 = arith.constant 7 : i32
    %328 = arith.subi %c7_i32_137, %c0_i32_136 : i32
    %cst_138 = arith.constant dense<0.000000e+00> : vector<8x512xf32>
    %329 = tpu.matmul %326, %325, %cst_138 {dimension_numbers = #tpu.dot_dimension_numbers<[1], [0], [0], [1], [0, 0, 1, 1], [], []>} : vector<8x128xf32>, vector<128x512xf32>, vector<8x512xf32> -> vector<8x512xf32>
    %330 = arith.index_cast %c0_i32_136 : i32 to index
    %c0_139 = arith.constant 0 : index
    %c0_140 = arith.constant 0 : index
    %331 = vector.load %arg10[%330, %c0_139, %c0_140] : memref<8x8x512xf32, #tpu.memory_space<vmem>>, vector<1x8x512xf32>
    %332 = vector.shape_cast %331 : vector<1x8x512xf32> to vector<8x512xf32>
    %333 = arith.addf %329, %332 : vector<8x512xf32>
    %334 = arith.index_cast %328 : i32 to index
    %c0_141 = arith.constant 0 : index
    %c0_142 = arith.constant 0 : index
    %335 = vector.load %arg11[%334, %c0_141, %c0_142] : memref<8x8x512xf32, #tpu.memory_space<vmem>>, vector<1x8x512xf32>
    %336 = vector.shape_cast %335 : vector<1x8x512xf32> to vector<8x512xf32>
    %337 = arith.addf %333, %336 : vector<8x512xf32>
    %338 = vector.extract_strided_slice %337 {offsets = [0, 0], sizes = [8, 384], strides = [1, 1]} : vector<8x512xf32> to vector<8x384xf32>
    %339 = arith.negf %338 : vector<8x384xf32>
    %340 = math.exp %339 : vector<8x384xf32>
    %cst_143 = arith.constant 1.000000e+00 : f32
    %341 = vector.broadcast %cst_143 : f32 to vector<8x384xf32>
    %342 = arith.addf %341, %340 : vector<8x384xf32>
    %343 = arith.divf %341, %342 : vector<8x384xf32>
    %344 = vector.extract_strided_slice %337 {offsets = [0, 384], sizes = [8, 128], strides = [1, 1]} : vector<8x512xf32> to vector<8x128xf32>
    %345 = math.tanh %344 : vector<8x128xf32>
    %346 = vector.extract_strided_slice %343 {offsets = [0, 0], sizes = [8, 128], strides = [1, 1]} : vector<8x384xf32> to vector<8x128xf32>
    %347 = vector.extract_strided_slice %343 {offsets = [0, 128], sizes = [8, 128], strides = [1, 1]} : vector<8x384xf32> to vector<8x128xf32>
    %348 = vector.extract_strided_slice %343 {offsets = [0, 256], sizes = [8, 128], strides = [1, 1]} : vector<8x384xf32> to vector<8x128xf32>
    %349 = arith.mulf %347, %327 : vector<8x128xf32>
    %350 = arith.mulf %346, %345 : vector<8x128xf32>
    %351 = arith.addf %349, %350 : vector<8x128xf32>
    %352 = math.tanh %351 : vector<8x128xf32>
    %353 = arith.mulf %348, %352 : vector<8x128xf32>
    %354 = vector.extract_strided_slice %353 {offsets = [0, 0], sizes = [8, 64], strides = [1, 1]} : vector<8x128xf32> to vector<8x64xf32>
    %355 = arith.index_cast %c0_i32_136 : i32 to index
    %c0_144 = arith.constant 0 : index
    %c0_145 = arith.constant 0 : index
    %356 = vector.load %arg9[%355, %c0_144, %c0_145] : memref<8x8x128xf32, #tpu.memory_space<vmem>>, vector<1x8x64xf32>
    %357 = vector.shape_cast %356 : vector<1x8x64xf32> to vector<8x64xf32>
    %358 = vector.shape_cast %354 : vector<8x64xf32> to vector<1x8x64xf32>
    tpu.vector_store %arg9[%355, %c0_144, %c0_145], %358 {strides = array<i32>} : memref<8x8x128xf32, #tpu.memory_space<vmem>>, vector<1x8x64xf32>,
    %359 = vector.extract_strided_slice %353 {offsets = [0, 64], sizes = [8, 64], strides = [1, 1]} : vector<8x128xf32> to vector<8x64xf32>
    %360 = arith.index_cast %328 : i32 to index
    %c0_146 = arith.constant 0 : index
    %c64_147 = arith.constant 64 : index
    %361 = vector.load %arg9[%360, %c0_146, %c64_147] : memref<8x8x128xf32, #tpu.memory_space<vmem>>, vector<1x8x64xf32>
    %362 = vector.shape_cast %361 : vector<1x8x64xf32> to vector<8x64xf32>
    %363 = vector.shape_cast %359 : vector<8x64xf32> to vector<1x8x64xf32>
    tpu.vector_store %arg9[%360, %c0_146, %c64_147], %363 {strides = array<i32>} : memref<8x8x128xf32, #tpu.memory_space<vmem>>, vector<1x8x64xf32>,
    %c1_i32_148 = arith.constant 1 : i32
    %c7_i32_149 = arith.constant 7 : i32
    %364 = arith.subi %c7_i32_149, %c1_i32_148 : i32
    %cst_150 = arith.constant dense<0.000000e+00> : vector<8x512xf32>
    %365 = tpu.matmul %353, %325, %cst_150 {dimension_numbers = #tpu.dot_dimension_numbers<[1], [0], [0], [1], [0, 0, 1, 1], [], []>} : vector<8x128xf32>, vector<128x512xf32>, vector<8x512xf32> -> vector<8x512xf32>
    %366 = arith.index_cast %c1_i32_148 : i32 to index
    %c0_151 = arith.constant 0 : index
    %c0_152 = arith.constant 0 : index
    %367 = vector.load %arg10[%366, %c0_151, %c0_152] : memref<8x8x512xf32, #tpu.memory_space<vmem>>, vector<1x8x512xf32>
    %368 = vector.shape_cast %367 : vector<1x8x512xf32> to vector<8x512xf32>
    %369 = arith.addf %365, %368 : vector<8x512xf32>
    %370 = arith.index_cast %364 : i32 to index
    %c0_153 = arith.constant 0 : index
    %c0_154 = arith.constant 0 : index
    %371 = vector.load %arg11[%370, %c0_153, %c0_154] : memref<8x8x512xf32, #tpu.memory_space<vmem>>, vector<1x8x512xf32>
    %372 = vector.shape_cast %371 : vector<1x8x512xf32> to vector<8x512xf32>
    %373 = arith.addf %369, %372 : vector<8x512xf32>
    %374 = vector.extract_strided_slice %373 {offsets = [0, 0], sizes = [8, 384], strides = [1, 1]} : vector<8x512xf32> to vector<8x384xf32>
    %375 = arith.negf %374 : vector<8x384xf32>
    %376 = math.exp %375 : vector<8x384xf32>
    %cst_155 = arith.constant 1.000000e+00 : f32
    %377 = vector.broadcast %cst_155 : f32 to vector<8x384xf32>
    %378 = arith.addf %377, %376 : vector<8x384xf32>
    %379 = arith.divf %377, %378 : vector<8x384xf32>
    %380 = vector.extract_strided_slice %373 {offsets = [0, 384], sizes = [8, 128], strides = [1, 1]} : vector<8x512xf32> to vector<8x128xf32>
    %381 = math.tanh %380 : vector<8x128xf32>
    %382 = vector.extract_strided_slice %379 {offsets = [0, 0], sizes = [8, 128], strides = [1, 1]} : vector<8x384xf32> to vector<8x128xf32>
    %383 = vector.extract_strided_slice %379 {offsets = [0, 128], sizes = [8, 128], strides = [1, 1]} : vector<8x384xf32> to vector<8x128xf32>
    %384 = vector.extract_strided_slice %379 {offsets = [0, 256], sizes = [8, 128], strides = [1, 1]} : vector<8x384xf32> to vector<8x128xf32>
    %385 = arith.mulf %383, %351 : vector<8x128xf32>
    %386 = arith.mulf %382, %381 : vector<8x128xf32>
    %387 = arith.addf %385, %386 : vector<8x128xf32>
    %388 = math.tanh %387 : vector<8x128xf32>
    %389 = arith.mulf %384, %388 : vector<8x128xf32>
    %390 = vector.extract_strided_slice %389 {offsets = [0, 0], sizes = [8, 64], strides = [1, 1]} : vector<8x128xf32> to vector<8x64xf32>
    %391 = arith.index_cast %c1_i32_148 : i32 to index
    %c0_156 = arith.constant 0 : index
    %c0_157 = arith.constant 0 : index
    %392 = vector.load %arg9[%391, %c0_156, %c0_157] : memref<8x8x128xf32, #tpu.memory_space<vmem>>, vector<1x8x64xf32>
    %393 = vector.shape_cast %392 : vector<1x8x64xf32> to vector<8x64xf32>
    %394 = vector.shape_cast %390 : vector<8x64xf32> to vector<1x8x64xf32>
    tpu.vector_store %arg9[%391, %c0_156, %c0_157], %394 {strides = array<i32>} : memref<8x8x128xf32, #tpu.memory_space<vmem>>, vector<1x8x64xf32>,
    %395 = vector.extract_strided_slice %389 {offsets = [0, 64], sizes = [8, 64], strides = [1, 1]} : vector<8x128xf32> to vector<8x64xf32>
    %396 = arith.index_cast %364 : i32 to index
    %c0_158 = arith.constant 0 : index
    %c64_159 = arith.constant 64 : index
    %397 = vector.load %arg9[%396, %c0_158, %c64_159] : memref<8x8x128xf32, #tpu.memory_space<vmem>>, vector<1x8x64xf32>
    %398 = vector.shape_cast %397 : vector<1x8x64xf32> to vector<8x64xf32>
    %399 = vector.shape_cast %395 : vector<8x64xf32> to vector<1x8x64xf32>
    tpu.vector_store %arg9[%396, %c0_158, %c64_159], %399 {strides = array<i32>} : memref<8x8x128xf32, #tpu.memory_space<vmem>>, vector<1x8x64xf32>,
    %c2_i32_160 = arith.constant 2 : i32
    %c7_i32_161 = arith.constant 7 : i32
    %400 = arith.subi %c7_i32_161, %c2_i32_160 : i32
    %cst_162 = arith.constant dense<0.000000e+00> : vector<8x512xf32>
    %401 = tpu.matmul %389, %325, %cst_162 {dimension_numbers = #tpu.dot_dimension_numbers<[1], [0], [0], [1], [0, 0, 1, 1], [], []>} : vector<8x128xf32>, vector<128x512xf32>, vector<8x512xf32> -> vector<8x512xf32>
    %402 = arith.index_cast %c2_i32_160 : i32 to index
    %c0_163 = arith.constant 0 : index
    %c0_164 = arith.constant 0 : index
    %403 = vector.load %arg10[%402, %c0_163, %c0_164] : memref<8x8x512xf32, #tpu.memory_space<vmem>>, vector<1x8x512xf32>
    %404 = vector.shape_cast %403 : vector<1x8x512xf32> to vector<8x512xf32>
    %405 = arith.addf %401, %404 : vector<8x512xf32>
    %406 = arith.index_cast %400 : i32 to index
    %c0_165 = arith.constant 0 : index
    %c0_166 = arith.constant 0 : index
    %407 = vector.load %arg11[%406, %c0_165, %c0_166] : memref<8x8x512xf32, #tpu.memory_space<vmem>>, vector<1x8x512xf32>
    %408 = vector.shape_cast %407 : vector<1x8x512xf32> to vector<8x512xf32>
    %409 = arith.addf %405, %408 : vector<8x512xf32>
    %410 = vector.extract_strided_slice %409 {offsets = [0, 0], sizes = [8, 384], strides = [1, 1]} : vector<8x512xf32> to vector<8x384xf32>
    %411 = arith.negf %410 : vector<8x384xf32>
    %412 = math.exp %411 : vector<8x384xf32>
    %cst_167 = arith.constant 1.000000e+00 : f32
    %413 = vector.broadcast %cst_167 : f32 to vector<8x384xf32>
    %414 = arith.addf %413, %412 : vector<8x384xf32>
    %415 = arith.divf %413, %414 : vector<8x384xf32>
    %416 = vector.extract_strided_slice %409 {offsets = [0, 384], sizes = [8, 128], strides = [1, 1]} : vector<8x512xf32> to vector<8x128xf32>
    %417 = math.tanh %416 : vector<8x128xf32>
    %418 = vector.extract_strided_slice %415 {offsets = [0, 0], sizes = [8, 128], strides = [1, 1]} : vector<8x384xf32> to vector<8x128xf32>
    %419 = vector.extract_strided_slice %415 {offsets = [0, 128], sizes = [8, 128], strides = [1, 1]} : vector<8x384xf32> to vector<8x128xf32>
    %420 = vector.extract_strided_slice %415 {offsets = [0, 256], sizes = [8, 128], strides = [1, 1]} : vector<8x384xf32> to vector<8x128xf32>
    %421 = arith.mulf %419, %387 : vector<8x128xf32>
    %422 = arith.mulf %418, %417 : vector<8x128xf32>
    %423 = arith.addf %421, %422 : vector<8x128xf32>
    %424 = math.tanh %423 : vector<8x128xf32>
    %425 = arith.mulf %420, %424 : vector<8x128xf32>
    %426 = vector.extract_strided_slice %425 {offsets = [0, 0], sizes = [8, 64], strides = [1, 1]} : vector<8x128xf32> to vector<8x64xf32>
    %427 = arith.index_cast %c2_i32_160 : i32 to index
    %c0_168 = arith.constant 0 : index
    %c0_169 = arith.constant 0 : index
    %428 = vector.load %arg9[%427, %c0_168, %c0_169] : memref<8x8x128xf32, #tpu.memory_space<vmem>>, vector<1x8x64xf32>
    %429 = vector.shape_cast %428 : vector<1x8x64xf32> to vector<8x64xf32>
    %430 = vector.shape_cast %426 : vector<8x64xf32> to vector<1x8x64xf32>
    tpu.vector_store %arg9[%427, %c0_168, %c0_169], %430 {strides = array<i32>} : memref<8x8x128xf32, #tpu.memory_space<vmem>>, vector<1x8x64xf32>,
    %431 = vector.extract_strided_slice %425 {offsets = [0, 64], sizes = [8, 64], strides = [1, 1]} : vector<8x128xf32> to vector<8x64xf32>
    %432 = arith.index_cast %400 : i32 to index
    %c0_170 = arith.constant 0 : index
    %c64_171 = arith.constant 64 : index
    %433 = vector.load %arg9[%432, %c0_170, %c64_171] : memref<8x8x128xf32, #tpu.memory_space<vmem>>, vector<1x8x64xf32>
    %434 = vector.shape_cast %433 : vector<1x8x64xf32> to vector<8x64xf32>
    %435 = vector.shape_cast %431 : vector<8x64xf32> to vector<1x8x64xf32>
    tpu.vector_store %arg9[%432, %c0_170, %c64_171], %435 {strides = array<i32>} : memref<8x8x128xf32, #tpu.memory_space<vmem>>, vector<1x8x64xf32>,
    %c3_i32_172 = arith.constant 3 : i32
    %c7_i32_173 = arith.constant 7 : i32
    %436 = arith.subi %c7_i32_173, %c3_i32_172 : i32
    %cst_174 = arith.constant dense<0.000000e+00> : vector<8x512xf32>
    %437 = tpu.matmul %425, %325, %cst_174 {dimension_numbers = #tpu.dot_dimension_numbers<[1], [0], [0], [1], [0, 0, 1, 1], [], []>} : vector<8x128xf32>, vector<128x512xf32>, vector<8x512xf32> -> vector<8x512xf32>
    %438 = arith.index_cast %c3_i32_172 : i32 to index
    %c0_175 = arith.constant 0 : index
    %c0_176 = arith.constant 0 : index
    %439 = vector.load %arg10[%438, %c0_175, %c0_176] : memref<8x8x512xf32, #tpu.memory_space<vmem>>, vector<1x8x512xf32>
    %440 = vector.shape_cast %439 : vector<1x8x512xf32> to vector<8x512xf32>
    %441 = arith.addf %437, %440 : vector<8x512xf32>
    %442 = arith.index_cast %436 : i32 to index
    %c0_177 = arith.constant 0 : index
    %c0_178 = arith.constant 0 : index
    %443 = vector.load %arg11[%442, %c0_177, %c0_178] : memref<8x8x512xf32, #tpu.memory_space<vmem>>, vector<1x8x512xf32>
    %444 = vector.shape_cast %443 : vector<1x8x512xf32> to vector<8x512xf32>
    %445 = arith.addf %441, %444 : vector<8x512xf32>
    %446 = vector.extract_strided_slice %445 {offsets = [0, 0], sizes = [8, 384], strides = [1, 1]} : vector<8x512xf32> to vector<8x384xf32>
    %447 = arith.negf %446 : vector<8x384xf32>
    %448 = math.exp %447 : vector<8x384xf32>
    %cst_179 = arith.constant 1.000000e+00 : f32
    %449 = vector.broadcast %cst_179 : f32 to vector<8x384xf32>
    %450 = arith.addf %449, %448 : vector<8x384xf32>
    %451 = arith.divf %449, %450 : vector<8x384xf32>
    %452 = vector.extract_strided_slice %445 {offsets = [0, 384], sizes = [8, 128], strides = [1, 1]} : vector<8x512xf32> to vector<8x128xf32>
    %453 = math.tanh %452 : vector<8x128xf32>
    %454 = vector.extract_strided_slice %451 {offsets = [0, 0], sizes = [8, 128], strides = [1, 1]} : vector<8x384xf32> to vector<8x128xf32>
    %455 = vector.extract_strided_slice %451 {offsets = [0, 128], sizes = [8, 128], strides = [1, 1]} : vector<8x384xf32> to vector<8x128xf32>
    %456 = vector.extract_strided_slice %451 {offsets = [0, 256], sizes = [8, 128], strides = [1, 1]} : vector<8x384xf32> to vector<8x128xf32>
    %457 = arith.mulf %455, %423 : vector<8x128xf32>
    %458 = arith.mulf %454, %453 : vector<8x128xf32>
    %459 = arith.addf %457, %458 : vector<8x128xf32>
    %460 = math.tanh %459 : vector<8x128xf32>
    %461 = arith.mulf %456, %460 : vector<8x128xf32>
    %462 = vector.extract_strided_slice %461 {offsets = [0, 0], sizes = [8, 64], strides = [1, 1]} : vector<8x128xf32> to vector<8x64xf32>
    %463 = arith.index_cast %c3_i32_172 : i32 to index
    %c0_180 = arith.constant 0 : index
    %c0_181 = arith.constant 0 : index
    %464 = vector.load %arg9[%463, %c0_180, %c0_181] : memref<8x8x128xf32, #tpu.memory_space<vmem>>, vector<1x8x64xf32>
    %465 = vector.shape_cast %464 : vector<1x8x64xf32> to vector<8x64xf32>
    %466 = vector.shape_cast %462 : vector<8x64xf32> to vector<1x8x64xf32>
    tpu.vector_store %arg9[%463, %c0_180, %c0_181], %466 {strides = array<i32>} : memref<8x8x128xf32, #tpu.memory_space<vmem>>, vector<1x8x64xf32>,
    %467 = vector.extract_strided_slice %461 {offsets = [0, 64], sizes = [8, 64], strides = [1, 1]} : vector<8x128xf32> to vector<8x64xf32>
    %468 = arith.index_cast %436 : i32 to index
    %c0_182 = arith.constant 0 : index
    %c64_183 = arith.constant 64 : index
    %469 = vector.load %arg9[%468, %c0_182, %c64_183] : memref<8x8x128xf32, #tpu.memory_space<vmem>>, vector<1x8x64xf32>
    %470 = vector.shape_cast %469 : vector<1x8x64xf32> to vector<8x64xf32>
    %471 = vector.shape_cast %467 : vector<8x64xf32> to vector<1x8x64xf32>
    tpu.vector_store %arg9[%468, %c0_182, %c64_183], %471 {strides = array<i32>} : memref<8x8x128xf32, #tpu.memory_space<vmem>>, vector<1x8x64xf32>,
    %c4_i32_184 = arith.constant 4 : i32
    %c7_i32_185 = arith.constant 7 : i32
    %472 = arith.subi %c7_i32_185, %c4_i32_184 : i32
    %cst_186 = arith.constant dense<0.000000e+00> : vector<8x512xf32>
    %473 = tpu.matmul %461, %325, %cst_186 {dimension_numbers = #tpu.dot_dimension_numbers<[1], [0], [0], [1], [0, 0, 1, 1], [], []>} : vector<8x128xf32>, vector<128x512xf32>, vector<8x512xf32> -> vector<8x512xf32>
    %474 = arith.index_cast %c4_i32_184 : i32 to index
    %c0_187 = arith.constant 0 : index
    %c0_188 = arith.constant 0 : index
    %475 = vector.load %arg10[%474, %c0_187, %c0_188] : memref<8x8x512xf32, #tpu.memory_space<vmem>>, vector<1x8x512xf32>
    %476 = vector.shape_cast %475 : vector<1x8x512xf32> to vector<8x512xf32>
    %477 = arith.addf %473, %476 : vector<8x512xf32>
    %478 = arith.index_cast %472 : i32 to index
    %c0_189 = arith.constant 0 : index
    %c0_190 = arith.constant 0 : index
    %479 = vector.load %arg11[%478, %c0_189, %c0_190] : memref<8x8x512xf32, #tpu.memory_space<vmem>>, vector<1x8x512xf32>
    %480 = vector.shape_cast %479 : vector<1x8x512xf32> to vector<8x512xf32>
    %481 = arith.addf %477, %480 : vector<8x512xf32>
    %482 = vector.extract_strided_slice %481 {offsets = [0, 0], sizes = [8, 384], strides = [1, 1]} : vector<8x512xf32> to vector<8x384xf32>
    %483 = arith.negf %482 : vector<8x384xf32>
    %484 = math.exp %483 : vector<8x384xf32>
    %cst_191 = arith.constant 1.000000e+00 : f32
    %485 = vector.broadcast %cst_191 : f32 to vector<8x384xf32>
    %486 = arith.addf %485, %484 : vector<8x384xf32>
    %487 = arith.divf %485, %486 : vector<8x384xf32>
    %488 = vector.extract_strided_slice %481 {offsets = [0, 384], sizes = [8, 128], strides = [1, 1]} : vector<8x512xf32> to vector<8x128xf32>
    %489 = math.tanh %488 : vector<8x128xf32>
    %490 = vector.extract_strided_slice %487 {offsets = [0, 0], sizes = [8, 128], strides = [1, 1]} : vector<8x384xf32> to vector<8x128xf32>
    %491 = vector.extract_strided_slice %487 {offsets = [0, 128], sizes = [8, 128], strides = [1, 1]} : vector<8x384xf32> to vector<8x128xf32>
    %492 = vector.extract_strided_slice %487 {offsets = [0, 256], sizes = [8, 128], strides = [1, 1]} : vector<8x384xf32> to vector<8x128xf32>
    %493 = arith.mulf %491, %459 : vector<8x128xf32>
    %494 = arith.mulf %490, %489 : vector<8x128xf32>
    %495 = arith.addf %493, %494 : vector<8x128xf32>
    %496 = math.tanh %495 : vector<8x128xf32>
    %497 = arith.mulf %492, %496 : vector<8x128xf32>
    %498 = vector.extract_strided_slice %497 {offsets = [0, 0], sizes = [8, 64], strides = [1, 1]} : vector<8x128xf32> to vector<8x64xf32>
    %499 = arith.index_cast %c4_i32_184 : i32 to index
    %c0_192 = arith.constant 0 : index
    %c0_193 = arith.constant 0 : index
    %500 = vector.load %arg9[%499, %c0_192, %c0_193] : memref<8x8x128xf32, #tpu.memory_space<vmem>>, vector<1x8x64xf32>
    %501 = vector.shape_cast %500 : vector<1x8x64xf32> to vector<8x64xf32>
    %502 = vector.shape_cast %498 : vector<8x64xf32> to vector<1x8x64xf32>
    tpu.vector_store %arg9[%499, %c0_192, %c0_193], %502 {strides = array<i32>} : memref<8x8x128xf32, #tpu.memory_space<vmem>>, vector<1x8x64xf32>,
    %503 = vector.extract_strided_slice %497 {offsets = [0, 64], sizes = [8, 64], strides = [1, 1]} : vector<8x128xf32> to vector<8x64xf32>
    %504 = arith.index_cast %472 : i32 to index
    %c0_194 = arith.constant 0 : index
    %c64_195 = arith.constant 64 : index
    %505 = vector.load %arg9[%504, %c0_194, %c64_195] : memref<8x8x128xf32, #tpu.memory_space<vmem>>, vector<1x8x64xf32>
    %506 = vector.shape_cast %505 : vector<1x8x64xf32> to vector<8x64xf32>
    %507 = vector.shape_cast %503 : vector<8x64xf32> to vector<1x8x64xf32>
    tpu.vector_store %arg9[%504, %c0_194, %c64_195], %507 {strides = array<i32>} : memref<8x8x128xf32, #tpu.memory_space<vmem>>, vector<1x8x64xf32>,
    %c5_i32_196 = arith.constant 5 : i32
    %c7_i32_197 = arith.constant 7 : i32
    %508 = arith.subi %c7_i32_197, %c5_i32_196 : i32
    %cst_198 = arith.constant dense<0.000000e+00> : vector<8x512xf32>
    %509 = tpu.matmul %497, %325, %cst_198 {dimension_numbers = #tpu.dot_dimension_numbers<[1], [0], [0], [1], [0, 0, 1, 1], [], []>} : vector<8x128xf32>, vector<128x512xf32>, vector<8x512xf32> -> vector<8x512xf32>
    %510 = arith.index_cast %c5_i32_196 : i32 to index
    %c0_199 = arith.constant 0 : index
    %c0_200 = arith.constant 0 : index
    %511 = vector.load %arg10[%510, %c0_199, %c0_200] : memref<8x8x512xf32, #tpu.memory_space<vmem>>, vector<1x8x512xf32>
    %512 = vector.shape_cast %511 : vector<1x8x512xf32> to vector<8x512xf32>
    %513 = arith.addf %509, %512 : vector<8x512xf32>
    %514 = arith.index_cast %508 : i32 to index
    %c0_201 = arith.constant 0 : index
    %c0_202 = arith.constant 0 : index
    %515 = vector.load %arg11[%514, %c0_201, %c0_202] : memref<8x8x512xf32, #tpu.memory_space<vmem>>, vector<1x8x512xf32>
    %516 = vector.shape_cast %515 : vector<1x8x512xf32> to vector<8x512xf32>
    %517 = arith.addf %513, %516 : vector<8x512xf32>
    %518 = vector.extract_strided_slice %517 {offsets = [0, 0], sizes = [8, 384], strides = [1, 1]} : vector<8x512xf32> to vector<8x384xf32>
    %519 = arith.negf %518 : vector<8x384xf32>
    %520 = math.exp %519 : vector<8x384xf32>
    %cst_203 = arith.constant 1.000000e+00 : f32
    %521 = vector.broadcast %cst_203 : f32 to vector<8x384xf32>
    %522 = arith.addf %521, %520 : vector<8x384xf32>
    %523 = arith.divf %521, %522 : vector<8x384xf32>
    %524 = vector.extract_strided_slice %517 {offsets = [0, 384], sizes = [8, 128], strides = [1, 1]} : vector<8x512xf32> to vector<8x128xf32>
    %525 = math.tanh %524 : vector<8x128xf32>
    %526 = vector.extract_strided_slice %523 {offsets = [0, 0], sizes = [8, 128], strides = [1, 1]} : vector<8x384xf32> to vector<8x128xf32>
    %527 = vector.extract_strided_slice %523 {offsets = [0, 128], sizes = [8, 128], strides = [1, 1]} : vector<8x384xf32> to vector<8x128xf32>
    %528 = vector.extract_strided_slice %523 {offsets = [0, 256], sizes = [8, 128], strides = [1, 1]} : vector<8x384xf32> to vector<8x128xf32>
    %529 = arith.mulf %527, %495 : vector<8x128xf32>
    %530 = arith.mulf %526, %525 : vector<8x128xf32>
    %531 = arith.addf %529, %530 : vector<8x128xf32>
    %532 = math.tanh %531 : vector<8x128xf32>
    %533 = arith.mulf %528, %532 : vector<8x128xf32>
    %534 = vector.extract_strided_slice %533 {offsets = [0, 0], sizes = [8, 64], strides = [1, 1]} : vector<8x128xf32> to vector<8x64xf32>
    %535 = arith.index_cast %c5_i32_196 : i32 to index
    %c0_204 = arith.constant 0 : index
    %c0_205 = arith.constant 0 : index
    %536 = vector.load %arg9[%535, %c0_204, %c0_205] : memref<8x8x128xf32, #tpu.memory_space<vmem>>, vector<1x8x64xf32>
    %537 = vector.shape_cast %536 : vector<1x8x64xf32> to vector<8x64xf32>
    %538 = vector.shape_cast %534 : vector<8x64xf32> to vector<1x8x64xf32>
    tpu.vector_store %arg9[%535, %c0_204, %c0_205], %538 {strides = array<i32>} : memref<8x8x128xf32, #tpu.memory_space<vmem>>, vector<1x8x64xf32>,
    %539 = vector.extract_strided_slice %533 {offsets = [0, 64], sizes = [8, 64], strides = [1, 1]} : vector<8x128xf32> to vector<8x64xf32>
    %540 = arith.index_cast %508 : i32 to index
    %c0_206 = arith.constant 0 : index
    %c64_207 = arith.constant 64 : index
    %541 = vector.load %arg9[%540, %c0_206, %c64_207] : memref<8x8x128xf32, #tpu.memory_space<vmem>>, vector<1x8x64xf32>
    %542 = vector.shape_cast %541 : vector<1x8x64xf32> to vector<8x64xf32>
    %543 = vector.shape_cast %539 : vector<8x64xf32> to vector<1x8x64xf32>
    tpu.vector_store %arg9[%540, %c0_206, %c64_207], %543 {strides = array<i32>} : memref<8x8x128xf32, #tpu.memory_space<vmem>>, vector<1x8x64xf32>,
    %c6_i32_208 = arith.constant 6 : i32
    %c7_i32_209 = arith.constant 7 : i32
    %544 = arith.subi %c7_i32_209, %c6_i32_208 : i32
    %cst_210 = arith.constant dense<0.000000e+00> : vector<8x512xf32>
    %545 = tpu.matmul %533, %325, %cst_210 {dimension_numbers = #tpu.dot_dimension_numbers<[1], [0], [0], [1], [0, 0, 1, 1], [], []>} : vector<8x128xf32>, vector<128x512xf32>, vector<8x512xf32> -> vector<8x512xf32>
    %546 = arith.index_cast %c6_i32_208 : i32 to index
    %c0_211 = arith.constant 0 : index
    %c0_212 = arith.constant 0 : index
    %547 = vector.load %arg10[%546, %c0_211, %c0_212] : memref<8x8x512xf32, #tpu.memory_space<vmem>>, vector<1x8x512xf32>
    %548 = vector.shape_cast %547 : vector<1x8x512xf32> to vector<8x512xf32>
    %549 = arith.addf %545, %548 : vector<8x512xf32>
    %550 = arith.index_cast %544 : i32 to index
    %c0_213 = arith.constant 0 : index
    %c0_214 = arith.constant 0 : index
    %551 = vector.load %arg11[%550, %c0_213, %c0_214] : memref<8x8x512xf32, #tpu.memory_space<vmem>>, vector<1x8x512xf32>
    %552 = vector.shape_cast %551 : vector<1x8x512xf32> to vector<8x512xf32>
    %553 = arith.addf %549, %552 : vector<8x512xf32>
    %554 = vector.extract_strided_slice %553 {offsets = [0, 0], sizes = [8, 384], strides = [1, 1]} : vector<8x512xf32> to vector<8x384xf32>
    %555 = arith.negf %554 : vector<8x384xf32>
    %556 = math.exp %555 : vector<8x384xf32>
    %cst_215 = arith.constant 1.000000e+00 : f32
    %557 = vector.broadcast %cst_215 : f32 to vector<8x384xf32>
    %558 = arith.addf %557, %556 : vector<8x384xf32>
    %559 = arith.divf %557, %558 : vector<8x384xf32>
    %560 = vector.extract_strided_slice %553 {offsets = [0, 384], sizes = [8, 128], strides = [1, 1]} : vector<8x512xf32> to vector<8x128xf32>
    %561 = math.tanh %560 : vector<8x128xf32>
    %562 = vector.extract_strided_slice %559 {offsets = [0, 0], sizes = [8, 128], strides = [1, 1]} : vector<8x384xf32> to vector<8x128xf32>
    %563 = vector.extract_strided_slice %559 {offsets = [0, 128], sizes = [8, 128], strides = [1, 1]} : vector<8x384xf32> to vector<8x128xf32>
    %564 = vector.extract_strided_slice %559 {offsets = [0, 256], sizes = [8, 128], strides = [1, 1]} : vector<8x384xf32> to vector<8x128xf32>
    %565 = arith.mulf %563, %531 : vector<8x128xf32>
    %566 = arith.mulf %562, %561 : vector<8x128xf32>
    %567 = arith.addf %565, %566 : vector<8x128xf32>
    %568 = math.tanh %567 : vector<8x128xf32>
    %569 = arith.mulf %564, %568 : vector<8x128xf32>
    %570 = vector.extract_strided_slice %569 {offsets = [0, 0], sizes = [8, 64], strides = [1, 1]} : vector<8x128xf32> to vector<8x64xf32>
    %571 = arith.index_cast %c6_i32_208 : i32 to index
    %c0_216 = arith.constant 0 : index
    %c0_217 = arith.constant 0 : index
    %572 = vector.load %arg9[%571, %c0_216, %c0_217] : memref<8x8x128xf32, #tpu.memory_space<vmem>>, vector<1x8x64xf32>
    %573 = vector.shape_cast %572 : vector<1x8x64xf32> to vector<8x64xf32>
    %574 = vector.shape_cast %570 : vector<8x64xf32> to vector<1x8x64xf32>
    tpu.vector_store %arg9[%571, %c0_216, %c0_217], %574 {strides = array<i32>} : memref<8x8x128xf32, #tpu.memory_space<vmem>>, vector<1x8x64xf32>,
    %575 = vector.extract_strided_slice %569 {offsets = [0, 64], sizes = [8, 64], strides = [1, 1]} : vector<8x128xf32> to vector<8x64xf32>
    %576 = arith.index_cast %544 : i32 to index
    %c0_218 = arith.constant 0 : index
    %c64_219 = arith.constant 64 : index
    %577 = vector.load %arg9[%576, %c0_218, %c64_219] : memref<8x8x128xf32, #tpu.memory_space<vmem>>, vector<1x8x64xf32>
    %578 = vector.shape_cast %577 : vector<1x8x64xf32> to vector<8x64xf32>
    %579 = vector.shape_cast %575 : vector<8x64xf32> to vector<1x8x64xf32>
    tpu.vector_store %arg9[%576, %c0_218, %c64_219], %579 {strides = array<i32>} : memref<8x8x128xf32, #tpu.memory_space<vmem>>, vector<1x8x64xf32>,
    %c7_i32_220 = arith.constant 7 : i32
    %c7_i32_221 = arith.constant 7 : i32
    %580 = arith.subi %c7_i32_221, %c7_i32_220 : i32
    %cst_222 = arith.constant dense<0.000000e+00> : vector<8x512xf32>
    %581 = tpu.matmul %569, %325, %cst_222 {dimension_numbers = #tpu.dot_dimension_numbers<[1], [0], [0], [1], [0, 0, 1, 1], [], []>} : vector<8x128xf32>, vector<128x512xf32>, vector<8x512xf32> -> vector<8x512xf32>
    %582 = arith.index_cast %c7_i32_220 : i32 to index
    %c0_223 = arith.constant 0 : index
    %c0_224 = arith.constant 0 : index
    %583 = vector.load %arg10[%582, %c0_223, %c0_224] : memref<8x8x512xf32, #tpu.memory_space<vmem>>, vector<1x8x512xf32>
    %584 = vector.shape_cast %583 : vector<1x8x512xf32> to vector<8x512xf32>
    %585 = arith.addf %581, %584 : vector<8x512xf32>
    %586 = arith.index_cast %580 : i32 to index
    %c0_225 = arith.constant 0 : index
    %c0_226 = arith.constant 0 : index
    %587 = vector.load %arg11[%586, %c0_225, %c0_226] : memref<8x8x512xf32, #tpu.memory_space<vmem>>, vector<1x8x512xf32>
    %588 = vector.shape_cast %587 : vector<1x8x512xf32> to vector<8x512xf32>
    %589 = arith.addf %585, %588 : vector<8x512xf32>
    %590 = vector.extract_strided_slice %589 {offsets = [0, 0], sizes = [8, 384], strides = [1, 1]} : vector<8x512xf32> to vector<8x384xf32>
    %591 = arith.negf %590 : vector<8x384xf32>
    %592 = math.exp %591 : vector<8x384xf32>
    %cst_227 = arith.constant 1.000000e+00 : f32
    %593 = vector.broadcast %cst_227 : f32 to vector<8x384xf32>
    %594 = arith.addf %593, %592 : vector<8x384xf32>
    %595 = arith.divf %593, %594 : vector<8x384xf32>
    %596 = vector.extract_strided_slice %589 {offsets = [0, 384], sizes = [8, 128], strides = [1, 1]} : vector<8x512xf32> to vector<8x128xf32>
    %597 = math.tanh %596 : vector<8x128xf32>
    %598 = vector.extract_strided_slice %595 {offsets = [0, 0], sizes = [8, 128], strides = [1, 1]} : vector<8x384xf32> to vector<8x128xf32>
    %599 = vector.extract_strided_slice %595 {offsets = [0, 128], sizes = [8, 128], strides = [1, 1]} : vector<8x384xf32> to vector<8x128xf32>
    %600 = vector.extract_strided_slice %595 {offsets = [0, 256], sizes = [8, 128], strides = [1, 1]} : vector<8x384xf32> to vector<8x128xf32>
    %601 = arith.mulf %599, %567 : vector<8x128xf32>
    %602 = arith.mulf %598, %597 : vector<8x128xf32>
    %603 = arith.addf %601, %602 : vector<8x128xf32>
    %604 = math.tanh %603 : vector<8x128xf32>
    %605 = arith.mulf %600, %604 : vector<8x128xf32>
    %606 = vector.extract_strided_slice %605 {offsets = [0, 0], sizes = [8, 64], strides = [1, 1]} : vector<8x128xf32> to vector<8x64xf32>
    %607 = arith.index_cast %c7_i32_220 : i32 to index
    %c0_228 = arith.constant 0 : index
    %c0_229 = arith.constant 0 : index
    %608 = vector.load %arg9[%607, %c0_228, %c0_229] : memref<8x8x128xf32, #tpu.memory_space<vmem>>, vector<1x8x64xf32>
    %609 = vector.shape_cast %608 : vector<1x8x64xf32> to vector<8x64xf32>
    %610 = vector.shape_cast %606 : vector<8x64xf32> to vector<1x8x64xf32>
    tpu.vector_store %arg9[%607, %c0_228, %c0_229], %610 {strides = array<i32>} : memref<8x8x128xf32, #tpu.memory_space<vmem>>, vector<1x8x64xf32>,
    %611 = vector.extract_strided_slice %605 {offsets = [0, 64], sizes = [8, 64], strides = [1, 1]} : vector<8x128xf32> to vector<8x64xf32>
    %612 = arith.index_cast %580 : i32 to index
    %c0_230 = arith.constant 0 : index
    %c64_231 = arith.constant 64 : index
    %613 = vector.load %arg9[%612, %c0_230, %c64_231] : memref<8x8x128xf32, #tpu.memory_space<vmem>>, vector<1x8x64xf32>
    %614 = vector.shape_cast %613 : vector<1x8x64xf32> to vector<8x64xf32>
    %615 = vector.shape_cast %611 : vector<8x64xf32> to vector<1x8x64xf32>
    tpu.vector_store %arg9[%612, %c0_230, %c64_231], %615 {strides = array<i32>} : memref<8x8x128xf32, #tpu.memory_space<vmem>>, vector<1x8x64xf32>,
    %c8_i32_232 = arith.constant 8 : i32
    %c0_233 = arith.constant 0 : index
    %c0_234 = arith.constant 0 : index
    %c0_235 = arith.constant 0 : index
    %616 = vector.load %arg9[%c0_233, %c0_234, %c0_235] : memref<8x8x128xf32, #tpu.memory_space<vmem>>, vector<8x8x128xf32>
    %617 = vector.shape_cast %616 : vector<8x8x128xf32> to vector<64x128xf32>
    %c1_236 = arith.constant 1 : index
    %c0_237 = arith.constant 0 : index
    %c0_238 = arith.constant 0 : index
    %c0_239 = arith.constant 0 : index
    %618 = vector.load %arg2[%c1_236, %c0_237, %c0_238, %c0_239] : memref<3x2x128x512xf32, #tpu.memory_space<vmem>>, vector<1x1x128x512xf32>
    %619 = vector.shape_cast %618 : vector<1x1x128x512xf32> to vector<128x512xf32>
    %c1_240 = arith.constant 1 : index
    %c1_241 = arith.constant 1 : index
    %c0_242 = arith.constant 0 : index
    %c0_243 = arith.constant 0 : index
    %620 = vector.load %arg2[%c1_240, %c1_241, %c0_242, %c0_243] : memref<3x2x128x512xf32, #tpu.memory_space<vmem>>, vector<1x1x128x512xf32>
    %621 = vector.shape_cast %620 : vector<1x1x128x512xf32> to vector<128x512xf32>
    %cst_244 = arith.constant dense<0.000000e+00> : vector<64x512xf32>
    %622 = tpu.matmul %617, %619, %cst_244 {dimension_numbers = #tpu.dot_dimension_numbers<[1], [0], [0], [1], [0, 0, 1, 1], [], []>} : vector<64x128xf32>, vector<128x512xf32>, vector<64x512xf32> -> vector<64x512xf32>
    %c2 = arith.constant 2 : index
    %c0_245 = arith.constant 0 : index
    %c0_246 = arith.constant 0 : index
    %623 = vector.load %arg4[%c2, %c0_245, %c0_246] : memref<4x1x512xf32, #tpu.memory_space<vmem>>, vector<1x1x512xf32>
    %624 = vector.shape_cast %623 : vector<1x1x512xf32> to vector<1x512xf32>
    %625 = vector.broadcast %624 : vector<1x512xf32> to vector<64x512xf32>
    %626 = arith.addf %622, %625 : vector<64x512xf32>
    %627 = vector.shape_cast %626 : vector<64x512xf32> to vector<8x8x512xf32>
    %c0_247 = arith.constant 0 : index
    %c0_248 = arith.constant 0 : index
    %c0_249 = arith.constant 0 : index
    %628 = vector.load %arg10[%c0_247, %c0_248, %c0_249] : memref<8x8x512xf32, #tpu.memory_space<vmem>>, vector<8x8x512xf32>
    tpu.vector_store %arg10[%c0_247, %c0_248, %c0_249], %627 {strides = array<i32>} : memref<8x8x512xf32, #tpu.memory_space<vmem>>, vector<8x8x512xf32>,
    %cst_250 = arith.constant dense<0.000000e+00> : vector<64x512xf32>
    %629 = tpu.matmul %617, %621, %cst_250 {dimension_numbers = #tpu.dot_dimension_numbers<[1], [0], [0], [1], [0, 0, 1, 1], [], []>} : vector<64x128xf32>, vector<128x512xf32>, vector<64x512xf32> -> vector<64x512xf32>
    %630 = vector.shape_cast %629 : vector<64x512xf32> to vector<8x8x512xf32>
    %c0_251 = arith.constant 0 : index
    %c0_252 = arith.constant 0 : index
    %c0_253 = arith.constant 0 : index
    %631 = vector.load %arg11[%c0_251, %c0_252, %c0_253] : memref<8x8x512xf32, #tpu.memory_space<vmem>>, vector<8x8x512xf32>
    tpu.vector_store %arg11[%c0_251, %c0_252, %c0_253], %630 {strides = array<i32>} : memref<8x8x512xf32, #tpu.memory_space<vmem>>, vector<8x8x512xf32>,
    %c2_254 = arith.constant 2 : index
    %c0_255 = arith.constant 0 : index
    %c0_256 = arith.constant 0 : index
    %632 = vector.load %arg3[%c2_254, %c0_255, %c0_256] : memref<4x128x512xf32, #tpu.memory_space<vmem>>, vector<1x128x512xf32>
    %633 = vector.shape_cast %632 : vector<1x128x512xf32> to vector<128x512xf32>
    %cst_257 = arith.constant 0.000000e+00 : f32
    %634 = vector.broadcast %cst_257 : f32 to vector<8x128xf32>
    %cst_258 = arith.constant 0.000000e+00 : f32
    %635 = vector.broadcast %cst_258 : f32 to vector<8x128xf32>
    %c0_i32_259 = arith.constant 0 : i32
    %c7_i32_260 = arith.constant 7 : i32
    %636 = arith.subi %c7_i32_260, %c0_i32_259 : i32
    %cst_261 = arith.constant dense<0.000000e+00> : vector<8x512xf32>
    %637 = tpu.matmul %634, %633, %cst_261 {dimension_numbers = #tpu.dot_dimension_numbers<[1], [0], [0], [1], [0, 0, 1, 1], [], []>} : vector<8x128xf32>, vector<128x512xf32>, vector<8x512xf32> -> vector<8x512xf32>
    %638 = arith.index_cast %c0_i32_259 : i32 to index
    %c0_262 = arith.constant 0 : index
    %c0_263 = arith.constant 0 : index
    %639 = vector.load %arg10[%638, %c0_262, %c0_263] : memref<8x8x512xf32, #tpu.memory_space<vmem>>, vector<1x8x512xf32>
    %640 = vector.shape_cast %639 : vector<1x8x512xf32> to vector<8x512xf32>
    %641 = arith.addf %637, %640 : vector<8x512xf32>
    %642 = arith.index_cast %636 : i32 to index
    %c0_264 = arith.constant 0 : index
    %c0_265 = arith.constant 0 : index
    %643 = vector.load %arg11[%642, %c0_264, %c0_265] : memref<8x8x512xf32, #tpu.memory_space<vmem>>, vector<1x8x512xf32>
    %644 = vector.shape_cast %643 : vector<1x8x512xf32> to vector<8x512xf32>
    %645 = arith.addf %641, %644 : vector<8x512xf32>
    %646 = vector.extract_strided_slice %645 {offsets = [0, 0], sizes = [8, 384], strides = [1, 1]} : vector<8x512xf32> to vector<8x384xf32>
    %647 = arith.negf %646 : vector<8x384xf32>
    %648 = math.exp %647 : vector<8x384xf32>
    %cst_266 = arith.constant 1.000000e+00 : f32
    %649 = vector.broadcast %cst_266 : f32 to vector<8x384xf32>
    %650 = arith.addf %649, %648 : vector<8x384xf32>
    %651 = arith.divf %649, %650 : vector<8x384xf32>
    %652 = vector.extract_strided_slice %645 {offsets = [0, 384], sizes = [8, 128], strides = [1, 1]} : vector<8x512xf32> to vector<8x128xf32>
    %653 = math.tanh %652 : vector<8x128xf32>
    %654 = vector.extract_strided_slice %651 {offsets = [0, 0], sizes = [8, 128], strides = [1, 1]} : vector<8x384xf32> to vector<8x128xf32>
    %655 = vector.extract_strided_slice %651 {offsets = [0, 128], sizes = [8, 128], strides = [1, 1]} : vector<8x384xf32> to vector<8x128xf32>
    %656 = vector.extract_strided_slice %651 {offsets = [0, 256], sizes = [8, 128], strides = [1, 1]} : vector<8x384xf32> to vector<8x128xf32>
    %657 = arith.mulf %655, %635 : vector<8x128xf32>
    %658 = arith.mulf %654, %653 : vector<8x128xf32>
    %659 = arith.addf %657, %658 : vector<8x128xf32>
    %660 = math.tanh %659 : vector<8x128xf32>
    %661 = arith.mulf %656, %660 : vector<8x128xf32>
    %662 = vector.extract_strided_slice %661 {offsets = [0, 0], sizes = [8, 64], strides = [1, 1]} : vector<8x128xf32> to vector<8x64xf32>
    %663 = arith.index_cast %c0_i32_259 : i32 to index
    %c0_267 = arith.constant 0 : index
    %c0_268 = arith.constant 0 : index
    %664 = vector.load %arg8[%663, %c0_267, %c0_268] : memref<8x8x128xf32, #tpu.memory_space<vmem>>, vector<1x8x64xf32>
    %665 = vector.shape_cast %664 : vector<1x8x64xf32> to vector<8x64xf32>
    %666 = vector.shape_cast %662 : vector<8x64xf32> to vector<1x8x64xf32>
    tpu.vector_store %arg8[%663, %c0_267, %c0_268], %666 {strides = array<i32>} : memref<8x8x128xf32, #tpu.memory_space<vmem>>, vector<1x8x64xf32>,
    %667 = vector.extract_strided_slice %661 {offsets = [0, 64], sizes = [8, 64], strides = [1, 1]} : vector<8x128xf32> to vector<8x64xf32>
    %668 = arith.index_cast %636 : i32 to index
    %c0_269 = arith.constant 0 : index
    %c64_270 = arith.constant 64 : index
    %669 = vector.load %arg8[%668, %c0_269, %c64_270] : memref<8x8x128xf32, #tpu.memory_space<vmem>>, vector<1x8x64xf32>
    %670 = vector.shape_cast %669 : vector<1x8x64xf32> to vector<8x64xf32>
    %671 = vector.shape_cast %667 : vector<8x64xf32> to vector<1x8x64xf32>
    tpu.vector_store %arg8[%668, %c0_269, %c64_270], %671 {strides = array<i32>} : memref<8x8x128xf32, #tpu.memory_space<vmem>>, vector<1x8x64xf32>,
    %c1_i32_271 = arith.constant 1 : i32
    %c7_i32_272 = arith.constant 7 : i32
    %672 = arith.subi %c7_i32_272, %c1_i32_271 : i32
    %cst_273 = arith.constant dense<0.000000e+00> : vector<8x512xf32>
    %673 = tpu.matmul %661, %633, %cst_273 {dimension_numbers = #tpu.dot_dimension_numbers<[1], [0], [0], [1], [0, 0, 1, 1], [], []>} : vector<8x128xf32>, vector<128x512xf32>, vector<8x512xf32> -> vector<8x512xf32>
    %674 = arith.index_cast %c1_i32_271 : i32 to index
    %c0_274 = arith.constant 0 : index
    %c0_275 = arith.constant 0 : index
    %675 = vector.load %arg10[%674, %c0_274, %c0_275] : memref<8x8x512xf32, #tpu.memory_space<vmem>>, vector<1x8x512xf32>
    %676 = vector.shape_cast %675 : vector<1x8x512xf32> to vector<8x512xf32>
    %677 = arith.addf %673, %676 : vector<8x512xf32>
    %678 = arith.index_cast %672 : i32 to index
    %c0_276 = arith.constant 0 : index
    %c0_277 = arith.constant 0 : index
    %679 = vector.load %arg11[%678, %c0_276, %c0_277] : memref<8x8x512xf32, #tpu.memory_space<vmem>>, vector<1x8x512xf32>
    %680 = vector.shape_cast %679 : vector<1x8x512xf32> to vector<8x512xf32>
    %681 = arith.addf %677, %680 : vector<8x512xf32>
    %682 = vector.extract_strided_slice %681 {offsets = [0, 0], sizes = [8, 384], strides = [1, 1]} : vector<8x512xf32> to vector<8x384xf32>
    %683 = arith.negf %682 : vector<8x384xf32>
    %684 = math.exp %683 : vector<8x384xf32>
    %cst_278 = arith.constant 1.000000e+00 : f32
    %685 = vector.broadcast %cst_278 : f32 to vector<8x384xf32>
    %686 = arith.addf %685, %684 : vector<8x384xf32>
    %687 = arith.divf %685, %686 : vector<8x384xf32>
    %688 = vector.extract_strided_slice %681 {offsets = [0, 384], sizes = [8, 128], strides = [1, 1]} : vector<8x512xf32> to vector<8x128xf32>
    %689 = math.tanh %688 : vector<8x128xf32>
    %690 = vector.extract_strided_slice %687 {offsets = [0, 0], sizes = [8, 128], strides = [1, 1]} : vector<8x384xf32> to vector<8x128xf32>
    %691 = vector.extract_strided_slice %687 {offsets = [0, 128], sizes = [8, 128], strides = [1, 1]} : vector<8x384xf32> to vector<8x128xf32>
    %692 = vector.extract_strided_slice %687 {offsets = [0, 256], sizes = [8, 128], strides = [1, 1]} : vector<8x384xf32> to vector<8x128xf32>
    %693 = arith.mulf %691, %659 : vector<8x128xf32>
    %694 = arith.mulf %690, %689 : vector<8x128xf32>
    %695 = arith.addf %693, %694 : vector<8x128xf32>
    %696 = math.tanh %695 : vector<8x128xf32>
    %697 = arith.mulf %692, %696 : vector<8x128xf32>
    %698 = vector.extract_strided_slice %697 {offsets = [0, 0], sizes = [8, 64], strides = [1, 1]} : vector<8x128xf32> to vector<8x64xf32>
    %699 = arith.index_cast %c1_i32_271 : i32 to index
    %c0_279 = arith.constant 0 : index
    %c0_280 = arith.constant 0 : index
    %700 = vector.load %arg8[%699, %c0_279, %c0_280] : memref<8x8x128xf32, #tpu.memory_space<vmem>>, vector<1x8x64xf32>
    %701 = vector.shape_cast %700 : vector<1x8x64xf32> to vector<8x64xf32>
    %702 = vector.shape_cast %698 : vector<8x64xf32> to vector<1x8x64xf32>
    tpu.vector_store %arg8[%699, %c0_279, %c0_280], %702 {strides = array<i32>} : memref<8x8x128xf32, #tpu.memory_space<vmem>>, vector<1x8x64xf32>,
    %703 = vector.extract_strided_slice %697 {offsets = [0, 64], sizes = [8, 64], strides = [1, 1]} : vector<8x128xf32> to vector<8x64xf32>
    %704 = arith.index_cast %672 : i32 to index
    %c0_281 = arith.constant 0 : index
    %c64_282 = arith.constant 64 : index
    %705 = vector.load %arg8[%704, %c0_281, %c64_282] : memref<8x8x128xf32, #tpu.memory_space<vmem>>, vector<1x8x64xf32>
    %706 = vector.shape_cast %705 : vector<1x8x64xf32> to vector<8x64xf32>
    %707 = vector.shape_cast %703 : vector<8x64xf32> to vector<1x8x64xf32>
    tpu.vector_store %arg8[%704, %c0_281, %c64_282], %707 {strides = array<i32>} : memref<8x8x128xf32, #tpu.memory_space<vmem>>, vector<1x8x64xf32>,
    %c2_i32_283 = arith.constant 2 : i32
    %c7_i32_284 = arith.constant 7 : i32
    %708 = arith.subi %c7_i32_284, %c2_i32_283 : i32
    %cst_285 = arith.constant dense<0.000000e+00> : vector<8x512xf32>
    %709 = tpu.matmul %697, %633, %cst_285 {dimension_numbers = #tpu.dot_dimension_numbers<[1], [0], [0], [1], [0, 0, 1, 1], [], []>} : vector<8x128xf32>, vector<128x512xf32>, vector<8x512xf32> -> vector<8x512xf32>
    %710 = arith.index_cast %c2_i32_283 : i32 to index
    %c0_286 = arith.constant 0 : index
    %c0_287 = arith.constant 0 : index
    %711 = vector.load %arg10[%710, %c0_286, %c0_287] : memref<8x8x512xf32, #tpu.memory_space<vmem>>, vector<1x8x512xf32>
    %712 = vector.shape_cast %711 : vector<1x8x512xf32> to vector<8x512xf32>
    %713 = arith.addf %709, %712 : vector<8x512xf32>
    %714 = arith.index_cast %708 : i32 to index
    %c0_288 = arith.constant 0 : index
    %c0_289 = arith.constant 0 : index
    %715 = vector.load %arg11[%714, %c0_288, %c0_289] : memref<8x8x512xf32, #tpu.memory_space<vmem>>, vector<1x8x512xf32>
    %716 = vector.shape_cast %715 : vector<1x8x512xf32> to vector<8x512xf32>
    %717 = arith.addf %713, %716 : vector<8x512xf32>
    %718 = vector.extract_strided_slice %717 {offsets = [0, 0], sizes = [8, 384], strides = [1, 1]} : vector<8x512xf32> to vector<8x384xf32>
    %719 = arith.negf %718 : vector<8x384xf32>
    %720 = math.exp %719 : vector<8x384xf32>
    %cst_290 = arith.constant 1.000000e+00 : f32
    %721 = vector.broadcast %cst_290 : f32 to vector<8x384xf32>
    %722 = arith.addf %721, %720 : vector<8x384xf32>
    %723 = arith.divf %721, %722 : vector<8x384xf32>
    %724 = vector.extract_strided_slice %717 {offsets = [0, 384], sizes = [8, 128], strides = [1, 1]} : vector<8x512xf32> to vector<8x128xf32>
    %725 = math.tanh %724 : vector<8x128xf32>
    %726 = vector.extract_strided_slice %723 {offsets = [0, 0], sizes = [8, 128], strides = [1, 1]} : vector<8x384xf32> to vector<8x128xf32>
    %727 = vector.extract_strided_slice %723 {offsets = [0, 128], sizes = [8, 128], strides = [1, 1]} : vector<8x384xf32> to vector<8x128xf32>
    %728 = vector.extract_strided_slice %723 {offsets = [0, 256], sizes = [8, 128], strides = [1, 1]} : vector<8x384xf32> to vector<8x128xf32>
    %729 = arith.mulf %727, %695 : vector<8x128xf32>
    %730 = arith.mulf %726, %725 : vector<8x128xf32>
    %731 = arith.addf %729, %730 : vector<8x128xf32>
    %732 = math.tanh %731 : vector<8x128xf32>
    %733 = arith.mulf %728, %732 : vector<8x128xf32>
    %734 = vector.extract_strided_slice %733 {offsets = [0, 0], sizes = [8, 64], strides = [1, 1]} : vector<8x128xf32> to vector<8x64xf32>
    %735 = arith.index_cast %c2_i32_283 : i32 to index
    %c0_291 = arith.constant 0 : index
    %c0_292 = arith.constant 0 : index
    %736 = vector.load %arg8[%735, %c0_291, %c0_292] : memref<8x8x128xf32, #tpu.memory_space<vmem>>, vector<1x8x64xf32>
    %737 = vector.shape_cast %736 : vector<1x8x64xf32> to vector<8x64xf32>
    %738 = vector.shape_cast %734 : vector<8x64xf32> to vector<1x8x64xf32>
    tpu.vector_store %arg8[%735, %c0_291, %c0_292], %738 {strides = array<i32>} : memref<8x8x128xf32, #tpu.memory_space<vmem>>, vector<1x8x64xf32>,
    %739 = vector.extract_strided_slice %733 {offsets = [0, 64], sizes = [8, 64], strides = [1, 1]} : vector<8x128xf32> to vector<8x64xf32>
    %740 = arith.index_cast %708 : i32 to index
    %c0_293 = arith.constant 0 : index
    %c64_294 = arith.constant 64 : index
    %741 = vector.load %arg8[%740, %c0_293, %c64_294] : memref<8x8x128xf32, #tpu.memory_space<vmem>>, vector<1x8x64xf32>
    %742 = vector.shape_cast %741 : vector<1x8x64xf32> to vector<8x64xf32>
    %743 = vector.shape_cast %739 : vector<8x64xf32> to vector<1x8x64xf32>
    tpu.vector_store %arg8[%740, %c0_293, %c64_294], %743 {strides = array<i32>} : memref<8x8x128xf32, #tpu.memory_space<vmem>>, vector<1x8x64xf32>,
    %c3_i32_295 = arith.constant 3 : i32
    %c7_i32_296 = arith.constant 7 : i32
    %744 = arith.subi %c7_i32_296, %c3_i32_295 : i32
    %cst_297 = arith.constant dense<0.000000e+00> : vector<8x512xf32>
    %745 = tpu.matmul %733, %633, %cst_297 {dimension_numbers = #tpu.dot_dimension_numbers<[1], [0], [0], [1], [0, 0, 1, 1], [], []>} : vector<8x128xf32>, vector<128x512xf32>, vector<8x512xf32> -> vector<8x512xf32>
    %746 = arith.index_cast %c3_i32_295 : i32 to index
    %c0_298 = arith.constant 0 : index
    %c0_299 = arith.constant 0 : index
    %747 = vector.load %arg10[%746, %c0_298, %c0_299] : memref<8x8x512xf32, #tpu.memory_space<vmem>>, vector<1x8x512xf32>
    %748 = vector.shape_cast %747 : vector<1x8x512xf32> to vector<8x512xf32>
    %749 = arith.addf %745, %748 : vector<8x512xf32>
    %750 = arith.index_cast %744 : i32 to index
    %c0_300 = arith.constant 0 : index
    %c0_301 = arith.constant 0 : index
    %751 = vector.load %arg11[%750, %c0_300, %c0_301] : memref<8x8x512xf32, #tpu.memory_space<vmem>>, vector<1x8x512xf32>
    %752 = vector.shape_cast %751 : vector<1x8x512xf32> to vector<8x512xf32>
    %753 = arith.addf %749, %752 : vector<8x512xf32>
    %754 = vector.extract_strided_slice %753 {offsets = [0, 0], sizes = [8, 384], strides = [1, 1]} : vector<8x512xf32> to vector<8x384xf32>
    %755 = arith.negf %754 : vector<8x384xf32>
    %756 = math.exp %755 : vector<8x384xf32>
    %cst_302 = arith.constant 1.000000e+00 : f32
    %757 = vector.broadcast %cst_302 : f32 to vector<8x384xf32>
    %758 = arith.addf %757, %756 : vector<8x384xf32>
    %759 = arith.divf %757, %758 : vector<8x384xf32>
    %760 = vector.extract_strided_slice %753 {offsets = [0, 384], sizes = [8, 128], strides = [1, 1]} : vector<8x512xf32> to vector<8x128xf32>
    %761 = math.tanh %760 : vector<8x128xf32>
    %762 = vector.extract_strided_slice %759 {offsets = [0, 0], sizes = [8, 128], strides = [1, 1]} : vector<8x384xf32> to vector<8x128xf32>
    %763 = vector.extract_strided_slice %759 {offsets = [0, 128], sizes = [8, 128], strides = [1, 1]} : vector<8x384xf32> to vector<8x128xf32>
    %764 = vector.extract_strided_slice %759 {offsets = [0, 256], sizes = [8, 128], strides = [1, 1]} : vector<8x384xf32> to vector<8x128xf32>
    %765 = arith.mulf %763, %731 : vector<8x128xf32>
    %766 = arith.mulf %762, %761 : vector<8x128xf32>
    %767 = arith.addf %765, %766 : vector<8x128xf32>
    %768 = math.tanh %767 : vector<8x128xf32>
    %769 = arith.mulf %764, %768 : vector<8x128xf32>
    %770 = vector.extract_strided_slice %769 {offsets = [0, 0], sizes = [8, 64], strides = [1, 1]} : vector<8x128xf32> to vector<8x64xf32>
    %771 = arith.index_cast %c3_i32_295 : i32 to index
    %c0_303 = arith.constant 0 : index
    %c0_304 = arith.constant 0 : index
    %772 = vector.load %arg8[%771, %c0_303, %c0_304] : memref<8x8x128xf32, #tpu.memory_space<vmem>>, vector<1x8x64xf32>
    %773 = vector.shape_cast %772 : vector<1x8x64xf32> to vector<8x64xf32>
    %774 = vector.shape_cast %770 : vector<8x64xf32> to vector<1x8x64xf32>
    tpu.vector_store %arg8[%771, %c0_303, %c0_304], %774 {strides = array<i32>} : memref<8x8x128xf32, #tpu.memory_space<vmem>>, vector<1x8x64xf32>,
    %775 = vector.extract_strided_slice %769 {offsets = [0, 64], sizes = [8, 64], strides = [1, 1]} : vector<8x128xf32> to vector<8x64xf32>
    %776 = arith.index_cast %744 : i32 to index
    %c0_305 = arith.constant 0 : index
    %c64_306 = arith.constant 64 : index
    %777 = vector.load %arg8[%776, %c0_305, %c64_306] : memref<8x8x128xf32, #tpu.memory_space<vmem>>, vector<1x8x64xf32>
    %778 = vector.shape_cast %777 : vector<1x8x64xf32> to vector<8x64xf32>
    %779 = vector.shape_cast %775 : vector<8x64xf32> to vector<1x8x64xf32>
    tpu.vector_store %arg8[%776, %c0_305, %c64_306], %779 {strides = array<i32>} : memref<8x8x128xf32, #tpu.memory_space<vmem>>, vector<1x8x64xf32>,
    %c4_i32_307 = arith.constant 4 : i32
    %c7_i32_308 = arith.constant 7 : i32
    %780 = arith.subi %c7_i32_308, %c4_i32_307 : i32
    %cst_309 = arith.constant dense<0.000000e+00> : vector<8x512xf32>
    %781 = tpu.matmul %769, %633, %cst_309 {dimension_numbers = #tpu.dot_dimension_numbers<[1], [0], [0], [1], [0, 0, 1, 1], [], []>} : vector<8x128xf32>, vector<128x512xf32>, vector<8x512xf32> -> vector<8x512xf32>
    %782 = arith.index_cast %c4_i32_307 : i32 to index
    %c0_310 = arith.constant 0 : index
    %c0_311 = arith.constant 0 : index
    %783 = vector.load %arg10[%782, %c0_310, %c0_311] : memref<8x8x512xf32, #tpu.memory_space<vmem>>, vector<1x8x512xf32>
    %784 = vector.shape_cast %783 : vector<1x8x512xf32> to vector<8x512xf32>
    %785 = arith.addf %781, %784 : vector<8x512xf32>
    %786 = arith.index_cast %780 : i32 to index
    %c0_312 = arith.constant 0 : index
    %c0_313 = arith.constant 0 : index
    %787 = vector.load %arg11[%786, %c0_312, %c0_313] : memref<8x8x512xf32, #tpu.memory_space<vmem>>, vector<1x8x512xf32>
    %788 = vector.shape_cast %787 : vector<1x8x512xf32> to vector<8x512xf32>
    %789 = arith.addf %785, %788 : vector<8x512xf32>
    %790 = vector.extract_strided_slice %789 {offsets = [0, 0], sizes = [8, 384], strides = [1, 1]} : vector<8x512xf32> to vector<8x384xf32>
    %791 = arith.negf %790 : vector<8x384xf32>
    %792 = math.exp %791 : vector<8x384xf32>
    %cst_314 = arith.constant 1.000000e+00 : f32
    %793 = vector.broadcast %cst_314 : f32 to vector<8x384xf32>
    %794 = arith.addf %793, %792 : vector<8x384xf32>
    %795 = arith.divf %793, %794 : vector<8x384xf32>
    %796 = vector.extract_strided_slice %789 {offsets = [0, 384], sizes = [8, 128], strides = [1, 1]} : vector<8x512xf32> to vector<8x128xf32>
    %797 = math.tanh %796 : vector<8x128xf32>
    %798 = vector.extract_strided_slice %795 {offsets = [0, 0], sizes = [8, 128], strides = [1, 1]} : vector<8x384xf32> to vector<8x128xf32>
    %799 = vector.extract_strided_slice %795 {offsets = [0, 128], sizes = [8, 128], strides = [1, 1]} : vector<8x384xf32> to vector<8x128xf32>
    %800 = vector.extract_strided_slice %795 {offsets = [0, 256], sizes = [8, 128], strides = [1, 1]} : vector<8x384xf32> to vector<8x128xf32>
    %801 = arith.mulf %799, %767 : vector<8x128xf32>
    %802 = arith.mulf %798, %797 : vector<8x128xf32>
    %803 = arith.addf %801, %802 : vector<8x128xf32>
    %804 = math.tanh %803 : vector<8x128xf32>
    %805 = arith.mulf %800, %804 : vector<8x128xf32>
    %806 = vector.extract_strided_slice %805 {offsets = [0, 0], sizes = [8, 64], strides = [1, 1]} : vector<8x128xf32> to vector<8x64xf32>
    %807 = arith.index_cast %c4_i32_307 : i32 to index
    %c0_315 = arith.constant 0 : index
    %c0_316 = arith.constant 0 : index
    %808 = vector.load %arg8[%807, %c0_315, %c0_316] : memref<8x8x128xf32, #tpu.memory_space<vmem>>, vector<1x8x64xf32>
    %809 = vector.shape_cast %808 : vector<1x8x64xf32> to vector<8x64xf32>
    %810 = vector.shape_cast %806 : vector<8x64xf32> to vector<1x8x64xf32>
    tpu.vector_store %arg8[%807, %c0_315, %c0_316], %810 {strides = array<i32>} : memref<8x8x128xf32, #tpu.memory_space<vmem>>, vector<1x8x64xf32>,
    %811 = vector.extract_strided_slice %805 {offsets = [0, 64], sizes = [8, 64], strides = [1, 1]} : vector<8x128xf32> to vector<8x64xf32>
    %812 = arith.index_cast %780 : i32 to index
    %c0_317 = arith.constant 0 : index
    %c64_318 = arith.constant 64 : index
    %813 = vector.load %arg8[%812, %c0_317, %c64_318] : memref<8x8x128xf32, #tpu.memory_space<vmem>>, vector<1x8x64xf32>
    %814 = vector.shape_cast %813 : vector<1x8x64xf32> to vector<8x64xf32>
    %815 = vector.shape_cast %811 : vector<8x64xf32> to vector<1x8x64xf32>
    tpu.vector_store %arg8[%812, %c0_317, %c64_318], %815 {strides = array<i32>} : memref<8x8x128xf32, #tpu.memory_space<vmem>>, vector<1x8x64xf32>,
    %c5_i32_319 = arith.constant 5 : i32
    %c7_i32_320 = arith.constant 7 : i32
    %816 = arith.subi %c7_i32_320, %c5_i32_319 : i32
    %cst_321 = arith.constant dense<0.000000e+00> : vector<8x512xf32>
    %817 = tpu.matmul %805, %633, %cst_321 {dimension_numbers = #tpu.dot_dimension_numbers<[1], [0], [0], [1], [0, 0, 1, 1], [], []>} : vector<8x128xf32>, vector<128x512xf32>, vector<8x512xf32> -> vector<8x512xf32>
    %818 = arith.index_cast %c5_i32_319 : i32 to index
    %c0_322 = arith.constant 0 : index
    %c0_323 = arith.constant 0 : index
    %819 = vector.load %arg10[%818, %c0_322, %c0_323] : memref<8x8x512xf32, #tpu.memory_space<vmem>>, vector<1x8x512xf32>
    %820 = vector.shape_cast %819 : vector<1x8x512xf32> to vector<8x512xf32>
    %821 = arith.addf %817, %820 : vector<8x512xf32>
    %822 = arith.index_cast %816 : i32 to index
    %c0_324 = arith.constant 0 : index
    %c0_325 = arith.constant 0 : index
    %823 = vector.load %arg11[%822, %c0_324, %c0_325] : memref<8x8x512xf32, #tpu.memory_space<vmem>>, vector<1x8x512xf32>
    %824 = vector.shape_cast %823 : vector<1x8x512xf32> to vector<8x512xf32>
    %825 = arith.addf %821, %824 : vector<8x512xf32>
    %826 = vector.extract_strided_slice %825 {offsets = [0, 0], sizes = [8, 384], strides = [1, 1]} : vector<8x512xf32> to vector<8x384xf32>
    %827 = arith.negf %826 : vector<8x384xf32>
    %828 = math.exp %827 : vector<8x384xf32>
    %cst_326 = arith.constant 1.000000e+00 : f32
    %829 = vector.broadcast %cst_326 : f32 to vector<8x384xf32>
    %830 = arith.addf %829, %828 : vector<8x384xf32>
    %831 = arith.divf %829, %830 : vector<8x384xf32>
    %832 = vector.extract_strided_slice %825 {offsets = [0, 384], sizes = [8, 128], strides = [1, 1]} : vector<8x512xf32> to vector<8x128xf32>
    %833 = math.tanh %832 : vector<8x128xf32>
    %834 = vector.extract_strided_slice %831 {offsets = [0, 0], sizes = [8, 128], strides = [1, 1]} : vector<8x384xf32> to vector<8x128xf32>
    %835 = vector.extract_strided_slice %831 {offsets = [0, 128], sizes = [8, 128], strides = [1, 1]} : vector<8x384xf32> to vector<8x128xf32>
    %836 = vector.extract_strided_slice %831 {offsets = [0, 256], sizes = [8, 128], strides = [1, 1]} : vector<8x384xf32> to vector<8x128xf32>
    %837 = arith.mulf %835, %803 : vector<8x128xf32>
    %838 = arith.mulf %834, %833 : vector<8x128xf32>
    %839 = arith.addf %837, %838 : vector<8x128xf32>
    %840 = math.tanh %839 : vector<8x128xf32>
    %841 = arith.mulf %836, %840 : vector<8x128xf32>
    %842 = vector.extract_strided_slice %841 {offsets = [0, 0], sizes = [8, 64], strides = [1, 1]} : vector<8x128xf32> to vector<8x64xf32>
    %843 = arith.index_cast %c5_i32_319 : i32 to index
    %c0_327 = arith.constant 0 : index
    %c0_328 = arith.constant 0 : index
    %844 = vector.load %arg8[%843, %c0_327, %c0_328] : memref<8x8x128xf32, #tpu.memory_space<vmem>>, vector<1x8x64xf32>
    %845 = vector.shape_cast %844 : vector<1x8x64xf32> to vector<8x64xf32>
    %846 = vector.shape_cast %842 : vector<8x64xf32> to vector<1x8x64xf32>
    tpu.vector_store %arg8[%843, %c0_327, %c0_328], %846 {strides = array<i32>} : memref<8x8x128xf32, #tpu.memory_space<vmem>>, vector<1x8x64xf32>,
    %847 = vector.extract_strided_slice %841 {offsets = [0, 64], sizes = [8, 64], strides = [1, 1]} : vector<8x128xf32> to vector<8x64xf32>
    %848 = arith.index_cast %816 : i32 to index
    %c0_329 = arith.constant 0 : index
    %c64_330 = arith.constant 64 : index
    %849 = vector.load %arg8[%848, %c0_329, %c64_330] : memref<8x8x128xf32, #tpu.memory_space<vmem>>, vector<1x8x64xf32>
    %850 = vector.shape_cast %849 : vector<1x8x64xf32> to vector<8x64xf32>
    %851 = vector.shape_cast %847 : vector<8x64xf32> to vector<1x8x64xf32>
    tpu.vector_store %arg8[%848, %c0_329, %c64_330], %851 {strides = array<i32>} : memref<8x8x128xf32, #tpu.memory_space<vmem>>, vector<1x8x64xf32>,
    %c6_i32_331 = arith.constant 6 : i32
    %c7_i32_332 = arith.constant 7 : i32
    %852 = arith.subi %c7_i32_332, %c6_i32_331 : i32
    %cst_333 = arith.constant dense<0.000000e+00> : vector<8x512xf32>
    %853 = tpu.matmul %841, %633, %cst_333 {dimension_numbers = #tpu.dot_dimension_numbers<[1], [0], [0], [1], [0, 0, 1, 1], [], []>} : vector<8x128xf32>, vector<128x512xf32>, vector<8x512xf32> -> vector<8x512xf32>
    %854 = arith.index_cast %c6_i32_331 : i32 to index
    %c0_334 = arith.constant 0 : index
    %c0_335 = arith.constant 0 : index
    %855 = vector.load %arg10[%854, %c0_334, %c0_335] : memref<8x8x512xf32, #tpu.memory_space<vmem>>, vector<1x8x512xf32>
    %856 = vector.shape_cast %855 : vector<1x8x512xf32> to vector<8x512xf32>
    %857 = arith.addf %853, %856 : vector<8x512xf32>
    %858 = arith.index_cast %852 : i32 to index
    %c0_336 = arith.constant 0 : index
    %c0_337 = arith.constant 0 : index
    %859 = vector.load %arg11[%858, %c0_336, %c0_337] : memref<8x8x512xf32, #tpu.memory_space<vmem>>, vector<1x8x512xf32>
    %860 = vector.shape_cast %859 : vector<1x8x512xf32> to vector<8x512xf32>
    %861 = arith.addf %857, %860 : vector<8x512xf32>
    %862 = vector.extract_strided_slice %861 {offsets = [0, 0], sizes = [8, 384], strides = [1, 1]} : vector<8x512xf32> to vector<8x384xf32>
    %863 = arith.negf %862 : vector<8x384xf32>
    %864 = math.exp %863 : vector<8x384xf32>
    %cst_338 = arith.constant 1.000000e+00 : f32
    %865 = vector.broadcast %cst_338 : f32 to vector<8x384xf32>
    %866 = arith.addf %865, %864 : vector<8x384xf32>
    %867 = arith.divf %865, %866 : vector<8x384xf32>
    %868 = vector.extract_strided_slice %861 {offsets = [0, 384], sizes = [8, 128], strides = [1, 1]} : vector<8x512xf32> to vector<8x128xf32>
    %869 = math.tanh %868 : vector<8x128xf32>
    %870 = vector.extract_strided_slice %867 {offsets = [0, 0], sizes = [8, 128], strides = [1, 1]} : vector<8x384xf32> to vector<8x128xf32>
    %871 = vector.extract_strided_slice %867 {offsets = [0, 128], sizes = [8, 128], strides = [1, 1]} : vector<8x384xf32> to vector<8x128xf32>
    %872 = vector.extract_strided_slice %867 {offsets = [0, 256], sizes = [8, 128], strides = [1, 1]} : vector<8x384xf32> to vector<8x128xf32>
    %873 = arith.mulf %871, %839 : vector<8x128xf32>
    %874 = arith.mulf %870, %869 : vector<8x128xf32>
    %875 = arith.addf %873, %874 : vector<8x128xf32>
    %876 = math.tanh %875 : vector<8x128xf32>
    %877 = arith.mulf %872, %876 : vector<8x128xf32>
    %878 = vector.extract_strided_slice %877 {offsets = [0, 0], sizes = [8, 64], strides = [1, 1]} : vector<8x128xf32> to vector<8x64xf32>
    %879 = arith.index_cast %c6_i32_331 : i32 to index
    %c0_339 = arith.constant 0 : index
    %c0_340 = arith.constant 0 : index
    %880 = vector.load %arg8[%879, %c0_339, %c0_340] : memref<8x8x128xf32, #tpu.memory_space<vmem>>, vector<1x8x64xf32>
    %881 = vector.shape_cast %880 : vector<1x8x64xf32> to vector<8x64xf32>
    %882 = vector.shape_cast %878 : vector<8x64xf32> to vector<1x8x64xf32>
    tpu.vector_store %arg8[%879, %c0_339, %c0_340], %882 {strides = array<i32>} : memref<8x8x128xf32, #tpu.memory_space<vmem>>, vector<1x8x64xf32>,
    %883 = vector.extract_strided_slice %877 {offsets = [0, 64], sizes = [8, 64], strides = [1, 1]} : vector<8x128xf32> to vector<8x64xf32>
    %884 = arith.index_cast %852 : i32 to index
    %c0_341 = arith.constant 0 : index
    %c64_342 = arith.constant 64 : index
    %885 = vector.load %arg8[%884, %c0_341, %c64_342] : memref<8x8x128xf32, #tpu.memory_space<vmem>>, vector<1x8x64xf32>
    %886 = vector.shape_cast %885 : vector<1x8x64xf32> to vector<8x64xf32>
    %887 = vector.shape_cast %883 : vector<8x64xf32> to vector<1x8x64xf32>
    tpu.vector_store %arg8[%884, %c0_341, %c64_342], %887 {strides = array<i32>} : memref<8x8x128xf32, #tpu.memory_space<vmem>>, vector<1x8x64xf32>,
    %c7_i32_343 = arith.constant 7 : i32
    %c7_i32_344 = arith.constant 7 : i32
    %888 = arith.subi %c7_i32_344, %c7_i32_343 : i32
    %cst_345 = arith.constant dense<0.000000e+00> : vector<8x512xf32>
    %889 = tpu.matmul %877, %633, %cst_345 {dimension_numbers = #tpu.dot_dimension_numbers<[1], [0], [0], [1], [0, 0, 1, 1], [], []>} : vector<8x128xf32>, vector<128x512xf32>, vector<8x512xf32> -> vector<8x512xf32>
    %890 = arith.index_cast %c7_i32_343 : i32 to index
    %c0_346 = arith.constant 0 : index
    %c0_347 = arith.constant 0 : index
    %891 = vector.load %arg10[%890, %c0_346, %c0_347] : memref<8x8x512xf32, #tpu.memory_space<vmem>>, vector<1x8x512xf32>
    %892 = vector.shape_cast %891 : vector<1x8x512xf32> to vector<8x512xf32>
    %893 = arith.addf %889, %892 : vector<8x512xf32>
    %894 = arith.index_cast %888 : i32 to index
    %c0_348 = arith.constant 0 : index
    %c0_349 = arith.constant 0 : index
    %895 = vector.load %arg11[%894, %c0_348, %c0_349] : memref<8x8x512xf32, #tpu.memory_space<vmem>>, vector<1x8x512xf32>
    %896 = vector.shape_cast %895 : vector<1x8x512xf32> to vector<8x512xf32>
    %897 = arith.addf %893, %896 : vector<8x512xf32>
    %898 = vector.extract_strided_slice %897 {offsets = [0, 0], sizes = [8, 384], strides = [1, 1]} : vector<8x512xf32> to vector<8x384xf32>
    %899 = arith.negf %898 : vector<8x384xf32>
    %900 = math.exp %899 : vector<8x384xf32>
    %cst_350 = arith.constant 1.000000e+00 : f32
    %901 = vector.broadcast %cst_350 : f32 to vector<8x384xf32>
    %902 = arith.addf %901, %900 : vector<8x384xf32>
    %903 = arith.divf %901, %902 : vector<8x384xf32>
    %904 = vector.extract_strided_slice %897 {offsets = [0, 384], sizes = [8, 128], strides = [1, 1]} : vector<8x512xf32> to vector<8x128xf32>
    %905 = math.tanh %904 : vector<8x128xf32>
    %906 = vector.extract_strided_slice %903 {offsets = [0, 0], sizes = [8, 128], strides = [1, 1]} : vector<8x384xf32> to vector<8x128xf32>
    %907 = vector.extract_strided_slice %903 {offsets = [0, 128], sizes = [8, 128], strides = [1, 1]} : vector<8x384xf32> to vector<8x128xf32>
    %908 = vector.extract_strided_slice %903 {offsets = [0, 256], sizes = [8, 128], strides = [1, 1]} : vector<8x384xf32> to vector<8x128xf32>
    %909 = arith.mulf %907, %875 : vector<8x128xf32>
    %910 = arith.mulf %906, %905 : vector<8x128xf32>
    %911 = arith.addf %909, %910 : vector<8x128xf32>
    %912 = math.tanh %911 : vector<8x128xf32>
    %913 = arith.mulf %908, %912 : vector<8x128xf32>
    %914 = vector.extract_strided_slice %913 {offsets = [0, 0], sizes = [8, 64], strides = [1, 1]} : vector<8x128xf32> to vector<8x64xf32>
    %915 = arith.index_cast %c7_i32_343 : i32 to index
    %c0_351 = arith.constant 0 : index
    %c0_352 = arith.constant 0 : index
    %916 = vector.load %arg8[%915, %c0_351, %c0_352] : memref<8x8x128xf32, #tpu.memory_space<vmem>>, vector<1x8x64xf32>
    %917 = vector.shape_cast %916 : vector<1x8x64xf32> to vector<8x64xf32>
    %918 = vector.shape_cast %914 : vector<8x64xf32> to vector<1x8x64xf32>
    tpu.vector_store %arg8[%915, %c0_351, %c0_352], %918 {strides = array<i32>} : memref<8x8x128xf32, #tpu.memory_space<vmem>>, vector<1x8x64xf32>,
    %919 = vector.extract_strided_slice %913 {offsets = [0, 64], sizes = [8, 64], strides = [1, 1]} : vector<8x128xf32> to vector<8x64xf32>
    %920 = arith.index_cast %888 : i32 to index
    %c0_353 = arith.constant 0 : index
    %c64_354 = arith.constant 64 : index
    %921 = vector.load %arg8[%920, %c0_353, %c64_354] : memref<8x8x128xf32, #tpu.memory_space<vmem>>, vector<1x8x64xf32>
    %922 = vector.shape_cast %921 : vector<1x8x64xf32> to vector<8x64xf32>
    %923 = vector.shape_cast %919 : vector<8x64xf32> to vector<1x8x64xf32>
    tpu.vector_store %arg8[%920, %c0_353, %c64_354], %923 {strides = array<i32>} : memref<8x8x128xf32, #tpu.memory_space<vmem>>, vector<1x8x64xf32>,
    %c8_i32_355 = arith.constant 8 : i32
    %c0_356 = arith.constant 0 : index
    %c0_357 = arith.constant 0 : index
    %c0_358 = arith.constant 0 : index
    %924 = vector.load %arg8[%c0_356, %c0_357, %c0_358] : memref<8x8x128xf32, #tpu.memory_space<vmem>>, vector<8x8x128xf32>
    %925 = vector.shape_cast %924 : vector<8x8x128xf32> to vector<64x128xf32>
    %c2_359 = arith.constant 2 : index
    %c0_360 = arith.constant 0 : index
    %c0_361 = arith.constant 0 : index
    %c0_362 = arith.constant 0 : index
    %926 = vector.load %arg2[%c2_359, %c0_360, %c0_361, %c0_362] : memref<3x2x128x512xf32, #tpu.memory_space<vmem>>, vector<1x1x128x512xf32>
    %927 = vector.shape_cast %926 : vector<1x1x128x512xf32> to vector<128x512xf32>
    %c2_363 = arith.constant 2 : index
    %c1_364 = arith.constant 1 : index
    %c0_365 = arith.constant 0 : index
    %c0_366 = arith.constant 0 : index
    %928 = vector.load %arg2[%c2_363, %c1_364, %c0_365, %c0_366] : memref<3x2x128x512xf32, #tpu.memory_space<vmem>>, vector<1x1x128x512xf32>
    %929 = vector.shape_cast %928 : vector<1x1x128x512xf32> to vector<128x512xf32>
    %cst_367 = arith.constant dense<0.000000e+00> : vector<64x512xf32>
    %930 = tpu.matmul %925, %927, %cst_367 {dimension_numbers = #tpu.dot_dimension_numbers<[1], [0], [0], [1], [0, 0, 1, 1], [], []>} : vector<64x128xf32>, vector<128x512xf32>, vector<64x512xf32> -> vector<64x512xf32>
    %c3 = arith.constant 3 : index
    %c0_368 = arith.constant 0 : index
    %c0_369 = arith.constant 0 : index
    %931 = vector.load %arg4[%c3, %c0_368, %c0_369] : memref<4x1x512xf32, #tpu.memory_space<vmem>>, vector<1x1x512xf32>
    %932 = vector.shape_cast %931 : vector<1x1x512xf32> to vector<1x512xf32>
    %933 = vector.broadcast %932 : vector<1x512xf32> to vector<64x512xf32>
    %934 = arith.addf %930, %933 : vector<64x512xf32>
    %935 = vector.shape_cast %934 : vector<64x512xf32> to vector<8x8x512xf32>
    %c0_370 = arith.constant 0 : index
    %c0_371 = arith.constant 0 : index
    %c0_372 = arith.constant 0 : index
    %936 = vector.load %arg10[%c0_370, %c0_371, %c0_372] : memref<8x8x512xf32, #tpu.memory_space<vmem>>, vector<8x8x512xf32>
    tpu.vector_store %arg10[%c0_370, %c0_371, %c0_372], %935 {strides = array<i32>} : memref<8x8x512xf32, #tpu.memory_space<vmem>>, vector<8x8x512xf32>,
    %cst_373 = arith.constant dense<0.000000e+00> : vector<64x512xf32>
    %937 = tpu.matmul %925, %929, %cst_373 {dimension_numbers = #tpu.dot_dimension_numbers<[1], [0], [0], [1], [0, 0, 1, 1], [], []>} : vector<64x128xf32>, vector<128x512xf32>, vector<64x512xf32> -> vector<64x512xf32>
    %938 = vector.shape_cast %937 : vector<64x512xf32> to vector<8x8x512xf32>
    %c0_374 = arith.constant 0 : index
    %c0_375 = arith.constant 0 : index
    %c0_376 = arith.constant 0 : index
    %939 = vector.load %arg11[%c0_374, %c0_375, %c0_376] : memref<8x8x512xf32, #tpu.memory_space<vmem>>, vector<8x8x512xf32>
    tpu.vector_store %arg11[%c0_374, %c0_375, %c0_376], %938 {strides = array<i32>} : memref<8x8x512xf32, #tpu.memory_space<vmem>>, vector<8x8x512xf32>,
    %c3_377 = arith.constant 3 : index
    %c0_378 = arith.constant 0 : index
    %c0_379 = arith.constant 0 : index
    %940 = vector.load %arg3[%c3_377, %c0_378, %c0_379] : memref<4x128x512xf32, #tpu.memory_space<vmem>>, vector<1x128x512xf32>
    %941 = vector.shape_cast %940 : vector<1x128x512xf32> to vector<128x512xf32>
    %cst_380 = arith.constant 0.000000e+00 : f32
    %942 = vector.broadcast %cst_380 : f32 to vector<8x128xf32>
    %cst_381 = arith.constant 0.000000e+00 : f32
    %943 = vector.broadcast %cst_381 : f32 to vector<8x128xf32>
    %c0_i32_382 = arith.constant 0 : i32
    %c7_i32_383 = arith.constant 7 : i32
    %944 = arith.subi %c7_i32_383, %c0_i32_382 : i32
    %cst_384 = arith.constant dense<0.000000e+00> : vector<8x512xf32>
    %945 = tpu.matmul %942, %941, %cst_384 {dimension_numbers = #tpu.dot_dimension_numbers<[1], [0], [0], [1], [0, 0, 1, 1], [], []>} : vector<8x128xf32>, vector<128x512xf32>, vector<8x512xf32> -> vector<8x512xf32>
    %946 = arith.index_cast %c0_i32_382 : i32 to index
    %c0_385 = arith.constant 0 : index
    %c0_386 = arith.constant 0 : index
    %947 = vector.load %arg10[%946, %c0_385, %c0_386] : memref<8x8x512xf32, #tpu.memory_space<vmem>>, vector<1x8x512xf32>
    %948 = vector.shape_cast %947 : vector<1x8x512xf32> to vector<8x512xf32>
    %949 = arith.addf %945, %948 : vector<8x512xf32>
    %950 = arith.index_cast %944 : i32 to index
    %c0_387 = arith.constant 0 : index
    %c0_388 = arith.constant 0 : index
    %951 = vector.load %arg11[%950, %c0_387, %c0_388] : memref<8x8x512xf32, #tpu.memory_space<vmem>>, vector<1x8x512xf32>
    %952 = vector.shape_cast %951 : vector<1x8x512xf32> to vector<8x512xf32>
    %953 = arith.addf %949, %952 : vector<8x512xf32>
    %954 = vector.extract_strided_slice %953 {offsets = [0, 0], sizes = [8, 384], strides = [1, 1]} : vector<8x512xf32> to vector<8x384xf32>
    %955 = arith.negf %954 : vector<8x384xf32>
    %956 = math.exp %955 : vector<8x384xf32>
    %cst_389 = arith.constant 1.000000e+00 : f32
    %957 = vector.broadcast %cst_389 : f32 to vector<8x384xf32>
    %958 = arith.addf %957, %956 : vector<8x384xf32>
    %959 = arith.divf %957, %958 : vector<8x384xf32>
    %960 = vector.extract_strided_slice %953 {offsets = [0, 384], sizes = [8, 128], strides = [1, 1]} : vector<8x512xf32> to vector<8x128xf32>
    %961 = math.tanh %960 : vector<8x128xf32>
    %962 = vector.extract_strided_slice %959 {offsets = [0, 0], sizes = [8, 128], strides = [1, 1]} : vector<8x384xf32> to vector<8x128xf32>
    %963 = vector.extract_strided_slice %959 {offsets = [0, 128], sizes = [8, 128], strides = [1, 1]} : vector<8x384xf32> to vector<8x128xf32>
    %964 = vector.extract_strided_slice %959 {offsets = [0, 256], sizes = [8, 128], strides = [1, 1]} : vector<8x384xf32> to vector<8x128xf32>
    %965 = arith.mulf %963, %943 : vector<8x128xf32>
    %966 = arith.mulf %962, %961 : vector<8x128xf32>
    %967 = arith.addf %965, %966 : vector<8x128xf32>
    %968 = math.tanh %967 : vector<8x128xf32>
    %969 = arith.mulf %964, %968 : vector<8x128xf32>
    %970 = vector.extract_strided_slice %969 {offsets = [0, 0], sizes = [8, 64], strides = [1, 1]} : vector<8x128xf32> to vector<8x64xf32>
    %971 = arith.index_cast %c0_i32_382 : i32 to index
    %c0_390 = arith.constant 0 : index
    %c0_391 = arith.constant 0 : index
    %972 = vector.load %arg9[%971, %c0_390, %c0_391] : memref<8x8x128xf32, #tpu.memory_space<vmem>>, vector<1x8x64xf32>
    %973 = vector.shape_cast %972 : vector<1x8x64xf32> to vector<8x64xf32>
    %974 = vector.shape_cast %970 : vector<8x64xf32> to vector<1x8x64xf32>
    tpu.vector_store %arg9[%971, %c0_390, %c0_391], %974 {strides = array<i32>} : memref<8x8x128xf32, #tpu.memory_space<vmem>>, vector<1x8x64xf32>,
    %975 = vector.extract_strided_slice %969 {offsets = [0, 64], sizes = [8, 64], strides = [1, 1]} : vector<8x128xf32> to vector<8x64xf32>
    %976 = arith.index_cast %944 : i32 to index
    %c0_392 = arith.constant 0 : index
    %c64_393 = arith.constant 64 : index
    %977 = vector.load %arg9[%976, %c0_392, %c64_393] : memref<8x8x128xf32, #tpu.memory_space<vmem>>, vector<1x8x64xf32>
    %978 = vector.shape_cast %977 : vector<1x8x64xf32> to vector<8x64xf32>
    %979 = vector.shape_cast %975 : vector<8x64xf32> to vector<1x8x64xf32>
    tpu.vector_store %arg9[%976, %c0_392, %c64_393], %979 {strides = array<i32>} : memref<8x8x128xf32, #tpu.memory_space<vmem>>, vector<1x8x64xf32>,
    %c1_i32_394 = arith.constant 1 : i32
    %c7_i32_395 = arith.constant 7 : i32
    %980 = arith.subi %c7_i32_395, %c1_i32_394 : i32
    %cst_396 = arith.constant dense<0.000000e+00> : vector<8x512xf32>
    %981 = tpu.matmul %969, %941, %cst_396 {dimension_numbers = #tpu.dot_dimension_numbers<[1], [0], [0], [1], [0, 0, 1, 1], [], []>} : vector<8x128xf32>, vector<128x512xf32>, vector<8x512xf32> -> vector<8x512xf32>
    %982 = arith.index_cast %c1_i32_394 : i32 to index
    %c0_397 = arith.constant 0 : index
    %c0_398 = arith.constant 0 : index
    %983 = vector.load %arg10[%982, %c0_397, %c0_398] : memref<8x8x512xf32, #tpu.memory_space<vmem>>, vector<1x8x512xf32>
    %984 = vector.shape_cast %983 : vector<1x8x512xf32> to vector<8x512xf32>
    %985 = arith.addf %981, %984 : vector<8x512xf32>
    %986 = arith.index_cast %980 : i32 to index
    %c0_399 = arith.constant 0 : index
    %c0_400 = arith.constant 0 : index
    %987 = vector.load %arg11[%986, %c0_399, %c0_400] : memref<8x8x512xf32, #tpu.memory_space<vmem>>, vector<1x8x512xf32>
    %988 = vector.shape_cast %987 : vector<1x8x512xf32> to vector<8x512xf32>
    %989 = arith.addf %985, %988 : vector<8x512xf32>
    %990 = vector.extract_strided_slice %989 {offsets = [0, 0], sizes = [8, 384], strides = [1, 1]} : vector<8x512xf32> to vector<8x384xf32>
    %991 = arith.negf %990 : vector<8x384xf32>
    %992 = math.exp %991 : vector<8x384xf32>
    %cst_401 = arith.constant 1.000000e+00 : f32
    %993 = vector.broadcast %cst_401 : f32 to vector<8x384xf32>
    %994 = arith.addf %993, %992 : vector<8x384xf32>
    %995 = arith.divf %993, %994 : vector<8x384xf32>
    %996 = vector.extract_strided_slice %989 {offsets = [0, 384], sizes = [8, 128], strides = [1, 1]} : vector<8x512xf32> to vector<8x128xf32>
    %997 = math.tanh %996 : vector<8x128xf32>
    %998 = vector.extract_strided_slice %995 {offsets = [0, 0], sizes = [8, 128], strides = [1, 1]} : vector<8x384xf32> to vector<8x128xf32>
    %999 = vector.extract_strided_slice %995 {offsets = [0, 128], sizes = [8, 128], strides = [1, 1]} : vector<8x384xf32> to vector<8x128xf32>
    %1000 = vector.extract_strided_slice %995 {offsets = [0, 256], sizes = [8, 128], strides = [1, 1]} : vector<8x384xf32> to vector<8x128xf32>
    %1001 = arith.mulf %999, %967 : vector<8x128xf32>
    %1002 = arith.mulf %998, %997 : vector<8x128xf32>
    %1003 = arith.addf %1001, %1002 : vector<8x128xf32>
    %1004 = math.tanh %1003 : vector<8x128xf32>
    %1005 = arith.mulf %1000, %1004 : vector<8x128xf32>
    %1006 = vector.extract_strided_slice %1005 {offsets = [0, 0], sizes = [8, 64], strides = [1, 1]} : vector<8x128xf32> to vector<8x64xf32>
    %1007 = arith.index_cast %c1_i32_394 : i32 to index
    %c0_402 = arith.constant 0 : index
    %c0_403 = arith.constant 0 : index
    %1008 = vector.load %arg9[%1007, %c0_402, %c0_403] : memref<8x8x128xf32, #tpu.memory_space<vmem>>, vector<1x8x64xf32>
    %1009 = vector.shape_cast %1008 : vector<1x8x64xf32> to vector<8x64xf32>
    %1010 = vector.shape_cast %1006 : vector<8x64xf32> to vector<1x8x64xf32>
    tpu.vector_store %arg9[%1007, %c0_402, %c0_403], %1010 {strides = array<i32>} : memref<8x8x128xf32, #tpu.memory_space<vmem>>, vector<1x8x64xf32>,
    %1011 = vector.extract_strided_slice %1005 {offsets = [0, 64], sizes = [8, 64], strides = [1, 1]} : vector<8x128xf32> to vector<8x64xf32>
    %1012 = arith.index_cast %980 : i32 to index
    %c0_404 = arith.constant 0 : index
    %c64_405 = arith.constant 64 : index
    %1013 = vector.load %arg9[%1012, %c0_404, %c64_405] : memref<8x8x128xf32, #tpu.memory_space<vmem>>, vector<1x8x64xf32>
    %1014 = vector.shape_cast %1013 : vector<1x8x64xf32> to vector<8x64xf32>
    %1015 = vector.shape_cast %1011 : vector<8x64xf32> to vector<1x8x64xf32>
    tpu.vector_store %arg9[%1012, %c0_404, %c64_405], %1015 {strides = array<i32>} : memref<8x8x128xf32, #tpu.memory_space<vmem>>, vector<1x8x64xf32>,
    %c2_i32_406 = arith.constant 2 : i32
    %c7_i32_407 = arith.constant 7 : i32
    %1016 = arith.subi %c7_i32_407, %c2_i32_406 : i32
    %cst_408 = arith.constant dense<0.000000e+00> : vector<8x512xf32>
    %1017 = tpu.matmul %1005, %941, %cst_408 {dimension_numbers = #tpu.dot_dimension_numbers<[1], [0], [0], [1], [0, 0, 1, 1], [], []>} : vector<8x128xf32>, vector<128x512xf32>, vector<8x512xf32> -> vector<8x512xf32>
    %1018 = arith.index_cast %c2_i32_406 : i32 to index
    %c0_409 = arith.constant 0 : index
    %c0_410 = arith.constant 0 : index
    %1019 = vector.load %arg10[%1018, %c0_409, %c0_410] : memref<8x8x512xf32, #tpu.memory_space<vmem>>, vector<1x8x512xf32>
    %1020 = vector.shape_cast %1019 : vector<1x8x512xf32> to vector<8x512xf32>
    %1021 = arith.addf %1017, %1020 : vector<8x512xf32>
    %1022 = arith.index_cast %1016 : i32 to index
    %c0_411 = arith.constant 0 : index
    %c0_412 = arith.constant 0 : index
    %1023 = vector.load %arg11[%1022, %c0_411, %c0_412] : memref<8x8x512xf32, #tpu.memory_space<vmem>>, vector<1x8x512xf32>
    %1024 = vector.shape_cast %1023 : vector<1x8x512xf32> to vector<8x512xf32>
    %1025 = arith.addf %1021, %1024 : vector<8x512xf32>
    %1026 = vector.extract_strided_slice %1025 {offsets = [0, 0], sizes = [8, 384], strides = [1, 1]} : vector<8x512xf32> to vector<8x384xf32>
    %1027 = arith.negf %1026 : vector<8x384xf32>
    %1028 = math.exp %1027 : vector<8x384xf32>
    %cst_413 = arith.constant 1.000000e+00 : f32
    %1029 = vector.broadcast %cst_413 : f32 to vector<8x384xf32>
    %1030 = arith.addf %1029, %1028 : vector<8x384xf32>
    %1031 = arith.divf %1029, %1030 : vector<8x384xf32>
    %1032 = vector.extract_strided_slice %1025 {offsets = [0, 384], sizes = [8, 128], strides = [1, 1]} : vector<8x512xf32> to vector<8x128xf32>
    %1033 = math.tanh %1032 : vector<8x128xf32>
    %1034 = vector.extract_strided_slice %1031 {offsets = [0, 0], sizes = [8, 128], strides = [1, 1]} : vector<8x384xf32> to vector<8x128xf32>
    %1035 = vector.extract_strided_slice %1031 {offsets = [0, 128], sizes = [8, 128], strides = [1, 1]} : vector<8x384xf32> to vector<8x128xf32>
    %1036 = vector.extract_strided_slice %1031 {offsets = [0, 256], sizes = [8, 128], strides = [1, 1]} : vector<8x384xf32> to vector<8x128xf32>
    %1037 = arith.mulf %1035, %1003 : vector<8x128xf32>
    %1038 = arith.mulf %1034, %1033 : vector<8x128xf32>
    %1039 = arith.addf %1037, %1038 : vector<8x128xf32>
    %1040 = math.tanh %1039 : vector<8x128xf32>
    %1041 = arith.mulf %1036, %1040 : vector<8x128xf32>
    %1042 = vector.extract_strided_slice %1041 {offsets = [0, 0], sizes = [8, 64], strides = [1, 1]} : vector<8x128xf32> to vector<8x64xf32>
    %1043 = arith.index_cast %c2_i32_406 : i32 to index
    %c0_414 = arith.constant 0 : index
    %c0_415 = arith.constant 0 : index
    %1044 = vector.load %arg9[%1043, %c0_414, %c0_415] : memref<8x8x128xf32, #tpu.memory_space<vmem>>, vector<1x8x64xf32>
    %1045 = vector.shape_cast %1044 : vector<1x8x64xf32> to vector<8x64xf32>
    %1046 = vector.shape_cast %1042 : vector<8x64xf32> to vector<1x8x64xf32>
    tpu.vector_store %arg9[%1043, %c0_414, %c0_415], %1046 {strides = array<i32>} : memref<8x8x128xf32, #tpu.memory_space<vmem>>, vector<1x8x64xf32>,
    %1047 = vector.extract_strided_slice %1041 {offsets = [0, 64], sizes = [8, 64], strides = [1, 1]} : vector<8x128xf32> to vector<8x64xf32>
    %1048 = arith.index_cast %1016 : i32 to index
    %c0_416 = arith.constant 0 : index
    %c64_417 = arith.constant 64 : index
    %1049 = vector.load %arg9[%1048, %c0_416, %c64_417] : memref<8x8x128xf32, #tpu.memory_space<vmem>>, vector<1x8x64xf32>
    %1050 = vector.shape_cast %1049 : vector<1x8x64xf32> to vector<8x64xf32>
    %1051 = vector.shape_cast %1047 : vector<8x64xf32> to vector<1x8x64xf32>
    tpu.vector_store %arg9[%1048, %c0_416, %c64_417], %1051 {strides = array<i32>} : memref<8x8x128xf32, #tpu.memory_space<vmem>>, vector<1x8x64xf32>,
    %c3_i32_418 = arith.constant 3 : i32
    %c7_i32_419 = arith.constant 7 : i32
    %1052 = arith.subi %c7_i32_419, %c3_i32_418 : i32
    %cst_420 = arith.constant dense<0.000000e+00> : vector<8x512xf32>
    %1053 = tpu.matmul %1041, %941, %cst_420 {dimension_numbers = #tpu.dot_dimension_numbers<[1], [0], [0], [1], [0, 0, 1, 1], [], []>} : vector<8x128xf32>, vector<128x512xf32>, vector<8x512xf32> -> vector<8x512xf32>
    %1054 = arith.index_cast %c3_i32_418 : i32 to index
    %c0_421 = arith.constant 0 : index
    %c0_422 = arith.constant 0 : index
    %1055 = vector.load %arg10[%1054, %c0_421, %c0_422] : memref<8x8x512xf32, #tpu.memory_space<vmem>>, vector<1x8x512xf32>
    %1056 = vector.shape_cast %1055 : vector<1x8x512xf32> to vector<8x512xf32>
    %1057 = arith.addf %1053, %1056 : vector<8x512xf32>
    %1058 = arith.index_cast %1052 : i32 to index
    %c0_423 = arith.constant 0 : index
    %c0_424 = arith.constant 0 : index
    %1059 = vector.load %arg11[%1058, %c0_423, %c0_424] : memref<8x8x512xf32, #tpu.memory_space<vmem>>, vector<1x8x512xf32>
    %1060 = vector.shape_cast %1059 : vector<1x8x512xf32> to vector<8x512xf32>
    %1061 = arith.addf %1057, %1060 : vector<8x512xf32>
    %1062 = vector.extract_strided_slice %1061 {offsets = [0, 0], sizes = [8, 384], strides = [1, 1]} : vector<8x512xf32> to vector<8x384xf32>
    %1063 = arith.negf %1062 : vector<8x384xf32>
    %1064 = math.exp %1063 : vector<8x384xf32>
    %cst_425 = arith.constant 1.000000e+00 : f32
    %1065 = vector.broadcast %cst_425 : f32 to vector<8x384xf32>
    %1066 = arith.addf %1065, %1064 : vector<8x384xf32>
    %1067 = arith.divf %1065, %1066 : vector<8x384xf32>
    %1068 = vector.extract_strided_slice %1061 {offsets = [0, 384], sizes = [8, 128], strides = [1, 1]} : vector<8x512xf32> to vector<8x128xf32>
    %1069 = math.tanh %1068 : vector<8x128xf32>
    %1070 = vector.extract_strided_slice %1067 {offsets = [0, 0], sizes = [8, 128], strides = [1, 1]} : vector<8x384xf32> to vector<8x128xf32>
    %1071 = vector.extract_strided_slice %1067 {offsets = [0, 128], sizes = [8, 128], strides = [1, 1]} : vector<8x384xf32> to vector<8x128xf32>
    %1072 = vector.extract_strided_slice %1067 {offsets = [0, 256], sizes = [8, 128], strides = [1, 1]} : vector<8x384xf32> to vector<8x128xf32>
    %1073 = arith.mulf %1071, %1039 : vector<8x128xf32>
    %1074 = arith.mulf %1070, %1069 : vector<8x128xf32>
    %1075 = arith.addf %1073, %1074 : vector<8x128xf32>
    %1076 = math.tanh %1075 : vector<8x128xf32>
    %1077 = arith.mulf %1072, %1076 : vector<8x128xf32>
    %1078 = vector.extract_strided_slice %1077 {offsets = [0, 0], sizes = [8, 64], strides = [1, 1]} : vector<8x128xf32> to vector<8x64xf32>
    %1079 = arith.index_cast %c3_i32_418 : i32 to index
    %c0_426 = arith.constant 0 : index
    %c0_427 = arith.constant 0 : index
    %1080 = vector.load %arg9[%1079, %c0_426, %c0_427] : memref<8x8x128xf32, #tpu.memory_space<vmem>>, vector<1x8x64xf32>
    %1081 = vector.shape_cast %1080 : vector<1x8x64xf32> to vector<8x64xf32>
    %1082 = vector.shape_cast %1078 : vector<8x64xf32> to vector<1x8x64xf32>
    tpu.vector_store %arg9[%1079, %c0_426, %c0_427], %1082 {strides = array<i32>} : memref<8x8x128xf32, #tpu.memory_space<vmem>>, vector<1x8x64xf32>,
    %1083 = vector.extract_strided_slice %1077 {offsets = [0, 64], sizes = [8, 64], strides = [1, 1]} : vector<8x128xf32> to vector<8x64xf32>
    %1084 = arith.index_cast %1052 : i32 to index
    %c0_428 = arith.constant 0 : index
    %c64_429 = arith.constant 64 : index
    %1085 = vector.load %arg9[%1084, %c0_428, %c64_429] : memref<8x8x128xf32, #tpu.memory_space<vmem>>, vector<1x8x64xf32>
    %1086 = vector.shape_cast %1085 : vector<1x8x64xf32> to vector<8x64xf32>
    %1087 = vector.shape_cast %1083 : vector<8x64xf32> to vector<1x8x64xf32>
    tpu.vector_store %arg9[%1084, %c0_428, %c64_429], %1087 {strides = array<i32>} : memref<8x8x128xf32, #tpu.memory_space<vmem>>, vector<1x8x64xf32>,
    %c4_i32_430 = arith.constant 4 : i32
    %c7_i32_431 = arith.constant 7 : i32
    %1088 = arith.subi %c7_i32_431, %c4_i32_430 : i32
    %cst_432 = arith.constant dense<0.000000e+00> : vector<8x512xf32>
    %1089 = tpu.matmul %1077, %941, %cst_432 {dimension_numbers = #tpu.dot_dimension_numbers<[1], [0], [0], [1], [0, 0, 1, 1], [], []>} : vector<8x128xf32>, vector<128x512xf32>, vector<8x512xf32> -> vector<8x512xf32>
    %1090 = arith.index_cast %c4_i32_430 : i32 to index
    %c0_433 = arith.constant 0 : index
    %c0_434 = arith.constant 0 : index
    %1091 = vector.load %arg10[%1090, %c0_433, %c0_434] : memref<8x8x512xf32, #tpu.memory_space<vmem>>, vector<1x8x512xf32>
    %1092 = vector.shape_cast %1091 : vector<1x8x512xf32> to vector<8x512xf32>
    %1093 = arith.addf %1089, %1092 : vector<8x512xf32>
    %1094 = arith.index_cast %1088 : i32 to index
    %c0_435 = arith.constant 0 : index
    %c0_436 = arith.constant 0 : index
    %1095 = vector.load %arg11[%1094, %c0_435, %c0_436] : memref<8x8x512xf32, #tpu.memory_space<vmem>>, vector<1x8x512xf32>
    %1096 = vector.shape_cast %1095 : vector<1x8x512xf32> to vector<8x512xf32>
    %1097 = arith.addf %1093, %1096 : vector<8x512xf32>
    %1098 = vector.extract_strided_slice %1097 {offsets = [0, 0], sizes = [8, 384], strides = [1, 1]} : vector<8x512xf32> to vector<8x384xf32>
    %1099 = arith.negf %1098 : vector<8x384xf32>
    %1100 = math.exp %1099 : vector<8x384xf32>
    %cst_437 = arith.constant 1.000000e+00 : f32
    %1101 = vector.broadcast %cst_437 : f32 to vector<8x384xf32>
    %1102 = arith.addf %1101, %1100 : vector<8x384xf32>
    %1103 = arith.divf %1101, %1102 : vector<8x384xf32>
    %1104 = vector.extract_strided_slice %1097 {offsets = [0, 384], sizes = [8, 128], strides = [1, 1]} : vector<8x512xf32> to vector<8x128xf32>
    %1105 = math.tanh %1104 : vector<8x128xf32>
    %1106 = vector.extract_strided_slice %1103 {offsets = [0, 0], sizes = [8, 128], strides = [1, 1]} : vector<8x384xf32> to vector<8x128xf32>
    %1107 = vector.extract_strided_slice %1103 {offsets = [0, 128], sizes = [8, 128], strides = [1, 1]} : vector<8x384xf32> to vector<8x128xf32>
    %1108 = vector.extract_strided_slice %1103 {offsets = [0, 256], sizes = [8, 128], strides = [1, 1]} : vector<8x384xf32> to vector<8x128xf32>
    %1109 = arith.mulf %1107, %1075 : vector<8x128xf32>
    %1110 = arith.mulf %1106, %1105 : vector<8x128xf32>
    %1111 = arith.addf %1109, %1110 : vector<8x128xf32>
    %1112 = math.tanh %1111 : vector<8x128xf32>
    %1113 = arith.mulf %1108, %1112 : vector<8x128xf32>
    %1114 = vector.extract_strided_slice %1113 {offsets = [0, 0], sizes = [8, 64], strides = [1, 1]} : vector<8x128xf32> to vector<8x64xf32>
    %1115 = arith.index_cast %c4_i32_430 : i32 to index
    %c0_438 = arith.constant 0 : index
    %c0_439 = arith.constant 0 : index
    %1116 = vector.load %arg9[%1115, %c0_438, %c0_439] : memref<8x8x128xf32, #tpu.memory_space<vmem>>, vector<1x8x64xf32>
    %1117 = vector.shape_cast %1116 : vector<1x8x64xf32> to vector<8x64xf32>
    %1118 = vector.shape_cast %1114 : vector<8x64xf32> to vector<1x8x64xf32>
    tpu.vector_store %arg9[%1115, %c0_438, %c0_439], %1118 {strides = array<i32>} : memref<8x8x128xf32, #tpu.memory_space<vmem>>, vector<1x8x64xf32>,
    %1119 = vector.extract_strided_slice %1113 {offsets = [0, 64], sizes = [8, 64], strides = [1, 1]} : vector<8x128xf32> to vector<8x64xf32>
    %1120 = arith.index_cast %1088 : i32 to index
    %c0_440 = arith.constant 0 : index
    %c64_441 = arith.constant 64 : index
    %1121 = vector.load %arg9[%1120, %c0_440, %c64_441] : memref<8x8x128xf32, #tpu.memory_space<vmem>>, vector<1x8x64xf32>
    %1122 = vector.shape_cast %1121 : vector<1x8x64xf32> to vector<8x64xf32>
    %1123 = vector.shape_cast %1119 : vector<8x64xf32> to vector<1x8x64xf32>
    tpu.vector_store %arg9[%1120, %c0_440, %c64_441], %1123 {strides = array<i32>} : memref<8x8x128xf32, #tpu.memory_space<vmem>>, vector<1x8x64xf32>,
    %c5_i32_442 = arith.constant 5 : i32
    %c7_i32_443 = arith.constant 7 : i32
    %1124 = arith.subi %c7_i32_443, %c5_i32_442 : i32
    %cst_444 = arith.constant dense<0.000000e+00> : vector<8x512xf32>
    %1125 = tpu.matmul %1113, %941, %cst_444 {dimension_numbers = #tpu.dot_dimension_numbers<[1], [0], [0], [1], [0, 0, 1, 1], [], []>} : vector<8x128xf32>, vector<128x512xf32>, vector<8x512xf32> -> vector<8x512xf32>
    %1126 = arith.index_cast %c5_i32_442 : i32 to index
    %c0_445 = arith.constant 0 : index
    %c0_446 = arith.constant 0 : index
    %1127 = vector.load %arg10[%1126, %c0_445, %c0_446] : memref<8x8x512xf32, #tpu.memory_space<vmem>>, vector<1x8x512xf32>
    %1128 = vector.shape_cast %1127 : vector<1x8x512xf32> to vector<8x512xf32>
    %1129 = arith.addf %1125, %1128 : vector<8x512xf32>
    %1130 = arith.index_cast %1124 : i32 to index
    %c0_447 = arith.constant 0 : index
    %c0_448 = arith.constant 0 : index
    %1131 = vector.load %arg11[%1130, %c0_447, %c0_448] : memref<8x8x512xf32, #tpu.memory_space<vmem>>, vector<1x8x512xf32>
    %1132 = vector.shape_cast %1131 : vector<1x8x512xf32> to vector<8x512xf32>
    %1133 = arith.addf %1129, %1132 : vector<8x512xf32>
    %1134 = vector.extract_strided_slice %1133 {offsets = [0, 0], sizes = [8, 384], strides = [1, 1]} : vector<8x512xf32> to vector<8x384xf32>
    %1135 = arith.negf %1134 : vector<8x384xf32>
    %1136 = math.exp %1135 : vector<8x384xf32>
    %cst_449 = arith.constant 1.000000e+00 : f32
    %1137 = vector.broadcast %cst_449 : f32 to vector<8x384xf32>
    %1138 = arith.addf %1137, %1136 : vector<8x384xf32>
    %1139 = arith.divf %1137, %1138 : vector<8x384xf32>
    %1140 = vector.extract_strided_slice %1133 {offsets = [0, 384], sizes = [8, 128], strides = [1, 1]} : vector<8x512xf32> to vector<8x128xf32>
    %1141 = math.tanh %1140 : vector<8x128xf32>
    %1142 = vector.extract_strided_slice %1139 {offsets = [0, 0], sizes = [8, 128], strides = [1, 1]} : vector<8x384xf32> to vector<8x128xf32>
    %1143 = vector.extract_strided_slice %1139 {offsets = [0, 128], sizes = [8, 128], strides = [1, 1]} : vector<8x384xf32> to vector<8x128xf32>
    %1144 = vector.extract_strided_slice %1139 {offsets = [0, 256], sizes = [8, 128], strides = [1, 1]} : vector<8x384xf32> to vector<8x128xf32>
    %1145 = arith.mulf %1143, %1111 : vector<8x128xf32>
    %1146 = arith.mulf %1142, %1141 : vector<8x128xf32>
    %1147 = arith.addf %1145, %1146 : vector<8x128xf32>
    %1148 = math.tanh %1147 : vector<8x128xf32>
    %1149 = arith.mulf %1144, %1148 : vector<8x128xf32>
    %1150 = vector.extract_strided_slice %1149 {offsets = [0, 0], sizes = [8, 64], strides = [1, 1]} : vector<8x128xf32> to vector<8x64xf32>
    %1151 = arith.index_cast %c5_i32_442 : i32 to index
    %c0_450 = arith.constant 0 : index
    %c0_451 = arith.constant 0 : index
    %1152 = vector.load %arg9[%1151, %c0_450, %c0_451] : memref<8x8x128xf32, #tpu.memory_space<vmem>>, vector<1x8x64xf32>
    %1153 = vector.shape_cast %1152 : vector<1x8x64xf32> to vector<8x64xf32>
    %1154 = vector.shape_cast %1150 : vector<8x64xf32> to vector<1x8x64xf32>
    tpu.vector_store %arg9[%1151, %c0_450, %c0_451], %1154 {strides = array<i32>} : memref<8x8x128xf32, #tpu.memory_space<vmem>>, vector<1x8x64xf32>,
    %1155 = vector.extract_strided_slice %1149 {offsets = [0, 64], sizes = [8, 64], strides = [1, 1]} : vector<8x128xf32> to vector<8x64xf32>
    %1156 = arith.index_cast %1124 : i32 to index
    %c0_452 = arith.constant 0 : index
    %c64_453 = arith.constant 64 : index
    %1157 = vector.load %arg9[%1156, %c0_452, %c64_453] : memref<8x8x128xf32, #tpu.memory_space<vmem>>, vector<1x8x64xf32>
    %1158 = vector.shape_cast %1157 : vector<1x8x64xf32> to vector<8x64xf32>
    %1159 = vector.shape_cast %1155 : vector<8x64xf32> to vector<1x8x64xf32>
    tpu.vector_store %arg9[%1156, %c0_452, %c64_453], %1159 {strides = array<i32>} : memref<8x8x128xf32, #tpu.memory_space<vmem>>, vector<1x8x64xf32>,
    %c6_i32_454 = arith.constant 6 : i32
    %c7_i32_455 = arith.constant 7 : i32
    %1160 = arith.subi %c7_i32_455, %c6_i32_454 : i32
    %cst_456 = arith.constant dense<0.000000e+00> : vector<8x512xf32>
    %1161 = tpu.matmul %1149, %941, %cst_456 {dimension_numbers = #tpu.dot_dimension_numbers<[1], [0], [0], [1], [0, 0, 1, 1], [], []>} : vector<8x128xf32>, vector<128x512xf32>, vector<8x512xf32> -> vector<8x512xf32>
    %1162 = arith.index_cast %c6_i32_454 : i32 to index
    %c0_457 = arith.constant 0 : index
    %c0_458 = arith.constant 0 : index
    %1163 = vector.load %arg10[%1162, %c0_457, %c0_458] : memref<8x8x512xf32, #tpu.memory_space<vmem>>, vector<1x8x512xf32>
    %1164 = vector.shape_cast %1163 : vector<1x8x512xf32> to vector<8x512xf32>
    %1165 = arith.addf %1161, %1164 : vector<8x512xf32>
    %1166 = arith.index_cast %1160 : i32 to index
    %c0_459 = arith.constant 0 : index
    %c0_460 = arith.constant 0 : index
    %1167 = vector.load %arg11[%1166, %c0_459, %c0_460] : memref<8x8x512xf32, #tpu.memory_space<vmem>>, vector<1x8x512xf32>
    %1168 = vector.shape_cast %1167 : vector<1x8x512xf32> to vector<8x512xf32>
    %1169 = arith.addf %1165, %1168 : vector<8x512xf32>
    %1170 = vector.extract_strided_slice %1169 {offsets = [0, 0], sizes = [8, 384], strides = [1, 1]} : vector<8x512xf32> to vector<8x384xf32>
    %1171 = arith.negf %1170 : vector<8x384xf32>
    %1172 = math.exp %1171 : vector<8x384xf32>
    %cst_461 = arith.constant 1.000000e+00 : f32
    %1173 = vector.broadcast %cst_461 : f32 to vector<8x384xf32>
    %1174 = arith.addf %1173, %1172 : vector<8x384xf32>
    %1175 = arith.divf %1173, %1174 : vector<8x384xf32>
    %1176 = vector.extract_strided_slice %1169 {offsets = [0, 384], sizes = [8, 128], strides = [1, 1]} : vector<8x512xf32> to vector<8x128xf32>
    %1177 = math.tanh %1176 : vector<8x128xf32>
    %1178 = vector.extract_strided_slice %1175 {offsets = [0, 0], sizes = [8, 128], strides = [1, 1]} : vector<8x384xf32> to vector<8x128xf32>
    %1179 = vector.extract_strided_slice %1175 {offsets = [0, 128], sizes = [8, 128], strides = [1, 1]} : vector<8x384xf32> to vector<8x128xf32>
    %1180 = vector.extract_strided_slice %1175 {offsets = [0, 256], sizes = [8, 128], strides = [1, 1]} : vector<8x384xf32> to vector<8x128xf32>
    %1181 = arith.mulf %1179, %1147 : vector<8x128xf32>
    %1182 = arith.mulf %1178, %1177 : vector<8x128xf32>
    %1183 = arith.addf %1181, %1182 : vector<8x128xf32>
    %1184 = math.tanh %1183 : vector<8x128xf32>
    %1185 = arith.mulf %1180, %1184 : vector<8x128xf32>
    %1186 = vector.extract_strided_slice %1185 {offsets = [0, 0], sizes = [8, 64], strides = [1, 1]} : vector<8x128xf32> to vector<8x64xf32>
    %1187 = arith.index_cast %c6_i32_454 : i32 to index
    %c0_462 = arith.constant 0 : index
    %c0_463 = arith.constant 0 : index
    %1188 = vector.load %arg9[%1187, %c0_462, %c0_463] : memref<8x8x128xf32, #tpu.memory_space<vmem>>, vector<1x8x64xf32>
    %1189 = vector.shape_cast %1188 : vector<1x8x64xf32> to vector<8x64xf32>
    %1190 = vector.shape_cast %1186 : vector<8x64xf32> to vector<1x8x64xf32>
    tpu.vector_store %arg9[%1187, %c0_462, %c0_463], %1190 {strides = array<i32>} : memref<8x8x128xf32, #tpu.memory_space<vmem>>, vector<1x8x64xf32>,
    %1191 = vector.extract_strided_slice %1185 {offsets = [0, 64], sizes = [8, 64], strides = [1, 1]} : vector<8x128xf32> to vector<8x64xf32>
    %1192 = arith.index_cast %1160 : i32 to index
    %c0_464 = arith.constant 0 : index
    %c64_465 = arith.constant 64 : index
    %1193 = vector.load %arg9[%1192, %c0_464, %c64_465] : memref<8x8x128xf32, #tpu.memory_space<vmem>>, vector<1x8x64xf32>
    %1194 = vector.shape_cast %1193 : vector<1x8x64xf32> to vector<8x64xf32>
    %1195 = vector.shape_cast %1191 : vector<8x64xf32> to vector<1x8x64xf32>
    tpu.vector_store %arg9[%1192, %c0_464, %c64_465], %1195 {strides = array<i32>} : memref<8x8x128xf32, #tpu.memory_space<vmem>>, vector<1x8x64xf32>,
    %c7_i32_466 = arith.constant 7 : i32
    %c7_i32_467 = arith.constant 7 : i32
    %1196 = arith.subi %c7_i32_467, %c7_i32_466 : i32
    %cst_468 = arith.constant dense<0.000000e+00> : vector<8x512xf32>
    %1197 = tpu.matmul %1185, %941, %cst_468 {dimension_numbers = #tpu.dot_dimension_numbers<[1], [0], [0], [1], [0, 0, 1, 1], [], []>} : vector<8x128xf32>, vector<128x512xf32>, vector<8x512xf32> -> vector<8x512xf32>
    %1198 = arith.index_cast %c7_i32_466 : i32 to index
    %c0_469 = arith.constant 0 : index
    %c0_470 = arith.constant 0 : index
    %1199 = vector.load %arg10[%1198, %c0_469, %c0_470] : memref<8x8x512xf32, #tpu.memory_space<vmem>>, vector<1x8x512xf32>
    %1200 = vector.shape_cast %1199 : vector<1x8x512xf32> to vector<8x512xf32>
    %1201 = arith.addf %1197, %1200 : vector<8x512xf32>
    %1202 = arith.index_cast %1196 : i32 to index
    %c0_471 = arith.constant 0 : index
    %c0_472 = arith.constant 0 : index
    %1203 = vector.load %arg11[%1202, %c0_471, %c0_472] : memref<8x8x512xf32, #tpu.memory_space<vmem>>, vector<1x8x512xf32>
    %1204 = vector.shape_cast %1203 : vector<1x8x512xf32> to vector<8x512xf32>
    %1205 = arith.addf %1201, %1204 : vector<8x512xf32>
    %1206 = vector.extract_strided_slice %1205 {offsets = [0, 0], sizes = [8, 384], strides = [1, 1]} : vector<8x512xf32> to vector<8x384xf32>
    %1207 = arith.negf %1206 : vector<8x384xf32>
    %1208 = math.exp %1207 : vector<8x384xf32>
    %cst_473 = arith.constant 1.000000e+00 : f32
    %1209 = vector.broadcast %cst_473 : f32 to vector<8x384xf32>
    %1210 = arith.addf %1209, %1208 : vector<8x384xf32>
    %1211 = arith.divf %1209, %1210 : vector<8x384xf32>
    %1212 = vector.extract_strided_slice %1205 {offsets = [0, 384], sizes = [8, 128], strides = [1, 1]} : vector<8x512xf32> to vector<8x128xf32>
    %1213 = math.tanh %1212 : vector<8x128xf32>
    %1214 = vector.extract_strided_slice %1211 {offsets = [0, 0], sizes = [8, 128], strides = [1, 1]} : vector<8x384xf32> to vector<8x128xf32>
    %1215 = vector.extract_strided_slice %1211 {offsets = [0, 128], sizes = [8, 128], strides = [1, 1]} : vector<8x384xf32> to vector<8x128xf32>
    %1216 = vector.extract_strided_slice %1211 {offsets = [0, 256], sizes = [8, 128], strides = [1, 1]} : vector<8x384xf32> to vector<8x128xf32>
    %1217 = arith.mulf %1215, %1183 : vector<8x128xf32>
    %1218 = arith.mulf %1214, %1213 : vector<8x128xf32>
    %1219 = arith.addf %1217, %1218 : vector<8x128xf32>
    %1220 = math.tanh %1219 : vector<8x128xf32>
    %1221 = arith.mulf %1216, %1220 : vector<8x128xf32>
    %1222 = vector.extract_strided_slice %1221 {offsets = [0, 0], sizes = [8, 64], strides = [1, 1]} : vector<8x128xf32> to vector<8x64xf32>
    %1223 = arith.index_cast %c7_i32_466 : i32 to index
    %c0_474 = arith.constant 0 : index
    %c0_475 = arith.constant 0 : index
    %1224 = vector.load %arg9[%1223, %c0_474, %c0_475] : memref<8x8x128xf32, #tpu.memory_space<vmem>>, vector<1x8x64xf32>
    %1225 = vector.shape_cast %1224 : vector<1x8x64xf32> to vector<8x64xf32>
    %1226 = vector.shape_cast %1222 : vector<8x64xf32> to vector<1x8x64xf32>
    tpu.vector_store %arg9[%1223, %c0_474, %c0_475], %1226 {strides = array<i32>} : memref<8x8x128xf32, #tpu.memory_space<vmem>>, vector<1x8x64xf32>,
    %1227 = vector.extract_strided_slice %1221 {offsets = [0, 64], sizes = [8, 64], strides = [1, 1]} : vector<8x128xf32> to vector<8x64xf32>
    %1228 = arith.index_cast %1196 : i32 to index
    %c0_476 = arith.constant 0 : index
    %c64_477 = arith.constant 64 : index
    %1229 = vector.load %arg9[%1228, %c0_476, %c64_477] : memref<8x8x128xf32, #tpu.memory_space<vmem>>, vector<1x8x64xf32>
    %1230 = vector.shape_cast %1229 : vector<1x8x64xf32> to vector<8x64xf32>
    %1231 = vector.shape_cast %1227 : vector<8x64xf32> to vector<1x8x64xf32>
    tpu.vector_store %arg9[%1228, %c0_476, %c64_477], %1231 {strides = array<i32>} : memref<8x8x128xf32, #tpu.memory_space<vmem>>, vector<1x8x64xf32>,
    %c8_i32_478 = arith.constant 8 : i32
    %c7 = arith.constant 7 : index
    %c0_479 = arith.constant 0 : index
    %c0_480 = arith.constant 0 : index
    %1232 = vector.load %arg9[%c7, %c0_479, %c0_480] : memref<8x8x128xf32, #tpu.memory_space<vmem>>, vector<1x8x128xf32>
    %1233 = vector.shape_cast %1232 : vector<1x8x128xf32> to vector<8x128xf32>
    %c0_481 = arith.constant 0 : index
    %c0_482 = arith.constant 0 : index
    %1234 = vector.load %arg5[%c0_481, %c0_482] : memref<128x5xf32, #tpu.memory_space<vmem>>, vector<128x5xf32>
    %cst_483 = arith.constant dense<0.000000e+00> : vector<8x5xf32>
    %1235 = tpu.matmul %1233, %1234, %cst_483 {dimension_numbers = #tpu.dot_dimension_numbers<[1], [0], [0], [1], [0, 0, 1, 1], [], []>} : vector<8x128xf32>, vector<128x5xf32>, vector<8x5xf32> -> vector<8x5xf32>
    %c0_484 = arith.constant 0 : index
    %c0_485 = arith.constant 0 : index
    %1236 = vector.load %arg6[%c0_484, %c0_485] : memref<1x5xf32, #tpu.memory_space<vmem>>, vector<1x5xf32>
    %1237 = vector.broadcast %1236 : vector<1x5xf32> to vector<8x5xf32>
    %1238 = arith.addf %1235, %1237 : vector<8x5xf32>
    %cst_486 = arith.constant dense<0xFF800000> : vector<8xf32>
    %1239 = vector.multi_reduction <maximumf>, %1238, %cst_486 [1] : vector<8x5xf32> to vector<8xf32>
    %1240 = vector.shape_cast %1239 : vector<8xf32> to vector<8x1xf32>
    %1241 = vector.broadcast %1240 : vector<8x1xf32> to vector<8x5xf32>
    %1242 = arith.subf %1238, %1241 : vector<8x5xf32>
    %1243 = math.exp %1242 : vector<8x5xf32>
    %cst_487 = arith.constant dense<0.000000e+00> : vector<8xf32>
    %1244 = vector.multi_reduction <add>, %1243, %cst_487 [1] : vector<8x5xf32> to vector<8xf32>
    %1245 = vector.shape_cast %1244 : vector<8xf32> to vector<8x1xf32>
    %1246 = math.log %1245 : vector<8x1xf32>
    %1247 = vector.broadcast %1246 : vector<8x1xf32> to vector<8x5xf32>
    %1248 = arith.subf %1242, %1247 : vector<8x5xf32>
    %c0_488 = arith.constant 0 : index
    %c0_489 = arith.constant 0 : index
    %1249 = vector.load %arg7[%c0_488, %c0_489] : memref<8x5xf32, #tpu.memory_space<vmem>>, vector<8x5xf32>
    tpu.vector_store %arg7[%c0_488, %c0_489], %1248 {strides = array<i32>} : memref<8x5xf32, #tpu.memory_space<vmem>>, vector<8x5xf32>,
    return
  }
}

</mosaic_0001>

<bundles_post_ra>
// kernel: tpu_custom_call.1
= control target key start
LH: loop header
LB: loop body
LE: loop exit
PB: predicated region body
PF: predicated region fallthrough
CT: control target
= control target key end

     0   :  { %12 = vsyncpa [#allocation7], 0  ;;  %s14958_s0 = inlined_call_operand.hbm [shape: f32[8,8,32], index: 0, kind: input, shape index: {}]   ;;  %s14959_s1 = inlined_call_operand.hbm [shape: f32[2,32,512], index: 1, kind: input, shape index: {}]   ;;  %s14960_s2 = inlined_call_operand.hbm [shape: f32[3,2,128,512], index: 2, kind: input, shape index: {}]   ;;  %s14961_s3 = inlined_call_operand.hbm [shape: f32[4,128,512], index: 3, kind: input, shape index: {}]   ;;  %s14962_s4 = inlined_call_operand.hbm [shape: f32[4,1,512], index: 4, kind: input, shape index: {}]   ;;  %s14963_s5 = inlined_call_operand.vmem [shape: f32[128,5], index: 5, kind: input, shape index: {}]   ;;  %s14964_s6 = inlined_call_operand.hbm [shape: f32[1,5], index: 6, kind: input, shape index: {}]   ;;  %s14965_s7 = inlined_call_operand.hbm [shape: f32[8,5], index: 7, kind: output, shape index: {}]  }
   0x1   :  { %13 = vsyncpa [#allocation10], 0 }
   0x2   :  { %14 = vsyncpa [#allocation13], 0 }
   0x3   :  { %15 = vsyncpa [#allocation16], 0 }
   0x4   :  { %16 = vsyncpa [#allocation8], 0  ;;  %s12669_s24 = smov [#allocation9]   ;;  %s12505_s28 = scalar_lea.hbm %s14959_s1, 4096 }
   0x5   :  { %s34_s25 = sshll.u32 %s12669_s24, 4  ;;  %p12506_p0 = scmp.ne.s32.totalorder %s14959_s1, %s12505_s28  ;;  %s35_s25 = int_to_ptr.vmem [resolvable:$true] %s34_s25 }
   0x6   :  { %p12509_p1 = scmp.lt.u32.totalorder %s12505_s28, %s14959_s1 }
   0x8   :  { %p12511_p2 = pnand %p12509_p1, %p12506_p0 }
   0xa   :  { %12514 = shalt.err (!%p12511_p2)
}
   0xb   :  { %s12515_s10 = scalar_lea.vmem %s35_s25, 4096  ;;  %p12520_p4 = scmp.lt.s32.totalorder %s35_s25, %s35_s25 }
   0xc   :  { %p12516_p3 = scmp.ne.s32.totalorder %s35_s25, %s12515_s10  ;;  %p12521_p5 = scmp.lt.s32.totalorder %s12515_s10, %s12515_s10 }
   0xe   :  { %p12522_p6 = por %p12521_p5, %p12520_p4 }
  0x10   :  { %p12523_p7 = pnand %p12522_p6, %p12516_p3 }
  0x12   :  { %12526 = shalt.err (!%p12523_p7)
}
  0x13   :  { %s12670_s11 = smov 512   ;;  %s12671_s12 = smov 32  }
  0x14   :  { %40 = dma.hbm_to_vmem [thread:$0]  %s14959_s1, 4096, %s35_s25, [#allocation10], %s12670_s11, %s12670_s11, %s12671_s12  }
  0x15   :  { %s12672_s15 = smov [#allocation12]   ;;  %s12673_s17 = smov [#allocation6]  }
  0x16   :  { %s58_s16 = sshll.u32 %s12672_s15, 4  ;;  %s22_s18 = sshll.u32 %s12673_s17, 4  ;;  %s59_s16 = int_to_ptr.vmem [resolvable:$true] %s58_s16  ;;  %s23_s18 = int_to_ptr.vmem [resolvable:$true] %s22_s18 }
  0x17   :  { %s12527_s21 = scalar_lea.hbm %s14961_s3, 32768 }
  0x18   :  { %p12528_p8 = scmp.ne.s32.totalorder %s14961_s3, %s12527_s21  ;;  %p12531_p9 = scmp.lt.u32.totalorder %s12527_s21, %s14961_s3 }
  0x1a   :  { %p12533_p10 = pnand %p12531_p9, %p12528_p8 }
  0x1c   :  { %12536 = shalt.err (!%p12533_p10)
}
  0x1d   :  { %s12537_s1 = scalar_lea.vmem %s59_s16, 32768  ;;  %p12542_p12 = scmp.lt.s32.totalorder %s59_s16, %s59_s16 }
  0x1e   :  { %p12538_p11 = scmp.ne.s32.totalorder %s59_s16, %s12537_s1  ;;  %p12543_p13 = scmp.lt.s32.totalorder %s12537_s1, %s12537_s1 }
  0x20   :  { %p12544_p0 = por %p12543_p13, %p12542_p12 }
  0x22   :  { %p12545_p1 = pnand %p12544_p0, %p12538_p11 }
  0x24   :  { %12548 = shalt.err (!%p12545_p1)
}
  0x25   :  { %64 = dma.hbm_to_vmem [thread:$0]  %s14961_s3, 32768, %s59_s16, [#allocation13], %s12670_s11, %s12670_s11, %s12671_s12  }
  0x26   :  { %s12549_s30 = scalar_lea.hbm %s14958_s0, 1024 }
  0x27   :  { %p12550_p2 = scmp.ne.s32.totalorder %s14958_s0, %s12549_s30  ;;  %p12553_p3 = scmp.lt.u32.totalorder %s12549_s30, %s14958_s0 }
  0x29   :  { %p12555_p4 = pnand %p12553_p3, %p12550_p2 }
  0x2b   :  { %12558 = shalt.err (!%p12555_p4)
}
  0x2c   :  { %s12559_s14 = scalar_lea.vmem %s23_s18, 1024  ;;  %p12564_p6 = scmp.lt.s32.totalorder %s23_s18, %s23_s18 }
  0x2d   :  { %p12560_p5 = scmp.ne.s32.totalorder %s23_s18, %s12559_s14  ;;  %p12565_p7 = scmp.lt.s32.totalorder %s12559_s14, %s12559_s14 }
  0x2f   :  { %p12566_p8 = por %p12565_p7, %p12564_p6 }
  0x31   :  { %p12567_p9 = pnand %p12566_p8, %p12560_p5 }
  0x33   :  { %12570 = shalt.err (!%p12567_p9)
}
  0x34   :  { %s12674_s3 = smov 128   ;;  %s12675_s15 = smov 8  }
  0x35   :  { %28 = dma.hbm_to_vmem [thread:$0]  %s14958_s0, 1024, %s23_s18, [#allocation7], %s12674_s3, %s12674_s3, %s12675_s15  }
  0x36   :  { %s12676_s19 = smov [#allocation11]   ;;  %s12677_s21 = smov [#allocation14]  }
  0x37   :  { %s46_s20 = sshll.u32 %s12676_s19, 4  ;;  %s70_s22 = sshll.u32 %s12677_s21, 4  ;;  %s47_s20 = int_to_ptr.vmem [resolvable:$true] %s46_s20  ;;  %s71_s22 = int_to_ptr.vmem [resolvable:$true] %s70_s22 }
  0x38   :  { %s12571_s26 = scalar_lea.hbm %s14960_s2, 49152 }
  0x39   :  { %p12572_p10 = scmp.ne.s32.totalorder %s14960_s2, %s12571_s26  ;;  %p12575_p11 = scmp.lt.u32.totalorder %s12571_s26, %s14960_s2 }
  0x3b   :  { %p12577_p12 = pnand %p12575_p11, %p12572_p10 }
  0x3d   :  { %12580 = shalt.err (!%p12577_p12)
}
  0x3e   :  { %s12581_s0 = scalar_lea.vmem %s47_s20, 49152  ;;  %p12586_p0 = scmp.lt.s32.totalorder %s47_s20, %s47_s20 }
  0x3f   :  { %p12582_p13 = scmp.ne.s32.totalorder %s47_s20, %s12581_s0  ;;  %p12587_p1 = scmp.lt.s32.totalorder %s12581_s0, %s12581_s0 }
  0x41   :  { %p12588_p2 = por %p12587_p1, %p12586_p0 }
  0x43   :  { %p12589_p3 = pnand %p12588_p2, %p12582_p13 }
  0x45   :  { %12592 = shalt.err (!%p12589_p3)
}
  0x46   :  { %52 = dma.hbm_to_vmem [thread:$0]  %s14960_s2, 49152, %s47_s20, [#allocation10], %s12670_s11, %s12670_s11, %s12671_s12  }
  0x47   :  { %s12593_s9 = scalar_lea.hbm %s14962_s4, 256 }
  0x48   :  { %p12594_p4 = scmp.ne.s32.totalorder %s14962_s4, %s12593_s9  ;;  %p12597_p5 = scmp.lt.u32.totalorder %s12593_s9, %s14962_s4 }
  0x4a   :  { %p12599_p6 = pnand %p12597_p5, %p12594_p4 }
  0x4c   :  { %12602 = shalt.err (!%p12599_p6)
}
  0x4d   :  { %s12603_s15 = scalar_lea.vmem %s71_s22, 256  ;;  %p12608_p8 = scmp.lt.s32.totalorder %s71_s22, %s71_s22 }
  0x4e   :  { %p12604_p7 = scmp.ne.s32.totalorder %s71_s22, %s12603_s15  ;;  %p12609_p9 = scmp.lt.s32.totalorder %s12603_s15, %s12603_s15 }
  0x50   :  { %p12610_p10 = por %p12609_p9, %p12608_p8 }
  0x52   :  { %p12611_p11 = pnand %p12610_p10, %p12604_p7 }
  0x54   :  { %12614 = shalt.err (!%p12611_p11)
}
  0x55   :  { %s12678_s2 = smov 64   ;;  %s12679_s11 = smov 4  }
  0x56   :  { %76 = dma.hbm_to_vmem [thread:$0]  %s14962_s4, 256, %s71_s22, [#allocation13], %s12678_s2, %s12678_s2, %s12679_s11  }
  0x57   :  { %s12680_s17 = smov [#allocation15]   ;;  %s12615_s23 = scalar_lea.hbm %s14964_s6, 16 }
  0x58   :  { %s85_s19 = sshll.u32 %s12680_s17, 4  ;;  %p12616_p12 = scmp.ne.s32.totalorder %s14964_s6, %s12615_s23  ;;  %s86_s19 = int_to_ptr.vmem [resolvable:$true] %s85_s19 }
  0x59   :  { %p12619_p13 = scmp.lt.u32.totalorder %s12615_s23, %s14964_s6 }
  0x5b   :  { %p12621_p0 = pnand %p12619_p13, %p12616_p12 }
  0x5d   :  { %12624 = shalt.err (!%p12621_p0)
}
  0x5e   :  { %s12625_s27 = scalar_lea.vmem %s86_s19, 16  ;;  %s12629_s4 = scalar_lea.vmem %s86_s19, 32 }
  0x5f   :  { %p12626_p1 = scmp.ne.s32.totalorder %s86_s19, %s12625_s27  ;;  %p12630_p2 = scmp.lt.s32.totalorder %s86_s19, %s86_s19 }
  0x60   :  { %p12631_p3 = scmp.lt.s32.totalorder %s12629_s4, %s12625_s27 }
  0x62   :  { %p12632_p4 = por %p12631_p3, %p12630_p2 }
  0x64   :  { %p12633_p5 = pnand %p12632_p4, %p12626_p1 }
  0x66   :  { %12636 = shalt.err (!%p12633_p5)
}
  0x67   :  { %88 = dma.hbm_to_vmem [thread:$0]  %s14964_s6, 16, %s86_s19, [#allocation16]  }
  0x68   :  { %12659 = dma.done.wait [#allocation7], 1024  }
  0x69   :  { %12660 = vsyncadd [#allocation7], 4294966272 }
  0x6a   :  { %12661 = dma.done.wait [#allocation10], 53248  }
  0x6b   :  { %12662 = vsyncadd [#allocation10], 4294914048 }
  0x6c   :  { %12663 = dma.done.wait [#allocation13], 33024  }
  0x6d   :  { %12664 = vsyncadd [#allocation13], 4294934272 }
  0x6e   :  { %12665 = dma.done.wait [#allocation16], 16  }
  0x6f   :  { %12666 = vsyncadd [#allocation16], 4294967280  ;;  %v14966_v0 = vmov 0.0   ;;  %v116_v1 = vld [vmem:[#allocation9 + $0x8] sm:$0xff]  ;;  %v115_v3 = vld [vmem:[#allocation9] sm:$0xff]  ;;  %vm170_vm0 = vcmask 261120  }
  0x70   :  { %259 = vmatprep.mubr.f32.mxu0 %v14966_v0  ;;  %283 = vmatprep.mubr.f32.mxu1 %v14966_v0  ;;  %v120_v2 = vld [vmem:[#allocation9 + $0x28] sm:$0xff]  ;;  %v119_v5 = vld [vmem:[#allocation9 + $0x20] sm:$0xff]  ;;  %v118_v12 = vld [vmem:[#allocation9 + $0x18] sm:$0xff]  ;;  %vm954_vm1 = vcmask 523264   ;;  %vm957_vm2 = vcmask 1048064   ;;  %vm12683_vm3 = vmmov 0  }
  0x71   :  { %v9097_v4 = vpack.c.bf16 %v120_v2, %v116_v1  ;;  %v124_v6 = vld [vmem:[#allocation9 + $0x48] sm:$0xff]  ;;  %v9099_v8 = vpack.c.bf16 %v119_v5, %v115_v3  ;;  %v123_v10 = vld [vmem:[#allocation9 + $0x40] sm:$0xff]  ;;  %v122_v13 = vld [vmem:[#allocation9 + $0x38] sm:$0xff]  ;;  %vm8884_vm4 = vcmask 39936  }
  0x72   :  { %v128_v7 = vld [vmem:[#allocation9 + $0x68] sm:$0xff]  ;;  %v127_v11 = vld [vmem:[#allocation9 + $0x60] sm:$0xff]  ;;  %v9105_v15 = vpack.c.bf16 %v122_v13, %v118_v12  ;;  %v117_v16 = vld [vmem:[#allocation9 + $0x10] sm:$0xff] }
  0x73   :  { %v9101_v9 = vpack.c.bf16 %v128_v7, %v124_v6  ;;  %9098 = vmatprep.subr.bf16.mxu0 %v9097_v4  ;;  %11585 = vmatprep.subr.bf16.mxu1 %v9097_v4  ;;  %v9103_v14 = vpack.c.bf16 %v127_v11, %v123_v10  ;;  %v121_v17 = vld [vmem:[#allocation9 + $0x30] sm:$0xff]  ;;  %v126_v18 = vld [vmem:[#allocation9 + $0x58] sm:$0xff]  ;;  %v133_v20 = vld [vmem:[#allocation9 + $0x88] sm:$0xff] }
  0x74   :  { %9100 = vmatpush1.bf16.msra.mxu0 %v9099_v8  ;;  %11587 = vmatpush1.bf16.msra.mxu1 %v9099_v8  ;;  %v130_v19 = vld [vmem:[#allocation9 + $0x78] sm:$0xff]  ;;  %v12808_v21 = vld [vmem:[#allocation6] sm:$0xff]  ;;  %v137_v22 = vld [vmem:[#allocation9 + $0xa8] sm:$0xff]  ;;  %v9107_v24 = vpack.c.bf16 %v121_v17, %v117_v16 }
  0x75   :  { %9102 = vmatprep.subr.bf16.mxu0 %v9101_v9  ;;  %11586 = vmatprep.subr.bf16.mxu1 %v9101_v9  ;;  %v12810_v23 = vld [vmem:[#allocation6 + $0x20] sm:$0xff]  ;;  %v9113_v25 = vpack.c.bf16 %v137_v22, %v133_v20  ;;  %v9109_v28 = vpack.c.bf16 %v130_v19, %v126_v18  ;;  %v125_v29 = vld [vmem:[#allocation9 + $0x50] sm:$0xff]  ;;  %v141_v32 = vld [vmem:[#allocation9 + $0xc8] sm:$0xff] }
  0x76   :  { %v132_v26 = vld [vmem:[#allocation9 + $0x80] sm:$0xff]  ;;  %v129_v30 = vld [vmem:[#allocation9 + $0x70] sm:$0xff]  ;;  %v145_v33 = vld [vmem:[#allocation9 + $0xe8] sm:$0xff] }
  0x77   :  { %v136_v27 = vld [vmem:[#allocation9 + $0xa0] sm:$0xff]  ;;  %v135_v36 = vld [vmem:[#allocation9 + $0x98] sm:$0xff]  ;;  %v12817_v38 = vld [vmem:[#allocation6 + $0x8] sm:$0xff]  ;;  %v9111_v40 = vpack.c.bf16 %v129_v30, %v125_v29  ;;  %v9117_v41 = vpack.c.bf16 %v145_v33, %v141_v32 }
  0x78   :  { %9104 = vmatpush1.bf16.msra.mxu0 %v9103_v14  ;;  %11588 = vmatpush1.bf16.msra.mxu1 %v9103_v14  ;;  %v9115_v31 = vpack.c.bf16 %v136_v27, %v132_v26  ;;  %v140_v34 = vld [vmem:[#allocation9 + $0xc0] sm:$0xff]  ;;  %v139_v37 = vld [vmem:[#allocation9 + $0xb8] sm:$0xff]  ;;  %v12819_v39 = vld [vmem:[#allocation6 + $0x28] sm:$0xff] }
  0x79   :  { %9106 = vmatprep.subr.bf16.mxu1 %v9105_v15  ;;  %9114 = vmatprep.subr.bf16.mxu0 %v9113_v25  ;;  %v144_v35 = vld [vmem:[#allocation9 + $0xe0] sm:$0xff]  ;;  %v9121_v43 = vpack.c.bf16 %v139_v37, %v135_v36  ;;  %v712_v44 = vld [vmem:[#allocation12 + $0x8] sm:$0xff]  ;;  %v12828_v46 = vld [vmem:[#allocation6 + $0x10] sm:$0xff] }
  0x7a   :  { %v9119_v42 = vpack.c.bf16 %v144_v35, %v140_v34  ;;  %v716_v45 = vld [vmem:[#allocation12 + $0x28] sm:$0xff]  ;;  %v12830_v47 = vld [vmem:[#allocation6 + $0x30] sm:$0xff]  ;;  %v12840_v49 = vld [vmem:[#allocation6 + $0x18] sm:$0xff] }
  0x7b   :  { %8916 = vmatmul.mubr.msk.f32.vlgmr.msra.gmra.mrb[0].mxu0 %vm170_vm0, %v12808_v21  ;;  %8920 = vmatmul.mubr.msk.f32.vlgmr.msra.gmra.mrb[0].mxu1 %vm170_vm0, %v12810_v23  ;;  %v12832_v48 = vpack.c.bf16 %v716_v45, %v712_v44  ;;  %v12842_v50 = vld [vmem:[#allocation6 + $0x38] sm:$0xff]  ;;  %v134_v51 = vld [vmem:[#allocation9 + $0x90] sm:$0xff]  ;;  %v711_v53 = vld [vmem:[#allocation12] sm:$0xff] }
  0x7c   :  { %9108 = vmatpush1.bf16.msra.mxu1 %v9107_v24  ;;  %265 = vmatprep.mubr.f32.mxu0 %v14966_v0  ;;  %v138_v52 = vld [vmem:[#allocation9 + $0xb0] sm:$0xff]  ;;  %v715_v54 = vld [vmem:[#allocation12 + $0x20] sm:$0xff]  ;;  %v720_v55 = vld [vmem:[#allocation12 + $0x48] sm:$0xff] }
  0x7d   :  { %289 = vmatprep.mubr.f32.mxu1 %v14966_v0  ;;  %9110 = vmatprep.subr.bf16.mxu1 %v9109_v28  ;;  %v724_v56 = vld [vmem:[#allocation12 + $0x68] sm:$0xff]  ;;  %v143_v57 = vld [vmem:[#allocation9 + $0xd8] sm:$0xff]  ;;  %v9123_v59 = vpack.c.bf16 %v138_v52, %v134_v51  ;;  %v12851_v60 = vpack.c.bf16 %v715_v54, %v711_v53  ;;  %v719_v61 = vld [vmem:[#allocation12 + $0x40] sm:$0xff] }
  0x7e   :  { %9116 = vmatpush1.bf16.msra.mxu0 %v9115_v31  ;;  %v147_v58 = vld [vmem:[#allocation9 + $0xf8] sm:$0xff]  ;;  %v723_v62 = vld [vmem:[#allocation12 + $0x60] sm:$0xff]  ;;  %v12853_v63 = vpack.c.bf16 %v724_v56, %v720_v55  ;;  %v728_v1 = vld [vmem:[#allocation12 + $0x88] sm:$0xff] }
  0x7f   :  { %8917 = vmatmul.mubr.msk.f32.gmra.mrb[2].mxu0 %vm170_vm0, %v12817_v38  ;;  %8921 = vmatmul.mubr.msk.f32.gmra.mrb[2].mxu1 %vm170_vm0, %v12819_v39  ;;  %v9125_v2 = vpack.c.bf16 %v147_v58, %v143_v57  ;;  %v142_v3 = vld [vmem:[#allocation9 + $0xd0] sm:$0xff]  ;;  %v732_v5 = vld [vmem:[#allocation12 + $0xa8] sm:$0xff]  ;;  %v714_v6 = vld [vmem:[#allocation12 + $0x18] sm:$0xff]  ;;  %v12862_v8 = vpack.c.bf16 %v723_v62, %v719_v61 }
  0x80   :  { %271 = vmatprep.mubr.f32.mxu0 %v14966_v0  ;;  %295 = vmatprep.mubr.f32.mxu1 %v14966_v0  ;;  %v146_v4 = vld [vmem:[#allocation9 + $0xf0] sm:$0xff]  ;;  %v718_v7 = vld [vmem:[#allocation12 + $0x38] sm:$0xff]  ;;  %v12865_v10 = vpack.c.bf16 %v732_v5, %v728_v1  ;;  %v727_v11 = vld [vmem:[#allocation12 + $0x80] sm:$0xff] }
  0x81   :  { %9112 = vmatpush1.bf16.msra.mxu1 %v9111_v40  ;;  %9118 = vmatprep.subr.bf16.mxu0 %v9117_v41  ;;  %v9127_v9 = vpack.c.bf16 %v146_v4, %v142_v3  ;;  %v731_v12 = vld [vmem:[#allocation12 + $0xa0] sm:$0xff]  ;;  %v12867_v13 = vpack.c.bf16 %v718_v7, %v714_v6  ;;  %v736_v14 = vld [vmem:[#allocation12 + $0xc8] sm:$0xff]  ;;  %v713_v54 = vld [vmem:[#allocation12 + $0x10] sm:$0xff] }
  0x82   :  { %9120 = vmatpush1.bf16.msra.mxu0 %v9119_v42  ;;  %9122 = vmatprep.subr.bf16.mxu1 %v9121_v43  ;;  %v740_v15 = vld [vmem:[#allocation12 + $0xe8] sm:$0xff]  ;;  %v12876_v16 = vpack.c.bf16 %v731_v12, %v727_v11  ;;  %v735_v18 = vld [vmem:[#allocation12 + $0xc0] sm:$0xff]  ;;  %v717_v55 = vld [vmem:[#allocation12 + $0x30] sm:$0xff] }
  0x83   :  { %8918 = vmatmul.mubr.msk.f32.gmra.mrb[4].mxu0 %vm170_vm0, %v12828_v46  ;;  %8922 = vmatmul.mubr.msk.f32.gmra.mrb[4].mxu1 %vm170_vm0, %v12830_v47  ;;  %v12879_v17 = vpack.c.bf16 %v740_v15, %v736_v14  ;;  %v739_v19 = vld [vmem:[#allocation12 + $0xe0] sm:$0xff]  ;;  %v744_v20 = vld [vmem:[#allocation12 + $0x108] sm:$0xff]  ;;  %v722_v56 = vld [vmem:[#allocation12 + $0x58] sm:$0xff]  ;;  %v12948_v58 = vpack.c.bf16 %v717_v55, %v713_v54 }
  0x84   :  { %277 = vmatprep.mubr.f32.mxu0 %v14966_v0  ;;  %301 = vmatprep.mubr.f32.mxu1 %v14966_v0  ;;  %v748_v22 = vld [vmem:[#allocation12 + $0x128] sm:$0xff]  ;;  %v12889_v24 = vpack.c.bf16 %v739_v19, %v735_v18  ;;  %v743_v26 = vld [vmem:[#allocation12 + $0x100] sm:$0xff]  ;;  %v726_v57 = vld [vmem:[#allocation12 + $0x78] sm:$0xff] }
  0x85   :  { %9130 = vmatprep.subr.bf16.mxu0 %v12832_v48  ;;  %v12892_v25 = vpack.c.bf16 %v748_v22, %v744_v20  ;;  %v747_v27 = vld [vmem:[#allocation12 + $0x120] sm:$0xff]  ;;  %v752_v28 = vld [vmem:[#allocation12 + $0x148] sm:$0xff]  ;;  %v721_v61 = vld [vmem:[#allocation12 + $0x50] sm:$0xff] }
  0x86   :  { %v756_v29 = vld [vmem:[#allocation12 + $0x168] sm:$0xff]  ;;  %v12901_v30 = vpack.c.bf16 %v747_v27, %v743_v26  ;;  %v751_v32 = vld [vmem:[#allocation12 + $0x140] sm:$0xff]  ;;  %v725_v62 = vld [vmem:[#allocation12 + $0x70] sm:$0xff] }
  0x87   :  { %8919 = vmatmul.mubr.msk.f32.gmra.mrb[6].mxu0 %vm170_vm0, %v12840_v49  ;;  %8923 = vmatmul.mubr.msk.f32.gmra.mrb[6].mxu1 %vm170_vm0, %v12842_v50  ;;  %v12904_v31 = vpack.c.bf16 %v756_v29, %v752_v28  ;;  %v755_v33 = vld [vmem:[#allocation12 + $0x160] sm:$0xff]  ;;  %v760_v34 = vld [vmem:[#allocation12 + $0x188] sm:$0xff]  ;;  %v730_v1 = vld [vmem:[#allocation12 + $0x98] sm:$0xff]  ;;  %v12957_v3 = vpack.c.bf16 %v725_v62, %v721_v61 }
  0x88   :  { %372 = vmatprep.mubr.f32.mxu1 %v14966_v0  ;;  %517 = vmatprep.mubr.f32.mxu0 %v14966_v0  ;;  %v764_v35 = vld [vmem:[#allocation12 + $0x1a8] sm:$0xff]  ;;  %v12913_v36 = vpack.c.bf16 %v755_v33, %v751_v32  ;;  %v759_v40 = vld [vmem:[#allocation12 + $0x180] sm:$0xff]  ;;  %v729_v5 = vld [vmem:[#allocation12 + $0x90] sm:$0xff] }
  0x89   :  { %v12916_v37 = vpack.c.bf16 %v764_v35, %v760_v34  ;;  %v763_v41 = vld [vmem:[#allocation12 + $0x1a0] sm:$0xff]  ;;  %v768_v42 = vld [vmem:[#allocation12 + $0x1c8] sm:$0xff]  ;;  %v733_v6 = vld [vmem:[#allocation12 + $0xb0] sm:$0xff] }
  0x8a   :  { %v772_v43 = vld [vmem:[#allocation12 + $0x1e8] sm:$0xff]  ;;  %v12925_v44 = vpack.c.bf16 %v763_v41, %v759_v40  ;;  %v767_v51 = vld [vmem:[#allocation12 + $0x1c0] sm:$0xff]  ;;  %v738_v7 = vld [vmem:[#allocation12 + $0xd8] sm:$0xff] }
  0x8b   :  { %8924 = vmatmul.mubr.msk.f32.vlgmr.msra.gmra.mrb[8].mxu1 %vm170_vm0, %v12808_v21  ;;  %8932 = vmatmul.mubr.msk.f32.vlgmr.msra.gmra.mrb[8].mxu0 %vm170_vm0, %v12808_v21  ;;  %v12928_v45 = vpack.c.bf16 %v772_v43, %v768_v42  ;;  %v771_v52 = vld [vmem:[#allocation12 + $0x1e0] sm:$0xff]  ;;  %v737_v12 = vld [vmem:[#allocation12 + $0xd0] sm:$0xff]  ;;  %v746_v15 = vld [vmem:[#allocation12 + $0x118] sm:$0xff] }
  0x8c   :  { %9124 = vmatpush1.bf16.msra.mxu1 %v9123_v59  ;;  %378 = vmatprep.mubr.f32.mxu1 %v14966_v0  ;;  %v12937_v53 = vpack.c.bf16 %v771_v52, %v767_v51  ;;  %v12950_v59 = vpack.c.bf16 %v726_v57, %v722_v56  ;;  %v741_v14 = vld [vmem:[#allocation12 + $0xf0] sm:$0xff]  ;;  %v750_v18 = vld [vmem:[#allocation12 + $0x138] sm:$0xff] }
  0x8d   :  { %523 = vmatprep.mubr.f32.mxu0 %v14966_v0  ;;  %9132 = vmatpush1.bf16.msra.mxu0 %v12851_v60  ;;  %v12983_v19 = vpack.c.bf16 %v750_v18, %v746_v15  ;;  %v745_v20 = vld [vmem:[#allocation12 + $0x110] sm:$0xff]  ;;  %v754_v26 = vld [vmem:[#allocation12 + $0x158] sm:$0xff] }
  0x8e   :  { %9134 = vmatprep.subr.bf16.mxu0 %v12853_v63  ;;  %9126 = vmatprep.subr.bf16.mxu1 %v9125_v2  ;;  %v734_v2 = vld [vmem:[#allocation12 + $0xb8] sm:$0xff]  ;;  %v749_v22 = vld [vmem:[#allocation12 + $0x130] sm:$0xff] }
  0x8f   :  { %8925 = vmatmul.mubr.msk.f32.gmra.mrb[10].mxu1 %vm170_vm0, %v12817_v38  ;;  %8933 = vmatmul.mubr.msk.f32.gmra.mrb[10].mxu0 %vm170_vm0, %v12817_v38  ;;  %v12960_v4 = vpack.c.bf16 %v734_v2, %v730_v1  ;;  %v758_v27 = vld [vmem:[#allocation12 + $0x178] sm:$0xff]  ;;  %v753_v29 = vld [vmem:[#allocation12 + $0x150] sm:$0xff]  ;;  %v150_v2 = vlaneseq }
  0x90   :  { %384 = vmatprep.mubr.f32.mxu1 %v14966_v0  ;;  %529 = vmatprep.mubr.f32.mxu0 %v14966_v0  ;;  %v12994_v28 = vpack.c.bf16 %v758_v27, %v754_v26  ;;  %v757_v32 = vld [vmem:[#allocation12 + $0x170] sm:$0xff]  ;;  %v762_v33 = vld [vmem:[#allocation12 + $0x198] sm:$0xff] }
  0x91   :  { %9136 = vmatpush1.bf16.msra.mxu0 %v12862_v8  ;;  %9128 = vmatpush1.bf16.msra.mxu1 %v9127_v9  ;;  %v742_v9 = vld [vmem:[#allocation12 + $0xf8] sm:$0xff]  ;;  %v761_v40 = vld [vmem:[#allocation12 + $0x190] sm:$0xff] }
  0x92   :  { %9138 = vmatprep.subr.bf16.mxu0 %v12865_v10  ;;  %9162 = vmatprep.subr.bf16.mxu1 %v12867_v13  ;;  %v12972_v11 = vpack.c.bf16 %v742_v9, %v738_v7  ;;  %v766_v34 = vld [vmem:[#allocation12 + $0x1b8] sm:$0xff]  ;;  %v765_v41 = vld [vmem:[#allocation12 + $0x1b0] sm:$0xff]  ;;  %v151_v7 = vshrl.u32 %v150_v2, 7 }
  0x93   :  { %8926 = vmatmul.mubr.msk.f32.gmra.mrb[12].mxu1 %vm170_vm0, %v12828_v46  ;;  %8934 = vmatmul.mubr.msk.f32.gmra.mrb[12].mxu0 %vm170_vm0, %v12828_v46  ;;  %v13005_v35 = vpack.c.bf16 %v766_v34, %v762_v33  ;;  %v770_v42 = vld [vmem:[#allocation12 + $0x1d8] sm:$0xff]  ;;  %v769_v52 = vld [vmem:[#allocation12 + $0x1d0] sm:$0xff] }
  0x94   :  { %390 = vmatprep.mubr.f32.mxu1 %v14966_v0  ;;  %535 = vmatprep.mubr.f32.mxu0 %v14966_v0  ;;  %v774_v43 = vld [vmem:[#allocation12 + $0x1f8] sm:$0xff]  ;;  %v773_v54 = vld [vmem:[#allocation12 + $0x1f0] sm:$0xff]  ;;  %v13070_v9 = vsub.s32 1, %v151_v7 }
  0x95   :  { %9140 = vmatpush1.bf16.msra.mxu0 %v12876_v16  ;;  %v13016_v51 = vpack.c.bf16 %v774_v43, %v770_v42 }
  0x96   :  { %9142 = vmatprep.subr.bf16.mxu0 %v12879_v17 }
  0x97   :  { %8927 = vmatmul.mubr.msk.f32.gmra.mrb[14].mxu1 %vm170_vm0, %v12840_v49  ;;  %8935 = vmatmul.mubr.msk.f32.gmra.mrb[14].mxu0 %vm170_vm0, %v12840_v49 }
  0x98   :  { %396 = vmatprep.mubr.f32.mxu1 %v14966_v0  ;;  %541 = vmatprep.mubr.f32.mxu0 %v14966_v0 }
  0x99   :  { %9144 = vmatpush1.bf16.msra.mxu0 %v12889_v24 }
  0x9a   :  { %9146 = vmatprep.subr.bf16.mxu0 %v12892_v25 }
  0x9b   :  { %8928 = vmatmul.mubr.msk.f32.gmra.mrb[16].mxu1 %vm170_vm0, %v12810_v23  ;;  %8936 = vmatmul.mubr.msk.f32.gmra.mrb[6].mxu0 %vm170_vm0, %v12810_v23 }
  0x9c   :  { %402 = vmatprep.mubr.f32.mxu1 %v14966_v0  ;;  %547 = vmatprep.mubr.f32.mxu0 %v14966_v0 }
  0x9d   :  { %9148 = vmatpush1.bf16.msra.mxu0 %v12901_v30 }
  0x9e   :  { %9150 = vmatprep.subr.bf16.mxu0 %v12904_v31 }
  0x9f   :  { %8929 = vmatmul.mubr.msk.f32.gmra.mrb[18].mxu1 %vm170_vm0, %v12819_v39  ;;  %8937 = vmatmul.mubr.msk.f32.gmra.mrb[4].mxu0 %vm170_vm0, %v12819_v39 }
  0xa0   :  { %408 = vmatprep.mubr.f32.mxu1 %v14966_v0  ;;  %553 = vmatprep.mubr.f32.mxu0 %v14966_v0 }
  0xa1   :  { %9152 = vmatpush1.bf16.msra.mxu0 %v12913_v36 }
  0xa2   :  { %9154 = vmatprep.subr.bf16.mxu0 %v12916_v37 }
  0xa3   :  { %8930 = vmatmul.mubr.msk.f32.gmra.mrb[20].mxu1 %vm170_vm0, %v12830_v47  ;;  %8938 = vmatmul.mubr.msk.f32.gmra.mrb[2].mxu0 %vm170_vm0, %v12830_v47 }
  0xa4   :  { %414 = vmatprep.mubr.f32.mxu1 %v14966_v0  ;;  %559 = vmatprep.mubr.f32.mxu0 %v14966_v0 }
  0xa5   :  { %9156 = vmatpush1.bf16.msra.mxu0 %v12925_v44 }
  0xa6   :  { %9158 = vmatprep.subr.bf16.mxu0 %v12928_v45 }
  0xa7   :  { %8931 = vmatmul.mubr.msk.f32.gmra.mrb[22].mxu1 %vm170_vm0, %v12842_v50  ;;  %8939 = vmatmul.mubr.msk.f32.gmra.mrb[0].mxu0 %vm170_vm0, %v12842_v50 }
  0xa8   :  { %630 = vmatprep.mubr.f32.mxu1 %v14966_v0  ;;  %843 = vmatprep.mubr.f32.mxu0 %v14966_v0 }
  0xa9   :  { %9160 = vmatpush1.bf16.msra.mxu0 %v12937_v53 }
  0xaa   :  { %9194 = vmatprep.subr.bf16.mxu0 %v12832_v48 }
  0xaf   :  { %8940 = vmatmul.mubr.msk.f32.vlgmr.msra.gmra.mrb[22].mxu1 %vm170_vm0, %v12808_v21  ;;  %844 = vmatmul.mubr.f32.vlgmr.msra.gmra.mrb[0].mxu0 %v14966_v0  ;;  %v12969_v21 = vpack.c.bf16 %v733_v6, %v729_v5 }
  0xb0   :  { %9164 = vmatpush1.bf16.msra.mxu1 %v12948_v58  ;;  %636 = vmatprep.mubr.f32.mxu1 %v14966_v0 }
  0xb1   :  { %9166 = vmatprep.subr.bf16.mxu1 %v12950_v59  ;;  %9196 = vmatpush1.bf16.msra.mxu0 %v12851_v60 }
  0xb2   :  { %9198 = vmatprep.subr.bf16.mxu0 %v12853_v63  ;;  %1028 = vmatprep.mubr.f32.mxu0 %v14966_v0 }
  0xb3   :  { %8941 = vmatmul.mubr.msk.f32.gmra.mrb[20].mxu1 %vm170_vm0, %v12817_v38  ;;  %v12980_v38 = vpack.c.bf16 %v741_v14, %v737_v12  ;;  %v148_v12 = vld [vmem:[#allocation14] sm:$0xf]  ;;  %v13072_v14 = vsub.s32 0, %v151_v7 }
  0xb4   :  { %9168 = vmatpush1.bf16.msra.mxu1 %v12957_v3  ;;  %642 = vmatprep.mubr.f32.mxu1 %v14966_v0  ;;  %v13075_v15 = vrot.slane %v148_v12, %v13070_v9 }
  0xb5   :  { %9170 = vmatprep.subr.bf16.mxu1 %v12960_v4  ;;  %9200 = vmatpush1.bf16.msra.mxu0 %v12862_v8  ;;  %v13078_v18 = vrot.slane %v148_v12, %v13072_v14 }
  0xb6   :  { %9202 = vmatprep.subr.bf16.mxu0 %v12865_v10 }
  0xb7   :  { %8942 = vmatmul.mubr.msk.f32.gmra.mrb[18].mxu1 %vm170_vm0, %v12828_v46  ;;  %v12991_v46 = vpack.c.bf16 %v749_v22, %v745_v20 }
  0xb8   :  { %9172 = vmatpush1.bf16.msra.mxu1 %v12969_v21  ;;  %648 = vmatprep.mubr.f32.mxu1 %v14966_v0 }
  0xb9   :  { %9174 = vmatprep.subr.bf16.mxu1 %v12972_v11  ;;  %9204 = vmatpush1.bf16.msra.mxu0 %v12876_v16 }
  0xba   :  { %9206 = vmatprep.subr.bf16.mxu0 %v12879_v17 }
  0xbb   :  { %8943 = vmatmul.mubr.msk.f32.gmra.mrb[16].mxu1 %vm170_vm0, %v12840_v49  ;;  %v13002_v49 = vpack.c.bf16 %v757_v32, %v753_v29  ;;  %v13082_v29 = vsub.s32 2, %v151_v7  ;;  %v13084_v32 = vsub.s32 3, %v151_v7 }
  0xbc   :  { %654 = vmatprep.mubr.f32.mxu1 %v14966_v0  ;;  %9176 = vmatpush1.bf16.msra.mxu1 %v12980_v38 }
  0xbd   :  { %9178 = vmatprep.subr.bf16.mxu1 %v12983_v19  ;;  %9208 = vmatpush1.bf16.msra.mxu0 %v12889_v24  ;;  %14972 = vst [vmem:[#allocation23_spill] sm:$0xff] %v13082_v29  ;;  %14973 = vst [vmem:[#allocation24_spill] sm:$0xff] %v13084_v32  ;;  %v13090_v42 = vrot.slane %v148_v12, %v13084_v32 }
  0xbe   :  { %9210 = vmatprep.subr.bf16.mxu0 %v12892_v25 }
  0xbf   :  { %8944 = vmatmul.mubr.msk.f32.gmra.mrb[14].mxu1 %vm170_vm0, %v12810_v23  ;;  %v13013_v23 = vpack.c.bf16 %v765_v41, %v761_v40  ;;  %v13087_v40 = vrot.slane %v148_v12, %v13082_v29 }
  0xc0   :  { %660 = vmatprep.mubr.f32.mxu1 %v14966_v0  ;;  %9180 = vmatpush1.bf16.msra.mxu1 %v12991_v46 }
  0xc1   :  { %9182 = vmatprep.subr.bf16.mxu1 %v12994_v28  ;;  %9212 = vmatpush1.bf16.msra.mxu0 %v12901_v30 }
  0xc2   :  { %9214 = vmatprep.subr.bf16.mxu0 %v12904_v31 }
  0xc3   :  { %8945 = vmatmul.mubr.msk.f32.gmra.mrb[12].mxu1 %vm170_vm0, %v12819_v39  ;;  %v13024_v39 = vpack.c.bf16 %v773_v54, %v769_v52 }
  0xc4   :  { %666 = vmatprep.mubr.f32.mxu1 %v14966_v0  ;;  %9184 = vmatpush1.bf16.msra.mxu1 %v13002_v49 }
  0xc5   :  { %9186 = vmatprep.subr.bf16.mxu1 %v13005_v35  ;;  %9216 = vmatpush1.bf16.msra.mxu0 %v12913_v36 }
  0xc6   :  { %9218 = vmatprep.subr.bf16.mxu0 %v12916_v37 }
  0xc7   :  { %8946 = vmatmul.mubr.msk.f32.gmra.mrb[10].mxu1 %vm170_vm0, %v12830_v47 }
  0xc8   :  { %672 = vmatprep.mubr.f32.mxu1 %v14966_v0  ;;  %9188 = vmatpush1.bf16.msra.mxu1 %v13013_v23 }
  0xc9   :  { %9190 = vmatprep.subr.bf16.mxu1 %v13016_v51  ;;  %9220 = vmatpush1.bf16.msra.mxu0 %v12925_v44 }
  0xca   :  { %9222 = vmatprep.subr.bf16.mxu0 %v12928_v45 }
  0xcb   :  { %8947 = vmatmul.mubr.msk.f32.gmra.mrb[8].mxu1 %vm170_vm0, %v12842_v50 }
  0xcc   :  { %9192 = vmatpush1.bf16.msra.mxu1 %v13024_v39  ;;  %914 = vmatprep.mubr.f32.mxu1 %v14966_v0 }
  0xcd   :  { %9226 = vmatprep.subr.bf16.mxu1 %v12867_v13  ;;  %9224 = vmatpush1.bf16.msra.mxu0 %v12937_v53 }
  0xce   :  { %9258 = vmatprep.subr.bf16.mxu0 %v12832_v48 }
  0xd3   :  { %915 = vmatmul.mubr.f32.vlgmr.msra.gmra.mrb[8].mxu1 %v14966_v0 }
  0xd4   :  { %9228 = vmatpush1.bf16.msra.mxu1 %v12948_v58  ;;  %1099 = vmatprep.mubr.f32.mxu1 %v14966_v0 }
  0xd5   :  { %9230 = vmatprep.subr.bf16.mxu1 %v12950_v59 }
  0xd8   :  { %9232 = vmatpush1.bf16.msra.mxu1 %v12957_v3 }
  0xd9   :  { %9234 = vmatprep.subr.bf16.mxu1 %v12960_v4 }
  0xdc   :  { %9236 = vmatpush1.bf16.msra.mxu1 %v12969_v21 }
  0xdd   :  { %9238 = vmatprep.subr.bf16.mxu1 %v12972_v11 }
  0xe0   :  { %9240 = vmatpush1.bf16.msra.mxu1 %v12980_v38 }
  0xe1   :  { %9242 = vmatprep.subr.bf16.mxu1 %v12983_v19 }
  0xe4   :  { %9244 = vmatpush1.bf16.msra.mxu1 %v12991_v46 }
  0xe5   :  { %9246 = vmatprep.subr.bf16.mxu1 %v12994_v28 }
  0xe8   :  { %9248 = vmatpush1.bf16.msra.mxu1 %v13002_v49 }
  0xe9   :  { %9250 = vmatprep.subr.bf16.mxu1 %v13005_v35 }
  0xec   :  { %9252 = vmatpush1.bf16.msra.mxu1 %v13013_v23 }
  0xed   :  { %9254 = vmatprep.subr.bf16.mxu1 %v13016_v51 }
  0xf0   :  { %9256 = vmatpush1.bf16.msra.mxu1 %v13024_v39 }
  0xf1   :  { %9290 = vmatprep.subr.bf16.mxu1 %v12867_v13 }
 0x14e   :  { %v13054_v47 = vpop.f32.mrb[0].mxu1 }
 0x14f   :  { %v13056_v50 = vpop.f32.mrb[1].mxu1 }
 0x152   :  { %v13058_v55 = vpop.f32.mrb[2].mxu1 }
 0x153   :  { %v13060_v56 = vpop.f32.mrb[3].mxu1 }
 0x156   :  { %v13062_v57 = vpop.f32.mrb[4].mxu1 }
 0x157   :  { %v13064_v61 = vpop.f32.mrb[5].mxu1 }
 0x15a   :  { %v13066_v62 = vpop.f32.mrb[6].mxu1 }
 0x15b   :  { %v13068_v1 = vpop.f32.mrb[7].mxu1 }
 0x182   :  { %v845_v5 = vpop.f32.mrb[0].mxu0 }
 0x183   :  { %v847_v6 = vpop.f32.mrb[1].mxu0  ;;  %v11589_v22 = vadd.f32 %v845_v5, %v13078_v18 }
 0x184   :  { %v11590_v20 = vadd.f32 %v847_v6, %v13075_v15 }
 0x185   :  { %v8948_v27 = vmul.f32 -1.442695, %v11589_v22 }
 0x186   :  { %v8949_v26 = vmul.f32 -1.442695, %v11590_v20 }
 0x188   :  { %11989 = vpow2.f32 %v8949_v26 }
 0x189   :  { %11991 = vpow2.f32 %v8948_v27 }
 0x192   :  { %v11990_v33 = vpop.eup %11989 }
 0x193   :  { %v11992_v34 = vpop.eup %11991  ;;  %v940_v41 = vadd.f32 1.0, %v11990_v33 }
 0x194   :  { %v939_v43 = vadd.f32 1.0, %v11992_v34 }
 0x195   :  { %11993 = vrcp.f32 %v940_v41 }
 0x196   :  { %11995 = vrcp.f32 %v939_v43 }
 0x19f   :  { %v11994_v7 = vpop.eup %11993 }
 0x1a0   :  { %v11996_v20 = vpop.eup %11995  ;;  %v949_v27 = vmul.f32 0.0, %v11994_v7 }
 0x1a6   :  { %v916_v52 = vpop.f32.mrb[8].mxu1 }
 0x1a7   :  { %v11613_v54 = vadd.f32 %v916_v52, %v13087_v40  ;;  %v918_v2 = vpop.f32.mrb[9].mxu1  ;;  %v14974_v52 = vmov 0.0  }
 0x1a8   :  { %v11614_v5 = vadd.f32 %v918_v2, %v13090_v42 }
 0x1a9   :  { %v8950_v6 = vmul.f32 -1.442695, %v11613_v54 }
 0x1aa   :  { %11997 = vtanh.f32 %v11614_v5 }
 0x1ab   :  { %11999 = vpow2.f32 %v8950_v6 }
 0x1b4   :  { %v11998_v22 = vpop.eup %11997 }
 0x1b5   :  { %v12000_v26 = vpop.eup %11999  ;;  %v950_v33 = vmul.f32 %v11998_v22, %v11996_v20 }
 0x1b6   :  { %v941_v12 = vadd.f32 1.0, %v12000_v26 }
 0x1b7   :  { %v13094_v0 = vadd.f32 %v950_v33, %v949_v27 }
 0x1b8   :  { %12001 = vrcp.f32 %v941_v12 }
 0x1b9   :  { %12003 = vtanh.f32 %v13094_v0 }
 0x1c2   :  { %v12002_v34 = vpop.eup %12001 }
 0x1c3   :  { %v12004_v41 = vpop.eup %12003 }
 0x1c4   :  { %v953_v43 = vmul.f32 %v12004_v41, %v12002_v34 }
 0x1c6   :  { %955 = vst.msk [vmem:[#allocation2] sm:$0xff] %vm954_vm1, %v953_v43  ;;  %1029 = vmatmul.mubr.f32.vlgmr.msra.gmra.mrb[2].mxu0 %v953_v43  ;;  %1100 = vmatmul.mubr.f32.vlgmr.msra.gmra.mrb[10].mxu1 %v953_v43 }
 0x1c7   :  { %958 = vst.msk [vmem:[#allocation2 + $0x38] sm:$0xff] %vm957_vm2, %v953_v43  ;;  %9260 = vmatpush1.bf16.msra.mxu0 %v12851_v60  ;;  %9292 = vmatpush1.bf16.msra.mxu1 %v12948_v58 }
 0x1c8   :  { %9262 = vmatprep.subr.bf16.mxu0 %v12853_v63  ;;  %9294 = vmatprep.subr.bf16.mxu1 %v12950_v59 }
 0x1c9   :  { %1212 = vmatprep.mubr.f32.mxu0 %v14974_v52  ;;  %1283 = vmatprep.mubr.f32.mxu1 %v14974_v52 }
 0x1cb   :  { %9264 = vmatpush1.bf16.msra.mxu0 %v12862_v8  ;;  %9296 = vmatpush1.bf16.msra.mxu1 %v12957_v3 }
 0x1cc   :  { %9266 = vmatprep.subr.bf16.mxu0 %v12865_v10  ;;  %9298 = vmatprep.subr.bf16.mxu1 %v12960_v4 }
 0x1cf   :  { %9268 = vmatpush1.bf16.msra.mxu0 %v12876_v16  ;;  %9300 = vmatpush1.bf16.msra.mxu1 %v12969_v21 }
 0x1d0   :  { %9270 = vmatprep.subr.bf16.mxu0 %v12879_v17  ;;  %9302 = vmatprep.subr.bf16.mxu1 %v12972_v11 }
 0x1d3   :  { %9272 = vmatpush1.bf16.msra.mxu0 %v12889_v24  ;;  %9304 = vmatpush1.bf16.msra.mxu1 %v12980_v38 }
 0x1d4   :  { %9274 = vmatprep.subr.bf16.mxu0 %v12892_v25  ;;  %9306 = vmatprep.subr.bf16.mxu1 %v12983_v19 }
 0x1d7   :  { %9276 = vmatpush1.bf16.msra.mxu0 %v12901_v30  ;;  %9308 = vmatpush1.bf16.msra.mxu1 %v12991_v46 }
 0x1d8   :  { %9278 = vmatprep.subr.bf16.mxu0 %v12904_v31  ;;  %9310 = vmatprep.subr.bf16.mxu1 %v12994_v28 }
 0x1db   :  { %9280 = vmatpush1.bf16.msra.mxu0 %v12913_v36  ;;  %9312 = vmatpush1.bf16.msra.mxu1 %v13002_v49 }
 0x1dc   :  { %9282 = vmatprep.subr.bf16.mxu0 %v12916_v37  ;;  %9314 = vmatprep.subr.bf16.mxu1 %v13005_v35 }
 0x1df   :  { %9284 = vmatpush1.bf16.msra.mxu0 %v12925_v44  ;;  %9316 = vmatpush1.bf16.msra.mxu1 %v13013_v23 }
 0x1e0   :  { %9286 = vmatprep.subr.bf16.mxu0 %v12928_v45  ;;  %9318 = vmatprep.subr.bf16.mxu1 %v13016_v51 }
 0x1e3   :  { %9288 = vmatpush1.bf16.msra.mxu0 %v12937_v53  ;;  %9320 = vmatpush1.bf16.msra.mxu1 %v13024_v39 }
 0x1e4   :  { %9322 = vmatprep.subr.bf16.mxu0 %v12832_v48  ;;  %9354 = vmatprep.subr.bf16.mxu1 %v12867_v13 }
 0x299   :  { %v1030_v54 = vpop.f32.mrb[2].mxu0  ;;  %v1101_v2 = vpop.f32.mrb[10].mxu1 }
 0x29a   :  { %v11591_v5 = vadd.f32 %v1030_v54, %v13078_v18  ;;  %v1032_v6 = vpop.f32.mrb[3].mxu0  ;;  %v1103_v7 = vpop.f32.mrb[11].mxu1  ;;  %v11615_v27 = vadd.f32 %v1101_v2, %v13087_v40 }
 0x29b   :  { %v11592_v20 = vadd.f32 %v1032_v6, %v13075_v15  ;;  %v11616_v33 = vadd.f32 %v1103_v7, %v13090_v42 }
 0x29c   :  { %v8951_v22 = vmul.f32 -1.442695, %v11591_v5  ;;  %v8953_v12 = vmul.f32 -1.442695, %v11615_v27 }
 0x29d   :  { %v8952_v26 = vmul.f32 -1.442695, %v11592_v20 }
 0x29e   :  { %12005 = vpow2.f32 %v8951_v22 }
 0x29f   :  { %12007 = vpow2.f32 %v8952_v26 }
 0x2a0   :  { %12009 = vtanh.f32 %v11616_v33 }
 0x2a1   :  { %12011 = vpow2.f32 %v8953_v12 }
 0x2a8   :  { %v12006_v34 = vpop.eup %12005 }
 0x2a9   :  { %v1124_v41 = vadd.f32 1.0, %v12006_v34  ;;  %v12008_v43 = vpop.eup %12007 }
 0x2aa   :  { %v1125_v54 = vadd.f32 1.0, %v12008_v43  ;;  %v12010_v32 = vpop.eup %12009 }
 0x2ab   :  { %12013 = vrcp.f32 %v1124_v41  ;;  %v12012_v29 = vpop.eup %12011 }
 0x2ac   :  { %12015 = vrcp.f32 %v1125_v54  ;;  %v1126_v22 = vadd.f32 1.0, %v12012_v29 }
 0x2ae   :  { %12017 = vrcp.f32 %v1126_v22 }
 0x2b5   :  { %v12014_v6 = vpop.eup %12013 }
 0x2b6   :  { %v1135_v5 = vmul.f32 %v12014_v6, %v12010_v32  ;;  %v12016_v20 = vpop.eup %12015 }
 0x2b7   :  { %v1134_v26 = vmul.f32 %v12016_v20, %v13094_v0 }
 0x2b8   :  { %v12018_v7 = vpop.eup %12017 }
 0x2b9   :  { %v13138_v2 = vadd.f32 %v1135_v5, %v1134_v26 }
 0x2bb   :  { %12019 = vtanh.f32 %v13138_v2 }
 0x2c5   :  { %v12020_v27 = vpop.eup %12019 }
 0x2c6   :  { %v1138_v33 = vmul.f32 %v12020_v27, %v12018_v7 }
 0x2c8   :  { %1140 = vst.msk [vmem:[#allocation2 + $0x8] sm:$0xff] %vm954_vm1, %v1138_v33  ;;  %1213 = vmatmul.mubr.f32.vlgmr.msra.gmra.mrb[4].mxu0 %v1138_v33  ;;  %1284 = vmatmul.mubr.f32.vlgmr.msra.gmra.mrb[12].mxu1 %v1138_v33 }
 0x2c9   :  { %1142 = vst.msk [vmem:[#allocation2 + $0x30] sm:$0xff] %vm957_vm2, %v1138_v33  ;;  %9324 = vmatpush1.bf16.msra.mxu0 %v12851_v60  ;;  %9356 = vmatpush1.bf16.msra.mxu1 %v12948_v58 }
 0x2ca   :  { %9326 = vmatprep.subr.bf16.mxu0 %v12853_v63  ;;  %9358 = vmatprep.subr.bf16.mxu1 %v12950_v59 }
 0x2cb   :  { %1396 = vmatprep.mubr.f32.mxu0 %v14974_v52  ;;  %1467 = vmatprep.mubr.f32.mxu1 %v14974_v52 }
 0x2cd   :  { %9328 = vmatpush1.bf16.msra.mxu0 %v12862_v8  ;;  %9360 = vmatpush1.bf16.msra.mxu1 %v12957_v3 }
 0x2ce   :  { %9330 = vmatprep.subr.bf16.mxu0 %v12865_v10  ;;  %9362 = vmatprep.subr.bf16.mxu1 %v12960_v4 }
 0x2d1   :  { %9332 = vmatpush1.bf16.msra.mxu0 %v12876_v16  ;;  %9364 = vmatpush1.bf16.msra.mxu1 %v12969_v21 }
 0x2d2   :  { %9334 = vmatprep.subr.bf16.mxu0 %v12879_v17  ;;  %9366 = vmatprep.subr.bf16.mxu1 %v12972_v11 }
 0x2d5   :  { %9336 = vmatpush1.bf16.msra.mxu0 %v12889_v24  ;;  %9368 = vmatpush1.bf16.msra.mxu1 %v12980_v38 }
 0x2d6   :  { %9338 = vmatprep.subr.bf16.mxu0 %v12892_v25  ;;  %9370 = vmatprep.subr.bf16.mxu1 %v12983_v19 }
 0x2d9   :  { %9340 = vmatpush1.bf16.msra.mxu0 %v12901_v30  ;;  %9372 = vmatpush1.bf16.msra.mxu1 %v12991_v46 }
 0x2da   :  { %9342 = vmatprep.subr.bf16.mxu0 %v12904_v31  ;;  %9374 = vmatprep.subr.bf16.mxu1 %v12994_v28 }
 0x2dd   :  { %9344 = vmatpush1.bf16.msra.mxu0 %v12913_v36  ;;  %9376 = vmatpush1.bf16.msra.mxu1 %v13002_v49 }
 0x2de   :  { %9346 = vmatprep.subr.bf16.mxu0 %v12916_v37  ;;  %9378 = vmatprep.subr.bf16.mxu1 %v13005_v35 }
 0x2e1   :  { %9348 = vmatpush1.bf16.msra.mxu0 %v12925_v44  ;;  %9380 = vmatpush1.bf16.msra.mxu1 %v13013_v23 }
 0x2e2   :  { %9350 = vmatprep.subr.bf16.mxu0 %v12928_v45  ;;  %9382 = vmatprep.subr.bf16.mxu1 %v13016_v51 }
 0x2e5   :  { %9352 = vmatpush1.bf16.msra.mxu0 %v12937_v53  ;;  %9384 = vmatpush1.bf16.msra.mxu1 %v13024_v39 }
 0x2e6   :  { %9386 = vmatprep.subr.bf16.mxu0 %v12832_v48  ;;  %9418 = vmatprep.subr.bf16.mxu1 %v12867_v13 }
 0x39b   :  { %v1214_v0 = vpop.f32.mrb[4].mxu0  ;;  %v1285_v29 = vpop.f32.mrb[12].mxu1 }
 0x39c   :  { %v11593_v32 = vadd.f32 %v1214_v0, %v13078_v18  ;;  %v1216_v12 = vpop.f32.mrb[5].mxu0  ;;  %v1287_v34 = vpop.f32.mrb[13].mxu1  ;;  %v11617_v6 = vadd.f32 %v1285_v29, %v13087_v40 }
 0x39d   :  { %v11594_v41 = vadd.f32 %v1216_v12, %v13075_v15  ;;  %v11618_v5 = vadd.f32 %v1287_v34, %v13090_v42 }
 0x39e   :  { %v8954_v43 = vmul.f32 -1.442695, %v11593_v32  ;;  %v8956_v20 = vmul.f32 -1.442695, %v11617_v6 }
 0x39f   :  { %v8955_v54 = vmul.f32 -1.442695, %v11594_v41 }
 0x3a0   :  { %12021 = vpow2.f32 %v8954_v43 }
 0x3a1   :  { %12023 = vpow2.f32 %v8955_v54 }
 0x3a2   :  { %12025 = vtanh.f32 %v11618_v5 }
 0x3a3   :  { %12027 = vpow2.f32 %v8956_v20 }
 0x3aa   :  { %v12022_v22 = vpop.eup %12021 }
 0x3ab   :  { %v1308_v26 = vadd.f32 1.0, %v12022_v22  ;;  %v12024_v7 = vpop.eup %12023 }
 0x3ac   :  { %v1309_v27 = vadd.f32 1.0, %v12024_v7  ;;  %v12026_v33 = vpop.eup %12025 }
 0x3ad   :  { %12029 = vrcp.f32 %v1308_v26  ;;  %v12028_v0 = vpop.eup %12027 }
 0x3ae   :  { %12031 = vrcp.f32 %v1309_v27  ;;  %v1310_v43 = vadd.f32 1.0, %v12028_v0 }
 0x3b0   :  { %12033 = vrcp.f32 %v1310_v43 }
 0x3b7   :  { %v12030_v12 = vpop.eup %12029 }
 0x3b8   :  { %v1319_v32 = vmul.f32 %v12030_v12, %v12026_v33  ;;  %v12032_v41 = vpop.eup %12031 }
 0x3b9   :  { %v1318_v54 = vmul.f32 %v12032_v41, %v13138_v2 }
 0x3ba   :  { %v12034_v34 = vpop.eup %12033 }
 0x3bb   :  { %v13182_v29 = vadd.f32 %v1319_v32, %v1318_v54 }
 0x3bd   :  { %12035 = vtanh.f32 %v13182_v29 }
 0x3c7   :  { %v12036_v6 = vpop.eup %12035 }
 0x3c8   :  { %v1322_v5 = vmul.f32 %v12036_v6, %v12034_v34 }
 0x3ca   :  { %1324 = vst.msk [vmem:[#allocation2 + $0x10] sm:$0xff] %vm954_vm1, %v1322_v5  ;;  %1397 = vmatmul.mubr.f32.vlgmr.msra.gmra.mrb[6].mxu0 %v1322_v5  ;;  %1468 = vmatmul.mubr.f32.vlgmr.msra.gmra.mrb[14].mxu1 %v1322_v5 }
 0x3cb   :  { %1326 = vst.msk [vmem:[#allocation2 + $0x28] sm:$0xff] %vm957_vm2, %v1322_v5  ;;  %9388 = vmatpush1.bf16.msra.mxu0 %v12851_v60  ;;  %9420 = vmatpush1.bf16.msra.mxu1 %v12948_v58 }
 0x3cc   :  { %9390 = vmatprep.subr.bf16.mxu0 %v12853_v63  ;;  %9422 = vmatprep.subr.bf16.mxu1 %v12950_v59 }
 0x3cd   :  { %1580 = vmatprep.mubr.f32.mxu0 %v14974_v52  ;;  %1651 = vmatprep.mubr.f32.mxu1 %v14974_v52 }
 0x3cf   :  { %9392 = vmatpush1.bf16.msra.mxu0 %v12862_v8  ;;  %9424 = vmatpush1.bf16.msra.mxu1 %v12957_v3 }
 0x3d0   :  { %9394 = vmatprep.subr.bf16.mxu0 %v12865_v10  ;;  %9426 = vmatprep.subr.bf16.mxu1 %v12960_v4 }
 0x3d3   :  { %9396 = vmatpush1.bf16.msra.mxu0 %v12876_v16  ;;  %9428 = vmatpush1.bf16.msra.mxu1 %v12969_v21 }
 0x3d4   :  { %9398 = vmatprep.subr.bf16.mxu0 %v12879_v17  ;;  %9430 = vmatprep.subr.bf16.mxu1 %v12972_v11 }
 0x3d7   :  { %9400 = vmatpush1.bf16.msra.mxu0 %v12889_v24  ;;  %9432 = vmatpush1.bf16.msra.mxu1 %v12980_v38 }
 0x3d8   :  { %9402 = vmatprep.subr.bf16.mxu0 %v12892_v25  ;;  %9434 = vmatprep.subr.bf16.mxu1 %v12983_v19 }
 0x3db   :  { %9404 = vmatpush1.bf16.msra.mxu0 %v12901_v30  ;;  %9436 = vmatpush1.bf16.msra.mxu1 %v12991_v46 }
 0x3dc   :  { %9406 = vmatprep.subr.bf16.mxu0 %v12904_v31  ;;  %9438 = vmatprep.subr.bf16.mxu1 %v12994_v28 }
 0x3df   :  { %9408 = vmatpush1.bf16.msra.mxu0 %v12913_v36  ;;  %9440 = vmatpush1.bf16.msra.mxu1 %v13002_v49 }
 0x3e0   :  { %9410 = vmatprep.subr.bf16.mxu0 %v12916_v37  ;;  %9442 = vmatprep.subr.bf16.mxu1 %v13005_v35 }
 0x3e3   :  { %9412 = vmatpush1.bf16.msra.mxu0 %v12925_v44  ;;  %9444 = vmatpush1.bf16.msra.mxu1 %v13013_v23 }
 0x3e4   :  { %9414 = vmatprep.subr.bf16.mxu0 %v12928_v45  ;;  %9446 = vmatprep.subr.bf16.mxu1 %v13016_v51 }
 0x3e7   :  { %9416 = vmatpush1.bf16.msra.mxu0 %v12937_v53  ;;  %9448 = vmatpush1.bf16.msra.mxu1 %v13024_v39 }
 0x3e8   :  { %9450 = vmatprep.subr.bf16.mxu0 %v12832_v48  ;;  %9482 = vmatprep.subr.bf16.mxu1 %v12867_v13 }
 0x49d   :  { %v1398_v2 = vpop.f32.mrb[6].mxu0  ;;  %v1469_v20 = vpop.f32.mrb[14].mxu1 }
 0x49e   :  { %v11595_v22 = vadd.f32 %v1398_v2, %v13078_v18  ;;  %v1400_v26 = vpop.f32.mrb[7].mxu0  ;;  %v1471_v7 = vpop.f32.mrb[15].mxu1  ;;  %v11619_v12 = vadd.f32 %v1469_v20, %v13087_v40 }
 0x49f   :  { %v11596_v27 = vadd.f32 %v1400_v26, %v13075_v15  ;;  %v11620_v32 = vadd.f32 %v1471_v7, %v13090_v42 }
 0x4a0   :  { %v8957_v33 = vmul.f32 -1.442695, %v11595_v22  ;;  %v8959_v41 = vmul.f32 -1.442695, %v11619_v12 }
 0x4a1   :  { %v8958_v0 = vmul.f32 -1.442695, %v11596_v27 }
 0x4a2   :  { %12037 = vpow2.f32 %v8957_v33 }
 0x4a3   :  { %12039 = vpow2.f32 %v8958_v0 }
 0x4a4   :  { %12041 = vtanh.f32 %v11620_v32 }
 0x4a5   :  { %12043 = vpow2.f32 %v8959_v41  ;;  %v288_v41 = vadd.f32 %v13056_v50, %v13075_v15 }
 0x4ac   :  { %v12038_v43 = vpop.eup %12037 }
 0x4ad   :  { %v1492_v54 = vadd.f32 1.0, %v12038_v43  ;;  %v12040_v34 = vpop.eup %12039 }
 0x4ae   :  { %v1493_v6 = vadd.f32 1.0, %v12040_v34  ;;  %v12042_v5 = vpop.eup %12041 }
 0x4af   :  { %12045 = vrcp.f32 %v1492_v54  ;;  %v12044_v2 = vpop.eup %12043 }
 0x4b0   :  { %12047 = vrcp.f32 %v1493_v6  ;;  %v1494_v33 = vadd.f32 1.0, %v12044_v2 }
 0x4b2   :  { %12049 = vrcp.f32 %v1494_v33 }
 0x4b9   :  { %v12046_v26 = vpop.eup %12045 }
 0x4ba   :  { %v1503_v22 = vmul.f32 %v12046_v26, %v12042_v5  ;;  %v12048_v27 = vpop.eup %12047 }
 0x4bb   :  { %v1502_v0 = vmul.f32 %v12048_v27, %v13182_v29  ;;  %v286_v29 = vadd.f32 %v13054_v47, %v13078_v18 }
 0x4bc   :  { %v12050_v7 = vpop.eup %12049 }
 0x4bd   :  { %v13226_v20 = vadd.f32 %v1503_v22, %v1502_v0 }
 0x4bf   :  { %12051 = vtanh.f32 %v13226_v20 }
 0x4c9   :  { %v12052_v12 = vpop.eup %12051 }
 0x4ca   :  { %v1506_v32 = vmul.f32 %v12052_v12, %v12050_v7 }
 0x4cc   :  { %1508 = vst.msk [vmem:[#allocation2 + $0x18] sm:$0xff] %vm954_vm1, %v1506_v32  ;;  %1581 = vmatmul.mubr.f32.vlgmr.msra.gmra.mrb[14].mxu0 %v1506_v32  ;;  %1652 = vmatmul.mubr.f32.vlgmr.msra.gmra.mrb[16].mxu1 %v1506_v32 }
 0x4cd   :  { %1510 = vst.msk [vmem:[#allocation2 + $0x20] sm:$0xff] %vm957_vm2, %v1506_v32  ;;  %9452 = vmatpush1.bf16.msra.mxu0 %v12851_v60  ;;  %9484 = vmatpush1.bf16.msra.mxu1 %v12948_v58 }
 0x4ce   :  { %9454 = vmatprep.subr.bf16.mxu0 %v12853_v63  ;;  %9486 = vmatprep.subr.bf16.mxu1 %v12950_v59 }
 0x4cf   :  { %1762 = vmatprep.mubr.f32.mxu0 %v14974_v52  ;;  %1833 = vmatprep.mubr.f32.mxu1 %v14974_v52 }
 0x4d1   :  { %9456 = vmatpush1.bf16.msra.mxu0 %v12862_v8  ;;  %9488 = vmatpush1.bf16.msra.mxu1 %v12957_v3 }
 0x4d2   :  { %9458 = vmatprep.subr.bf16.mxu0 %v12865_v10  ;;  %9490 = vmatprep.subr.bf16.mxu1 %v12960_v4 }
 0x4d5   :  { %9460 = vmatpush1.bf16.msra.mxu0 %v12876_v16  ;;  %9492 = vmatpush1.bf16.msra.mxu1 %v12969_v21 }
 0x4d6   :  { %9462 = vmatprep.subr.bf16.mxu0 %v12879_v17  ;;  %9494 = vmatprep.subr.bf16.mxu1 %v12972_v11 }
 0x4d9   :  { %9464 = vmatpush1.bf16.msra.mxu0 %v12889_v24  ;;  %9496 = vmatpush1.bf16.msra.mxu1 %v12980_v38 }
 0x4da   :  { %9466 = vmatprep.subr.bf16.mxu0 %v12892_v25  ;;  %9498 = vmatprep.subr.bf16.mxu1 %v12983_v19 }
 0x4dd   :  { %9468 = vmatpush1.bf16.msra.mxu0 %v12901_v30  ;;  %9500 = vmatpush1.bf16.msra.mxu1 %v12991_v46 }
 0x4de   :  { %9470 = vmatprep.subr.bf16.mxu0 %v12904_v31  ;;  %9502 = vmatprep.subr.bf16.mxu1 %v12994_v28 }
 0x4e1   :  { %9472 = vmatpush1.bf16.msra.mxu0 %v12913_v36  ;;  %9504 = vmatpush1.bf16.msra.mxu1 %v13002_v49 }
 0x4e2   :  { %9474 = vmatprep.subr.bf16.mxu0 %v12916_v37  ;;  %9506 = vmatprep.subr.bf16.mxu1 %v13005_v35 }
 0x4e5   :  { %9476 = vmatpush1.bf16.msra.mxu0 %v12925_v44  ;;  %9508 = vmatpush1.bf16.msra.mxu1 %v13013_v23 }
 0x4e6   :  { %9478 = vmatprep.subr.bf16.mxu0 %v12928_v45  ;;  %9510 = vmatprep.subr.bf16.mxu1 %v13016_v51 }
 0x4e9   :  { %9480 = vmatpush1.bf16.msra.mxu0 %v12937_v53  ;;  %9512 = vmatpush1.bf16.msra.mxu1 %v13024_v39 }
 0x4ea   :  { %9514 = vmatprep.subr.bf16.mxu0 %v12832_v48  ;;  %9546 = vmatprep.subr.bf16.mxu1 %v12867_v13 }
 0x59f   :  { %v1582_v43 = vpop.f32.mrb[14].mxu0  ;;  %v1653_v54 = vpop.f32.mrb[16].mxu1 }
 0x5a0   :  { %v1583_v34 = vadd.f32 %v1582_v43, %v286_v29  ;;  %v1584_v6 = vpop.f32.mrb[15].mxu0  ;;  %v1655_v5 = vpop.f32.mrb[17].mxu1  ;;  %v11621_v27 = vadd.f32 %v1653_v54, %v13087_v40 }
 0x5a1   :  { %v1585_v2 = vadd.f32 %v1584_v6, %v288_v41  ;;  %v11622_v33 = vadd.f32 %v1655_v5, %v13090_v42 }
 0x5a2   :  { %v8960_v26 = vmul.f32 -1.442695, %v1583_v34  ;;  %v8962_v0 = vmul.f32 -1.442695, %v11621_v27  ;;  %v294_v27 = vadd.f32 %v13060_v56, %v13075_v15 }
 0x5a3   :  { %v8961_v22 = vmul.f32 -1.442695, %v1585_v2 }
 0x5a4   :  { %12053 = vpow2.f32 %v8960_v26 }
 0x5a5   :  { %12055 = vpow2.f32 %v8961_v22 }
 0x5a6   :  { %12057 = vtanh.f32 %v11622_v33 }
 0x5a7   :  { %12059 = vpow2.f32 %v8962_v0 }
 0x5ae   :  { %v12054_v7 = vpop.eup %12053 }
 0x5af   :  { %v1676_v47 = vadd.f32 1.0, %v12054_v7  ;;  %v12056_v12 = vpop.eup %12055 }
 0x5b0   :  { %v1677_v50 = vadd.f32 1.0, %v12056_v12  ;;  %v12058_v32 = vpop.eup %12057 }
 0x5b1   :  { %12061 = vrcp.f32 %v1676_v47  ;;  %v12060_v29 = vpop.eup %12059 }
 0x5b2   :  { %12063 = vrcp.f32 %v1677_v50  ;;  %v1678_v6 = vadd.f32 1.0, %v12060_v29 }
 0x5b4   :  { %12065 = vrcp.f32 %v1678_v6 }
 0x5bb   :  { %v12062_v41 = vpop.eup %12061 }
 0x5bc   :  { %v1687_v43 = vmul.f32 %v12062_v41, %v12058_v32  ;;  %v12064_v34 = vpop.eup %12063 }
 0x5bd   :  { %v1686_v2 = vmul.f32 %v12064_v34, %v13226_v20  ;;  %v292_v20 = vadd.f32 %v13058_v55, %v13078_v18 }
 0x5be   :  { %v12066_v5 = vpop.eup %12065 }
 0x5bf   :  { %v13272_v54 = vadd.f32 %v1687_v43, %v1686_v2 }
 0x5c1   :  { %12067 = vtanh.f32 %v13272_v54 }
 0x5cb   :  { %v12068_v26 = vpop.eup %12067 }
 0x5cc   :  { %v1690_v22 = vmul.f32 %v12068_v26, %v12066_v5 }
 0x5ce   :  { %1691 = vst.msk [vmem:[#allocation2 + $0x20] sm:$0xff] %vm954_vm1, %v1690_v22  ;;  %1763 = vmatmul.mubr.f32.vlgmr.msra.gmra.mrb[12].mxu0 %v1690_v22  ;;  %1834 = vmatmul.mubr.f32.vlgmr.msra.gmra.mrb[18].mxu1 %v1690_v22 }
 0x5cf   :  { %1692 = vst.msk [vmem:[#allocation2 + $0x18] sm:$0xff] %vm957_vm2, %v1690_v22  ;;  %9516 = vmatpush1.bf16.msra.mxu0 %v12851_v60  ;;  %9548 = vmatpush1.bf16.msra.mxu1 %v12948_v58 }
 0x5d0   :  { %9518 = vmatprep.subr.bf16.mxu0 %v12853_v63  ;;  %9550 = vmatprep.subr.bf16.mxu1 %v12950_v59 }
 0x5d1   :  { %1944 = vmatprep.mubr.f32.mxu0 %v14974_v52  ;;  %2015 = vmatprep.mubr.f32.mxu1 %v14974_v52 }
 0x5d3   :  { %9520 = vmatpush1.bf16.msra.mxu0 %v12862_v8  ;;  %9552 = vmatpush1.bf16.msra.mxu1 %v12957_v3 }
 0x5d4   :  { %9522 = vmatprep.subr.bf16.mxu0 %v12865_v10  ;;  %9554 = vmatprep.subr.bf16.mxu1 %v12960_v4 }
 0x5d7   :  { %9524 = vmatpush1.bf16.msra.mxu0 %v12876_v16  ;;  %9556 = vmatpush1.bf16.msra.mxu1 %v12969_v21 }
 0x5d8   :  { %9526 = vmatprep.subr.bf16.mxu0 %v12879_v17  ;;  %9558 = vmatprep.subr.bf16.mxu1 %v12972_v11 }
 0x5db   :  { %9528 = vmatpush1.bf16.msra.mxu0 %v12889_v24  ;;  %9560 = vmatpush1.bf16.msra.mxu1 %v12980_v38 }
 0x5dc   :  { %9530 = vmatprep.subr.bf16.mxu0 %v12892_v25  ;;  %9562 = vmatprep.subr.bf16.mxu1 %v12983_v19 }
 0x5df   :  { %9532 = vmatpush1.bf16.msra.mxu0 %v12901_v30  ;;  %9564 = vmatpush1.bf16.msra.mxu1 %v12991_v46 }
 0x5e0   :  { %9534 = vmatprep.subr.bf16.mxu0 %v12904_v31  ;;  %9566 = vmatprep.subr.bf16.mxu1 %v12994_v28 }
 0x5e3   :  { %9536 = vmatpush1.bf16.msra.mxu0 %v12913_v36  ;;  %9568 = vmatpush1.bf16.msra.mxu1 %v13002_v49 }
 0x5e4   :  { %9538 = vmatprep.subr.bf16.mxu0 %v12916_v37  ;;  %9570 = vmatprep.subr.bf16.mxu1 %v13005_v35 }
 0x5e7   :  { %9540 = vmatpush1.bf16.msra.mxu0 %v12925_v44  ;;  %9572 = vmatpush1.bf16.msra.mxu1 %v13013_v23 }
 0x5e8   :  { %9542 = vmatprep.subr.bf16.mxu0 %v12928_v45  ;;  %9574 = vmatprep.subr.bf16.mxu1 %v13016_v51 }
 0x5eb   :  { %9544 = vmatpush1.bf16.msra.mxu0 %v12937_v53  ;;  %9576 = vmatpush1.bf16.msra.mxu1 %v13024_v39 }
 0x5ec   :  { %9578 = vmatprep.subr.bf16.mxu0 %v12832_v48  ;;  %9610 = vmatprep.subr.bf16.mxu1 %v12867_v13 }
 0x6a1   :  { %v1764_v33 = vpop.f32.mrb[12].mxu0  ;;  %v1835_v0 = vpop.f32.mrb[18].mxu1 }
 0x6a2   :  { %v1765_v7 = vadd.f32 %v1764_v33, %v292_v20  ;;  %v1766_v47 = vpop.f32.mrb[13].mxu0  ;;  %v1837_v12 = vpop.f32.mrb[19].mxu1  ;;  %v11623_v48 = vadd.f32 %v1835_v0, %v13087_v40 }
 0x6a3   :  { %v1767_v50 = vadd.f32 %v1766_v47, %v294_v27  ;;  %v11624_v13 = vadd.f32 %v1837_v12, %v13090_v42  ;;  %v2246_v12 = vld [vmem:[#allocation11] sm:$0xff] }
 0x6a4   :  { %v8963_v32 = vmul.f32 -1.442695, %v1765_v7  ;;  %v8965_v41 = vmul.f32 -1.442695, %v11623_v48  ;;  %v2248_v48 = vld [vmem:[#allocation11 + $0x10] sm:$0xff] }
 0x6a5   :  { %v8964_v29 = vmul.f32 -1.442695, %v1767_v50  ;;  %v2250_v50 = vld [vmem:[#allocation11 + $0x20] sm:$0xff] }
 0x6a6   :  { %12069 = vpow2.f32 %v8963_v32 }
 0x6a7   :  { %12071 = vpow2.f32 %v8964_v29  ;;  %v9643_v29 = vpack.c.bf16 %v2250_v50, %v2246_v12  ;;  %v2287_v50 = vld [vmem:[#allocation11 + $0x148] sm:$0xff] }
 0x6a8   :  { %12073 = vtanh.f32 %v11624_v13  ;;  %v2252_v13 = vld [vmem:[#allocation11 + $0x30] sm:$0xff] }
 0x6a9   :  { %12075 = vpow2.f32 %v8965_v41  ;;  %v9675_v41 = vpack.c.bf16 %v2252_v13, %v2248_v48  ;;  %v2293_v13 = vld [vmem:[#allocation11 + $0x178] sm:$0xff] }
 0x6b0   :  { %v12070_v43 = vpop.eup %12069 }
 0x6b1   :  { %v1858_v55 = vadd.f32 1.0, %v12070_v43  ;;  %v12072_v34 = vpop.eup %12071  ;;  %v2255_v43 = vld [vmem:[#allocation11 + $0x48] sm:$0xff] }
 0x6b2   :  { %v1859_v56 = vadd.f32 1.0, %v12072_v34  ;;  %v12074_v6 = vpop.eup %12073  ;;  %v2257_v34 = vld [vmem:[#allocation11 + $0x58] sm:$0xff] }
 0x6b3   :  { %12077 = vrcp.f32 %v1858_v55  ;;  %v12076_v2 = vpop.eup %12075  ;;  %v2259_v55 = vld [vmem:[#allocation11 + $0x68] sm:$0xff] }
 0x6b4   :  { %12079 = vrcp.f32 %v1859_v56  ;;  %v1860_v20 = vadd.f32 1.0, %v12076_v2  ;;  %v9645_v56 = vpack.c.bf16 %v2259_v55, %v2255_v43  ;;  %v2254_v2 = vld [vmem:[#allocation11 + $0x40] sm:$0xff] }
 0x6b5   :  { %v2290_v43 = vld [vmem:[#allocation11 + $0x160] sm:$0xff] }
 0x6b6   :  { %12081 = vrcp.f32 %v1860_v20  ;;  %v2256_v20 = vld [vmem:[#allocation11 + $0x50] sm:$0xff] }
 0x6bd   :  { %v12078_v5 = vpop.eup %12077 }
 0x6be   :  { %v1869_v26 = vmul.f32 %v12078_v5, %v12074_v6  ;;  %v12080_v22 = vpop.eup %12079  ;;  %v2261_v6 = vld [vmem:[#allocation11 + $0x78] sm:$0xff]  ;;  %v2258_v5 = vld [vmem:[#allocation11 + $0x60] sm:$0xff] }
 0x6bf   :  { %v1868_v27 = vmul.f32 %v12080_v22, %v13272_v54  ;;  %v2253_v54 = vld [vmem:[#allocation11 + $0x38] sm:$0xff]  ;;  %v9647_v22 = vpack.c.bf16 %v2258_v5, %v2254_v2  ;;  %v2295_v5 = vld [vmem:[#allocation11 + $0x188] sm:$0xff] }
 0x6c0   :  { %v12082_v0 = vpop.eup %12081 }
 0x6c1   :  { %v13318_v33 = vadd.f32 %v1869_v26, %v1868_v27  ;;  %v9677_v26 = vpack.c.bf16 %v2261_v6, %v2257_v34  ;;  %v2260_v27 = vld [vmem:[#allocation11 + $0x70] sm:$0xff] }
 0x6c2   :  { %v2292_v6 = vld [vmem:[#allocation11 + $0x170] sm:$0xff] }
 0x6c3   :  { %12083 = vtanh.f32 %v13318_v33 }
 0x6cd   :  { %v12084_v7 = vpop.eup %12083 }
 0x6ce   :  { %v1872_v47 = vmul.f32 %v12084_v7, %v12082_v0  ;;  %v2263_v0 = vld [vmem:[#allocation11 + $0x88] sm:$0xff] }
 0x6cf   :  { %v2267_v7 = vld [vmem:[#allocation11 + $0xa8] sm:$0xff] }
 0x6d0   :  { %1873 = vst.msk [vmem:[#allocation2 + $0x28] sm:$0xff] %vm954_vm1, %v1872_v47  ;;  %1945 = vmatmul.mubr.f32.vlgmr.msra.gmra.mrb[10].mxu0 %v1872_v47  ;;  %2016 = vmatmul.mubr.f32.vlgmr.msra.gmra.mrb[20].mxu1 %v1872_v47 }
 0x6d1   :  { %1874 = vst.msk [vmem:[#allocation2 + $0x10] sm:$0xff] %vm957_vm2, %v1872_v47  ;;  %9580 = vmatpush1.bf16.msra.mxu0 %v12851_v60  ;;  %9612 = vmatpush1.bf16.msra.mxu1 %v12948_v58  ;;  %v298_v60 = vadd.f32 %v13062_v57, %v13078_v18  ;;  %v2249_v57 = vld [vmem:[#allocation11 + $0x18] sm:$0xff] }
 0x6d2   :  { %9582 = vmatprep.subr.bf16.mxu0 %v12853_v63  ;;  %9614 = vmatprep.subr.bf16.mxu1 %v12950_v59  ;;  %v300_v63 = vadd.f32 %v13064_v61, %v13075_v15  ;;  %v9673_v32 = vpack.c.bf16 %v2253_v54, %v2249_v57  ;;  %v2265_v47 = vld [vmem:[#allocation11 + $0x98] sm:$0xff]  ;;  %v2284_v54 = vld [vmem:[#allocation11 + $0x130] sm:$0xff] }
 0x6d3   :  { %2126 = vmatprep.mubr.f32.mxu0 %v14974_v52  ;;  %2197 = vmatprep.mubr.f32.mxu1 %v14974_v52 }
 0x6d5   :  { %9584 = vmatpush1.bf16.msra.mxu0 %v12862_v8  ;;  %9616 = vmatpush1.bf16.msra.mxu1 %v12957_v3 }
 0x6d6   :  { %9586 = vmatprep.subr.bf16.mxu0 %v12865_v10  ;;  %9618 = vmatprep.subr.bf16.mxu1 %v12960_v4 }
 0x6d9   :  { %9588 = vmatpush1.bf16.msra.mxu0 %v12876_v16  ;;  %9620 = vmatpush1.bf16.msra.mxu1 %v12969_v21 }
 0x6da   :  { %9590 = vmatprep.subr.bf16.mxu0 %v12879_v17  ;;  %9622 = vmatprep.subr.bf16.mxu1 %v12972_v11 }
 0x6dd   :  { %9592 = vmatpush1.bf16.msra.mxu0 %v12889_v24  ;;  %9624 = vmatpush1.bf16.msra.mxu1 %v12980_v38 }
 0x6de   :  { %9594 = vmatprep.subr.bf16.mxu0 %v12892_v25  ;;  %9626 = vmatprep.subr.bf16.mxu1 %v12983_v19 }
 0x6e1   :  { %9596 = vmatpush1.bf16.msra.mxu0 %v12901_v30  ;;  %9628 = vmatpush1.bf16.msra.mxu1 %v12991_v46 }
 0x6e2   :  { %9598 = vmatprep.subr.bf16.mxu0 %v12904_v31  ;;  %9630 = vmatprep.subr.bf16.mxu1 %v12994_v28 }
 0x6e5   :  { %9600 = vmatpush1.bf16.msra.mxu0 %v12913_v36  ;;  %9632 = vmatpush1.bf16.msra.mxu1 %v13002_v49 }
 0x6e6   :  { %9602 = vmatprep.subr.bf16.mxu0 %v12916_v37  ;;  %9634 = vmatprep.subr.bf16.mxu1 %v13005_v35 }
 0x6e9   :  { %9604 = vmatpush1.bf16.msra.mxu0 %v12925_v44  ;;  %9636 = vmatpush1.bf16.msra.mxu1 %v13013_v23 }
 0x6ea   :  { %9606 = vmatprep.subr.bf16.mxu0 %v12928_v45  ;;  %9638 = vmatprep.subr.bf16.mxu1 %v13016_v51  ;;  %v2247_v51 = vld [vmem:[#allocation11 + $0x8] sm:$0xff] }
 0x6ed   :  { %9608 = vmatpush1.bf16.msra.mxu0 %v12937_v53  ;;  %9640 = vmatpush1.bf16.msra.mxu1 %v13024_v39  ;;  %v2251_v39 = vld [vmem:[#allocation11 + $0x28] sm:$0xff] }
 0x6ee   :  { %v9641_v61 = vpack.c.bf16 %v2251_v39, %v2247_v51  ;;  %9674 = vmatprep.subr.bf16.mxu1 %v9673_v32  ;;  %v2282_v51 = vld [vmem:[#allocation11 + $0x120] sm:$0xff]  ;;  %v2291_v32 = vld [vmem:[#allocation11 + $0x168] sm:$0xff] }
 0x6ef   :  { %v9661_v48 = vpack.c.bf16 %v2291_v32, %v2287_v50 }
 0x6f0   :  { %9642 = vmatprep.subr.bf16.mxu0 %v9641_v61  ;;  %v2280_v61 = vld [vmem:[#allocation11 + $0x110] sm:$0xff] }
 0x6f1   :  { %v9691_v12 = vpack.c.bf16 %v2284_v54, %v2280_v61 }
 0x7a3   :  { %v1946_v8 = vpop.f32.mrb[10].mxu0  ;;  %v2017_v10 = vpop.f32.mrb[20].mxu1 }
 0x7a4   :  { %v1947_v16 = vadd.f32 %v1946_v8, %v298_v60  ;;  %v1948_v17 = vpop.f32.mrb[11].mxu0  ;;  %v2019_v24 = vpop.f32.mrb[21].mxu1  ;;  %v11625_v36 = vadd.f32 %v2017_v10, %v13087_v40  ;;  %v9649_v60 = vpack.c.bf16 %v2267_v7, %v2263_v0  ;;  %v2262_v8 = vld [vmem:[#allocation11 + $0x80] sm:$0xff] }
 0x7a5   :  { %v1949_v25 = vadd.f32 %v1948_v17, %v300_v63  ;;  %v11626_v37 = vadd.f32 %v2019_v24, %v13090_v42  ;;  %v2269_v63 = vld [vmem:[#allocation11 + $0xb8] sm:$0xff]  ;;  %v2266_v10 = vld [vmem:[#allocation11 + $0xa0] sm:$0xff]  ;;  %v2264_v24 = vld [vmem:[#allocation11 + $0x90] sm:$0xff] }
 0x7a6   :  { %v8966_v30 = vmul.f32 -1.442695, %v1947_v16  ;;  %v8968_v44 = vmul.f32 -1.442695, %v11625_v36  ;;  %v9681_v16 = vpack.c.bf16 %v2269_v63, %v2265_v47  ;;  %v9651_v17 = vpack.c.bf16 %v2266_v10, %v2262_v8  ;;  %v2275_v36 = vld [vmem:[#allocation11 + $0xe8] sm:$0xff]  ;;  %v2298_v0 = vld [vmem:[#allocation11 + $0x1a0] sm:$0xff] }
 0x7a7   :  { %v8967_v31 = vmul.f32 -1.442695, %v1949_v25  ;;  %v2268_v25 = vld [vmem:[#allocation11 + $0xb0] sm:$0xff]  ;;  %v2303_v10 = vld [vmem:[#allocation11 + $0x1c8] sm:$0xff] }
 0x7a8   :  { %12085 = vpow2.f32 %v8966_v30  ;;  %v9683_v30 = vpack.c.bf16 %v2268_v25, %v2264_v24  ;;  %v2300_v63 = vld [vmem:[#allocation11 + $0x1b0] sm:$0xff]  ;;  %v2309_v25 = vld [vmem:[#allocation11 + $0x1f8] sm:$0xff] }
 0x7a9   :  { %12087 = vpow2.f32 %v8967_v31  ;;  %v2271_v31 = vld [vmem:[#allocation11 + $0xc8] sm:$0xff] }
 0x7aa   :  { %12089 = vtanh.f32 %v11626_v37  ;;  %v2273_v37 = vld [vmem:[#allocation11 + $0xd8] sm:$0xff] }
 0x7ab   :  { %12091 = vpow2.f32 %v8968_v44  ;;  %v9653_v44 = vpack.c.bf16 %v2275_v36, %v2271_v31  ;;  %v2306_v31 = vld [vmem:[#allocation11 + $0x1e0] sm:$0xff] }
 0x7b2   :  { %v12086_v45 = vpop.eup %12085 }
 0x7b3   :  { %v2040_v53 = vadd.f32 1.0, %v12086_v45  ;;  %v12088_v58 = vpop.eup %12087  ;;  %v2277_v45 = vld [vmem:[#allocation11 + $0xf8] sm:$0xff] }
 0x7b4   :  { %v2041_v59 = vadd.f32 1.0, %v12088_v58  ;;  %v12090_v3 = vpop.eup %12089  ;;  %v2274_v58 = vld [vmem:[#allocation11 + $0xe0] sm:$0xff] }
 0x7b5   :  { %12093 = vrcp.f32 %v2040_v53  ;;  %v12092_v4 = vpop.eup %12091  ;;  %v2270_v53 = vld [vmem:[#allocation11 + $0xc0] sm:$0xff] }
 0x7b6   :  { %12095 = vrcp.f32 %v2041_v59  ;;  %v2042_v19 = vadd.f32 1.0, %v12092_v4  ;;  %v9685_v59 = vpack.c.bf16 %v2277_v45, %v2273_v37  ;;  %v2272_v4 = vld [vmem:[#allocation11 + $0xd0] sm:$0xff] }
 0x7b7   :  { %v2308_v45 = vld [vmem:[#allocation11 + $0x1f0] sm:$0xff] }
 0x7b8   :  { %12097 = vrcp.f32 %v2042_v19  ;;  %v2283_v19 = vld [vmem:[#allocation11 + $0x128] sm:$0xff] }
 0x7bf   :  { %v12094_v21 = vpop.eup %12093 }
 0x7c0   :  { %v2051_v11 = vmul.f32 %v12094_v21, %v12090_v3  ;;  %v12096_v38 = vpop.eup %12095  ;;  %v9655_v3 = vpack.c.bf16 %v2274_v58, %v2270_v53  ;;  %v2276_v21 = vld [vmem:[#allocation11 + $0xf0] sm:$0xff]  ;;  %v2312_v58 = vld [vmem:[#allocation11 + $0x208] sm:$0xff] }
 0x7c1   :  { %v2050_v46 = vmul.f32 %v12096_v38, %v13318_v33  ;;  %v9679_v33 = vpack.c.bf16 %v2260_v27, %v2256_v20  ;;  %v2279_v38 = vld [vmem:[#allocation11 + $0x108] sm:$0xff]  ;;  %v2301_v27 = vld [vmem:[#allocation11 + $0x1b8] sm:$0xff] }
 0x7c2   :  { %v12098_v49 = vpop.eup %12097 }
 0x7c3   :  { %v13362_v28 = vadd.f32 %v2051_v11, %v2050_v46  ;;  %v9687_v11 = vpack.c.bf16 %v2276_v21, %v2272_v4  ;;  %v2281_v46 = vld [vmem:[#allocation11 + $0x118] sm:$0xff] }
 0x7c4   :  { %v2314_v4 = vld [vmem:[#allocation11 + $0x218] sm:$0xff] }
 0x7c5   :  { %12099 = vtanh.f32 %v13362_v28  ;;  %v2318_v21 = vld [vmem:[#allocation11 + $0x238] sm:$0xff] }
 0x7cf   :  { %v12100_v35 = vpop.eup %12099 }
 0x7d0   :  { %v2054_v23 = vmul.f32 %v12100_v35, %v12098_v49  ;;  %v9657_v49 = vpack.c.bf16 %v2283_v19, %v2279_v38  ;;  %v2285_v35 = vld [vmem:[#allocation11 + $0x138] sm:$0xff]  ;;  %v304_v38 = vadd.f32 %v13066_v62, %v13078_v18  ;;  %v306_v19 = vadd.f32 %v13068_v1, %v13075_v15 }
 0x7d1   :  { %v9689_v39 = vpack.c.bf16 %v2285_v35, %v2281_v46 }
 0x7d2   :  { %2055 = vst.msk [vmem:[#allocation2 + $0x30] sm:$0xff] %vm954_vm1, %v2054_v23  ;;  %2127 = vmatmul.mubr.f32.vlgmr.msra.gmra.mrb[8].mxu0 %v2054_v23  ;;  %2198 = vmatmul.mubr.f32.vlgmr.msra.gmra.mrb[22].mxu1 %v2054_v23 }
 0x7d3   :  { %2056 = vst.msk [vmem:[#allocation2 + $0x8] sm:$0xff] %vm957_vm2, %v2054_v23  ;;  %2462 = vmatprep.mubr.f32.mxu0 %v14974_v52  ;;  %2575 = vmatprep.mubr.f32.mxu1 %v14974_v52  ;;  %v2278_v23 = vld [vmem:[#allocation11 + $0x100] sm:$0xff] }
 0x7d4   :  { %9644 = vmatpush1.bf16.msra.mxu0 %v9643_v29  ;;  %9676 = vmatpush1.bf16.msra.mxu1 %v9675_v41  ;;  %v9659_v57 = vpack.c.bf16 %v2282_v51, %v2278_v23  ;;  %v2289_v29 = vld [vmem:[#allocation11 + $0x158] sm:$0xff]  ;;  %v2286_v41 = vld [vmem:[#allocation11 + $0x140] sm:$0xff] }
 0x7d5   :  { %9646 = vmatprep.subr.bf16.mxu0 %v9645_v56  ;;  %9678 = vmatprep.subr.bf16.mxu1 %v9677_v26  ;;  %v9693_v55 = vpack.c.bf16 %v2293_v13, %v2289_v29  ;;  %v9663_v34 = vpack.c.bf16 %v2290_v43, %v2286_v41  ;;  %v2288_v56 = vld [vmem:[#allocation11 + $0x150] sm:$0xff]  ;;  %v2299_v26 = vld [vmem:[#allocation11 + $0x1a8] sm:$0xff] }
 0x7d6   :  { %v9695_v2 = vpack.c.bf16 %v2292_v6, %v2288_v56  ;;  %v9665_v20 = vpack.c.bf16 %v2299_v26, %v2295_v5  ;;  %v2311_v6 = vld [vmem:[#allocation11 + $0x200] sm:$0xff]  ;;  %v2320_v5 = vld [vmem:[#allocation11 + $0x248] sm:$0xff] }
 0x7d7   :  { %v2324_v26 = vld [vmem:[#allocation11 + $0x268] sm:$0xff] }
 0x7d8   :  { %9648 = vmatpush1.bf16.msra.mxu0 %v9647_v22  ;;  %9680 = vmatpush1.bf16.msra.mxu1 %v9679_v33  ;;  %v2297_v22 = vld [vmem:[#allocation11 + $0x198] sm:$0xff]  ;;  %v2294_v33 = vld [vmem:[#allocation11 + $0x180] sm:$0xff] }
 0x7d9   :  { %9650 = vmatprep.subr.bf16.mxu0 %v9649_v60  ;;  %9682 = vmatprep.subr.bf16.mxu1 %v9681_v16  ;;  %v9697_v7 = vpack.c.bf16 %v2301_v27, %v2297_v22  ;;  %v9667_v47 = vpack.c.bf16 %v2298_v0, %v2294_v33  ;;  %v2296_v60 = vld [vmem:[#allocation11 + $0x190] sm:$0xff]  ;;  %v2307_v16 = vld [vmem:[#allocation11 + $0x1e8] sm:$0xff]  ;;  %v9709_v33 = vpack.c.bf16 %v2324_v26, %v2320_v5  ;;  %v2319_v0 = vld [vmem:[#allocation11 + $0x240] sm:$0xff] }
 0x7da   :  { %v9699_v8 = vpack.c.bf16 %v2300_v63, %v2296_v60  ;;  %v9669_v24 = vpack.c.bf16 %v2307_v16, %v2303_v10  ;;  %v2313_v22 = vld [vmem:[#allocation11 + $0x210] sm:$0xff]  ;;  %v2326_v63 = vld [vmem:[#allocation11 + $0x278] sm:$0xff]  ;;  %v2328_v10 = vld [vmem:[#allocation11 + $0x288] sm:$0xff] }
 0x7db   :  { %v2332_v16 = vld [vmem:[#allocation11 + $0x2a8] sm:$0xff]  ;;  %v2355_v26 = vld [vmem:[#allocation11 + $0x360] sm:$0xff] }
 0x7dc   :  { %9652 = vmatpush1.bf16.msra.mxu0 %v9651_v17  ;;  %9684 = vmatpush1.bf16.msra.mxu1 %v9683_v30  ;;  %v2305_v17 = vld [vmem:[#allocation11 + $0x1d8] sm:$0xff]  ;;  %v2302_v30 = vld [vmem:[#allocation11 + $0x1c0] sm:$0xff] }
 0x7dd   :  { %9654 = vmatprep.subr.bf16.mxu0 %v9653_v44  ;;  %9686 = vmatprep.subr.bf16.mxu1 %v9685_v59  ;;  %v9701_v36 = vpack.c.bf16 %v2309_v25, %v2305_v17  ;;  %v9671_v37 = vpack.c.bf16 %v2306_v31, %v2302_v30  ;;  %v2304_v44 = vld [vmem:[#allocation11 + $0x1d0] sm:$0xff]  ;;  %v2316_v59 = vld [vmem:[#allocation11 + $0x228] sm:$0xff]  ;;  %v2327_v31 = vld [vmem:[#allocation11 + $0x280] sm:$0xff] }
 0x7de   :  { %v9703_v53 = vpack.c.bf16 %v2308_v45, %v2304_v44  ;;  %v2325_v17 = vld [vmem:[#allocation11 + $0x270] sm:$0xff]  ;;  %v13384_v25 = vld [vmem:[#allocation2 + $0x8] sm:$0xff]  ;;  %v2330_v45 = vld [vmem:[#allocation11 + $0x298] sm:$0xff] }
 0x7e0   :  { %9656 = vmatpush1.bf16.msra.mxu0 %v9655_v3  ;;  %9688 = vmatpush1.bf16.msra.mxu1 %v9687_v11  ;;  %v9705_v3 = vpack.c.bf16 %v2316_v59, %v2312_v58  ;;  %v9737_v11 = vpack.c.bf16 %v2318_v21, %v2314_v4  ;;  %v2329_v58 = vld [vmem:[#allocation11 + $0x290] sm:$0xff]  ;;  %v2340_v4 = vld [vmem:[#allocation11 + $0x2e8] sm:$0xff] }
 0x7e1   :  { %9658 = vmatprep.subr.bf16.mxu0 %v9657_v49  ;;  %9690 = vmatprep.subr.bf16.mxu1 %v9689_v39  ;;  %v2333_v59 = vld [vmem:[#allocation11 + $0x2b0] sm:$0xff] }
 0x7e4   :  { %9660 = vmatpush1.bf16.msra.mxu0 %v9659_v57  ;;  %9692 = vmatpush1.bf16.msra.mxu1 %v9691_v12 }
 0x7e5   :  { %9662 = vmatprep.subr.bf16.mxu0 %v9661_v48  ;;  %9694 = vmatprep.subr.bf16.mxu1 %v9693_v55 }
 0x7e8   :  { %9664 = vmatpush1.bf16.msra.mxu0 %v9663_v34  ;;  %9696 = vmatpush1.bf16.msra.mxu1 %v9695_v2  ;;  %v2315_v2 = vld [vmem:[#allocation11 + $0x220] sm:$0xff] }
 0x7e9   :  { %9666 = vmatprep.subr.bf16.mxu0 %v9665_v20  ;;  %9698 = vmatprep.subr.bf16.mxu1 %v9697_v7  ;;  %v2317_v20 = vld [vmem:[#allocation11 + $0x230] sm:$0xff]  ;;  %v9707_v27 = vpack.c.bf16 %v2315_v2, %v2311_v6  ;;  %v2322_v7 = vld [vmem:[#allocation11 + $0x258] sm:$0xff] }
 0x7ea   :  { %v9739_v60 = vpack.c.bf16 %v2317_v20, %v2313_v22  ;;  %v9741_v30 = vpack.c.bf16 %v2326_v63, %v2322_v7  ;;  %v2354_v6 = vld [vmem:[#allocation11 + $0x358] sm:$0xff]  ;;  %v2353_v20 = vld [vmem:[#allocation11 + $0x350] sm:$0xff]  ;;  %v2359_v63 = vld [vmem:[#allocation11 + $0x380] sm:$0xff] }
 0x7eb   :  { %v2358_v22 = vld [vmem:[#allocation11 + $0x378] sm:$0xff] }
 0x7ec   :  { %9668 = vmatpush1.bf16.msra.mxu0 %v9667_v47  ;;  %9700 = vmatpush1.bf16.msra.mxu1 %v9699_v8  ;;  %v2321_v8 = vld [vmem:[#allocation11 + $0x250] sm:$0xff] }
 0x7ed   :  { %9670 = vmatprep.subr.bf16.mxu0 %v9669_v24  ;;  %9702 = vmatprep.subr.bf16.mxu1 %v9701_v36  ;;  %v2331_v36 = vld [vmem:[#allocation11 + $0x2a0] sm:$0xff]  ;;  %v9743_v44 = vpack.c.bf16 %v2325_v17, %v2321_v8  ;;  %v2362_v8 = vld [vmem:[#allocation11 + $0x398] sm:$0xff] }
 0x7ee   :  { %v9715_v21 = vpack.c.bf16 %v2331_v36, %v2327_v31  ;;  %v2363_v17 = vld [vmem:[#allocation11 + $0x3a0] sm:$0xff]  ;;  %v2365_v31 = vld [vmem:[#allocation11 + $0x3b0] sm:$0xff]  ;;  %v2368_v36 = vld [vmem:[#allocation11 + $0x3c8] sm:$0xff] }
 0x7f0   :  { %9672 = vmatpush1.bf16.msra.mxu0 %v9671_v37  ;;  %9704 = vmatpush1.bf16.msra.mxu1 %v9703_v53  ;;  %v9713_v37 = vpack.c.bf16 %v2332_v16, %v2328_v10  ;;  %v2334_v53 = vld [vmem:[#allocation11 + $0x2b8] sm:$0xff] }
 0x7f1   :  { %9706 = vmatprep.subr.bf16.mxu0 %v9705_v3  ;;  %9738 = vmatprep.subr.bf16.mxu1 %v9737_v11  ;;  %v2336_v3 = vld [vmem:[#allocation11 + $0x2c8] sm:$0xff]  ;;  %v13390_v11 = vld [vmem:[#allocation2 + $0x10] sm:$0xff] }
 0x8a5   :  { %v2128_v46 = vpop.f32.mrb[8].mxu0  ;;  %v2199_v49 = vpop.f32.mrb[22].mxu1 }
 0x8a6   :  { %v2129_v35 = vadd.f32 %v2128_v46, %v304_v38  ;;  %v2130_v23 = vpop.f32.mrb[9].mxu0  ;;  %v2201_v51 = vpop.f32.mrb[23].mxu1  ;;  %v11627_v54 = vadd.f32 %v2199_v49, %v13087_v40  ;;  %v9745_v38 = vpack.c.bf16 %v2334_v53, %v2330_v45  ;;  %v2339_v46 = vld [vmem:[#allocation11 + $0x2e0] sm:$0xff]  ;;  %v9747_v49 = vpack.c.bf16 %v2333_v59, %v2329_v58  ;;  %v2370_v58 = vld [vmem:[#allocation11 + $0x3d8] sm:$0xff] }
 0x8a7   :  { %v2131_v39 = vadd.f32 %v2130_v23, %v306_v19  ;;  %v11628_v12 = vadd.f32 %v2201_v51, %v13090_v42  ;;  %v2335_v19 = vld [vmem:[#allocation11 + $0x2c0] sm:$0xff]  ;;  %v2338_v23 = vld [vmem:[#allocation11 + $0x2d8] sm:$0xff]  ;;  %v9731_v45 = vpack.c.bf16 %v2363_v17, %v2359_v63  ;;  %v2933_v63 = vld [vmem:[#allocation12 + $0x290] sm:$0xff] }
 0x8a8   :  { %v8969_v57 = vmul.f32 -1.442695, %v2129_v35  ;;  %v8971_v50 = vmul.f32 -1.442695, %v11627_v54  ;;  %v9717_v35 = vpack.c.bf16 %v2340_v4, %v2336_v3  ;;  %v2342_v51 = vld [vmem:[#allocation11 + $0x2f8] sm:$0xff]  ;;  %v2348_v54 = vld [vmem:[#allocation11 + $0x328] sm:$0xff] }
 0x8a9   :  { %v8970_v61 = vmul.f32 -1.442695, %v2131_v39  ;;  %v2337_v39 = vld [vmem:[#allocation11 + $0x2d0] sm:$0xff]  ;;  %v2374_v59 = vld [vmem:[#allocation11 + $0x3f8] sm:$0xff] }
 0x8aa   :  { %12101 = vpow2.f32 %v8969_v57  ;;  %v2341_v57 = vld [vmem:[#allocation11 + $0x2f0] sm:$0xff] }
 0x8ab   :  { %12103 = vpow2.f32 %v8970_v61  ;;  %v2344_v61 = vld [vmem:[#allocation11 + $0x308] sm:$0xff] }
 0x8ac   :  { %12105 = vtanh.f32 %v11628_v12  ;;  %v13396_v12 = vld [vmem:[#allocation2 + $0x18] sm:$0xff] }
 0x8ad   :  { %12107 = vpow2.f32 %v8971_v50  ;;  %v9719_v50 = vpack.c.bf16 %v2339_v46, %v2335_v19  ;;  %v2369_v19 = vld [vmem:[#allocation11 + $0x3d0] sm:$0xff] }
 0x8ae   :  { %v2373_v46 = vld [vmem:[#allocation11 + $0x3f0] sm:$0xff] }
 0x8b4   :  { %v12102_v32 = vpop.eup %12101 }
 0x8b5   :  { %v2221_v62 = vadd.f32 1.0, %v12102_v32  ;;  %v12104_v18 = vpop.eup %12103  ;;  %v9749_v32 = vpack.c.bf16 %v2342_v51, %v2338_v23  ;;  %v9765_v23 = vpack.c.bf16 %v2374_v59, %v2370_v58  ;;  %v2918_v51 = vld [vmem:[#allocation12 + $0x218] sm:$0xff]  ;;  %v2945_v58 = vld [vmem:[#allocation12 + $0x2f0] sm:$0xff]  ;;  %v2948_v59 = vld [vmem:[#allocation12 + $0x308] sm:$0xff] }
 0x8b6   :  { %v2222_v1 = vadd.f32 1.0, %v12104_v18  ;;  %v12106_v15 = vpop.eup %12105  ;;  %v2347_v18 = vld [vmem:[#allocation11 + $0x320] sm:$0xff] }
 0x8b7   :  { %12109 = vrcp.f32 %v2221_v62  ;;  %v12108_v29 = vpop.eup %12107  ;;  %v2343_v62 = vld [vmem:[#allocation11 + $0x300] sm:$0xff] }
 0x8b8   :  { %12111 = vrcp.f32 %v2222_v1  ;;  %v2223_v43 = vadd.f32 1.0, %v12108_v29  ;;  %v9751_v1 = vpack.c.bf16 %v2341_v57, %v2337_v39  ;;  %v2346_v29 = vld [vmem:[#allocation11 + $0x318] sm:$0xff] }
 0x8b9   :  { %v2922_v39 = vld [vmem:[#allocation12 + $0x238] sm:$0xff] }
 0x8ba   :  { %12113 = vrcp.f32 %v2223_v43  ;;  %v2352_v43 = vld [vmem:[#allocation11 + $0x348] sm:$0xff] }
 0x8c1   :  { %v12110_v48 = vpop.eup %12109 }
 0x8c2   :  { %v2232_v13 = vmul.f32 %v12110_v48, %v12106_v15  ;;  %v12112_v41 = vpop.eup %12111  ;;  %v9721_v15 = vpack.c.bf16 %v2348_v54, %v2344_v61  ;;  %v2350_v48 = vld [vmem:[#allocation11 + $0x338] sm:$0xff]  ;;  %v9767_v54 = vpack.c.bf16 %v2373_v46, %v2369_v19  ;;  %v2951_v19 = vld [vmem:[#allocation12 + $0x320] sm:$0xff] }
 0x8c3   :  { %v2231_v55 = vmul.f32 %v12112_v41, %v13362_v28  ;;  %v2323_v28 = vld [vmem:[#allocation11 + $0x260] sm:$0xff]  ;;  %v2349_v41 = vld [vmem:[#allocation11 + $0x330] sm:$0xff] }
 0x8c4   :  { %v12114_v42 = vpop.eup %12113  ;;  %v9711_v24 = vpack.c.bf16 %v2323_v28, %v2319_v0  ;;  %v2364_v0 = vld [vmem:[#allocation11 + $0x3a8] sm:$0xff] }
 0x8c5   :  { %v2233_v40 = vadd.f32 %v2232_v13, %v2231_v55  ;;  %v2345_v13 = vld [vmem:[#allocation11 + $0x310] sm:$0xff]  ;;  %v2356_v55 = vld [vmem:[#allocation11 + $0x368] sm:$0xff] }
 0x8c6   :  { %v9755_v2 = vpack.c.bf16 %v2349_v41, %v2345_v13  ;;  %v9725_v5 = vpack.c.bf16 %v2356_v55, %v2352_v43  ;;  %v13408_v28 = vld [vmem:[#allocation2 + $0x28] sm:$0xff]  ;;  %v2923_v43 = vld [vmem:[#allocation12 + $0x240] sm:$0xff] }
 0x8c7   :  { %12115 = vtanh.f32 %v2233_v40  ;;  %v13402_v40 = vld [vmem:[#allocation2 + $0x20] sm:$0xff] }
 0x8c8   :  { %v2927_v55 = vld [vmem:[#allocation12 + $0x260] sm:$0xff] }
 0x8d1   :  { %v12116_v34 = vpop.eup %12115 }
 0x8d2   :  { %v2235_v56 = vmul.f32 %v12116_v34, %v12114_v42  ;;  %v9723_v42 = vpack.c.bf16 %v2347_v18, %v2343_v62  ;;  %v9753_v34 = vpack.c.bf16 %v2350_v48, %v2346_v29  ;;  %v2915_v62 = vld [vmem:[#allocation12 + $0x200] sm:$0xff]  ;;  %v2917_v29 = vld [vmem:[#allocation12 + $0x210] sm:$0xff] }
 0x8d3   :  { %v2919_v18 = vld [vmem:[#allocation12 + $0x220] sm:$0xff]  ;;  %v2921_v48 = vld [vmem:[#allocation12 + $0x230] sm:$0xff] }
 0x8d4   :  { %2236 = vst.msk [vmem:[#allocation2 + $0x38] sm:$0xff] %vm954_vm1, %v2235_v56  ;;  %v13432_v13 = vpack.c.bf16 %v2919_v18, %v2915_v62  ;;  %v2955_v18 = vld [vmem:[#allocation12 + $0x340] sm:$0xff] }
 0x8d5   :  { %2237 = vst.msk [vmem:[#allocation2] sm:$0xff] %vm957_vm2, %v2235_v56  ;;  %v2351_v56 = vld [vmem:[#allocation11 + $0x340] sm:$0xff] }
 0x8d6   :  { %v9727_v7 = vpack.c.bf16 %v2355_v26, %v2351_v56  ;;  %v2930_v56 = vld [vmem:[#allocation12 + $0x278] sm:$0xff]  ;;  %v2929_v26 = vld [vmem:[#allocation12 + $0x270] sm:$0xff] }
 0x8db   :  { %v13420_v61 = vld [vmem:[#allocation2 + $0x38] sm:$0xff] }
 0x8dc   :  { %v13378_v47 = vld [vmem:[#allocation2] sm:$0xff] }
 0x8dd   :  { %2463 = vmatmul.mubr.f32.vlgmr.msra.gmra.mrb[16].mxu0 %v13378_v47  ;;  %2576 = vmatmul.mubr.f32.vlgmr.msra.gmra.mrb[24].mxu1 %v13378_v47 }
 0x8de   :  { %9708 = vmatpush1.bf16.msra.mxu0 %v9707_v27  ;;  %2468 = vmatprep.mubr.f32.mxu0 %v14974_v52  ;;  %v2357_v27 = vld [vmem:[#allocation11 + $0x370] sm:$0xff] }
 0x8df   :  { %2581 = vmatprep.mubr.f32.mxu1 %v14974_v52  ;;  %9710 = vmatprep.subr.bf16.mxu0 %v9709_v33  ;;  %v2360_v33 = vld [vmem:[#allocation11 + $0x388] sm:$0xff]  ;;  %v9759_v10 = vpack.c.bf16 %v2357_v27, %v2353_v20  ;;  %v2931_v27 = vld [vmem:[#allocation12 + $0x280] sm:$0xff] }
 0x8e0   :  { %9740 = vmatpush1.bf16.msra.mxu1 %v9739_v60  ;;  %v9757_v60 = vpack.c.bf16 %v2358_v22, %v2354_v6  ;;  %v9729_v16 = vpack.c.bf16 %v2364_v0, %v2360_v33  ;;  %v2925_v6 = vld [vmem:[#allocation12 + $0x250] sm:$0xff]  ;;  %v13442_v22 = vpack.c.bf16 %v2927_v55, %v2923_v43  ;;  %v2935_v33 = vld [vmem:[#allocation12 + $0x2a0] sm:$0xff] }
 0x8e1   :  { %2469 = vmatmul.mubr.f32.gmra.mrb[18].mxu0 %v13384_v25  ;;  %2582 = vmatmul.mubr.f32.gmra.mrb[26].mxu1 %v13384_v25  ;;  %v13451_v0 = vpack.c.bf16 %v2929_v26, %v2925_v6  ;;  %v13457_v17 = vpack.c.bf16 %v2935_v33, %v2931_v27  ;;  %v2957_v43 = vld [vmem:[#allocation12 + $0x350] sm:$0xff]  ;;  %v2966_v26 = vld [vmem:[#allocation12 + $0x398] sm:$0xff]  ;;  %v2967_v33 = vld [vmem:[#allocation12 + $0x3a0] sm:$0xff] }
 0x8e2   :  { %9712 = vmatpush1.bf16.msra.mxu0 %v9711_v24  ;;  %2474 = vmatprep.mubr.f32.mxu0 %v14974_v52  ;;  %v2366_v24 = vld [vmem:[#allocation11 + $0x3b8] sm:$0xff]  ;;  %v2961_v55 = vld [vmem:[#allocation12 + $0x370] sm:$0xff] }
 0x8e3   :  { %2587 = vmatprep.mubr.f32.mxu1 %v14974_v52  ;;  %9742 = vmatprep.subr.bf16.mxu1 %v9741_v30  ;;  %v2361_v30 = vld [vmem:[#allocation11 + $0x390] sm:$0xff]  ;;  %v9761_v53 = vpack.c.bf16 %v2366_v24, %v2362_v8 }
 0x8e4   :  { %9714 = vmatprep.subr.bf16.mxu0 %v9713_v37  ;;  %9744 = vmatpush1.bf16.msra.mxu1 %v9743_v44  ;;  %v2372_v37 = vld [vmem:[#allocation11 + $0x3e8] sm:$0xff]  ;;  %v13414_v44 = vld [vmem:[#allocation2 + $0x30] sm:$0xff]  ;;  %v9763_v3 = vpack.c.bf16 %v2365_v31, %v2361_v30  ;;  %v2939_v30 = vld [vmem:[#allocation12 + $0x2c0] sm:$0xff] }
 0x8e5   :  { %2475 = vmatmul.mubr.f32.gmra.mrb[20].mxu0 %v13390_v11  ;;  %2588 = vmatmul.mubr.f32.gmra.mrb[28].mxu1 %v13390_v11  ;;  %v9733_v4 = vpack.c.bf16 %v2372_v37, %v2368_v36  ;;  %v2937_v8 = vld [vmem:[#allocation12 + $0x2b0] sm:$0xff]  ;;  %v2943_v31 = vld [vmem:[#allocation12 + $0x2e0] sm:$0xff]  ;;  %v2942_v37 = vld [vmem:[#allocation12 + $0x2d8] sm:$0xff] }
 0x8e6   :  { %9716 = vmatpush1.bf16.msra.mxu0 %v9715_v21  ;;  %2480 = vmatprep.mubr.f32.mxu0 %v14974_v52  ;;  %v2367_v21 = vld [vmem:[#allocation11 + $0x3c0] sm:$0xff] }
 0x8e7   :  { %2593 = vmatprep.mubr.f32.mxu1 %v14974_v52  ;;  %9746 = vmatprep.subr.bf16.mxu1 %v9745_v38  ;;  %v2371_v38 = vld [vmem:[#allocation11 + $0x3e0] sm:$0xff] }
 0x8e8   :  { %9748 = vmatpush1.bf16.msra.mxu1 %v9747_v49  ;;  %9718 = vmatprep.subr.bf16.mxu0 %v9717_v35  ;;  %v2916_v49 = vld [vmem:[#allocation12 + $0x208] sm:$0xff]  ;;  %v9735_v57 = vpack.c.bf16 %v2371_v38, %v2367_v21  ;;  %v2947_v38 = vld [vmem:[#allocation12 + $0x300] sm:$0xff] }
 0x8e9   :  { %2481 = vmatmul.mubr.f32.gmra.mrb[22].mxu0 %v13396_v12  ;;  %2594 = vmatmul.mubr.f32.gmra.mrb[30].mxu1 %v13396_v12  ;;  %v2920_v35 = vld [vmem:[#allocation12 + $0x228] sm:$0xff] }
 0x8ea   :  { %2486 = vmatprep.mubr.f32.mxu0 %v14974_v52  ;;  %2599 = vmatprep.mubr.f32.mxu1 %v14974_v52 }
 0x8eb   :  { %9720 = vmatpush1.bf16.msra.mxu0 %v9719_v50  ;;  %9750 = vmatprep.subr.bf16.mxu1 %v9749_v32  ;;  %v13422_v50 = vpack.c.bf16 %v2920_v35, %v2916_v49  ;;  %v13426_v32 = vpack.c.bf16 %v2922_v39, %v2918_v51  ;;  %v2950_v49 = vld [vmem:[#allocation12 + $0x318] sm:$0xff]  ;;  %v2953_v51 = vld [vmem:[#allocation12 + $0x330] sm:$0xff]  ;;  %v2956_v39 = vld [vmem:[#allocation12 + $0x348] sm:$0xff] }
 0x8ec   :  { %9752 = vmatpush1.bf16.msra.mxu1 %v9751_v1  ;;  %9722 = vmatprep.subr.bf16.mxu0 %v9721_v15  ;;  %v2924_v1 = vld [vmem:[#allocation12 + $0x248] sm:$0xff]  ;;  %v2954_v35 = vld [vmem:[#allocation12 + $0x338] sm:$0xff] }
 0x8ed   :  { %2487 = vmatmul.mubr.f32.gmra.mrb[24].mxu0 %v13402_v40  ;;  %2600 = vmatmul.mubr.f32.gmra.mrb[32].mxu1 %v13402_v40  ;;  %v2928_v15 = vld [vmem:[#allocation12 + $0x268] sm:$0xff]  ;;  %v13493_v62 = vpack.c.bf16 %v2954_v35, %v2950_v49 }
 0x8ee   :  { %2492 = vmatprep.mubr.f32.mxu0 %v14974_v52  ;;  %2605 = vmatprep.mubr.f32.mxu1 %v14974_v52  ;;  %v13434_v41 = vpack.c.bf16 %v2928_v15, %v2924_v1  ;;  %v2958_v1 = vld [vmem:[#allocation12 + $0x358] sm:$0xff] }
 0x8ef   :  { %9724 = vmatpush1.bf16.msra.mxu0 %v9723_v42  ;;  %9754 = vmatprep.subr.bf16.mxu1 %v9753_v34  ;;  %v13436_v42 = vpack.c.bf16 %v2921_v48, %v2917_v29  ;;  %v2926_v34 = vld [vmem:[#allocation12 + $0x258] sm:$0xff]  ;;  %v2959_v29 = vld [vmem:[#allocation12 + $0x360] sm:$0xff] }
 0x8f0   :  { %9756 = vmatpush1.bf16.msra.mxu1 %v9755_v2  ;;  %9726 = vmatprep.subr.bf16.mxu0 %v9725_v5  ;;  %v2932_v2 = vld [vmem:[#allocation12 + $0x288] sm:$0xff]  ;;  %v13446_v20 = vpack.c.bf16 %v2930_v56, %v2926_v34  ;;  %v2962_v48 = vld [vmem:[#allocation12 + $0x378] sm:$0xff]  ;;  %v13507_v6 = vpack.c.bf16 %v2959_v29, %v2955_v18 }
 0x8f1   :  { %2493 = vmatmul.mubr.f32.gmra.mrb[26].mxu0 %v13408_v28  ;;  %2606 = vmatmul.mubr.f32.gmra.mrb[34].mxu1 %v13408_v28  ;;  %v2936_v5 = vld [vmem:[#allocation12 + $0x2a8] sm:$0xff] }
 0x8f2   :  { %2498 = vmatprep.mubr.f32.mxu0 %v14974_v52  ;;  %2611 = vmatprep.mubr.f32.mxu1 %v14974_v52  ;;  %v2964_v34 = vld [vmem:[#allocation12 + $0x388] sm:$0xff] }
 0x8f3   :  { %9728 = vmatpush1.bf16.msra.mxu0 %v9727_v7  ;;  %9758 = vmatprep.subr.bf16.mxu1 %v9757_v60  ;;  %v2934_v7 = vld [vmem:[#allocation12 + $0x298] sm:$0xff]  ;;  %v2968_v56 = vld [vmem:[#allocation12 + $0x3a8] sm:$0xff] }
 0x8f4   :  { %9760 = vmatpush1.bf16.msra.mxu1 %v9759_v10  ;;  %9730 = vmatprep.subr.bf16.mxu0 %v9729_v16  ;;  %v2938_v60 = vld [vmem:[#allocation12 + $0x2b8] sm:$0xff]  ;;  %v2940_v10 = vld [vmem:[#allocation12 + $0x2c8] sm:$0xff]  ;;  %v13515_v27 = vpack.c.bf16 %v2968_v56, %v2964_v34 }
 0x8f5   :  { %2499 = vmatmul.mubr.f32.gmra.mrb[28].mxu0 %v13414_v44  ;;  %2612 = vmatmul.mubr.f32.gmra.mrb[36].mxu1 %v13414_v44  ;;  %v2944_v16 = vld [vmem:[#allocation12 + $0x2e8] sm:$0xff]  ;;  %v13461_v24 = vpack.c.bf16 %v2938_v60, %v2934_v7  ;;  %v2970_v7 = vld [vmem:[#allocation12 + $0x3b8] sm:$0xff]  ;;  %v2965_v60 = vld [vmem:[#allocation12 + $0x390] sm:$0xff] }
 0x8f6   :  { %2504 = vmatprep.mubr.f32.mxu0 %v14974_v52  ;;  %2617 = vmatprep.mubr.f32.mxu1 %v14974_v52  ;;  %v13467_v36 = vpack.c.bf16 %v2944_v16, %v2940_v10  ;;  %v2976_v10 = vld [vmem:[#allocation12 + $0x3e8] sm:$0xff] }
 0x8f7   :  { %9732 = vmatpush1.bf16.msra.mxu0 %v9731_v45  ;;  %9762 = vmatprep.subr.bf16.mxu1 %v9761_v53  ;;  %v2946_v45 = vld [vmem:[#allocation12 + $0x2f8] sm:$0xff]  ;;  %v2941_v53 = vld [vmem:[#allocation12 + $0x2d0] sm:$0xff]  ;;  %v14976_v34 = vld [vmem:[#allocation24_spill] sm:$0xff] }
 0x8f8   :  { %9764 = vmatpush1.bf16.msra.mxu1 %v9763_v3  ;;  %9734 = vmatprep.subr.bf16.mxu0 %v9733_v4  ;;  %v2952_v3 = vld [vmem:[#allocation12 + $0x328] sm:$0xff]  ;;  %v13475_v4 = vpack.c.bf16 %v2943_v31, %v2939_v30  ;;  %v13477_v21 = vpack.c.bf16 %v2946_v45, %v2942_v37  ;;  %v13525_v30 = vpack.c.bf16 %v2970_v7, %v2966_v26  ;;  %v2974_v31 = vld [vmem:[#allocation12 + $0x3d8] sm:$0xff] }
 0x8f9   :  { %2505 = vmatmul.mubr.f32.gmra.mrb[30].mxu0 %v13420_v61  ;;  %2618 = vmatmul.mubr.f32.gmra.mrb[38].mxu1 %v13420_v61  ;;  %v13483_v46 = vpack.c.bf16 %v2952_v3, %v2948_v59  ;;  %v2978_v37 = vld [vmem:[#allocation12 + $0x3f8] sm:$0xff]  ;;  %v2973_v59 = vld [vmem:[#allocation12 + $0x3d0] sm:$0xff] }
 0x8fa   :  { %9766 = vmatprep.subr.bf16.mxu1 %v9765_v23  ;;  %2720 = vmatprep.mubr.f32.mxu0 %v14974_v52  ;;  %v2949_v23 = vld [vmem:[#allocation12 + $0x310] sm:$0xff] }
 0x8fb   :  { %9736 = vmatpush1.bf16.msra.mxu0 %v9735_v57  ;;  %2833 = vmatprep.mubr.f32.mxu1 %v14974_v52  ;;  %v2960_v57 = vld [vmem:[#allocation12 + $0x368] sm:$0xff]  ;;  %v2977_v3 = vld [vmem:[#allocation12 + $0x3f0] sm:$0xff] }
 0x8fc   :  { %9768 = vmatpush1.bf16.msra.mxu1 %v9767_v54  ;;  %9770 = vmatprep.subr.bf16.mxu0 %v13422_v50  ;;  %v13491_v54 = vpack.c.bf16 %v2951_v19, %v2947_v38  ;;  %v13499_v15 = vpack.c.bf16 %v2960_v57, %v2956_v39  ;;  %v13537_v38 = vpack.c.bf16 %v2978_v37, %v2974_v31 }
 0x8fd   :  { %9802 = vmatprep.subr.bf16.mxu1 %v13426_v32  ;;  %v13545_v49 = vpack.c.bf16 %v2977_v3, %v2973_v59 }
 0x901   :  { %2721 = vmatmul.mubr.f32.vlgmr.msra.gmra.mrb[30].mxu0 %v13378_v47  ;;  %2834 = vmatmul.mubr.f32.vlgmr.msra.gmra.mrb[38].mxu1 %v13378_v47  ;;  %v13449_v47 = vpack.c.bf16 %v2936_v5, %v2932_v2  ;;  %v13509_v2 = vpack.c.bf16 %v2962_v48, %v2958_v1  ;;  %v2963_v5 = vld [vmem:[#allocation12 + $0x380] sm:$0xff] }
 0x902   :  { %9772 = vmatpush1.bf16.msra.mxu0 %v13432_v13  ;;  %2726 = vmatprep.mubr.f32.mxu0 %v14974_v52  ;;  %v13523_v16 = vpack.c.bf16 %v2967_v33, %v2963_v5 }
 0x903   :  { %2839 = vmatprep.mubr.f32.mxu1 %v14974_v52  ;;  %9774 = vmatprep.subr.bf16.mxu0 %v13434_v41 }
 0x904   :  { %9804 = vmatpush1.bf16.msra.mxu1 %v13436_v42 }
 0x905   :  { %2727 = vmatmul.mubr.f32.gmra.mrb[28].mxu0 %v13384_v25  ;;  %2840 = vmatmul.mubr.f32.gmra.mrb[36].mxu1 %v13384_v25  ;;  %v13465_v25 = vpack.c.bf16 %v2937_v8, %v2933_v63  ;;  %v2969_v63 = vld [vmem:[#allocation12 + $0x3b0] sm:$0xff]  ;;  %v2972_v8 = vld [vmem:[#allocation12 + $0x3c8] sm:$0xff] }
 0x906   :  { %9776 = vmatpush1.bf16.msra.mxu0 %v13442_v22  ;;  %2732 = vmatprep.mubr.f32.mxu0 %v14974_v52  ;;  %v13531_v45 = vpack.c.bf16 %v2976_v10, %v2972_v8 }
 0x907   :  { %2845 = vmatprep.mubr.f32.mxu1 %v14974_v52  ;;  %9806 = vmatprep.subr.bf16.mxu1 %v13446_v20 }
 0x908   :  { %9778 = vmatprep.subr.bf16.mxu0 %v13449_v47  ;;  %9808 = vmatpush1.bf16.msra.mxu1 %v13451_v0 }
 0x909   :  { %2733 = vmatmul.mubr.f32.gmra.mrb[26].mxu0 %v13390_v11  ;;  %2846 = vmatmul.mubr.f32.gmra.mrb[34].mxu1 %v13390_v11  ;;  %v13481_v11 = vpack.c.bf16 %v2945_v58, %v2941_v53  ;;  %v2971_v53 = vld [vmem:[#allocation12 + $0x3c0] sm:$0xff] }
 0x90a   :  { %9780 = vmatpush1.bf16.msra.mxu0 %v13457_v17  ;;  %2738 = vmatprep.mubr.f32.mxu0 %v14974_v52  ;;  %v2975_v58 = vld [vmem:[#allocation12 + $0x3e0] sm:$0xff] }
 0x90b   :  { %2851 = vmatprep.mubr.f32.mxu1 %v14974_v52  ;;  %9810 = vmatprep.subr.bf16.mxu1 %v13461_v24  ;;  %v13541_v19 = vpack.c.bf16 %v2975_v58, %v2971_v53 }
 0x90c   :  { %9812 = vmatpush1.bf16.msra.mxu1 %v13465_v25  ;;  %9782 = vmatprep.subr.bf16.mxu0 %v13467_v36 }
 0x90d   :  { %2739 = vmatmul.mubr.f32.gmra.mrb[24].mxu0 %v13396_v12  ;;  %2852 = vmatmul.mubr.f32.gmra.mrb[32].mxu1 %v13396_v12  ;;  %v13497_v12 = vpack.c.bf16 %v2953_v51, %v2949_v23 }
 0x90e   :  { %2744 = vmatprep.mubr.f32.mxu0 %v14974_v52  ;;  %2857 = vmatprep.mubr.f32.mxu1 %v14974_v52 }
 0x90f   :  { %9784 = vmatpush1.bf16.msra.mxu0 %v13475_v4  ;;  %9814 = vmatprep.subr.bf16.mxu1 %v13477_v21 }
 0x910   :  { %9816 = vmatpush1.bf16.msra.mxu1 %v13481_v11  ;;  %9786 = vmatprep.subr.bf16.mxu0 %v13483_v46 }
 0x911   :  { %2745 = vmatmul.mubr.f32.gmra.mrb[22].mxu0 %v13402_v40  ;;  %2858 = vmatmul.mubr.f32.gmra.mrb[30].mxu1 %v13402_v40  ;;  %v13513_v40 = vpack.c.bf16 %v2961_v55, %v2957_v43  ;;  %v14975_v43 = vld [vmem:[#allocation23_spill] sm:$0xff] }
 0x912   :  { %2750 = vmatprep.mubr.f32.mxu0 %v14974_v52  ;;  %2863 = vmatprep.mubr.f32.mxu1 %v14974_v52 }
 0x913   :  { %9788 = vmatpush1.bf16.msra.mxu0 %v13491_v54  ;;  %9818 = vmatprep.subr.bf16.mxu1 %v13493_v62 }
 0x914   :  { %9820 = vmatpush1.bf16.msra.mxu1 %v13497_v12  ;;  %9790 = vmatprep.subr.bf16.mxu0 %v13499_v15 }
 0x915   :  { %2751 = vmatmul.mubr.f32.gmra.mrb[20].mxu0 %v13408_v28  ;;  %2864 = vmatmul.mubr.f32.gmra.mrb[28].mxu1 %v13408_v28  ;;  %v13529_v28 = vpack.c.bf16 %v2969_v63, %v2965_v60 }
 0x916   :  { %2756 = vmatprep.mubr.f32.mxu0 %v14974_v52  ;;  %2869 = vmatprep.mubr.f32.mxu1 %v14974_v52 }
 0x917   :  { %9792 = vmatpush1.bf16.msra.mxu0 %v13507_v6  ;;  %9822 = vmatprep.subr.bf16.mxu1 %v13509_v2 }
 0x918   :  { %9824 = vmatpush1.bf16.msra.mxu1 %v13513_v40  ;;  %9794 = vmatprep.subr.bf16.mxu0 %v13515_v27 }
 0x919   :  { %2757 = vmatmul.mubr.f32.gmra.mrb[18].mxu0 %v13414_v44  ;;  %2870 = vmatmul.mubr.f32.gmra.mrb[26].mxu1 %v13414_v44  ;;  %v2376_v44 = vld [vmem:[#allocation14 + $0x4] sm:$0xf] }
 0x91a   :  { %2762 = vmatprep.mubr.f32.mxu0 %v14974_v52  ;;  %2875 = vmatprep.mubr.f32.mxu1 %v14974_v52  ;;  %v13596_v35 = vrot.slane %v2376_v44, %v13070_v9  ;;  %v13601_v55 = vrot.slane %v2376_v44, %v14975_v43  ;;  %v13604_v56 = vrot.slane %v2376_v44, %v14976_v34 }
 0x91b   :  { %9796 = vmatpush1.bf16.msra.mxu0 %v13523_v16  ;;  %9826 = vmatprep.subr.bf16.mxu1 %v13525_v30 }
 0x91c   :  { %9828 = vmatpush1.bf16.msra.mxu1 %v13529_v28  ;;  %9798 = vmatprep.subr.bf16.mxu0 %v13531_v45 }
 0x91d   :  { %2763 = vmatmul.mubr.f32.gmra.mrb[16].mxu0 %v13420_v61  ;;  %2876 = vmatmul.mubr.f32.gmra.mrb[24].mxu1 %v13420_v61  ;;  %v13593_v61 = vrot.slane %v2376_v44, %v13072_v14 }
 0x91e   :  { %9830 = vmatprep.subr.bf16.mxu1 %v13537_v38  ;;  %3047 = vmatprep.mubr.f32.mxu0 %v14974_v52 }
 0x91f   :  { %9800 = vmatpush1.bf16.msra.mxu0 %v13541_v19  ;;  %3118 = vmatprep.mubr.f32.mxu1 %v14974_v52 }
 0x920   :  { %9832 = vmatpush1.bf16.msra.mxu1 %v13545_v49  ;;  %9834 = vmatprep.subr.bf16.mxu0 %v13422_v50 }
 0x921   :  { %9866 = vmatprep.subr.bf16.mxu1 %v13426_v32 }
 0x925   :  { %3048 = vmatmul.mubr.f32.vlgmr.msra.gmra.mrb[16].mxu0 %v14974_v52  ;;  %3119 = vmatmul.mubr.f32.vlgmr.msra.gmra.mrb[24].mxu1 %v14974_v52 }
 0x926   :  { %9836 = vmatpush1.bf16.msra.mxu0 %v13432_v13  ;;  %9868 = vmatpush1.bf16.msra.mxu1 %v13436_v42 }
 0x927   :  { %9838 = vmatprep.subr.bf16.mxu0 %v13434_v41  ;;  %9870 = vmatprep.subr.bf16.mxu1 %v13446_v20 }
 0x928   :  { %3228 = vmatprep.mubr.f32.mxu0 %v14974_v52  ;;  %3299 = vmatprep.mubr.f32.mxu1 %v14974_v52 }
 0x92a   :  { %9840 = vmatpush1.bf16.msra.mxu0 %v13442_v22  ;;  %9872 = vmatpush1.bf16.msra.mxu1 %v13451_v0 }
 0x92b   :  { %9842 = vmatprep.subr.bf16.mxu0 %v13449_v47  ;;  %9874 = vmatprep.subr.bf16.mxu1 %v13461_v24 }
 0x92e   :  { %9844 = vmatpush1.bf16.msra.mxu0 %v13457_v17  ;;  %9876 = vmatpush1.bf16.msra.mxu1 %v13465_v25 }
 0x92f   :  { %9846 = vmatprep.subr.bf16.mxu0 %v13467_v36  ;;  %9878 = vmatprep.subr.bf16.mxu1 %v13477_v21 }
 0x932   :  { %9848 = vmatpush1.bf16.msra.mxu0 %v13475_v4  ;;  %9880 = vmatpush1.bf16.msra.mxu1 %v13481_v11 }
 0x933   :  { %9850 = vmatprep.subr.bf16.mxu0 %v13483_v46  ;;  %9882 = vmatprep.subr.bf16.mxu1 %v13493_v62 }
 0x936   :  { %9852 = vmatpush1.bf16.msra.mxu0 %v13491_v54  ;;  %9884 = vmatpush1.bf16.msra.mxu1 %v13497_v12 }
 0x937   :  { %9854 = vmatprep.subr.bf16.mxu0 %v13499_v15  ;;  %9886 = vmatprep.subr.bf16.mxu1 %v13509_v2 }
 0x93a   :  { %9856 = vmatpush1.bf16.msra.mxu0 %v13507_v6  ;;  %9888 = vmatpush1.bf16.msra.mxu1 %v13513_v40 }
 0x93b   :  { %9858 = vmatprep.subr.bf16.mxu0 %v13515_v27  ;;  %9890 = vmatprep.subr.bf16.mxu1 %v13525_v30 }
 0x93e   :  { %9860 = vmatpush1.bf16.msra.mxu0 %v13523_v16  ;;  %9892 = vmatpush1.bf16.msra.mxu1 %v13529_v28 }
 0x93f   :  { %9862 = vmatprep.subr.bf16.mxu0 %v13531_v45  ;;  %9894 = vmatprep.subr.bf16.mxu1 %v13537_v38 }
 0x942   :  { %9864 = vmatpush1.bf16.msra.mxu0 %v13541_v19  ;;  %9896 = vmatpush1.bf16.msra.mxu1 %v13545_v49 }
 0x943   :  { %9898 = vmatprep.subr.bf16.mxu0 %v13422_v50  ;;  %9930 = vmatprep.subr.bf16.mxu1 %v13426_v32 }
 0x9f8   :  { %v3049_v23 = vpop.f32.mrb[16].mxu0  ;;  %v3120_v51 = vpop.f32.mrb[24].mxu1 }
 0x9f9   :  { %v11629_v39 = vadd.f32 %v3049_v23, %v13593_v61  ;;  %v3051_v57 = vpop.f32.mrb[17].mxu0  ;;  %v3122_v18 = vpop.f32.mrb[25].mxu1  ;;  %v11645_v5 = vadd.f32 %v3120_v51, %v13601_v55 }
 0x9fa   :  { %v11630_v1 = vadd.f32 %v3051_v57, %v13596_v35  ;;  %v11646_v26 = vadd.f32 %v3122_v18, %v13604_v56 }
 0x9fb   :  { %v8972_v29 = vmul.f32 -1.442695, %v11629_v39  ;;  %v8974_v33 = vmul.f32 -1.442695, %v11645_v5 }
 0x9fc   :  { %v8973_v48 = vmul.f32 -1.442695, %v11630_v1 }
 0x9fd   :  { %12117 = vpow2.f32 %v8972_v29 }
 0x9fe   :  { %12119 = vpow2.f32 %v8973_v48 }
 0x9ff   :  { %12121 = vtanh.f32 %v11646_v26 }
 0xa00   :  { %12123 = vpow2.f32 %v8974_v33 }
 0xa07   :  { %v12118_v7 = vpop.eup %12117 }
 0xa08   :  { %v3142_v60 = vadd.f32 1.0, %v12118_v7  ;;  %v12120_v63 = vpop.eup %12119 }
 0xa09   :  { %v3143_v8 = vadd.f32 1.0, %v12120_v63  ;;  %v12122_v10 = vpop.eup %12121 }
 0xa0a   :  { %12125 = vrcp.f32 %v3142_v60  ;;  %v12124_v31 = vpop.eup %12123 }
 0xa0b   :  { %12127 = vrcp.f32 %v3143_v8  ;;  %v3144_v59 = vadd.f32 1.0, %v12124_v31 }
 0xa0d   :  { %12129 = vrcp.f32 %v3144_v59 }
 0xa14   :  { %v12126_v37 = vpop.eup %12125 }
 0xa15   :  { %v3153_v53 = vmul.f32 %v12126_v37, %v12122_v10  ;;  %v12128_v58 = vpop.eup %12127 }
 0xa16   :  { %v3152_v3 = vmul.f32 0.0, %v12128_v58 }
 0xa17   :  { %v12130_v23 = vpop.eup %12129 }
 0xa18   :  { %v13608_v44 = vadd.f32 %v3153_v53, %v3152_v3 }
 0xa1a   :  { %12131 = vtanh.f32 %v13608_v44 }
 0xa24   :  { %v12132_v51 = vpop.eup %12131 }
 0xa25   :  { %v3156_v39 = vmul.f32 %v12132_v51, %v12130_v23 }
 0xa27   :  { %3157 = vst.msk [vmem:[#allocation3] sm:$0xff] %vm954_vm1, %v3156_v39  ;;  %3229 = vmatmul.mubr.f32.vlgmr.msra.gmra.mrb[18].mxu0 %v3156_v39  ;;  %3300 = vmatmul.mubr.f32.vlgmr.msra.gmra.mrb[26].mxu1 %v3156_v39 }
 0xa28   :  { %3159 = vst.msk [vmem:[#allocation3 + $0x38] sm:$0xff] %vm957_vm2, %v3156_v39  ;;  %9900 = vmatpush1.bf16.msra.mxu0 %v13432_v13  ;;  %9932 = vmatpush1.bf16.msra.mxu1 %v13436_v42 }
 0xa29   :  { %9902 = vmatprep.subr.bf16.mxu0 %v13434_v41  ;;  %9934 = vmatprep.subr.bf16.mxu1 %v13446_v20 }
 0xa2a   :  { %3410 = vmatprep.mubr.f32.mxu0 %v14974_v52  ;;  %3481 = vmatprep.mubr.f32.mxu1 %v14974_v52 }
 0xa2c   :  { %9904 = vmatpush1.bf16.msra.mxu0 %v13442_v22  ;;  %9936 = vmatpush1.bf16.msra.mxu1 %v13451_v0 }
 0xa2d   :  { %9906 = vmatprep.subr.bf16.mxu0 %v13449_v47  ;;  %9938 = vmatprep.subr.bf16.mxu1 %v13461_v24 }
 0xa30   :  { %9908 = vmatpush1.bf16.msra.mxu0 %v13457_v17  ;;  %9940 = vmatpush1.bf16.msra.mxu1 %v13465_v25 }
 0xa31   :  { %9910 = vmatprep.subr.bf16.mxu0 %v13467_v36  ;;  %9942 = vmatprep.subr.bf16.mxu1 %v13477_v21 }
 0xa34   :  { %9912 = vmatpush1.bf16.msra.mxu0 %v13475_v4  ;;  %9944 = vmatpush1.bf16.msra.mxu1 %v13481_v11 }
 0xa35   :  { %9914 = vmatprep.subr.bf16.mxu0 %v13483_v46  ;;  %9946 = vmatprep.subr.bf16.mxu1 %v13493_v62 }
 0xa38   :  { %9916 = vmatpush1.bf16.msra.mxu0 %v13491_v54  ;;  %9948 = vmatpush1.bf16.msra.mxu1 %v13497_v12 }
 0xa39   :  { %9918 = vmatprep.subr.bf16.mxu0 %v13499_v15  ;;  %9950 = vmatprep.subr.bf16.mxu1 %v13509_v2 }
 0xa3c   :  { %9920 = vmatpush1.bf16.msra.mxu0 %v13507_v6  ;;  %9952 = vmatpush1.bf16.msra.mxu1 %v13513_v40 }
 0xa3d   :  { %9922 = vmatprep.subr.bf16.mxu0 %v13515_v27  ;;  %9954 = vmatprep.subr.bf16.mxu1 %v13525_v30 }
 0xa40   :  { %9924 = vmatpush1.bf16.msra.mxu0 %v13523_v16  ;;  %9956 = vmatpush1.bf16.msra.mxu1 %v13529_v28 }
 0xa41   :  { %9926 = vmatprep.subr.bf16.mxu0 %v13531_v45  ;;  %9958 = vmatprep.subr.bf16.mxu1 %v13537_v38 }
 0xa44   :  { %9928 = vmatpush1.bf16.msra.mxu0 %v13541_v19  ;;  %9960 = vmatpush1.bf16.msra.mxu1 %v13545_v49 }
 0xa45   :  { %9962 = vmatprep.subr.bf16.mxu0 %v13422_v50  ;;  %9994 = vmatprep.subr.bf16.mxu1 %v13426_v32 }
 0xafa   :  { %v3230_v57 = vpop.f32.mrb[18].mxu0  ;;  %v3301_v18 = vpop.f32.mrb[26].mxu1 }
 0xafb   :  { %v11631_v1 = vadd.f32 %v3230_v57, %v13593_v61  ;;  %v3232_v29 = vpop.f32.mrb[19].mxu0  ;;  %v3303_v48 = vpop.f32.mrb[27].mxu1  ;;  %v11647_v7 = vadd.f32 %v3301_v18, %v13601_v55 }
 0xafc   :  { %v11632_v5 = vadd.f32 %v3232_v29, %v13596_v35  ;;  %v11648_v60 = vadd.f32 %v3303_v48, %v13604_v56 }
 0xafd   :  { %v8975_v26 = vmul.f32 -1.442695, %v11631_v1  ;;  %v8977_v63 = vmul.f32 -1.442695, %v11647_v7 }
 0xafe   :  { %v8976_v33 = vmul.f32 -1.442695, %v11632_v5 }
 0xaff   :  { %12133 = vpow2.f32 %v8975_v26 }
 0xb00   :  { %12135 = vpow2.f32 %v8976_v33 }
 0xb01   :  { %12137 = vtanh.f32 %v11648_v60 }
 0xb02   :  { %12139 = vpow2.f32 %v8977_v63 }
 0xb09   :  { %v12134_v8 = vpop.eup %12133 }
 0xb0a   :  { %v3323_v10 = vadd.f32 1.0, %v12134_v8  ;;  %v12136_v31 = vpop.eup %12135 }
 0xb0b   :  { %v3324_v37 = vadd.f32 1.0, %v12136_v31  ;;  %v12138_v53 = vpop.eup %12137 }
 0xb0c   :  { %12141 = vrcp.f32 %v3323_v10  ;;  %v12140_v58 = vpop.eup %12139 }
 0xb0d   :  { %12143 = vrcp.f32 %v3324_v37  ;;  %v3325_v51 = vadd.f32 1.0, %v12140_v58 }
 0xb0f   :  { %12145 = vrcp.f32 %v3325_v51 }
 0xb16   :  { %v12142_v59 = vpop.eup %12141 }
 0xb17   :  { %v3334_v3 = vmul.f32 %v12142_v59, %v12138_v53  ;;  %v12144_v23 = vpop.eup %12143 }
 0xb18   :  { %v3333_v39 = vmul.f32 %v12144_v23, %v13608_v44 }
 0xb19   :  { %v12146_v18 = vpop.eup %12145 }
 0xb1a   :  { %v13652_v57 = vadd.f32 %v3334_v3, %v3333_v39 }
 0xb1c   :  { %12147 = vtanh.f32 %v13652_v57 }
 0xb26   :  { %v12148_v1 = vpop.eup %12147 }
 0xb27   :  { %v3337_v29 = vmul.f32 %v12148_v1, %v12146_v18 }
 0xb29   :  { %3339 = vst.msk [vmem:[#allocation3 + $0x8] sm:$0xff] %vm954_vm1, %v3337_v29  ;;  %3411 = vmatmul.mubr.f32.vlgmr.msra.gmra.mrb[20].mxu0 %v3337_v29  ;;  %3482 = vmatmul.mubr.f32.vlgmr.msra.gmra.mrb[28].mxu1 %v3337_v29 }
 0xb2a   :  { %3341 = vst.msk [vmem:[#allocation3 + $0x30] sm:$0xff] %vm957_vm2, %v3337_v29  ;;  %9964 = vmatpush1.bf16.msra.mxu0 %v13432_v13  ;;  %9996 = vmatpush1.bf16.msra.mxu1 %v13436_v42 }
 0xb2b   :  { %9966 = vmatprep.subr.bf16.mxu0 %v13434_v41  ;;  %9998 = vmatprep.subr.bf16.mxu1 %v13446_v20 }
 0xb2c   :  { %3592 = vmatprep.mubr.f32.mxu0 %v14974_v52  ;;  %3663 = vmatprep.mubr.f32.mxu1 %v14974_v52 }
 0xb2e   :  { %9968 = vmatpush1.bf16.msra.mxu0 %v13442_v22  ;;  %10000 = vmatpush1.bf16.msra.mxu1 %v13451_v0 }
 0xb2f   :  { %9970 = vmatprep.subr.bf16.mxu0 %v13449_v47  ;;  %10002 = vmatprep.subr.bf16.mxu1 %v13461_v24 }
 0xb32   :  { %9972 = vmatpush1.bf16.msra.mxu0 %v13457_v17  ;;  %10004 = vmatpush1.bf16.msra.mxu1 %v13465_v25 }
 0xb33   :  { %9974 = vmatprep.subr.bf16.mxu0 %v13467_v36  ;;  %10006 = vmatprep.subr.bf16.mxu1 %v13477_v21 }
 0xb36   :  { %9976 = vmatpush1.bf16.msra.mxu0 %v13475_v4  ;;  %10008 = vmatpush1.bf16.msra.mxu1 %v13481_v11 }
 0xb37   :  { %9978 = vmatprep.subr.bf16.mxu0 %v13483_v46  ;;  %10010 = vmatprep.subr.bf16.mxu1 %v13493_v62 }
 0xb3a   :  { %9980 = vmatpush1.bf16.msra.mxu0 %v13491_v54  ;;  %10012 = vmatpush1.bf16.msra.mxu1 %v13497_v12 }
 0xb3b   :  { %9982 = vmatprep.subr.bf16.mxu0 %v13499_v15  ;;  %10014 = vmatprep.subr.bf16.mxu1 %v13509_v2 }
 0xb3e   :  { %9984 = vmatpush1.bf16.msra.mxu0 %v13507_v6  ;;  %10016 = vmatpush1.bf16.msra.mxu1 %v13513_v40 }
 0xb3f   :  { %9986 = vmatprep.subr.bf16.mxu0 %v13515_v27  ;;  %10018 = vmatprep.subr.bf16.mxu1 %v13525_v30 }
 0xb42   :  { %9988 = vmatpush1.bf16.msra.mxu0 %v13523_v16  ;;  %10020 = vmatpush1.bf16.msra.mxu1 %v13529_v28 }
 0xb43   :  { %9990 = vmatprep.subr.bf16.mxu0 %v13531_v45  ;;  %10022 = vmatprep.subr.bf16.mxu1 %v13537_v38 }
 0xb46   :  { %9992 = vmatpush1.bf16.msra.mxu0 %v13541_v19  ;;  %10024 = vmatpush1.bf16.msra.mxu1 %v13545_v49 }
 0xb47   :  { %10026 = vmatprep.subr.bf16.mxu0 %v13422_v50  ;;  %10058 = vmatprep.subr.bf16.mxu1 %v13426_v32 }
 0xbfc   :  { %v3412_v44 = vpop.f32.mrb[20].mxu0  ;;  %v3483_v48 = vpop.f32.mrb[28].mxu1 }
 0xbfd   :  { %v11633_v5 = vadd.f32 %v3412_v44, %v13593_v61  ;;  %v3414_v26 = vpop.f32.mrb[21].mxu0  ;;  %v3485_v33 = vpop.f32.mrb[29].mxu1  ;;  %v11649_v8 = vadd.f32 %v3483_v48, %v13601_v55 }
 0xbfe   :  { %v11634_v7 = vadd.f32 %v3414_v26, %v13596_v35  ;;  %v11650_v10 = vadd.f32 %v3485_v33, %v13604_v56 }
 0xbff   :  { %v8978_v60 = vmul.f32 -1.442695, %v11633_v5  ;;  %v8980_v31 = vmul.f32 -1.442695, %v11649_v8 }
 0xc00   :  { %v8979_v63 = vmul.f32 -1.442695, %v11634_v7 }
 0xc01   :  { %12149 = vpow2.f32 %v8978_v60 }
 0xc02   :  { %12151 = vpow2.f32 %v8979_v63 }
 0xc03   :  { %12153 = vtanh.f32 %v11650_v10 }
 0xc04   :  { %12155 = vpow2.f32 %v8980_v31 }
 0xc0b   :  { %v12150_v37 = vpop.eup %12149 }
 0xc0c   :  { %v3505_v53 = vadd.f32 1.0, %v12150_v37  ;;  %v12152_v58 = vpop.eup %12151 }
 0xc0d   :  { %v3506_v59 = vadd.f32 1.0, %v12152_v58  ;;  %v12154_v3 = vpop.eup %12153 }
 0xc0e   :  { %12157 = vrcp.f32 %v3505_v53  ;;  %v12156_v23 = vpop.eup %12155 }
 0xc0f   :  { %12159 = vrcp.f32 %v3506_v59  ;;  %v3507_v1 = vadd.f32 1.0, %v12156_v23 }
 0xc11   :  { %12161 = vrcp.f32 %v3507_v1 }
 0xc18   :  { %v12158_v51 = vpop.eup %12157 }
 0xc19   :  { %v3516_v39 = vmul.f32 %v12158_v51, %v12154_v3  ;;  %v12160_v18 = vpop.eup %12159 }
 0xc1a   :  { %v3515_v29 = vmul.f32 %v12160_v18, %v13652_v57 }
 0xc1b   :  { %v12162_v48 = vpop.eup %12161 }
 0xc1c   :  { %v13696_v44 = vadd.f32 %v3516_v39, %v3515_v29 }
 0xc1e   :  { %12163 = vtanh.f32 %v13696_v44 }
 0xc28   :  { %v12164_v5 = vpop.eup %12163 }
 0xc29   :  { %v3519_v26 = vmul.f32 %v12164_v5, %v12162_v48 }
 0xc2b   :  { %3521 = vst.msk [vmem:[#allocation3 + $0x10] sm:$0xff] %vm954_vm1, %v3519_v26  ;;  %3593 = vmatmul.mubr.f32.vlgmr.msra.gmra.mrb[22].mxu0 %v3519_v26  ;;  %3664 = vmatmul.mubr.f32.vlgmr.msra.gmra.mrb[30].mxu1 %v3519_v26 }
 0xc2c   :  { %3523 = vst.msk [vmem:[#allocation3 + $0x28] sm:$0xff] %vm957_vm2, %v3519_v26  ;;  %10028 = vmatpush1.bf16.msra.mxu0 %v13432_v13  ;;  %10060 = vmatpush1.bf16.msra.mxu1 %v13436_v42 }
 0xc2d   :  { %10030 = vmatprep.subr.bf16.mxu0 %v13434_v41  ;;  %10062 = vmatprep.subr.bf16.mxu1 %v13446_v20 }
 0xc2e   :  { %3774 = vmatprep.mubr.f32.mxu0 %v14974_v52  ;;  %3845 = vmatprep.mubr.f32.mxu1 %v14974_v52 }
 0xc30   :  { %10032 = vmatpush1.bf16.msra.mxu0 %v13442_v22  ;;  %10064 = vmatpush1.bf16.msra.mxu1 %v13451_v0 }
 0xc31   :  { %10034 = vmatprep.subr.bf16.mxu0 %v13449_v47  ;;  %10066 = vmatprep.subr.bf16.mxu1 %v13461_v24 }
 0xc34   :  { %10036 = vmatpush1.bf16.msra.mxu0 %v13457_v17  ;;  %10068 = vmatpush1.bf16.msra.mxu1 %v13465_v25 }
 0xc35   :  { %10038 = vmatprep.subr.bf16.mxu0 %v13467_v36  ;;  %10070 = vmatprep.subr.bf16.mxu1 %v13477_v21 }
 0xc38   :  { %10040 = vmatpush1.bf16.msra.mxu0 %v13475_v4  ;;  %10072 = vmatpush1.bf16.msra.mxu1 %v13481_v11 }
 0xc39   :  { %10042 = vmatprep.subr.bf16.mxu0 %v13483_v46  ;;  %10074 = vmatprep.subr.bf16.mxu1 %v13493_v62 }
 0xc3c   :  { %10044 = vmatpush1.bf16.msra.mxu0 %v13491_v54  ;;  %10076 = vmatpush1.bf16.msra.mxu1 %v13497_v12 }
 0xc3d   :  { %10046 = vmatprep.subr.bf16.mxu0 %v13499_v15  ;;  %10078 = vmatprep.subr.bf16.mxu1 %v13509_v2 }
 0xc40   :  { %10048 = vmatpush1.bf16.msra.mxu0 %v13507_v6  ;;  %10080 = vmatpush1.bf16.msra.mxu1 %v13513_v40 }
 0xc41   :  { %10050 = vmatprep.subr.bf16.mxu0 %v13515_v27  ;;  %10082 = vmatprep.subr.bf16.mxu1 %v13525_v30 }
 0xc44   :  { %10052 = vmatpush1.bf16.msra.mxu0 %v13523_v16  ;;  %10084 = vmatpush1.bf16.msra.mxu1 %v13529_v28 }
 0xc45   :  { %10054 = vmatprep.subr.bf16.mxu0 %v13531_v45  ;;  %10086 = vmatprep.subr.bf16.mxu1 %v13537_v38 }
 0xc48   :  { %10056 = vmatpush1.bf16.msra.mxu0 %v13541_v19  ;;  %10088 = vmatpush1.bf16.msra.mxu1 %v13545_v49 }
 0xc49   :  { %10090 = vmatprep.subr.bf16.mxu0 %v13422_v50  ;;  %10122 = vmatprep.subr.bf16.mxu1 %v13426_v32 }
 0xcfe   :  { %v3594_v57 = vpop.f32.mrb[22].mxu0  ;;  %v3665_v33 = vpop.f32.mrb[30].mxu1 }
 0xcff   :  { %v11635_v7 = vadd.f32 %v3594_v57, %v13593_v61  ;;  %v3596_v60 = vpop.f32.mrb[23].mxu0  ;;  %v3667_v63 = vpop.f32.mrb[31].mxu1  ;;  %v11651_v37 = vadd.f32 %v3665_v33, %v13601_v55 }
 0xd00   :  { %v11636_v8 = vadd.f32 %v3596_v60, %v13596_v35  ;;  %v11652_v53 = vadd.f32 %v3667_v63, %v13604_v56 }
 0xd01   :  { %v8981_v10 = vmul.f32 -1.442695, %v11635_v7  ;;  %v8983_v58 = vmul.f32 -1.442695, %v11651_v37 }
 0xd02   :  { %v8982_v31 = vmul.f32 -1.442695, %v11636_v8 }
 0xd03   :  { %12165 = vpow2.f32 %v8981_v10 }
 0xd04   :  { %12167 = vpow2.f32 %v8982_v31 }
 0xd05   :  { %12169 = vtanh.f32 %v11652_v53 }
 0xd06   :  { %12171 = vpow2.f32 %v8983_v58 }
 0xd0d   :  { %v12166_v59 = vpop.eup %12165 }
 0xd0e   :  { %v3687_v3 = vadd.f32 1.0, %v12166_v59  ;;  %v12168_v23 = vpop.eup %12167 }
 0xd0f   :  { %v3688_v51 = vadd.f32 1.0, %v12168_v23  ;;  %v12170_v39 = vpop.eup %12169 }
 0xd10   :  { %12173 = vrcp.f32 %v3687_v3  ;;  %v12172_v18 = vpop.eup %12171 }
 0xd11   :  { %12175 = vrcp.f32 %v3688_v51  ;;  %v3689_v5 = vadd.f32 1.0, %v12172_v18 }
 0xd13   :  { %12177 = vrcp.f32 %v3689_v5 }
 0xd1a   :  { %v12174_v1 = vpop.eup %12173 }
 0xd1b   :  { %v3698_v29 = vmul.f32 %v12174_v1, %v12170_v39  ;;  %v12176_v48 = vpop.eup %12175 }
 0xd1c   :  { %v3697_v26 = vmul.f32 %v12176_v48, %v13696_v44 }
 0xd1d   :  { %v12178_v33 = vpop.eup %12177 }
 0xd1e   :  { %v13740_v57 = vadd.f32 %v3698_v29, %v3697_v26 }
 0xd20   :  { %12179 = vtanh.f32 %v13740_v57 }
 0xd2a   :  { %v12180_v7 = vpop.eup %12179 }
 0xd2b   :  { %v3701_v60 = vmul.f32 %v12180_v7, %v12178_v33 }
 0xd2d   :  { %3703 = vst.msk [vmem:[#allocation3 + $0x18] sm:$0xff] %vm954_vm1, %v3701_v60  ;;  %3775 = vmatmul.mubr.f32.vlgmr.msra.gmra.mrb[24].mxu0 %v3701_v60  ;;  %3846 = vmatmul.mubr.f32.vlgmr.msra.gmra.mrb[32].mxu1 %v3701_v60 }
 0xd2e   :  { %3705 = vst.msk [vmem:[#allocation3 + $0x20] sm:$0xff] %vm957_vm2, %v3701_v60  ;;  %10092 = vmatpush1.bf16.msra.mxu0 %v13432_v13  ;;  %10124 = vmatpush1.bf16.msra.mxu1 %v13436_v42 }
 0xd2f   :  { %10094 = vmatprep.subr.bf16.mxu0 %v13434_v41  ;;  %10126 = vmatprep.subr.bf16.mxu1 %v13446_v20 }
 0xd30   :  { %3954 = vmatprep.mubr.f32.mxu0 %v14974_v52  ;;  %4025 = vmatprep.mubr.f32.mxu1 %v14974_v52 }
 0xd32   :  { %10096 = vmatpush1.bf16.msra.mxu0 %v13442_v22  ;;  %10128 = vmatpush1.bf16.msra.mxu1 %v13451_v0 }
 0xd33   :  { %10098 = vmatprep.subr.bf16.mxu0 %v13449_v47  ;;  %10130 = vmatprep.subr.bf16.mxu1 %v13461_v24 }
 0xd36   :  { %10100 = vmatpush1.bf16.msra.mxu0 %v13457_v17  ;;  %10132 = vmatpush1.bf16.msra.mxu1 %v13465_v25 }
 0xd37   :  { %10102 = vmatprep.subr.bf16.mxu0 %v13467_v36  ;;  %10134 = vmatprep.subr.bf16.mxu1 %v13477_v21 }
 0xd3a   :  { %10104 = vmatpush1.bf16.msra.mxu0 %v13475_v4  ;;  %10136 = vmatpush1.bf16.msra.mxu1 %v13481_v11 }
 0xd3b   :  { %10106 = vmatprep.subr.bf16.mxu0 %v13483_v46  ;;  %10138 = vmatprep.subr.bf16.mxu1 %v13493_v62 }
 0xd3e   :  { %10108 = vmatpush1.bf16.msra.mxu0 %v13491_v54  ;;  %10140 = vmatpush1.bf16.msra.mxu1 %v13497_v12 }
 0xd3f   :  { %10110 = vmatprep.subr.bf16.mxu0 %v13499_v15  ;;  %10142 = vmatprep.subr.bf16.mxu1 %v13509_v2 }
 0xd42   :  { %10112 = vmatpush1.bf16.msra.mxu0 %v13507_v6  ;;  %10144 = vmatpush1.bf16.msra.mxu1 %v13513_v40 }
 0xd43   :  { %10114 = vmatprep.subr.bf16.mxu0 %v13515_v27  ;;  %10146 = vmatprep.subr.bf16.mxu1 %v13525_v30 }
 0xd46   :  { %10116 = vmatpush1.bf16.msra.mxu0 %v13523_v16  ;;  %10148 = vmatpush1.bf16.msra.mxu1 %v13529_v28 }
 0xd47   :  { %10118 = vmatprep.subr.bf16.mxu0 %v13531_v45  ;;  %10150 = vmatprep.subr.bf16.mxu1 %v13537_v38 }
 0xd4a   :  { %10120 = vmatpush1.bf16.msra.mxu0 %v13541_v19  ;;  %10152 = vmatpush1.bf16.msra.mxu1 %v13545_v49 }
 0xd4b   :  { %10154 = vmatprep.subr.bf16.mxu0 %v13422_v50  ;;  %10186 = vmatprep.subr.bf16.mxu1 %v13426_v32 }
 0xe00   :  { %v3776_v44 = vpop.f32.mrb[24].mxu0  ;;  %v3847_v63 = vpop.f32.mrb[32].mxu1 }
 0xe01   :  { %v11637_v8 = vadd.f32 %v3776_v44, %v13593_v61  ;;  %v3778_v10 = vpop.f32.mrb[25].mxu0  ;;  %v3849_v31 = vpop.f32.mrb[33].mxu1  ;;  %v11653_v59 = vadd.f32 %v3847_v63, %v13601_v55 }
 0xe02   :  { %v11638_v37 = vadd.f32 %v3778_v10, %v13596_v35  ;;  %v11654_v3 = vadd.f32 %v3849_v31, %v13604_v56 }
 0xe03   :  { %v8984_v53 = vmul.f32 -1.442695, %v11637_v8  ;;  %v8986_v23 = vmul.f32 -1.442695, %v11653_v59 }
 0xe04   :  { %v8985_v58 = vmul.f32 -1.442695, %v11638_v37 }
 0xe05   :  { %12181 = vpow2.f32 %v8984_v53 }
 0xe06   :  { %12183 = vpow2.f32 %v8985_v58 }
 0xe07   :  { %12185 = vtanh.f32 %v11654_v3 }
 0xe08   :  { %12187 = vpow2.f32 %v8986_v23 }
 0xe0f   :  { %v12182_v51 = vpop.eup %12181 }
 0xe10   :  { %v3869_v39 = vadd.f32 1.0, %v12182_v51  ;;  %v12184_v18 = vpop.eup %12183 }
 0xe11   :  { %v3870_v1 = vadd.f32 1.0, %v12184_v18  ;;  %v12186_v29 = vpop.eup %12185 }
 0xe12   :  { %12189 = vrcp.f32 %v3869_v39  ;;  %v12188_v48 = vpop.eup %12187 }
 0xe13   :  { %12191 = vrcp.f32 %v3870_v1  ;;  %v3871_v7 = vadd.f32 1.0, %v12188_v48 }
 0xe15   :  { %12193 = vrcp.f32 %v3871_v7 }
 0xe1c   :  { %v12190_v5 = vpop.eup %12189 }
 0xe1d   :  { %v3880_v26 = vmul.f32 %v12190_v5, %v12186_v29  ;;  %v12192_v33 = vpop.eup %12191 }
 0xe1e   :  { %v3879_v60 = vmul.f32 %v12192_v33, %v13740_v57 }
 0xe1f   :  { %v12194_v63 = vpop.eup %12193 }
 0xe20   :  { %v13784_v44 = vadd.f32 %v3880_v26, %v3879_v60 }
 0xe22   :  { %12195 = vtanh.f32 %v13784_v44 }
 0xe2c   :  { %v12196_v8 = vpop.eup %12195 }
 0xe2d   :  { %v3883_v10 = vmul.f32 %v12196_v8, %v12194_v63 }
 0xe2f   :  { %3884 = vst.msk [vmem:[#allocation3 + $0x20] sm:$0xff] %vm954_vm1, %v3883_v10  ;;  %3955 = vmatmul.mubr.f32.vlgmr.msra.gmra.mrb[26].mxu0 %v3883_v10  ;;  %4026 = vmatmul.mubr.f32.vlgmr.msra.gmra.mrb[34].mxu1 %v3883_v10 }
 0xe30   :  { %3885 = vst.msk [vmem:[#allocation3 + $0x18] sm:$0xff] %vm957_vm2, %v3883_v10  ;;  %10156 = vmatpush1.bf16.msra.mxu0 %v13432_v13  ;;  %10188 = vmatpush1.bf16.msra.mxu1 %v13436_v42 }
 0xe31   :  { %10158 = vmatprep.subr.bf16.mxu0 %v13434_v41  ;;  %10190 = vmatprep.subr.bf16.mxu1 %v13446_v20 }
 0xe32   :  { %4134 = vmatprep.mubr.f32.mxu0 %v14974_v52  ;;  %4205 = vmatprep.mubr.f32.mxu1 %v14974_v52 }
 0xe34   :  { %10160 = vmatpush1.bf16.msra.mxu0 %v13442_v22  ;;  %10192 = vmatpush1.bf16.msra.mxu1 %v13451_v0 }
 0xe35   :  { %10162 = vmatprep.subr.bf16.mxu0 %v13449_v47  ;;  %10194 = vmatprep.subr.bf16.mxu1 %v13461_v24 }
 0xe38   :  { %10164 = vmatpush1.bf16.msra.mxu0 %v13457_v17  ;;  %10196 = vmatpush1.bf16.msra.mxu1 %v13465_v25 }
 0xe39   :  { %10166 = vmatprep.subr.bf16.mxu0 %v13467_v36  ;;  %10198 = vmatprep.subr.bf16.mxu1 %v13477_v21 }
 0xe3c   :  { %10168 = vmatpush1.bf16.msra.mxu0 %v13475_v4  ;;  %10200 = vmatpush1.bf16.msra.mxu1 %v13481_v11 }
 0xe3d   :  { %10170 = vmatprep.subr.bf16.mxu0 %v13483_v46  ;;  %10202 = vmatprep.subr.bf16.mxu1 %v13493_v62 }
 0xe40   :  { %10172 = vmatpush1.bf16.msra.mxu0 %v13491_v54  ;;  %10204 = vmatpush1.bf16.msra.mxu1 %v13497_v12 }
 0xe41   :  { %10174 = vmatprep.subr.bf16.mxu0 %v13499_v15  ;;  %10206 = vmatprep.subr.bf16.mxu1 %v13509_v2 }
 0xe44   :  { %10176 = vmatpush1.bf16.msra.mxu0 %v13507_v6  ;;  %10208 = vmatpush1.bf16.msra.mxu1 %v13513_v40 }
 0xe45   :  { %10178 = vmatprep.subr.bf16.mxu0 %v13515_v27  ;;  %10210 = vmatprep.subr.bf16.mxu1 %v13525_v30 }
 0xe48   :  { %10180 = vmatpush1.bf16.msra.mxu0 %v13523_v16  ;;  %10212 = vmatpush1.bf16.msra.mxu1 %v13529_v28 }
 0xe49   :  { %10182 = vmatprep.subr.bf16.mxu0 %v13531_v45  ;;  %10214 = vmatprep.subr.bf16.mxu1 %v13537_v38 }
 0xe4c   :  { %10184 = vmatpush1.bf16.msra.mxu0 %v13541_v19  ;;  %10216 = vmatpush1.bf16.msra.mxu1 %v13545_v49 }
 0xe4d   :  { %10218 = vmatprep.subr.bf16.mxu0 %v13422_v50  ;;  %10250 = vmatprep.subr.bf16.mxu1 %v13426_v32 }
 0xf02   :  { %v3956_v57 = vpop.f32.mrb[26].mxu0  ;;  %v4027_v31 = vpop.f32.mrb[34].mxu1 }
 0xf03   :  { %v11639_v37 = vadd.f32 %v3956_v57, %v13593_v61  ;;  %v3958_v53 = vpop.f32.mrb[27].mxu0  ;;  %v4029_v58 = vpop.f32.mrb[35].mxu1  ;;  %v11655_v51 = vadd.f32 %v4027_v31, %v13601_v55 }
 0xf04   :  { %v11640_v59 = vadd.f32 %v3958_v53, %v13596_v35  ;;  %v11656_v39 = vadd.f32 %v4029_v58, %v13604_v56  ;;  %v4439_v53 = vld [vmem:[#allocation11 + $0x420] sm:$0xff] }
 0xf05   :  { %v8987_v3 = vmul.f32 -1.442695, %v11639_v37  ;;  %v8989_v18 = vmul.f32 -1.442695, %v11655_v51  ;;  %v4435_v37 = vld [vmem:[#allocation11 + $0x400] sm:$0xff] }
 0xf06   :  { %v8988_v23 = vmul.f32 -1.442695, %v11640_v59  ;;  %v10283_v59 = vpack.c.bf16 %v4439_v53, %v4435_v37  ;;  %v4476_v53 = vld [vmem:[#allocation11 + $0x548] sm:$0xff] }
 0xf07   :  { %12197 = vpow2.f32 %v8987_v3  ;;  %v4437_v3 = vld [vmem:[#allocation11 + $0x410] sm:$0xff] }
 0xf08   :  { %12199 = vpow2.f32 %v8988_v23  ;;  %v4441_v23 = vld [vmem:[#allocation11 + $0x430] sm:$0xff] }
 0xf09   :  { %12201 = vtanh.f32 %v11656_v39  ;;  %v10315_v51 = vpack.c.bf16 %v4441_v23, %v4437_v3  ;;  %v4444_v39 = vld [vmem:[#allocation11 + $0x448] sm:$0xff]  ;;  %v4482_v23 = vld [vmem:[#allocation11 + $0x578] sm:$0xff] }
 0xf0a   :  { %12203 = vpow2.f32 %v8989_v18  ;;  %v4448_v18 = vld [vmem:[#allocation11 + $0x468] sm:$0xff] }
 0xf11   :  { %v12198_v50 = vpop.eup %12197 }
 0xf12   :  { %v4049_v1 = vadd.f32 1.0, %v12198_v50  ;;  %v12200_v32 = vpop.eup %12199  ;;  %v4446_v50 = vld [vmem:[#allocation11 + $0x458] sm:$0xff] }
 0xf13   :  { %v4050_v29 = vadd.f32 1.0, %v12200_v32  ;;  %v12202_v48 = vpop.eup %12201  ;;  %v4450_v32 = vld [vmem:[#allocation11 + $0x478] sm:$0xff] }
 0xf14   :  { %12205 = vrcp.f32 %v4049_v1  ;;  %v12204_v5 = vpop.eup %12203  ;;  %v10285_v1 = vpack.c.bf16 %v4448_v18, %v4444_v39  ;;  %v4479_v39 = vld [vmem:[#allocation11 + $0x560] sm:$0xff] }
 0xf15   :  { %12207 = vrcp.f32 %v4050_v29  ;;  %v4051_v60 = vadd.f32 1.0, %v12204_v5  ;;  %v4443_v29 = vld [vmem:[#allocation11 + $0x440] sm:$0xff]  ;;  %v10317_v5 = vpack.c.bf16 %v4450_v32, %v4446_v50  ;;  %v4481_v32 = vld [vmem:[#allocation11 + $0x570] sm:$0xff] }
 0xf17   :  { %12209 = vrcp.f32 %v4051_v60 }
 0xf1e   :  { %v12206_v26 = vpop.eup %12205 }
 0xf1f   :  { %v4060_v33 = vmul.f32 %v12206_v26, %v12202_v48  ;;  %v12208_v7 = vpop.eup %12207  ;;  %v4447_v48 = vld [vmem:[#allocation11 + $0x460] sm:$0xff] }
 0xf20   :  { %v4059_v63 = vmul.f32 %v12208_v7, %v13784_v44  ;;  %v4442_v44 = vld [vmem:[#allocation11 + $0x438] sm:$0xff]  ;;  %v10287_v26 = vpack.c.bf16 %v4447_v48, %v4443_v29  ;;  %v4449_v7 = vld [vmem:[#allocation11 + $0x470] sm:$0xff]  ;;  %v4484_v48 = vld [vmem:[#allocation11 + $0x588] sm:$0xff] }
 0xf21   :  { %v12210_v10 = vpop.eup %12209 }
 0xf22   :  { %v13828_v8 = vadd.f32 %v4060_v33, %v4059_v63  ;;  %v4445_v33 = vld [vmem:[#allocation11 + $0x450] sm:$0xff]  ;;  %v4452_v63 = vld [vmem:[#allocation11 + $0x488] sm:$0xff] }
 0xf23   :  { %v10319_v60 = vpack.c.bf16 %v4449_v7, %v4445_v33  ;;  %v4490_v7 = vld [vmem:[#allocation11 + $0x5b8] sm:$0xff] }
 0xf24   :  { %12211 = vtanh.f32 %v13828_v8 }
 0xf2e   :  { %v12212_v57 = vpop.eup %12211 }
 0xf2f   :  { %v4063_v31 = vmul.f32 %v12212_v57, %v12210_v10  ;;  %v4454_v10 = vld [vmem:[#allocation11 + $0x498] sm:$0xff] }
 0xf31   :  { %4064 = vst.msk [vmem:[#allocation3 + $0x28] sm:$0xff] %vm954_vm1, %v4063_v31  ;;  %4135 = vmatmul.mubr.f32.vlgmr.msra.gmra.mrb[28].mxu0 %v4063_v31  ;;  %4206 = vmatmul.mubr.f32.vlgmr.msra.gmra.mrb[36].mxu1 %v4063_v31 }
 0xf32   :  { %4065 = vst.msk [vmem:[#allocation3 + $0x10] sm:$0xff] %vm957_vm2, %v4063_v31  ;;  %10220 = vmatpush1.bf16.msra.mxu0 %v13432_v13  ;;  %10252 = vmatpush1.bf16.msra.mxu1 %v13436_v42  ;;  %v4458_v31 = vld [vmem:[#allocation11 + $0x4b8] sm:$0xff] }
 0xf33   :  { %10222 = vmatprep.subr.bf16.mxu0 %v13434_v41  ;;  %10254 = vmatprep.subr.bf16.mxu1 %v13446_v20 }
 0xf34   :  { %4314 = vmatprep.mubr.f32.mxu0 %v14974_v52  ;;  %4385 = vmatprep.mubr.f32.mxu1 %v14974_v52 }
 0xf36   :  { %10224 = vmatpush1.bf16.msra.mxu0 %v13442_v22  ;;  %10256 = vmatpush1.bf16.msra.mxu1 %v13451_v0 }
 0xf37   :  { %10226 = vmatprep.subr.bf16.mxu0 %v13449_v47  ;;  %10258 = vmatprep.subr.bf16.mxu1 %v13461_v24 }
 0xf3a   :  { %10228 = vmatpush1.bf16.msra.mxu0 %v13457_v17  ;;  %10260 = vmatpush1.bf16.msra.mxu1 %v13465_v25 }
 0xf3b   :  { %10230 = vmatprep.subr.bf16.mxu0 %v13467_v36  ;;  %10262 = vmatprep.subr.bf16.mxu1 %v13477_v21 }
 0xf3e   :  { %10232 = vmatpush1.bf16.msra.mxu0 %v13475_v4  ;;  %10264 = vmatpush1.bf16.msra.mxu1 %v13481_v11 }
 0xf3f   :  { %10234 = vmatprep.subr.bf16.mxu0 %v13483_v46  ;;  %10266 = vmatprep.subr.bf16.mxu1 %v13493_v62 }
 0xf42   :  { %10236 = vmatpush1.bf16.msra.mxu0 %v13491_v54  ;;  %10268 = vmatpush1.bf16.msra.mxu1 %v13497_v12 }
 0xf43   :  { %10238 = vmatprep.subr.bf16.mxu0 %v13499_v15  ;;  %10270 = vmatprep.subr.bf16.mxu1 %v13509_v2 }
 0xf46   :  { %10240 = vmatpush1.bf16.msra.mxu0 %v13507_v6  ;;  %10272 = vmatpush1.bf16.msra.mxu1 %v13513_v40 }
 0xf47   :  { %10242 = vmatprep.subr.bf16.mxu0 %v13515_v27  ;;  %10274 = vmatprep.subr.bf16.mxu1 %v13525_v30 }
 0xf4a   :  { %10244 = vmatpush1.bf16.msra.mxu0 %v13523_v16  ;;  %10276 = vmatpush1.bf16.msra.mxu1 %v13529_v28 }
 0xf4b   :  { %10246 = vmatprep.subr.bf16.mxu0 %v13531_v45  ;;  %10278 = vmatprep.subr.bf16.mxu1 %v13537_v38  ;;  %v4436_v45 = vld [vmem:[#allocation11 + $0x408] sm:$0xff] }
 0xf4c   :  { %v4440_v38 = vld [vmem:[#allocation11 + $0x428] sm:$0xff] }
 0xf4e   :  { %10248 = vmatpush1.bf16.msra.mxu0 %v13541_v19  ;;  %10280 = vmatpush1.bf16.msra.mxu1 %v13545_v49  ;;  %v4438_v19 = vld [vmem:[#allocation11 + $0x418] sm:$0xff]  ;;  %v10281_v49 = vpack.c.bf16 %v4440_v38, %v4436_v45  ;;  %v4471_v45 = vld [vmem:[#allocation11 + $0x520] sm:$0xff] }
 0xf4f   :  { %v10313_v58 = vpack.c.bf16 %v4442_v44, %v4438_v19  ;;  %v4473_v44 = vld [vmem:[#allocation11 + $0x530] sm:$0xff] }
 0xf50   :  { %10282 = vmatprep.subr.bf16.mxu0 %v10281_v49  ;;  %v4469_v49 = vld [vmem:[#allocation11 + $0x510] sm:$0xff] }
 0xf51   :  { %10314 = vmatprep.subr.bf16.mxu1 %v10313_v58  ;;  %v10331_v37 = vpack.c.bf16 %v4473_v44, %v4469_v49  ;;  %v4480_v58 = vld [vmem:[#allocation11 + $0x568] sm:$0xff] }
 0xf52   :  { %v10301_v3 = vpack.c.bf16 %v4480_v58, %v4476_v53 }
0x1004   :  { %v4136_v13 = vpop.f32.mrb[28].mxu0  ;;  %v4207_v41 = vpop.f32.mrb[36].mxu1 }
0x1005   :  { %v11641_v42 = vadd.f32 %v4136_v13, %v13593_v61  ;;  %v4138_v22 = vpop.f32.mrb[29].mxu0  ;;  %v4209_v20 = vpop.f32.mrb[37].mxu1  ;;  %v11657_v24 = vadd.f32 %v4207_v41, %v13601_v55  ;;  %v4451_v13 = vld [vmem:[#allocation11 + $0x480] sm:$0xff] }
0x1006   :  { %v11642_v47 = vadd.f32 %v4138_v22, %v13596_v35  ;;  %v11658_v25 = vadd.f32 %v4209_v20, %v13604_v56  ;;  %v4455_v41 = vld [vmem:[#allocation11 + $0x4a0] sm:$0xff]  ;;  %v4453_v20 = vld [vmem:[#allocation11 + $0x490] sm:$0xff] }
0x1007   :  { %v8990_v0 = vmul.f32 -1.442695, %v11641_v42  ;;  %v8992_v36 = vmul.f32 -1.442695, %v11657_v24  ;;  %v10321_v42 = vpack.c.bf16 %v4458_v31, %v4454_v10  ;;  %v10291_v22 = vpack.c.bf16 %v4455_v41, %v4451_v13  ;;  %v4464_v24 = vld [vmem:[#allocation11 + $0x4e8] sm:$0xff]  ;;  %v4489_v31 = vld [vmem:[#allocation11 + $0x5b0] sm:$0xff] }
0x1008   :  { %v8991_v17 = vmul.f32 -1.442695, %v11642_v47  ;;  %v4457_v47 = vld [vmem:[#allocation11 + $0x4b0] sm:$0xff]  ;;  %v4492_v41 = vld [vmem:[#allocation11 + $0x5c8] sm:$0xff] }
0x1009   :  { %12213 = vpow2.f32 %v8990_v0  ;;  %v10323_v0 = vpack.c.bf16 %v4457_v47, %v4453_v20  ;;  %v4498_v47 = vld [vmem:[#allocation11 + $0x5f8] sm:$0xff] }
0x100a   :  { %12215 = vpow2.f32 %v8991_v17  ;;  %v4460_v17 = vld [vmem:[#allocation11 + $0x4c8] sm:$0xff] }
0x100b   :  { %12217 = vtanh.f32 %v11658_v25  ;;  %v4462_v25 = vld [vmem:[#allocation11 + $0x4d8] sm:$0xff] }
0x100c   :  { %12219 = vpow2.f32 %v8992_v36  ;;  %v10293_v36 = vpack.c.bf16 %v4464_v24, %v4460_v17  ;;  %v4495_v17 = vld [vmem:[#allocation11 + $0x5e0] sm:$0xff] }
0x1013   :  { %v12214_v4 = vpop.eup %12213 }
0x1014   :  { %v4229_v21 = vadd.f32 1.0, %v12214_v4  ;;  %v12216_v11 = vpop.eup %12215  ;;  %v4466_v4 = vld [vmem:[#allocation11 + $0x4f8] sm:$0xff] }
0x1015   :  { %v4230_v46 = vadd.f32 1.0, %v12216_v11  ;;  %v12218_v54 = vpop.eup %12217  ;;  %v4463_v11 = vld [vmem:[#allocation11 + $0x4e0] sm:$0xff] }
0x1016   :  { %12221 = vrcp.f32 %v4229_v21  ;;  %v12220_v62 = vpop.eup %12219  ;;  %v4459_v21 = vld [vmem:[#allocation11 + $0x4c0] sm:$0xff] }
0x1017   :  { %12223 = vrcp.f32 %v4230_v46  ;;  %v4231_v2 = vadd.f32 1.0, %v12220_v62  ;;  %v10325_v46 = vpack.c.bf16 %v4466_v4, %v4462_v25  ;;  %v4461_v62 = vld [vmem:[#allocation11 + $0x4d0] sm:$0xff] }
0x1018   :  { %v4497_v4 = vld [vmem:[#allocation11 + $0x5f0] sm:$0xff] }
0x1019   :  { %12225 = vrcp.f32 %v4231_v2  ;;  %v4472_v2 = vld [vmem:[#allocation11 + $0x528] sm:$0xff] }
0x1020   :  { %v12222_v12 = vpop.eup %12221 }
0x1021   :  { %v4240_v15 = vmul.f32 %v12222_v12, %v12218_v54  ;;  %v12224_v6 = vpop.eup %12223  ;;  %v10295_v54 = vpack.c.bf16 %v4463_v11, %v4459_v21  ;;  %v4465_v12 = vld [vmem:[#allocation11 + $0x4f0] sm:$0xff]  ;;  %v4501_v11 = vld [vmem:[#allocation11 + $0x608] sm:$0xff] }
0x1022   :  { %v4239_v40 = vmul.f32 %v12224_v6, %v13828_v8  ;;  %v4456_v8 = vld [vmem:[#allocation11 + $0x4a8] sm:$0xff] }
0x1023   :  { %v12226_v16 = vpop.eup %12225  ;;  %v10289_v57 = vpack.c.bf16 %v4456_v8, %v4452_v63  ;;  %v4468_v6 = vld [vmem:[#allocation11 + $0x508] sm:$0xff]  ;;  %v4487_v63 = vld [vmem:[#allocation11 + $0x5a0] sm:$0xff] }
0x1024   :  { %v13870_v27 = vadd.f32 %v4240_v15, %v4239_v40  ;;  %v10327_v15 = vpack.c.bf16 %v4465_v12, %v4461_v62  ;;  %v4470_v40 = vld [vmem:[#allocation11 + $0x518] sm:$0xff] }
0x1025   :  { %v4503_v62 = vld [vmem:[#allocation11 + $0x618] sm:$0xff] }
0x1026   :  { %12227 = vtanh.f32 %v13870_v27  ;;  %v4507_v12 = vld [vmem:[#allocation11 + $0x638] sm:$0xff] }
0x1030   :  { %v12228_v30 = vpop.eup %12227 }
0x1031   :  { %v4243_v28 = vmul.f32 %v12228_v30, %v12226_v16  ;;  %v10297_v16 = vpack.c.bf16 %v4472_v2, %v4468_v6  ;;  %v4474_v30 = vld [vmem:[#allocation11 + $0x538] sm:$0xff] }
0x1032   :  { %v10329_v38 = vpack.c.bf16 %v4474_v30, %v4470_v40 }
0x1033   :  { %4244 = vst.msk [vmem:[#allocation3 + $0x30] sm:$0xff] %vm954_vm1, %v4243_v28  ;;  %4315 = vmatmul.mubr.f32.vlgmr.msra.gmra.mrb[30].mxu0 %v4243_v28  ;;  %4386 = vmatmul.mubr.f32.vlgmr.msra.gmra.mrb[38].mxu1 %v4243_v28 }
0x1034   :  { %4245 = vst.msk [vmem:[#allocation3 + $0x8] sm:$0xff] %vm957_vm2, %v4243_v28  ;;  %4651 = vmatprep.mubr.f32.mxu0 %v14974_v52  ;;  %4764 = vmatprep.mubr.f32.mxu1 %v14974_v52  ;;  %v4467_v28 = vld [vmem:[#allocation11 + $0x500] sm:$0xff] }
0x1035   :  { %10284 = vmatpush1.bf16.msra.mxu0 %v10283_v59  ;;  %10316 = vmatpush1.bf16.msra.mxu1 %v10315_v51  ;;  %v10299_v19 = vpack.c.bf16 %v4471_v45, %v4467_v28  ;;  %v4478_v59 = vld [vmem:[#allocation11 + $0x558] sm:$0xff]  ;;  %v4475_v51 = vld [vmem:[#allocation11 + $0x540] sm:$0xff] }
0x1036   :  { %10286 = vmatprep.subr.bf16.mxu0 %v10285_v1  ;;  %10318 = vmatprep.subr.bf16.mxu1 %v10317_v5  ;;  %v10333_v18 = vpack.c.bf16 %v4482_v23, %v4478_v59  ;;  %v10303_v50 = vpack.c.bf16 %v4479_v39, %v4475_v51  ;;  %v4477_v1 = vld [vmem:[#allocation11 + $0x550] sm:$0xff]  ;;  %v4488_v5 = vld [vmem:[#allocation11 + $0x5a8] sm:$0xff] }
0x1037   :  { %v10335_v29 = vpack.c.bf16 %v4481_v32, %v4477_v1  ;;  %v10305_v33 = vpack.c.bf16 %v4488_v5, %v4484_v48  ;;  %v4500_v32 = vld [vmem:[#allocation11 + $0x600] sm:$0xff]  ;;  %v4509_v48 = vld [vmem:[#allocation11 + $0x648] sm:$0xff] }
0x1038   :  { %v4513_v5 = vld [vmem:[#allocation11 + $0x668] sm:$0xff] }
0x1039   :  { %10288 = vmatpush1.bf16.msra.mxu0 %v10287_v26  ;;  %10320 = vmatpush1.bf16.msra.mxu1 %v10319_v60  ;;  %v4486_v26 = vld [vmem:[#allocation11 + $0x598] sm:$0xff]  ;;  %v4483_v60 = vld [vmem:[#allocation11 + $0x580] sm:$0xff] }
0x103a   :  { %10290 = vmatprep.subr.bf16.mxu0 %v10289_v57  ;;  %10322 = vmatprep.subr.bf16.mxu1 %v10321_v42  ;;  %v10337_v8 = vpack.c.bf16 %v4490_v7, %v4486_v26  ;;  %v10307_v10 = vpack.c.bf16 %v4487_v63, %v4483_v60  ;;  %v4485_v57 = vld [vmem:[#allocation11 + $0x590] sm:$0xff]  ;;  %v4496_v42 = vld [vmem:[#allocation11 + $0x5e8] sm:$0xff]  ;;  %v10349_v60 = vpack.c.bf16 %v4513_v5, %v4509_v48  ;;  %v4508_v63 = vld [vmem:[#allocation11 + $0x640] sm:$0xff] }
0x103b   :  { %v10339_v13 = vpack.c.bf16 %v4489_v31, %v4485_v57  ;;  %v10309_v20 = vpack.c.bf16 %v4496_v42, %v4492_v41  ;;  %v4502_v26 = vld [vmem:[#allocation11 + $0x610] sm:$0xff]  ;;  %v4515_v31 = vld [vmem:[#allocation11 + $0x678] sm:$0xff]  ;;  %v4517_v41 = vld [vmem:[#allocation11 + $0x688] sm:$0xff] }
0x103c   :  { %v4521_v42 = vld [vmem:[#allocation11 + $0x6a8] sm:$0xff]  ;;  %v4543_v48 = vld [vmem:[#allocation11 + $0x758] sm:$0xff] }
0x103d   :  { %10292 = vmatpush1.bf16.msra.mxu0 %v10291_v22  ;;  %10324 = vmatpush1.bf16.msra.mxu1 %v10323_v0  ;;  %v4494_v22 = vld [vmem:[#allocation11 + $0x5d8] sm:$0xff]  ;;  %v4491_v0 = vld [vmem:[#allocation11 + $0x5c0] sm:$0xff] }
0x103e   :  { %10294 = vmatprep.subr.bf16.mxu0 %v10293_v36  ;;  %10326 = vmatprep.subr.bf16.mxu1 %v10325_v46  ;;  %v10341_v24 = vpack.c.bf16 %v4498_v47, %v4494_v22  ;;  %v10311_v25 = vpack.c.bf16 %v4495_v17, %v4491_v0  ;;  %v4493_v36 = vld [vmem:[#allocation11 + $0x5d0] sm:$0xff]  ;;  %v4505_v46 = vld [vmem:[#allocation11 + $0x628] sm:$0xff]  ;;  %v4516_v17 = vld [vmem:[#allocation11 + $0x680] sm:$0xff] }
0x103f   :  { %v10343_v21 = vpack.c.bf16 %v4497_v4, %v4493_v36  ;;  %v4514_v22 = vld [vmem:[#allocation11 + $0x670] sm:$0xff]  ;;  %v13890_v47 = vld [vmem:[#allocation3 + $0x8] sm:$0xff]  ;;  %v4519_v4 = vld [vmem:[#allocation11 + $0x698] sm:$0xff] }
0x1041   :  { %10296 = vmatpush1.bf16.msra.mxu0 %v10295_v54  ;;  %10328 = vmatpush1.bf16.msra.mxu1 %v10327_v15  ;;  %v10345_v54 = vpack.c.bf16 %v4505_v46, %v4501_v11  ;;  %v10377_v15 = vpack.c.bf16 %v4507_v12, %v4503_v62  ;;  %v4518_v11 = vld [vmem:[#allocation11 + $0x690] sm:$0xff]  ;;  %v4529_v62 = vld [vmem:[#allocation11 + $0x6e8] sm:$0xff] }
0x1042   :  { %10298 = vmatprep.subr.bf16.mxu0 %v10297_v16  ;;  %10330 = vmatprep.subr.bf16.mxu1 %v10329_v38  ;;  %v4522_v46 = vld [vmem:[#allocation11 + $0x6b0] sm:$0xff] }
0x1045   :  { %10300 = vmatpush1.bf16.msra.mxu0 %v10299_v19  ;;  %10332 = vmatpush1.bf16.msra.mxu1 %v10331_v37 }
0x1046   :  { %10302 = vmatprep.subr.bf16.mxu0 %v10301_v3  ;;  %10334 = vmatprep.subr.bf16.mxu1 %v10333_v18 }
0x1049   :  { %10304 = vmatpush1.bf16.msra.mxu0 %v10303_v50  ;;  %10336 = vmatpush1.bf16.msra.mxu1 %v10335_v29  ;;  %v4504_v29 = vld [vmem:[#allocation11 + $0x620] sm:$0xff] }
0x104a   :  { %10306 = vmatprep.subr.bf16.mxu0 %v10305_v33  ;;  %10338 = vmatprep.subr.bf16.mxu1 %v10337_v8  ;;  %v4506_v33 = vld [vmem:[#allocation11 + $0x630] sm:$0xff]  ;;  %v10347_v7 = vpack.c.bf16 %v4504_v29, %v4500_v32  ;;  %v4511_v8 = vld [vmem:[#allocation11 + $0x658] sm:$0xff]  ;;  %v4540_v29 = vld [vmem:[#allocation11 + $0x740] sm:$0xff] }
0x104b   :  { %v10379_v57 = vpack.c.bf16 %v4506_v33, %v4502_v26  ;;  %v10381_v0 = vpack.c.bf16 %v4515_v31, %v4511_v8  ;;  %v4544_v33 = vld [vmem:[#allocation11 + $0x760] sm:$0xff]  ;;  %v4553_v8 = vld [vmem:[#allocation11 + $0x7a8] sm:$0xff] }
0x104c   :  { %v10367_v31 = vpack.c.bf16 %v4544_v33, %v4540_v29  ;;  %v5121_v33 = vld [vmem:[#allocation12 + $0x488] sm:$0xff] }
0x104d   :  { %10308 = vmatpush1.bf16.msra.mxu0 %v10307_v10  ;;  %10340 = vmatpush1.bf16.msra.mxu1 %v10339_v13  ;;  %v4510_v13 = vld [vmem:[#allocation11 + $0x650] sm:$0xff] }
0x104e   :  { %10310 = vmatprep.subr.bf16.mxu0 %v10309_v20  ;;  %10342 = vmatprep.subr.bf16.mxu1 %v10341_v24  ;;  %v4520_v24 = vld [vmem:[#allocation11 + $0x6a0] sm:$0xff]  ;;  %v10383_v36 = vpack.c.bf16 %v4514_v22, %v4510_v13 }
0x104f   :  { %v10355_v12 = vpack.c.bf16 %v4520_v24, %v4516_v17  ;;  %v4555_v17 = vld [vmem:[#allocation11 + $0x7b8] sm:$0xff]  ;;  %v4550_v24 = vld [vmem:[#allocation11 + $0x790] sm:$0xff] }
0x1051   :  { %10312 = vmatpush1.bf16.msra.mxu0 %v10311_v25  ;;  %10344 = vmatpush1.bf16.msra.mxu1 %v10343_v21  ;;  %v10353_v25 = vpack.c.bf16 %v4521_v42, %v4517_v41  ;;  %v4523_v21 = vld [vmem:[#allocation11 + $0x6b8] sm:$0xff]  ;;  %v4548_v41 = vld [vmem:[#allocation11 + $0x780] sm:$0xff] }
0x1052   :  { %10346 = vmatprep.subr.bf16.mxu0 %v10345_v54  ;;  %10378 = vmatprep.subr.bf16.mxu1 %v10377_v15  ;;  %v4525_v54 = vld [vmem:[#allocation11 + $0x6c8] sm:$0xff]  ;;  %v13896_v15 = vld [vmem:[#allocation3 + $0x10] sm:$0xff]  ;;  %v4551_v42 = vld [vmem:[#allocation11 + $0x798] sm:$0xff] }
0x1106   :  { %v4316_v6 = vpop.f32.mrb[30].mxu0  ;;  %v4387_v2 = vpop.f32.mrb[38].mxu1 }
0x1107   :  { %v11643_v40 = vadd.f32 %v4316_v6, %v13593_v61  ;;  %v4318_v16 = vpop.f32.mrb[31].mxu0  ;;  %v4389_v30 = vpop.f32.mrb[39].mxu1  ;;  %v11659_v19 = vadd.f32 %v4387_v2, %v13601_v55  ;;  %v10385_v6 = vpack.c.bf16 %v4523_v21, %v4519_v4  ;;  %v4524_v2 = vld [vmem:[#allocation11 + $0x6c0] sm:$0xff]  ;;  %v4561_v4 = vld [vmem:[#allocation11 + $0x7e8] sm:$0xff]  ;;  %v13920_v21 = vld [vmem:[#allocation3 + $0x30] sm:$0xff] }
0x1108   :  { %v11644_v28 = vadd.f32 %v4318_v16, %v13596_v35  ;;  %v11660_v49 = vadd.f32 %v4389_v30, %v13604_v56  ;;  %v10387_v16 = vpack.c.bf16 %v4522_v46, %v4518_v11  ;;  %v10357_v30 = vpack.c.bf16 %v4529_v62, %v4525_v54  ;;  %v4559_v54 = vld [vmem:[#allocation11 + $0x7d8] sm:$0xff] }
0x1109   :  { %v8993_v45 = vmul.f32 -1.442695, %v11643_v40  ;;  %v8995_v44 = vmul.f32 -1.442695, %v11659_v19  ;;  %v4528_v40 = vld [vmem:[#allocation11 + $0x6e0] sm:$0xff]  ;;  %v4530_v19 = vld [vmem:[#allocation11 + $0x6f0] sm:$0xff]  ;;  %v10401_v46 = vpack.c.bf16 %v4555_v17, %v4551_v42 }
0x110a   :  { %v8994_v38 = vmul.f32 -1.442695, %v11644_v28  ;;  %v4527_v28 = vld [vmem:[#allocation11 + $0x6d8] sm:$0xff]  ;;  %v5133_v17 = vld [vmem:[#allocation12 + $0x4e8] sm:$0xff] }
0x110b   :  { %12229 = vpow2.f32 %v8993_v45  ;;  %v4531_v45 = vld [vmem:[#allocation11 + $0x6f8] sm:$0xff] }
0x110c   :  { %12231 = vpow2.f32 %v8994_v38  ;;  %v4526_v38 = vld [vmem:[#allocation11 + $0x6d0] sm:$0xff]  ;;  %v4563_v62 = vld [vmem:[#allocation11 + $0x7f8] sm:$0xff] }
0x110d   :  { %12233 = vtanh.f32 %v11660_v49  ;;  %v4533_v49 = vld [vmem:[#allocation11 + $0x708] sm:$0xff]  ;;  %v5127_v42 = vld [vmem:[#allocation12 + $0x4b8] sm:$0xff] }
0x110e   :  { %12235 = vpow2.f32 %v8995_v44  ;;  %v4537_v44 = vld [vmem:[#allocation11 + $0x728] sm:$0xff] }
0x1115   :  { %v12230_v37 = vpop.eup %12229 }
0x1116   :  { %v4409_v53 = vadd.f32 1.0, %v12230_v37  ;;  %v12232_v58 = vpop.eup %12231  ;;  %v13902_v37 = vld [vmem:[#allocation3 + $0x18] sm:$0xff] }
0x1117   :  { %v4410_v61 = vadd.f32 1.0, %v12232_v58  ;;  %v12234_v59 = vpop.eup %12233  ;;  %v10389_v58 = vpack.c.bf16 %v4531_v45, %v4527_v28  ;;  %v5105_v28 = vld [vmem:[#allocation12 + $0x408] sm:$0xff] }
0x1118   :  { %12237 = vrcp.f32 %v4409_v53  ;;  %v12236_v3 = vpop.eup %12235  ;;  %v10359_v53 = vpack.c.bf16 %v4528_v40, %v4524_v2  ;;  %v4556_v2 = vld [vmem:[#allocation11 + $0x7c0] sm:$0xff]  ;;  %v5109_v45 = vld [vmem:[#allocation12 + $0x428] sm:$0xff] }
0x1119   :  { %12239 = vrcp.f32 %v4410_v61  ;;  %v4411_v39 = vadd.f32 1.0, %v12236_v3  ;;  %v4532_v61 = vld [vmem:[#allocation11 + $0x700] sm:$0xff]  ;;  %v10391_v3 = vpack.c.bf16 %v4530_v19, %v4526_v38  ;;  %v10405_v38 = vpack.c.bf16 %v4563_v62, %v4559_v54  ;;  %v5107_v19 = vld [vmem:[#allocation12 + $0x418] sm:$0xff]  ;;  %v5130_v62 = vld [vmem:[#allocation12 + $0x4d0] sm:$0xff] }
0x111a   :  { %v4560_v40 = vld [vmem:[#allocation11 + $0x7e0] sm:$0xff]  ;;  %v5135_v54 = vld [vmem:[#allocation12 + $0x4f8] sm:$0xff] }
0x111b   :  { %12241 = vrcp.f32 %v4411_v39  ;;  %v4534_v39 = vld [vmem:[#allocation11 + $0x710] sm:$0xff] }
0x1122   :  { %v12238_v35 = vpop.eup %12237 }
0x1123   :  { %v4420_v23 = vmul.f32 %v12238_v35, %v12234_v59  ;;  %v12240_v51 = vpop.eup %12239  ;;  %v4536_v59 = vld [vmem:[#allocation11 + $0x720] sm:$0xff]  ;;  %v10361_v35 = vpack.c.bf16 %v4537_v44, %v4533_v49  ;;  %v5111_v49 = vld [vmem:[#allocation12 + $0x438] sm:$0xff]  ;;  %v10375_v44 = vpack.c.bf16 %v4560_v40, %v4556_v2  ;;  %v5141_v2 = vld [vmem:[#allocation12 + $0x528] sm:$0xff] }
0x1124   :  { %v4419_v18 = vmul.f32 %v12240_v51, %v13870_v27  ;;  %v4512_v27 = vld [vmem:[#allocation11 + $0x660] sm:$0xff]  ;;  %v4539_v51 = vld [vmem:[#allocation11 + $0x738] sm:$0xff] }
0x1125   :  { %v12242_v56 = vpop.eup %12241  ;;  %v10351_v20 = vpack.c.bf16 %v4512_v27, %v4508_v63  ;;  %v4546_v63 = vld [vmem:[#allocation11 + $0x770] sm:$0xff]  ;;  %v4549_v27 = vld [vmem:[#allocation11 + $0x788] sm:$0xff] }
0x1126   :  { %v4421_v55 = vadd.f32 %v4420_v23, %v4419_v18  ;;  %v4535_v23 = vld [vmem:[#allocation11 + $0x718] sm:$0xff]  ;;  %v4538_v18 = vld [vmem:[#allocation11 + $0x730] sm:$0xff] }
0x1127   :  { %v10393_v32 = vpack.c.bf16 %v4539_v51, %v4535_v23  ;;  %v10395_v5 = vpack.c.bf16 %v4538_v18, %v4534_v39  ;;  %v5113_v23 = vld [vmem:[#allocation12 + $0x448] sm:$0xff]  ;;  %v5106_v39 = vld [vmem:[#allocation12 + $0x410] sm:$0xff] }
0x1128   :  { %12243 = vtanh.f32 %v4421_v55  ;;  %v4541_v55 = vld [vmem:[#allocation11 + $0x748] sm:$0xff]  ;;  %v5110_v18 = vld [vmem:[#allocation12 + $0x430] sm:$0xff] }
0x1129   :  { %v5117_v51 = vld [vmem:[#allocation12 + $0x468] sm:$0xff]  ;;  %v13942_v29 = vpack.c.bf16 %v5110_v18, %v5106_v39  ;;  %v5147_v39 = vld [vmem:[#allocation12 + $0x558] sm:$0xff] }
0x1132   :  { %v12244_v50 = vpop.eup %12243 }
0x1133   :  { %v4423_v1 = vmul.f32 %v12244_v50, %v12242_v56  ;;  %v4545_v56 = vld [vmem:[#allocation11 + $0x768] sm:$0xff]  ;;  %v13908_v50 = vld [vmem:[#allocation3 + $0x20] sm:$0xff] }
0x1134   :  { %v10365_v26 = vpack.c.bf16 %v4545_v56, %v4541_v55  ;;  %v13940_v56 = vpack.c.bf16 %v5117_v51, %v5113_v23  ;;  %v5144_v51 = vld [vmem:[#allocation12 + $0x540] sm:$0xff] }
0x1135   :  { %4424 = vst.msk [vmem:[#allocation3 + $0x38] sm:$0xff] %vm954_vm1, %v4423_v1 }
0x1136   :  { %4425 = vst.msk [vmem:[#allocation3] sm:$0xff] %vm957_vm2, %v4423_v1  ;;  %v10363_v1 = vpack.c.bf16 %v4536_v59, %v4532_v61  ;;  %v13928_v61 = vpack.c.bf16 %v5109_v45, %v5105_v28  ;;  %v13932_v59 = vpack.c.bf16 %v5111_v49, %v5107_v19  ;;  %v5140_v28 = vld [vmem:[#allocation12 + $0x520] sm:$0xff]  ;;  %v5143_v19 = vld [vmem:[#allocation12 + $0x538] sm:$0xff]  ;;  %v5138_v49 = vld [vmem:[#allocation12 + $0x510] sm:$0xff] }
0x113d   :  { %v13884_v10 = vld [vmem:[#allocation3] sm:$0xff] }
0x113e   :  { %4652 = vmatmul.mubr.f32.vlgmr.msra.gmra.mrb[32].mxu0 %v13884_v10  ;;  %4765 = vmatmul.mubr.f32.vlgmr.msra.gmra.mrb[40].mxu1 %v13884_v10 }
0x113f   :  { %10348 = vmatpush1.bf16.msra.mxu0 %v10347_v7  ;;  %4657 = vmatprep.mubr.f32.mxu0 %v14974_v52  ;;  %v4547_v7 = vld [vmem:[#allocation11 + $0x778] sm:$0xff] }
0x1140   :  { %4770 = vmatprep.mubr.f32.mxu1 %v14974_v52  ;;  %10350 = vmatprep.subr.bf16.mxu0 %v10349_v60  ;;  %v4542_v60 = vld [vmem:[#allocation11 + $0x750] sm:$0xff]  ;;  %v10397_v13 = vpack.c.bf16 %v4547_v7, %v4543_v48  ;;  %v5115_v48 = vld [vmem:[#allocation12 + $0x458] sm:$0xff]  ;;  %v5125_v7 = vld [vmem:[#allocation12 + $0x4a8] sm:$0xff] }
0x1141   :  { %10380 = vmatpush1.bf16.msra.mxu1 %v10379_v57  ;;  %v13914_v57 = vld [vmem:[#allocation3 + $0x28] sm:$0xff]  ;;  %v10399_v22 = vpack.c.bf16 %v4546_v63, %v4542_v60  ;;  %v5118_v60 = vld [vmem:[#allocation12 + $0x470] sm:$0xff] }
0x1142   :  { %4658 = vmatmul.mubr.f32.gmra.mrb[34].mxu0 %v13890_v47  ;;  %4771 = vmatmul.mubr.f32.gmra.mrb[42].mxu1 %v13890_v47 }
0x1143   :  { %10352 = vmatpush1.bf16.msra.mxu0 %v10351_v20  ;;  %4663 = vmatprep.mubr.f32.mxu0 %v14974_v52  ;;  %v10369_v20 = vpack.c.bf16 %v4553_v8, %v4549_v27  ;;  %v5120_v8 = vld [vmem:[#allocation12 + $0x480] sm:$0xff] }
0x1144   :  { %4776 = vmatprep.mubr.f32.mxu1 %v14974_v52  ;;  %10382 = vmatprep.subr.bf16.mxu1 %v10381_v0  ;;  %v4552_v0 = vld [vmem:[#allocation11 + $0x7a0] sm:$0xff] }
0x1145   :  { %10354 = vmatprep.subr.bf16.mxu0 %v10353_v25  ;;  %10384 = vmatpush1.bf16.msra.mxu1 %v10383_v36  ;;  %v4554_v25 = vld [vmem:[#allocation11 + $0x7b0] sm:$0xff]  ;;  %v4557_v36 = vld [vmem:[#allocation11 + $0x7c8] sm:$0xff]  ;;  %v10371_v11 = vpack.c.bf16 %v4552_v0, %v4548_v41  ;;  %v5123_v41 = vld [vmem:[#allocation12 + $0x498] sm:$0xff] }
0x1146   :  { %4664 = vmatmul.mubr.f32.gmra.mrb[36].mxu0 %v13896_v15  ;;  %4777 = vmatmul.mubr.f32.gmra.mrb[44].mxu1 %v13896_v15  ;;  %v5129_v0 = vld [vmem:[#allocation12 + $0x4c8] sm:$0xff] }
0x1147   :  { %10356 = vmatpush1.bf16.msra.mxu0 %v10355_v12  ;;  %4669 = vmatprep.mubr.f32.mxu0 %v14974_v52  ;;  %v10403_v12 = vpack.c.bf16 %v4554_v25, %v4550_v24  ;;  %v13967_v25 = vpack.c.bf16 %v5127_v42, %v5123_v41  ;;  %v5156_v42 = vld [vmem:[#allocation12 + $0x5a0] sm:$0xff] }
0x1148   :  { %4782 = vmatprep.mubr.f32.mxu1 %v14974_v52  ;;  %10386 = vmatprep.subr.bf16.mxu1 %v10385_v6  ;;  %v10373_v6 = vpack.c.bf16 %v4561_v4, %v4557_v36  ;;  %v5128_v36 = vld [vmem:[#allocation12 + $0x4c0] sm:$0xff] }
0x1149   :  { %10388 = vmatpush1.bf16.msra.mxu1 %v10387_v16  ;;  %10358 = vmatprep.subr.bf16.mxu0 %v10357_v30  ;;  %v4558_v16 = vld [vmem:[#allocation11 + $0x7d0] sm:$0xff]  ;;  %v5132_v4 = vld [vmem:[#allocation12 + $0x4e0] sm:$0xff] }
0x114a   :  { %4670 = vmatmul.mubr.f32.gmra.mrb[38].mxu0 %v13902_v37  ;;  %4783 = vmatmul.mubr.f32.gmra.mrb[46].mxu1 %v13902_v37  ;;  %v4562_v30 = vld [vmem:[#allocation11 + $0x7f0] sm:$0xff]  ;;  %v13981_v40 = vpack.c.bf16 %v5132_v4, %v5128_v36  ;;  %v5165_v36 = vld [vmem:[#allocation12 + $0x5e8] sm:$0xff] }
0x114b   :  { %4675 = vmatprep.mubr.f32.mxu0 %v14974_v52  ;;  %4788 = vmatprep.mubr.f32.mxu1 %v14974_v52 }
0x114c   :  { %10360 = vmatpush1.bf16.msra.mxu0 %v10359_v53  ;;  %10390 = vmatprep.subr.bf16.mxu1 %v10389_v58  ;;  %v13926_v53 = vld [vmem:[#allocation3 + $0x38] sm:$0xff]  ;;  %v10407_v58 = vpack.c.bf16 %v4562_v30, %v4558_v16  ;;  %v5136_v30 = vld [vmem:[#allocation12 + $0x500] sm:$0xff] }
0x114d   :  { %10392 = vmatpush1.bf16.msra.mxu1 %v10391_v3  ;;  %10362 = vmatprep.subr.bf16.mxu0 %v10361_v35  ;;  %v5104_v3 = vld [vmem:[#allocation12 + $0x400] sm:$0xff] }
0x114e   :  { %4676 = vmatmul.mubr.f32.gmra.mrb[40].mxu0 %v13908_v50  ;;  %4789 = vmatmul.mubr.f32.gmra.mrb[48].mxu1 %v13908_v50  ;;  %v5108_v35 = vld [vmem:[#allocation12 + $0x420] sm:$0xff] }
0x114f   :  { %4681 = vmatprep.mubr.f32.mxu0 %v14974_v52  ;;  %4794 = vmatprep.mubr.f32.mxu1 %v14974_v52  ;;  %v13938_v55 = vpack.c.bf16 %v5108_v35, %v5104_v3  ;;  %v5149_v3 = vld [vmem:[#allocation12 + $0x568] sm:$0xff]  ;;  %v13997_v35 = vpack.c.bf16 %v5140_v28, %v5136_v30  ;;  %v5162_v30 = vld [vmem:[#allocation12 + $0x5d0] sm:$0xff] }
0x1150   :  { %10364 = vmatpush1.bf16.msra.mxu0 %v10363_v1  ;;  %10394 = vmatprep.subr.bf16.mxu1 %v10393_v32  ;;  %v5112_v1 = vld [vmem:[#allocation12 + $0x440] sm:$0xff]  ;;  %v5166_v28 = vld [vmem:[#allocation12 + $0x5f0] sm:$0xff] }
0x1151   :  { %10396 = vmatpush1.bf16.msra.mxu1 %v10395_v5  ;;  %10366 = vmatprep.subr.bf16.mxu0 %v10365_v26  ;;  %v5116_v32 = vld [vmem:[#allocation12 + $0x460] sm:$0xff]  ;;  %v5119_v5 = vld [vmem:[#allocation12 + $0x478] sm:$0xff]  ;;  %v5114_v26 = vld [vmem:[#allocation12 + $0x450] sm:$0xff] }
0x1152   :  { %4682 = vmatmul.mubr.f32.gmra.mrb[42].mxu0 %v13914_v57  ;;  %4795 = vmatmul.mubr.f32.gmra.mrb[50].mxu1 %v13914_v57  ;;  %v13948_v63 = vpack.c.bf16 %v5116_v32, %v5112_v1  ;;  %v13952_v27 = vpack.c.bf16 %v5119_v5, %v5115_v48  ;;  %v5148_v1 = vld [vmem:[#allocation12 + $0x560] sm:$0xff]  ;;  %v5151_v32 = vld [vmem:[#allocation12 + $0x578] sm:$0xff]  ;;  %v5146_v48 = vld [vmem:[#allocation12 + $0x550] sm:$0xff] }
0x1153   :  { %4687 = vmatprep.mubr.f32.mxu0 %v14974_v52  ;;  %4800 = vmatprep.mubr.f32.mxu1 %v14974_v52  ;;  %v5150_v5 = vld [vmem:[#allocation12 + $0x570] sm:$0xff] }
0x1154   :  { %10368 = vmatpush1.bf16.msra.mxu0 %v10367_v31  ;;  %10398 = vmatprep.subr.bf16.mxu1 %v10397_v13  ;;  %v5124_v31 = vld [vmem:[#allocation12 + $0x4a0] sm:$0xff]  ;;  %v13957_v13 = vpack.c.bf16 %v5118_v60, %v5114_v26  ;;  %v5153_v26 = vld [vmem:[#allocation12 + $0x588] sm:$0xff]  ;;  %v14015_v60 = vpack.c.bf16 %v5151_v32, %v5147_v39 }
0x1155   :  { %10400 = vmatpush1.bf16.msra.mxu1 %v10399_v22  ;;  %10370 = vmatprep.subr.bf16.mxu0 %v10369_v20  ;;  %v5122_v22 = vld [vmem:[#allocation12 + $0x490] sm:$0xff]  ;;  %v13963_v24 = vpack.c.bf16 %v5124_v31, %v5120_v8  ;;  %v5152_v8 = vld [vmem:[#allocation12 + $0x580] sm:$0xff]  ;;  %v5155_v31 = vld [vmem:[#allocation12 + $0x598] sm:$0xff] }
0x1156   :  { %4688 = vmatmul.mubr.f32.gmra.mrb[44].mxu0 %v13920_v21  ;;  %4801 = vmatmul.mubr.f32.gmra.mrb[52].mxu1 %v13920_v21  ;;  %v5126_v20 = vld [vmem:[#allocation12 + $0x4b0] sm:$0xff]  ;;  %v14029_v4 = vpack.c.bf16 %v5156_v42, %v5152_v8 }
0x1157   :  { %4693 = vmatprep.mubr.f32.mxu0 %v14974_v52  ;;  %4806 = vmatprep.mubr.f32.mxu1 %v14974_v52 }
0x1158   :  { %10372 = vmatpush1.bf16.msra.mxu0 %v10371_v11  ;;  %10402 = vmatprep.subr.bf16.mxu1 %v10401_v46  ;;  %v13973_v11 = vpack.c.bf16 %v5133_v17, %v5129_v0  ;;  %v5131_v46 = vld [vmem:[#allocation12 + $0x4d8] sm:$0xff]  ;;  %v5158_v0 = vld [vmem:[#allocation12 + $0x5b0] sm:$0xff]  ;;  %v5161_v17 = vld [vmem:[#allocation12 + $0x5c8] sm:$0xff] }
0x1159   :  { %10404 = vmatpush1.bf16.msra.mxu1 %v10403_v12  ;;  %10374 = vmatprep.subr.bf16.mxu0 %v10373_v6  ;;  %v5134_v12 = vld [vmem:[#allocation12 + $0x4f0] sm:$0xff]  ;;  %v5137_v6 = vld [vmem:[#allocation12 + $0x508] sm:$0xff]  ;;  %v13983_v16 = vpack.c.bf16 %v5135_v54, %v5131_v46  ;;  %v5163_v54 = vld [vmem:[#allocation12 + $0x5d8] sm:$0xff] }
0x115a   :  { %4694 = vmatmul.mubr.f32.gmra.mrb[46].mxu0 %v13926_v53  ;;  %4807 = vmatmul.mubr.f32.gmra.mrb[54].mxu1 %v13926_v53  ;;  %v13989_v45 = vpack.c.bf16 %v5141_v2, %v5137_v6  ;;  %v5160_v6 = vld [vmem:[#allocation12 + $0x5c0] sm:$0xff] }
0x115b   :  { %10406 = vmatprep.subr.bf16.mxu1 %v10405_v38  ;;  %4909 = vmatprep.mubr.f32.mxu0 %v14974_v52  ;;  %v5139_v38 = vld [vmem:[#allocation12 + $0x518] sm:$0xff]  ;;  %v5164_v2 = vld [vmem:[#allocation12 + $0x5e0] sm:$0xff] }
0x115c   :  { %10376 = vmatpush1.bf16.msra.mxu0 %v10375_v44  ;;  %5022 = vmatprep.mubr.f32.mxu1 %v14974_v52  ;;  %v5142_v44 = vld [vmem:[#allocation12 + $0x530] sm:$0xff]  ;;  %v13999_v23 = vpack.c.bf16 %v5143_v19, %v5139_v38  ;;  %v14047_v19 = vpack.c.bf16 %v5164_v2, %v5160_v6 }
0x115d   :  { %10408 = vmatpush1.bf16.msra.mxu1 %v10407_v58  ;;  %10410 = vmatprep.subr.bf16.mxu0 %v13928_v61  ;;  %v5145_v58 = vld [vmem:[#allocation12 + $0x548] sm:$0xff] }
0x115e   :  { %10442 = vmatprep.subr.bf16.mxu1 %v13932_v59  ;;  %v14005_v18 = vpack.c.bf16 %v5149_v3, %v5145_v58 }
0x1162   :  { %4910 = vmatmul.mubr.f32.vlgmr.msra.gmra.mrb[46].mxu0 %v13884_v10  ;;  %5023 = vmatmul.mubr.f32.vlgmr.msra.gmra.mrb[54].mxu1 %v13884_v10  ;;  %v13955_v10 = vpack.c.bf16 %v5125_v7, %v5121_v33  ;;  %v5157_v33 = vld [vmem:[#allocation12 + $0x5a8] sm:$0xff]  ;;  %v14013_v7 = vpack.c.bf16 %v5148_v1, %v5144_v51 }
0x1163   :  { %10412 = vmatpush1.bf16.msra.mxu0 %v13938_v55  ;;  %4915 = vmatprep.mubr.f32.mxu0 %v14974_v52  ;;  %v14021_v41 = vpack.c.bf16 %v5157_v33, %v5153_v26 }
0x1164   :  { %5028 = vmatprep.mubr.f32.mxu1 %v14974_v52  ;;  %10414 = vmatprep.subr.bf16.mxu0 %v13940_v56 }
0x1165   :  { %10444 = vmatpush1.bf16.msra.mxu1 %v13942_v29 }
0x1166   :  { %4916 = vmatmul.mubr.f32.gmra.mrb[44].mxu0 %v13890_v47  ;;  %5029 = vmatmul.mubr.f32.gmra.mrb[52].mxu1 %v13890_v47  ;;  %v13971_v47 = vpack.c.bf16 %v5126_v20, %v5122_v22  ;;  %v5159_v22 = vld [vmem:[#allocation12 + $0x5b8] sm:$0xff]  ;;  %v5154_v20 = vld [vmem:[#allocation12 + $0x590] sm:$0xff] }
0x1167   :  { %10416 = vmatpush1.bf16.msra.mxu0 %v13948_v63  ;;  %4921 = vmatprep.mubr.f32.mxu0 %v14974_v52  ;;  %v14031_v46 = vpack.c.bf16 %v5159_v22, %v5155_v31 }
0x1168   :  { %5034 = vmatprep.mubr.f32.mxu1 %v14974_v52  ;;  %10446 = vmatprep.subr.bf16.mxu1 %v13952_v27 }
0x1169   :  { %10418 = vmatprep.subr.bf16.mxu0 %v13955_v10  ;;  %10448 = vmatpush1.bf16.msra.mxu1 %v13957_v13 }
0x116a   :  { %4922 = vmatmul.mubr.f32.gmra.mrb[42].mxu0 %v13896_v15  ;;  %5035 = vmatmul.mubr.f32.gmra.mrb[50].mxu1 %v13896_v15  ;;  %v13987_v15 = vpack.c.bf16 %v5134_v12, %v5130_v62  ;;  %v5167_v62 = vld [vmem:[#allocation12 + $0x5f8] sm:$0xff]  ;;  %v14037_v12 = vpack.c.bf16 %v5165_v36, %v5161_v17 }
0x116b   :  { %10420 = vmatpush1.bf16.msra.mxu0 %v13963_v24  ;;  %4927 = vmatprep.mubr.f32.mxu0 %v14974_v52  ;;  %v14043_v38 = vpack.c.bf16 %v5167_v62, %v5163_v54 }
0x116c   :  { %5040 = vmatprep.mubr.f32.mxu1 %v14974_v52  ;;  %10450 = vmatprep.subr.bf16.mxu1 %v13967_v25 }
0x116d   :  { %10452 = vmatpush1.bf16.msra.mxu1 %v13971_v47  ;;  %10422 = vmatprep.subr.bf16.mxu0 %v13973_v11 }
0x116e   :  { %4928 = vmatmul.mubr.f32.gmra.mrb[40].mxu0 %v13902_v37  ;;  %5041 = vmatmul.mubr.f32.gmra.mrb[48].mxu1 %v13902_v37  ;;  %v14003_v37 = vpack.c.bf16 %v5142_v44, %v5138_v49  ;;  %v14051_v49 = vpack.c.bf16 %v5166_v28, %v5162_v30 }
0x116f   :  { %4933 = vmatprep.mubr.f32.mxu0 %v14974_v52  ;;  %5046 = vmatprep.mubr.f32.mxu1 %v14974_v52 }
0x1170   :  { %10424 = vmatpush1.bf16.msra.mxu0 %v13981_v40  ;;  %10454 = vmatprep.subr.bf16.mxu1 %v13983_v16 }
0x1171   :  { %10456 = vmatpush1.bf16.msra.mxu1 %v13987_v15  ;;  %10426 = vmatprep.subr.bf16.mxu0 %v13989_v45 }
0x1172   :  { %4934 = vmatmul.mubr.f32.gmra.mrb[38].mxu0 %v13908_v50  ;;  %5047 = vmatmul.mubr.f32.gmra.mrb[46].mxu1 %v13908_v50  ;;  %v14019_v50 = vpack.c.bf16 %v5150_v5, %v5146_v48 }
0x1173   :  { %4939 = vmatprep.mubr.f32.mxu0 %v14974_v52  ;;  %5052 = vmatprep.mubr.f32.mxu1 %v14974_v52 }
0x1174   :  { %10428 = vmatpush1.bf16.msra.mxu0 %v13997_v35  ;;  %10458 = vmatprep.subr.bf16.mxu1 %v13999_v23 }
0x1175   :  { %10460 = vmatpush1.bf16.msra.mxu1 %v14003_v37  ;;  %10430 = vmatprep.subr.bf16.mxu0 %v14005_v18 }
0x1176   :  { %4940 = vmatmul.mubr.f32.gmra.mrb[36].mxu0 %v13914_v57  ;;  %5053 = vmatmul.mubr.f32.gmra.mrb[44].mxu1 %v13914_v57  ;;  %v14035_v57 = vpack.c.bf16 %v5158_v0, %v5154_v20 }
0x1177   :  { %4945 = vmatprep.mubr.f32.mxu0 %v14974_v52  ;;  %5058 = vmatprep.mubr.f32.mxu1 %v14974_v52 }
0x1178   :  { %10432 = vmatpush1.bf16.msra.mxu0 %v14013_v7  ;;  %10462 = vmatprep.subr.bf16.mxu1 %v14015_v60 }
0x1179   :  { %10464 = vmatpush1.bf16.msra.mxu1 %v14019_v50  ;;  %10434 = vmatprep.subr.bf16.mxu0 %v14021_v41 }
0x117a   :  { %4946 = vmatmul.mubr.f32.gmra.mrb[34].mxu0 %v13920_v21  ;;  %5059 = vmatmul.mubr.f32.gmra.mrb[42].mxu1 %v13920_v21  ;;  %v4565_v21 = vld [vmem:[#allocation14 + $0x8] sm:$0xf] }
0x117b   :  { %4951 = vmatprep.mubr.f32.mxu0 %v14974_v52  ;;  %5064 = vmatprep.mubr.f32.mxu1 %v14974_v52  ;;  %v14102_v44 = vrot.slane %v4565_v21, %v13070_v9  ;;  %v14107_v26 = vrot.slane %v4565_v21, %v14975_v43  ;;  %v14110_v33 = vrot.slane %v4565_v21, %v14976_v34 }
0x117c   :  { %10436 = vmatpush1.bf16.msra.mxu0 %v14029_v4  ;;  %10466 = vmatprep.subr.bf16.mxu1 %v14031_v46 }
0x117d   :  { %10468 = vmatpush1.bf16.msra.mxu1 %v14035_v57  ;;  %10438 = vmatprep.subr.bf16.mxu0 %v14037_v12 }
0x117e   :  { %4952 = vmatmul.mubr.f32.gmra.mrb[32].mxu0 %v13926_v53  ;;  %5065 = vmatmul.mubr.f32.gmra.mrb[40].mxu1 %v13926_v53  ;;  %v14099_v53 = vrot.slane %v4565_v21, %v13072_v14 }
0x117f   :  { %10470 = vmatprep.subr.bf16.mxu1 %v14043_v38  ;;  %5236 = vmatprep.mubr.f32.mxu0 %v14974_v52 }
0x1180   :  { %10440 = vmatpush1.bf16.msra.mxu0 %v14047_v19  ;;  %5307 = vmatprep.mubr.f32.mxu1 %v14974_v52 }
0x1181   :  { %10472 = vmatpush1.bf16.msra.mxu1 %v14051_v49  ;;  %10474 = vmatprep.subr.bf16.mxu0 %v13928_v61 }
0x1182   :  { %10506 = vmatprep.subr.bf16.mxu1 %v13932_v59 }
0x1186   :  { %5237 = vmatmul.mubr.f32.vlgmr.msra.gmra.mrb[32].mxu0 %v14974_v52  ;;  %5308 = vmatmul.mubr.f32.vlgmr.msra.gmra.mrb[40].mxu1 %v14974_v52 }
0x1187   :  { %10476 = vmatpush1.bf16.msra.mxu0 %v13938_v55  ;;  %10508 = vmatpush1.bf16.msra.mxu1 %v13942_v29 }
0x1188   :  { %10478 = vmatprep.subr.bf16.mxu0 %v13940_v56  ;;  %10510 = vmatprep.subr.bf16.mxu1 %v13952_v27 }
0x1189   :  { %5416 = vmatprep.mubr.f32.mxu0 %v14974_v52  ;;  %5487 = vmatprep.mubr.f32.mxu1 %v14974_v52 }
0x118b   :  { %10480 = vmatpush1.bf16.msra.mxu0 %v13948_v63  ;;  %10512 = vmatpush1.bf16.msra.mxu1 %v13957_v13 }
0x118c   :  { %10482 = vmatprep.subr.bf16.mxu0 %v13955_v10  ;;  %10514 = vmatprep.subr.bf16.mxu1 %v13967_v25 }
0x118f   :  { %10484 = vmatpush1.bf16.msra.mxu0 %v13963_v24  ;;  %10516 = vmatpush1.bf16.msra.mxu1 %v13971_v47 }
0x1190   :  { %10486 = vmatprep.subr.bf16.mxu0 %v13973_v11  ;;  %10518 = vmatprep.subr.bf16.mxu1 %v13983_v16 }
0x1193   :  { %10488 = vmatpush1.bf16.msra.mxu0 %v13981_v40  ;;  %10520 = vmatpush1.bf16.msra.mxu1 %v13987_v15 }
0x1194   :  { %10490 = vmatprep.subr.bf16.mxu0 %v13989_v45  ;;  %10522 = vmatprep.subr.bf16.mxu1 %v13999_v23 }
0x1197   :  { %10492 = vmatpush1.bf16.msra.mxu0 %v13997_v35  ;;  %10524 = vmatpush1.bf16.msra.mxu1 %v14003_v37 }
0x1198   :  { %10494 = vmatprep.subr.bf16.mxu0 %v14005_v18  ;;  %10526 = vmatprep.subr.bf16.mxu1 %v14015_v60 }
0x119b   :  { %10496 = vmatpush1.bf16.msra.mxu0 %v14013_v7  ;;  %10528 = vmatpush1.bf16.msra.mxu1 %v14019_v50 }
0x119c   :  { %10498 = vmatprep.subr.bf16.mxu0 %v14021_v41  ;;  %10530 = vmatprep.subr.bf16.mxu1 %v14031_v46 }
0x119f   :  { %10500 = vmatpush1.bf16.msra.mxu0 %v14029_v4  ;;  %10532 = vmatpush1.bf16.msra.mxu1 %v14035_v57 }
0x11a0   :  { %10502 = vmatprep.subr.bf16.mxu0 %v14037_v12  ;;  %10534 = vmatprep.subr.bf16.mxu1 %v14043_v38 }
0x11a3   :  { %10504 = vmatpush1.bf16.msra.mxu0 %v14047_v19  ;;  %10536 = vmatpush1.bf16.msra.mxu1 %v14051_v49 }
0x11a4   :  { %10538 = vmatprep.subr.bf16.mxu0 %v13928_v61  ;;  %10570 = vmatprep.subr.bf16.mxu1 %v13932_v59 }
0x1259   :  { %v5238_v58 = vpop.f32.mrb[32].mxu0  ;;  %v5309_v3 = vpop.f32.mrb[40].mxu1 }
0x125a   :  { %v11661_v51 = vadd.f32 %v5238_v58, %v14099_v53  ;;  %v5240_v39 = vpop.f32.mrb[33].mxu0  ;;  %v5311_v1 = vpop.f32.mrb[41].mxu1  ;;  %v11677_v8 = vadd.f32 %v5309_v3, %v14107_v26 }
0x125b   :  { %v11662_v32 = vadd.f32 %v5240_v39, %v14102_v44  ;;  %v11678_v31 = vadd.f32 %v5311_v1, %v14110_v33 }
0x125c   :  { %v8996_v48 = vmul.f32 -1.442695, %v11661_v51  ;;  %v8998_v42 = vmul.f32 -1.442695, %v11677_v8 }
0x125d   :  { %v8997_v5 = vmul.f32 -1.442695, %v11662_v32 }
0x125e   :  { %12245 = vpow2.f32 %v8996_v48 }
0x125f   :  { %12247 = vpow2.f32 %v8997_v5 }
0x1260   :  { %12249 = vtanh.f32 %v11678_v31 }
0x1261   :  { %12251 = vpow2.f32 %v8998_v42 }
0x1268   :  { %v12246_v22 = vpop.eup %12245 }
0x1269   :  { %v5331_v20 = vadd.f32 1.0, %v12246_v22  ;;  %v12248_v0 = vpop.eup %12247 }
0x126a   :  { %v5332_v17 = vadd.f32 1.0, %v12248_v0  ;;  %v12250_v36 = vpop.eup %12249 }
0x126b   :  { %12253 = vrcp.f32 %v5331_v20  ;;  %v12252_v54 = vpop.eup %12251 }
0x126c   :  { %12255 = vrcp.f32 %v5332_v17  ;;  %v5333_v30 = vadd.f32 1.0, %v12252_v54 }
0x126e   :  { %12257 = vrcp.f32 %v5333_v30 }
0x1275   :  { %v12254_v62 = vpop.eup %12253 }
0x1276   :  { %v5342_v6 = vmul.f32 %v12254_v62, %v12250_v36  ;;  %v12256_v2 = vpop.eup %12255 }
0x1277   :  { %v5341_v28 = vmul.f32 0.0, %v12256_v2 }
0x1278   :  { %v12258_v58 = vpop.eup %12257 }
0x1279   :  { %v14114_v21 = vadd.f32 %v5342_v6, %v5341_v28 }
0x127b   :  { %12259 = vtanh.f32 %v14114_v21 }
0x1285   :  { %v12260_v3 = vpop.eup %12259 }
0x1286   :  { %v5345_v51 = vmul.f32 %v12260_v3, %v12258_v58 }
0x1288   :  { %5346 = vst.msk [vmem:[#allocation2] sm:$0xff] %vm954_vm1, %v5345_v51  ;;  %5417 = vmatmul.mubr.f32.vlgmr.msra.gmra.mrb[34].mxu0 %v5345_v51  ;;  %5488 = vmatmul.mubr.f32.vlgmr.msra.gmra.mrb[42].mxu1 %v5345_v51 }
0x1289   :  { %5347 = vst.msk [vmem:[#allocation2 + $0x38] sm:$0xff] %vm957_vm2, %v5345_v51  ;;  %10540 = vmatpush1.bf16.msra.mxu0 %v13938_v55  ;;  %10572 = vmatpush1.bf16.msra.mxu1 %v13942_v29 }
0x128a   :  { %10542 = vmatprep.subr.bf16.mxu0 %v13940_v56  ;;  %10574 = vmatprep.subr.bf16.mxu1 %v13952_v27 }
0x128b   :  { %5596 = vmatprep.mubr.f32.mxu0 %v14974_v52  ;;  %5667 = vmatprep.mubr.f32.mxu1 %v14974_v52 }
0x128d   :  { %10544 = vmatpush1.bf16.msra.mxu0 %v13948_v63  ;;  %10576 = vmatpush1.bf16.msra.mxu1 %v13957_v13 }
0x128e   :  { %10546 = vmatprep.subr.bf16.mxu0 %v13955_v10  ;;  %10578 = vmatprep.subr.bf16.mxu1 %v13967_v25 }
0x1291   :  { %10548 = vmatpush1.bf16.msra.mxu0 %v13963_v24  ;;  %10580 = vmatpush1.bf16.msra.mxu1 %v13971_v47 }
0x1292   :  { %10550 = vmatprep.subr.bf16.mxu0 %v13973_v11  ;;  %10582 = vmatprep.subr.bf16.mxu1 %v13983_v16 }
0x1295   :  { %10552 = vmatpush1.bf16.msra.mxu0 %v13981_v40  ;;  %10584 = vmatpush1.bf16.msra.mxu1 %v13987_v15 }
0x1296   :  { %10554 = vmatprep.subr.bf16.mxu0 %v13989_v45  ;;  %10586 = vmatprep.subr.bf16.mxu1 %v13999_v23 }
0x1299   :  { %10556 = vmatpush1.bf16.msra.mxu0 %v13997_v35  ;;  %10588 = vmatpush1.bf16.msra.mxu1 %v14003_v37 }
0x129a   :  { %10558 = vmatprep.subr.bf16.mxu0 %v14005_v18  ;;  %10590 = vmatprep.subr.bf16.mxu1 %v14015_v60 }
0x129d   :  { %10560 = vmatpush1.bf16.msra.mxu0 %v14013_v7  ;;  %10592 = vmatpush1.bf16.msra.mxu1 %v14019_v50 }
0x129e   :  { %10562 = vmatprep.subr.bf16.mxu0 %v14021_v41  ;;  %10594 = vmatprep.subr.bf16.mxu1 %v14031_v46 }
0x12a1   :  { %10564 = vmatpush1.bf16.msra.mxu0 %v14029_v4  ;;  %10596 = vmatpush1.bf16.msra.mxu1 %v14035_v57 }
0x12a2   :  { %10566 = vmatprep.subr.bf16.mxu0 %v14037_v12  ;;  %10598 = vmatprep.subr.bf16.mxu1 %v14043_v38 }
0x12a5   :  { %10568 = vmatpush1.bf16.msra.mxu0 %v14047_v19  ;;  %10600 = vmatpush1.bf16.msra.mxu1 %v14051_v49 }
0x12a6   :  { %10602 = vmatprep.subr.bf16.mxu0 %v13928_v61  ;;  %10634 = vmatprep.subr.bf16.mxu1 %v13932_v59 }
0x135b   :  { %v5418_v39 = vpop.f32.mrb[34].mxu0  ;;  %v5489_v1 = vpop.f32.mrb[42].mxu1 }
0x135c   :  { %v11663_v32 = vadd.f32 %v5418_v39, %v14099_v53  ;;  %v5420_v48 = vpop.f32.mrb[35].mxu0  ;;  %v5491_v5 = vpop.f32.mrb[43].mxu1  ;;  %v11679_v22 = vadd.f32 %v5489_v1, %v14107_v26 }
0x135d   :  { %v11664_v8 = vadd.f32 %v5420_v48, %v14102_v44  ;;  %v11680_v20 = vadd.f32 %v5491_v5, %v14110_v33 }
0x135e   :  { %v8999_v31 = vmul.f32 -1.442695, %v11663_v32  ;;  %v9001_v0 = vmul.f32 -1.442695, %v11679_v22 }
0x135f   :  { %v9000_v42 = vmul.f32 -1.442695, %v11664_v8 }
0x1360   :  { %12261 = vpow2.f32 %v8999_v31 }
0x1361   :  { %12263 = vpow2.f32 %v9000_v42 }
0x1362   :  { %12265 = vtanh.f32 %v11680_v20 }
0x1363   :  { %12267 = vpow2.f32 %v9001_v0 }
0x136a   :  { %v12262_v17 = vpop.eup %12261 }
0x136b   :  { %v5511_v36 = vadd.f32 1.0, %v12262_v17  ;;  %v12264_v54 = vpop.eup %12263 }
0x136c   :  { %v5512_v62 = vadd.f32 1.0, %v12264_v54  ;;  %v12266_v6 = vpop.eup %12265 }
0x136d   :  { %12269 = vrcp.f32 %v5511_v36  ;;  %v12268_v2 = vpop.eup %12267 }
0x136e   :  { %12271 = vrcp.f32 %v5512_v62  ;;  %v5513_v3 = vadd.f32 1.0, %v12268_v2 }
0x1370   :  { %12273 = vrcp.f32 %v5513_v3 }
0x1377   :  { %v12270_v30 = vpop.eup %12269 }
0x1378   :  { %v5522_v28 = vmul.f32 %v12270_v30, %v12266_v6  ;;  %v12272_v58 = vpop.eup %12271 }
0x1379   :  { %v5521_v51 = vmul.f32 %v12272_v58, %v14114_v21 }
0x137a   :  { %v12274_v1 = vpop.eup %12273 }
0x137b   :  { %v14158_v39 = vadd.f32 %v5522_v28, %v5521_v51 }
0x137d   :  { %12275 = vtanh.f32 %v14158_v39 }
0x1387   :  { %v12276_v32 = vpop.eup %12275 }
0x1388   :  { %v5525_v48 = vmul.f32 %v12276_v32, %v12274_v1 }
0x138a   :  { %5597 = vmatmul.mubr.f32.vlgmr.msra.gmra.mrb[36].mxu0 %v5525_v48  ;;  %5526 = vst.msk [vmem:[#allocation2 + $0x8] sm:$0xff] %vm954_vm1, %v5525_v48  ;;  %5668 = vmatmul.mubr.f32.vlgmr.msra.gmra.mrb[44].mxu1 %v5525_v48 }
0x138b   :  { %5527 = vst.msk [vmem:[#allocation2 + $0x30] sm:$0xff] %vm957_vm2, %v5525_v48  ;;  %10604 = vmatpush1.bf16.msra.mxu0 %v13938_v55  ;;  %10636 = vmatpush1.bf16.msra.mxu1 %v13942_v29 }
0x138c   :  { %10606 = vmatprep.subr.bf16.mxu0 %v13940_v56  ;;  %10638 = vmatprep.subr.bf16.mxu1 %v13952_v27 }
0x138d   :  { %5776 = vmatprep.mubr.f32.mxu0 %v14974_v52  ;;  %5847 = vmatprep.mubr.f32.mxu1 %v14974_v52 }
0x138f   :  { %10608 = vmatpush1.bf16.msra.mxu0 %v13948_v63  ;;  %10640 = vmatpush1.bf16.msra.mxu1 %v13957_v13 }
0x1390   :  { %10610 = vmatprep.subr.bf16.mxu0 %v13955_v10  ;;  %10642 = vmatprep.subr.bf16.mxu1 %v13967_v25 }
0x1393   :  { %10612 = vmatpush1.bf16.msra.mxu0 %v13963_v24  ;;  %10644 = vmatpush1.bf16.msra.mxu1 %v13971_v47 }
0x1394   :  { %10614 = vmatprep.subr.bf16.mxu0 %v13973_v11  ;;  %10646 = vmatprep.subr.bf16.mxu1 %v13983_v16 }
0x1397   :  { %10616 = vmatpush1.bf16.msra.mxu0 %v13981_v40  ;;  %10648 = vmatpush1.bf16.msra.mxu1 %v13987_v15 }
0x1398   :  { %10618 = vmatprep.subr.bf16.mxu0 %v13989_v45  ;;  %10650 = vmatprep.subr.bf16.mxu1 %v13999_v23 }
0x139b   :  { %10620 = vmatpush1.bf16.msra.mxu0 %v13997_v35  ;;  %10652 = vmatpush1.bf16.msra.mxu1 %v14003_v37 }
0x139c   :  { %10622 = vmatprep.subr.bf16.mxu0 %v14005_v18  ;;  %10654 = vmatprep.subr.bf16.mxu1 %v14015_v60 }
0x139f   :  { %10624 = vmatpush1.bf16.msra.mxu0 %v14013_v7  ;;  %10656 = vmatpush1.bf16.msra.mxu1 %v14019_v50 }
0x13a0   :  { %10626 = vmatprep.subr.bf16.mxu0 %v14021_v41  ;;  %10658 = vmatprep.subr.bf16.mxu1 %v14031_v46 }
0x13a3   :  { %10628 = vmatpush1.bf16.msra.mxu0 %v14029_v4  ;;  %10660 = vmatpush1.bf16.msra.mxu1 %v14035_v57 }
0x13a4   :  { %10630 = vmatprep.subr.bf16.mxu0 %v14037_v12  ;;  %10662 = vmatprep.subr.bf16.mxu1 %v14043_v38 }
0x13a7   :  { %10632 = vmatpush1.bf16.msra.mxu0 %v14047_v19  ;;  %10664 = vmatpush1.bf16.msra.mxu1 %v14051_v49 }
0x13a8   :  { %10666 = vmatprep.subr.bf16.mxu0 %v13928_v61  ;;  %10698 = vmatprep.subr.bf16.mxu1 %v13932_v59 }
0x145d   :  { %v5598_v21 = vpop.f32.mrb[36].mxu0  ;;  %v5669_v5 = vpop.f32.mrb[44].mxu1 }
0x145e   :  { %v11665_v8 = vadd.f32 %v5598_v21, %v14099_v53  ;;  %v5600_v31 = vpop.f32.mrb[37].mxu0  ;;  %v5671_v42 = vpop.f32.mrb[45].mxu1  ;;  %v11681_v17 = vadd.f32 %v5669_v5, %v14107_v26 }
0x145f   :  { %v11666_v22 = vadd.f32 %v5600_v31, %v14102_v44  ;;  %v11682_v36 = vadd.f32 %v5671_v42, %v14110_v33 }
0x1460   :  { %v9002_v20 = vmul.f32 -1.442695, %v11665_v8  ;;  %v9004_v54 = vmul.f32 -1.442695, %v11681_v17 }
0x1461   :  { %v9003_v0 = vmul.f32 -1.442695, %v11666_v22 }
0x1462   :  { %12277 = vpow2.f32 %v9002_v20 }
0x1463   :  { %12279 = vpow2.f32 %v9003_v0 }
0x1464   :  { %12281 = vtanh.f32 %v11682_v36 }
0x1465   :  { %12283 = vpow2.f32 %v9004_v54 }
0x146c   :  { %v12278_v62 = vpop.eup %12277 }
0x146d   :  { %v5691_v6 = vadd.f32 1.0, %v12278_v62  ;;  %v12280_v2 = vpop.eup %12279 }
0x146e   :  { %v5692_v30 = vadd.f32 1.0, %v12280_v2  ;;  %v12282_v28 = vpop.eup %12281 }
0x146f   :  { %12285 = vrcp.f32 %v5691_v6  ;;  %v12284_v58 = vpop.eup %12283 }
0x1470   :  { %12287 = vrcp.f32 %v5692_v30  ;;  %v5693_v32 = vadd.f32 1.0, %v12284_v58 }
0x1472   :  { %12289 = vrcp.f32 %v5693_v32 }
0x1479   :  { %v12286_v3 = vpop.eup %12285 }
0x147a   :  { %v5702_v51 = vmul.f32 %v12286_v3, %v12282_v28  ;;  %v12288_v1 = vpop.eup %12287 }
0x147b   :  { %v5701_v48 = vmul.f32 %v12288_v1, %v14158_v39 }
0x147c   :  { %v12290_v5 = vpop.eup %12289 }
0x147d   :  { %v14202_v21 = vadd.f32 %v5702_v51, %v5701_v48 }
0x147f   :  { %12291 = vtanh.f32 %v14202_v21 }
0x1489   :  { %v12292_v8 = vpop.eup %12291 }
0x148a   :  { %v5705_v31 = vmul.f32 %v12292_v8, %v12290_v5 }
0x148c   :  { %5777 = vmatmul.mubr.f32.vlgmr.msra.gmra.mrb[38].mxu0 %v5705_v31  ;;  %5706 = vst.msk [vmem:[#allocation2 + $0x10] sm:$0xff] %vm954_vm1, %v5705_v31  ;;  %5848 = vmatmul.mubr.f32.vlgmr.msra.gmra.mrb[46].mxu1 %v5705_v31 }
0x148d   :  { %5707 = vst.msk [vmem:[#allocation2 + $0x28] sm:$0xff] %vm957_vm2, %v5705_v31  ;;  %10668 = vmatpush1.bf16.msra.mxu0 %v13938_v55  ;;  %10700 = vmatpush1.bf16.msra.mxu1 %v13942_v29 }
0x148e   :  { %10670 = vmatprep.subr.bf16.mxu0 %v13940_v56  ;;  %10702 = vmatprep.subr.bf16.mxu1 %v13952_v27 }
0x148f   :  { %5956 = vmatprep.mubr.f32.mxu0 %v14974_v52  ;;  %6027 = vmatprep.mubr.f32.mxu1 %v14974_v52 }
0x1491   :  { %10672 = vmatpush1.bf16.msra.mxu0 %v13948_v63  ;;  %10704 = vmatpush1.bf16.msra.mxu1 %v13957_v13 }
0x1492   :  { %10674 = vmatprep.subr.bf16.mxu0 %v13955_v10  ;;  %10706 = vmatprep.subr.bf16.mxu1 %v13967_v25 }
0x1495   :  { %10676 = vmatpush1.bf16.msra.mxu0 %v13963_v24  ;;  %10708 = vmatpush1.bf16.msra.mxu1 %v13971_v47 }
0x1496   :  { %10678 = vmatprep.subr.bf16.mxu0 %v13973_v11  ;;  %10710 = vmatprep.subr.bf16.mxu1 %v13983_v16 }
0x1499   :  { %10680 = vmatpush1.bf16.msra.mxu0 %v13981_v40  ;;  %10712 = vmatpush1.bf16.msra.mxu1 %v13987_v15 }
0x149a   :  { %10682 = vmatprep.subr.bf16.mxu0 %v13989_v45  ;;  %10714 = vmatprep.subr.bf16.mxu1 %v13999_v23 }
0x149d   :  { %10684 = vmatpush1.bf16.msra.mxu0 %v13997_v35  ;;  %10716 = vmatpush1.bf16.msra.mxu1 %v14003_v37 }
0x149e   :  { %10686 = vmatprep.subr.bf16.mxu0 %v14005_v18  ;;  %10718 = vmatprep.subr.bf16.mxu1 %v14015_v60 }
0x14a1   :  { %10688 = vmatpush1.bf16.msra.mxu0 %v14013_v7  ;;  %10720 = vmatpush1.bf16.msra.mxu1 %v14019_v50 }
0x14a2   :  { %10690 = vmatprep.subr.bf16.mxu0 %v14021_v41  ;;  %10722 = vmatprep.subr.bf16.mxu1 %v14031_v46 }
0x14a5   :  { %10692 = vmatpush1.bf16.msra.mxu0 %v14029_v4  ;;  %10724 = vmatpush1.bf16.msra.mxu1 %v14035_v57 }
0x14a6   :  { %10694 = vmatprep.subr.bf16.mxu0 %v14037_v12  ;;  %10726 = vmatprep.subr.bf16.mxu1 %v14043_v38 }
0x14a9   :  { %10696 = vmatpush1.bf16.msra.mxu0 %v14047_v19  ;;  %10728 = vmatpush1.bf16.msra.mxu1 %v14051_v49 }
0x14aa   :  { %10730 = vmatprep.subr.bf16.mxu0 %v13928_v61  ;;  %10762 = vmatprep.subr.bf16.mxu1 %v13932_v59 }
0x155f   :  { %v5778_v39 = vpop.f32.mrb[38].mxu0  ;;  %v5849_v42 = vpop.f32.mrb[46].mxu1 }
0x1560   :  { %v11667_v22 = vadd.f32 %v5778_v39, %v14099_v53  ;;  %v5780_v20 = vpop.f32.mrb[39].mxu0  ;;  %v5851_v0 = vpop.f32.mrb[47].mxu1  ;;  %v11683_v62 = vadd.f32 %v5849_v42, %v14107_v26 }
0x1561   :  { %v11668_v17 = vadd.f32 %v5780_v20, %v14102_v44  ;;  %v11684_v6 = vadd.f32 %v5851_v0, %v14110_v33 }
0x1562   :  { %v9005_v36 = vmul.f32 -1.442695, %v11667_v22  ;;  %v9007_v2 = vmul.f32 -1.442695, %v11683_v62 }
0x1563   :  { %v9006_v54 = vmul.f32 -1.442695, %v11668_v17 }
0x1564   :  { %12293 = vpow2.f32 %v9005_v36 }
0x1565   :  { %12295 = vpow2.f32 %v9006_v54 }
0x1566   :  { %12297 = vtanh.f32 %v11684_v6 }
0x1567   :  { %12299 = vpow2.f32 %v9007_v2 }
0x156e   :  { %v12294_v30 = vpop.eup %12293 }
0x156f   :  { %v5871_v28 = vadd.f32 1.0, %v12294_v30  ;;  %v12296_v58 = vpop.eup %12295 }
0x1570   :  { %v5872_v3 = vadd.f32 1.0, %v12296_v58  ;;  %v12298_v51 = vpop.eup %12297 }
0x1571   :  { %12301 = vrcp.f32 %v5871_v28  ;;  %v12300_v1 = vpop.eup %12299 }
0x1572   :  { %12303 = vrcp.f32 %v5872_v3  ;;  %v5873_v8 = vadd.f32 1.0, %v12300_v1 }
0x1574   :  { %12305 = vrcp.f32 %v5873_v8 }
0x157b   :  { %v12302_v32 = vpop.eup %12301 }
0x157c   :  { %v5882_v48 = vmul.f32 %v12302_v32, %v12298_v51  ;;  %v12304_v5 = vpop.eup %12303 }
0x157d   :  { %v5881_v31 = vmul.f32 %v12304_v5, %v14202_v21 }
0x157e   :  { %v12306_v42 = vpop.eup %12305 }
0x157f   :  { %v14246_v39 = vadd.f32 %v5882_v48, %v5881_v31 }
0x1581   :  { %12307 = vtanh.f32 %v14246_v39 }
0x158b   :  { %v12308_v22 = vpop.eup %12307 }
0x158c   :  { %v5885_v20 = vmul.f32 %v12308_v22, %v12306_v42 }
0x158e   :  { %5957 = vmatmul.mubr.f32.vlgmr.msra.gmra.mrb[40].mxu0 %v5885_v20  ;;  %5886 = vst.msk [vmem:[#allocation2 + $0x18] sm:$0xff] %vm954_vm1, %v5885_v20  ;;  %6028 = vmatmul.mubr.f32.vlgmr.msra.gmra.mrb[48].mxu1 %v5885_v20 }
0x158f   :  { %5887 = vst.msk [vmem:[#allocation2 + $0x20] sm:$0xff] %vm957_vm2, %v5885_v20  ;;  %10732 = vmatpush1.bf16.msra.mxu0 %v13938_v55  ;;  %10764 = vmatpush1.bf16.msra.mxu1 %v13942_v29 }
0x1590   :  { %10734 = vmatprep.subr.bf16.mxu0 %v13940_v56  ;;  %10766 = vmatprep.subr.bf16.mxu1 %v13952_v27 }
0x1591   :  { %6136 = vmatprep.mubr.f32.mxu0 %v14974_v52  ;;  %6207 = vmatprep.mubr.f32.mxu1 %v14974_v52 }
0x1593   :  { %10736 = vmatpush1.bf16.msra.mxu0 %v13948_v63  ;;  %10768 = vmatpush1.bf16.msra.mxu1 %v13957_v13 }
0x1594   :  { %10738 = vmatprep.subr.bf16.mxu0 %v13955_v10  ;;  %10770 = vmatprep.subr.bf16.mxu1 %v13967_v25 }
0x1597   :  { %10740 = vmatpush1.bf16.msra.mxu0 %v13963_v24  ;;  %10772 = vmatpush1.bf16.msra.mxu1 %v13971_v47 }
0x1598   :  { %10742 = vmatprep.subr.bf16.mxu0 %v13973_v11  ;;  %10774 = vmatprep.subr.bf16.mxu1 %v13983_v16 }
0x159b   :  { %10744 = vmatpush1.bf16.msra.mxu0 %v13981_v40  ;;  %10776 = vmatpush1.bf16.msra.mxu1 %v13987_v15 }
0x159c   :  { %10746 = vmatprep.subr.bf16.mxu0 %v13989_v45  ;;  %10778 = vmatprep.subr.bf16.mxu1 %v13999_v23 }
0x159f   :  { %10748 = vmatpush1.bf16.msra.mxu0 %v13997_v35  ;;  %10780 = vmatpush1.bf16.msra.mxu1 %v14003_v37 }
0x15a0   :  { %10750 = vmatprep.subr.bf16.mxu0 %v14005_v18  ;;  %10782 = vmatprep.subr.bf16.mxu1 %v14015_v60 }
0x15a3   :  { %10752 = vmatpush1.bf16.msra.mxu0 %v14013_v7  ;;  %10784 = vmatpush1.bf16.msra.mxu1 %v14019_v50 }
0x15a4   :  { %10754 = vmatprep.subr.bf16.mxu0 %v14021_v41  ;;  %10786 = vmatprep.subr.bf16.mxu1 %v14031_v46 }
0x15a7   :  { %10756 = vmatpush1.bf16.msra.mxu0 %v14029_v4  ;;  %10788 = vmatpush1.bf16.msra.mxu1 %v14035_v57 }
0x15a8   :  { %10758 = vmatprep.subr.bf16.mxu0 %v14037_v12  ;;  %10790 = vmatprep.subr.bf16.mxu1 %v14043_v38 }
0x15ab   :  { %10760 = vmatpush1.bf16.msra.mxu0 %v14047_v19  ;;  %10792 = vmatpush1.bf16.msra.mxu1 %v14051_v49 }
0x15ac   :  { %10794 = vmatprep.subr.bf16.mxu0 %v13928_v61  ;;  %10826 = vmatprep.subr.bf16.mxu1 %v13932_v59 }
0x1661   :  { %v5958_v21 = vpop.f32.mrb[40].mxu0  ;;  %v6029_v0 = vpop.f32.mrb[48].mxu1 }
0x1662   :  { %v11669_v17 = vadd.f32 %v5958_v21, %v14099_v53  ;;  %v5960_v36 = vpop.f32.mrb[41].mxu0  ;;  %v6031_v54 = vpop.f32.mrb[49].mxu1  ;;  %v11685_v30 = vadd.f32 %v6029_v0, %v14107_v26 }
0x1663   :  { %v11670_v62 = vadd.f32 %v5960_v36, %v14102_v44  ;;  %v11686_v28 = vadd.f32 %v6031_v54, %v14110_v33 }
0x1664   :  { %v9008_v6 = vmul.f32 -1.442695, %v11669_v17  ;;  %v9010_v58 = vmul.f32 -1.442695, %v11685_v30 }
0x1665   :  { %v9009_v2 = vmul.f32 -1.442695, %v11670_v62 }
0x1666   :  { %12309 = vpow2.f32 %v9008_v6 }
0x1667   :  { %12311 = vpow2.f32 %v9009_v2 }
0x1668   :  { %12313 = vtanh.f32 %v11686_v28 }
0x1669   :  { %12315 = vpow2.f32 %v9010_v58 }
0x1670   :  { %v12310_v3 = vpop.eup %12309 }
0x1671   :  { %v6051_v51 = vadd.f32 1.0, %v12310_v3  ;;  %v12312_v1 = vpop.eup %12311 }
0x1672   :  { %v6052_v32 = vadd.f32 1.0, %v12312_v1  ;;  %v12314_v48 = vpop.eup %12313 }
0x1673   :  { %12317 = vrcp.f32 %v6051_v51  ;;  %v12316_v5 = vpop.eup %12315 }
0x1674   :  { %12319 = vrcp.f32 %v6052_v32  ;;  %v6053_v22 = vadd.f32 1.0, %v12316_v5 }
0x1676   :  { %12321 = vrcp.f32 %v6053_v22 }
0x167d   :  { %v12318_v8 = vpop.eup %12317 }
0x167e   :  { %v6062_v31 = vmul.f32 %v12318_v8, %v12314_v48  ;;  %v12320_v42 = vpop.eup %12319 }
0x167f   :  { %v6061_v20 = vmul.f32 %v12320_v42, %v14246_v39 }
0x1680   :  { %v12322_v0 = vpop.eup %12321 }
0x1681   :  { %v14290_v21 = vadd.f32 %v6062_v31, %v6061_v20 }
0x1683   :  { %12323 = vtanh.f32 %v14290_v21 }
0x168d   :  { %v12324_v17 = vpop.eup %12323 }
0x168e   :  { %v6065_v36 = vmul.f32 %v12324_v17, %v12322_v0 }
0x1690   :  { %6066 = vst.msk [vmem:[#allocation2 + $0x20] sm:$0xff] %vm954_vm1, %v6065_v36  ;;  %6137 = vmatmul.mubr.f32.vlgmr.msra.gmra.mrb[42].mxu0 %v6065_v36  ;;  %6208 = vmatmul.mubr.f32.vlgmr.msra.gmra.mrb[50].mxu1 %v6065_v36 }
0x1691   :  { %6067 = vst.msk [vmem:[#allocation2 + $0x18] sm:$0xff] %vm957_vm2, %v6065_v36  ;;  %10796 = vmatpush1.bf16.msra.mxu0 %v13938_v55  ;;  %10828 = vmatpush1.bf16.msra.mxu1 %v13942_v29 }
0x1692   :  { %10798 = vmatprep.subr.bf16.mxu0 %v13940_v56  ;;  %10830 = vmatprep.subr.bf16.mxu1 %v13952_v27 }
0x1693   :  { %6316 = vmatprep.mubr.f32.mxu0 %v14974_v52  ;;  %6387 = vmatprep.mubr.f32.mxu1 %v14974_v52 }
0x1695   :  { %10800 = vmatpush1.bf16.msra.mxu0 %v13948_v63  ;;  %10832 = vmatpush1.bf16.msra.mxu1 %v13957_v13 }
0x1696   :  { %10802 = vmatprep.subr.bf16.mxu0 %v13955_v10  ;;  %10834 = vmatprep.subr.bf16.mxu1 %v13967_v25 }
0x1699   :  { %10804 = vmatpush1.bf16.msra.mxu0 %v13963_v24  ;;  %10836 = vmatpush1.bf16.msra.mxu1 %v13971_v47 }
0x169a   :  { %10806 = vmatprep.subr.bf16.mxu0 %v13973_v11  ;;  %10838 = vmatprep.subr.bf16.mxu1 %v13983_v16 }
0x169d   :  { %10808 = vmatpush1.bf16.msra.mxu0 %v13981_v40  ;;  %10840 = vmatpush1.bf16.msra.mxu1 %v13987_v15 }
0x169e   :  { %10810 = vmatprep.subr.bf16.mxu0 %v13989_v45  ;;  %10842 = vmatprep.subr.bf16.mxu1 %v13999_v23 }
0x16a1   :  { %10812 = vmatpush1.bf16.msra.mxu0 %v13997_v35  ;;  %10844 = vmatpush1.bf16.msra.mxu1 %v14003_v37 }
0x16a2   :  { %10814 = vmatprep.subr.bf16.mxu0 %v14005_v18  ;;  %10846 = vmatprep.subr.bf16.mxu1 %v14015_v60 }
0x16a5   :  { %10816 = vmatpush1.bf16.msra.mxu0 %v14013_v7  ;;  %10848 = vmatpush1.bf16.msra.mxu1 %v14019_v50 }
0x16a6   :  { %10818 = vmatprep.subr.bf16.mxu0 %v14021_v41  ;;  %10850 = vmatprep.subr.bf16.mxu1 %v14031_v46 }
0x16a9   :  { %10820 = vmatpush1.bf16.msra.mxu0 %v14029_v4  ;;  %10852 = vmatpush1.bf16.msra.mxu1 %v14035_v57 }
0x16aa   :  { %10822 = vmatprep.subr.bf16.mxu0 %v14037_v12  ;;  %10854 = vmatprep.subr.bf16.mxu1 %v14043_v38 }
0x16ad   :  { %10824 = vmatpush1.bf16.msra.mxu0 %v14047_v19  ;;  %10856 = vmatpush1.bf16.msra.mxu1 %v14051_v49 }
0x16ae   :  { %10858 = vmatprep.subr.bf16.mxu0 %v13928_v61  ;;  %10890 = vmatprep.subr.bf16.mxu1 %v13932_v59 }
0x1763   :  { %v6138_v39 = vpop.f32.mrb[42].mxu0  ;;  %v6209_v54 = vpop.f32.mrb[50].mxu1 }
0x1764   :  { %v11671_v62 = vadd.f32 %v6138_v39, %v14099_v53  ;;  %v6140_v6 = vpop.f32.mrb[43].mxu0  ;;  %v6211_v2 = vpop.f32.mrb[51].mxu1  ;;  %v11687_v3 = vadd.f32 %v6209_v54, %v14107_v26 }
0x1765   :  { %v11672_v30 = vadd.f32 %v6140_v6, %v14102_v44  ;;  %v11688_v51 = vadd.f32 %v6211_v2, %v14110_v33  ;;  %v6621_v6 = vld [vmem:[#allocation11 + $0x820] sm:$0xff] }
0x1766   :  { %v9011_v28 = vmul.f32 -1.442695, %v11671_v62  ;;  %v9013_v1 = vmul.f32 -1.442695, %v11687_v3  ;;  %v6617_v62 = vld [vmem:[#allocation11 + $0x800] sm:$0xff] }
0x1767   :  { %v9012_v58 = vmul.f32 -1.442695, %v11672_v30  ;;  %v10923_v30 = vpack.c.bf16 %v6621_v6, %v6617_v62  ;;  %v6658_v6 = vld [vmem:[#allocation11 + $0x948] sm:$0xff] }
0x1768   :  { %12325 = vpow2.f32 %v9011_v28  ;;  %v6619_v28 = vld [vmem:[#allocation11 + $0x810] sm:$0xff] }
0x1769   :  { %12327 = vpow2.f32 %v9012_v58  ;;  %v6623_v58 = vld [vmem:[#allocation11 + $0x830] sm:$0xff] }
0x176a   :  { %12329 = vtanh.f32 %v11688_v51  ;;  %v10955_v3 = vpack.c.bf16 %v6623_v58, %v6619_v28  ;;  %v6626_v51 = vld [vmem:[#allocation11 + $0x848] sm:$0xff]  ;;  %v6664_v58 = vld [vmem:[#allocation11 + $0x978] sm:$0xff] }
0x176b   :  { %12331 = vpow2.f32 %v9013_v1  ;;  %v6630_v1 = vld [vmem:[#allocation11 + $0x868] sm:$0xff] }
0x1772   :  { %v12326_v61 = vpop.eup %12325 }
0x1773   :  { %v6231_v32 = vadd.f32 1.0, %v12326_v61  ;;  %v12328_v59 = vpop.eup %12327  ;;  %v6628_v61 = vld [vmem:[#allocation11 + $0x858] sm:$0xff] }
0x1774   :  { %v6232_v48 = vadd.f32 1.0, %v12328_v59  ;;  %v12330_v5 = vpop.eup %12329  ;;  %v6632_v59 = vld [vmem:[#allocation11 + $0x878] sm:$0xff] }
0x1775   :  { %12333 = vrcp.f32 %v6231_v32  ;;  %v12332_v8 = vpop.eup %12331  ;;  %v10925_v32 = vpack.c.bf16 %v6630_v1, %v6626_v51  ;;  %v6661_v51 = vld [vmem:[#allocation11 + $0x960] sm:$0xff] }
0x1776   :  { %12335 = vrcp.f32 %v6232_v48  ;;  %v6233_v20 = vadd.f32 1.0, %v12332_v8  ;;  %v6625_v48 = vld [vmem:[#allocation11 + $0x840] sm:$0xff]  ;;  %v10957_v8 = vpack.c.bf16 %v6632_v59, %v6628_v61  ;;  %v6663_v59 = vld [vmem:[#allocation11 + $0x970] sm:$0xff] }
0x1778   :  { %12337 = vrcp.f32 %v6233_v20 }
0x177f   :  { %v12334_v31 = vpop.eup %12333 }
0x1780   :  { %v6242_v42 = vmul.f32 %v12334_v31, %v12330_v5  ;;  %v12336_v22 = vpop.eup %12335  ;;  %v6629_v5 = vld [vmem:[#allocation11 + $0x860] sm:$0xff] }
0x1781   :  { %v6241_v0 = vmul.f32 %v12336_v22, %v14290_v21  ;;  %v6624_v21 = vld [vmem:[#allocation11 + $0x838] sm:$0xff]  ;;  %v10927_v31 = vpack.c.bf16 %v6629_v5, %v6625_v48  ;;  %v6631_v22 = vld [vmem:[#allocation11 + $0x870] sm:$0xff]  ;;  %v6666_v5 = vld [vmem:[#allocation11 + $0x988] sm:$0xff] }
0x1782   :  { %v12338_v36 = vpop.eup %12337 }
0x1783   :  { %v14334_v17 = vadd.f32 %v6242_v42, %v6241_v0  ;;  %v6627_v42 = vld [vmem:[#allocation11 + $0x850] sm:$0xff]  ;;  %v6634_v0 = vld [vmem:[#allocation11 + $0x888] sm:$0xff] }
0x1784   :  { %v10959_v20 = vpack.c.bf16 %v6631_v22, %v6627_v42  ;;  %v6672_v22 = vld [vmem:[#allocation11 + $0x9b8] sm:$0xff] }
0x1785   :  { %12339 = vtanh.f32 %v14334_v17 }
0x178f   :  { %v12340_v39 = vpop.eup %12339 }
0x1790   :  { %v6245_v54 = vmul.f32 %v12340_v39, %v12338_v36  ;;  %v6636_v36 = vld [vmem:[#allocation11 + $0x898] sm:$0xff] }
0x1792   :  { %6246 = vst.msk [vmem:[#allocation2 + $0x28] sm:$0xff] %vm954_vm1, %v6245_v54  ;;  %6317 = vmatmul.mubr.f32.vlgmr.msra.gmra.mrb[44].mxu0 %v6245_v54  ;;  %6388 = vmatmul.mubr.f32.vlgmr.msra.gmra.mrb[52].mxu1 %v6245_v54 }
0x1793   :  { %6247 = vst.msk [vmem:[#allocation2 + $0x10] sm:$0xff] %vm957_vm2, %v6245_v54  ;;  %10860 = vmatpush1.bf16.msra.mxu0 %v13938_v55  ;;  %10892 = vmatpush1.bf16.msra.mxu1 %v13942_v29  ;;  %v6640_v54 = vld [vmem:[#allocation11 + $0x8b8] sm:$0xff] }
0x1794   :  { %10862 = vmatprep.subr.bf16.mxu0 %v13940_v56  ;;  %10894 = vmatprep.subr.bf16.mxu1 %v13952_v27 }
0x1795   :  { %6496 = vmatprep.mubr.f32.mxu0 %v14974_v52  ;;  %6567 = vmatprep.mubr.f32.mxu1 %v14974_v52 }
0x1797   :  { %10864 = vmatpush1.bf16.msra.mxu0 %v13948_v63  ;;  %10896 = vmatpush1.bf16.msra.mxu1 %v13957_v13 }
0x1798   :  { %10866 = vmatprep.subr.bf16.mxu0 %v13955_v10  ;;  %10898 = vmatprep.subr.bf16.mxu1 %v13967_v25 }
0x179b   :  { %10868 = vmatpush1.bf16.msra.mxu0 %v13963_v24  ;;  %10900 = vmatpush1.bf16.msra.mxu1 %v13971_v47 }
0x179c   :  { %10870 = vmatprep.subr.bf16.mxu0 %v13973_v11  ;;  %10902 = vmatprep.subr.bf16.mxu1 %v13983_v16 }
0x179f   :  { %10872 = vmatpush1.bf16.msra.mxu0 %v13981_v40  ;;  %10904 = vmatpush1.bf16.msra.mxu1 %v13987_v15 }
0x17a0   :  { %10874 = vmatprep.subr.bf16.mxu0 %v13989_v45  ;;  %10906 = vmatprep.subr.bf16.mxu1 %v13999_v23 }
0x17a3   :  { %10876 = vmatpush1.bf16.msra.mxu0 %v13997_v35  ;;  %10908 = vmatpush1.bf16.msra.mxu1 %v14003_v37 }
0x17a4   :  { %10878 = vmatprep.subr.bf16.mxu0 %v14005_v18  ;;  %10910 = vmatprep.subr.bf16.mxu1 %v14015_v60 }
0x17a7   :  { %10880 = vmatpush1.bf16.msra.mxu0 %v14013_v7  ;;  %10912 = vmatpush1.bf16.msra.mxu1 %v14019_v50 }
0x17a8   :  { %10882 = vmatprep.subr.bf16.mxu0 %v14021_v41  ;;  %10914 = vmatprep.subr.bf16.mxu1 %v14031_v46 }
0x17ab   :  { %10884 = vmatpush1.bf16.msra.mxu0 %v14029_v4  ;;  %10916 = vmatpush1.bf16.msra.mxu1 %v14035_v57 }
0x17ac   :  { %10886 = vmatprep.subr.bf16.mxu0 %v14037_v12  ;;  %10918 = vmatprep.subr.bf16.mxu1 %v14043_v38  ;;  %v6618_v12 = vld [vmem:[#allocation11 + $0x808] sm:$0xff] }
0x17ad   :  { %v6622_v38 = vld [vmem:[#allocation11 + $0x828] sm:$0xff] }
0x17af   :  { %10888 = vmatpush1.bf16.msra.mxu0 %v14047_v19  ;;  %10920 = vmatpush1.bf16.msra.mxu1 %v14051_v49  ;;  %v6620_v19 = vld [vmem:[#allocation11 + $0x818] sm:$0xff]  ;;  %v10921_v49 = vpack.c.bf16 %v6622_v38, %v6618_v12  ;;  %v6653_v12 = vld [vmem:[#allocation11 + $0x920] sm:$0xff] }
0x17b0   :  { %v10953_v2 = vpack.c.bf16 %v6624_v21, %v6620_v19  ;;  %v6655_v21 = vld [vmem:[#allocation11 + $0x930] sm:$0xff] }
0x17b1   :  { %10922 = vmatprep.subr.bf16.mxu0 %v10921_v49  ;;  %v6651_v49 = vld [vmem:[#allocation11 + $0x910] sm:$0xff] }
0x17b2   :  { %10954 = vmatprep.subr.bf16.mxu1 %v10953_v2  ;;  %v10971_v62 = vpack.c.bf16 %v6655_v21, %v6651_v49  ;;  %v6662_v2 = vld [vmem:[#allocation11 + $0x968] sm:$0xff] }
0x17b3   :  { %v10941_v28 = vpack.c.bf16 %v6662_v2, %v6658_v6 }
0x1865   :  { %v6318_v55 = vpop.f32.mrb[44].mxu0  ;;  %v6389_v56 = vpop.f32.mrb[52].mxu1 }
0x1866   :  { %v11673_v29 = vadd.f32 %v6318_v55, %v14099_v53  ;;  %v6320_v63 = vpop.f32.mrb[45].mxu0  ;;  %v6391_v27 = vpop.f32.mrb[53].mxu1  ;;  %v11689_v25 = vadd.f32 %v6389_v56, %v14107_v26  ;;  %v6633_v55 = vld [vmem:[#allocation11 + $0x880] sm:$0xff] }
0x1867   :  { %v11674_v10 = vadd.f32 %v6320_v63, %v14102_v44  ;;  %v11690_v47 = vadd.f32 %v6391_v27, %v14110_v33  ;;  %v6637_v56 = vld [vmem:[#allocation11 + $0x8a0] sm:$0xff]  ;;  %v6635_v27 = vld [vmem:[#allocation11 + $0x890] sm:$0xff] }
0x1868   :  { %v9014_v13 = vmul.f32 -1.442695, %v11673_v29  ;;  %v9016_v11 = vmul.f32 -1.442695, %v11689_v25  ;;  %v10961_v29 = vpack.c.bf16 %v6640_v54, %v6636_v36  ;;  %v10931_v63 = vpack.c.bf16 %v6637_v56, %v6633_v55  ;;  %v6646_v25 = vld [vmem:[#allocation11 + $0x8e8] sm:$0xff]  ;;  %v6671_v54 = vld [vmem:[#allocation11 + $0x9b0] sm:$0xff] }
0x1869   :  { %v9015_v24 = vmul.f32 -1.442695, %v11674_v10  ;;  %v6639_v10 = vld [vmem:[#allocation11 + $0x8b0] sm:$0xff]  ;;  %v6674_v56 = vld [vmem:[#allocation11 + $0x9c8] sm:$0xff] }
0x186a   :  { %12341 = vpow2.f32 %v9014_v13  ;;  %v10963_v13 = vpack.c.bf16 %v6639_v10, %v6635_v27  ;;  %v6680_v10 = vld [vmem:[#allocation11 + $0x9f8] sm:$0xff] }
0x186b   :  { %12343 = vpow2.f32 %v9015_v24  ;;  %v6642_v24 = vld [vmem:[#allocation11 + $0x8c8] sm:$0xff] }
0x186c   :  { %12345 = vtanh.f32 %v11690_v47  ;;  %v6644_v47 = vld [vmem:[#allocation11 + $0x8d8] sm:$0xff] }
0x186d   :  { %12347 = vpow2.f32 %v9016_v11  ;;  %v10933_v11 = vpack.c.bf16 %v6646_v25, %v6642_v24  ;;  %v6677_v24 = vld [vmem:[#allocation11 + $0x9e0] sm:$0xff] }
0x1874   :  { %v12342_v40 = vpop.eup %12341 }
0x1875   :  { %v6411_v16 = vadd.f32 1.0, %v12342_v40  ;;  %v12344_v15 = vpop.eup %12343  ;;  %v6648_v40 = vld [vmem:[#allocation11 + $0x8f8] sm:$0xff] }
0x1876   :  { %v6412_v45 = vadd.f32 1.0, %v12344_v15  ;;  %v12346_v35 = vpop.eup %12345  ;;  %v6645_v15 = vld [vmem:[#allocation11 + $0x8e0] sm:$0xff] }
0x1877   :  { %12349 = vrcp.f32 %v6411_v16  ;;  %v12348_v23 = vpop.eup %12347  ;;  %v6641_v16 = vld [vmem:[#allocation11 + $0x8c0] sm:$0xff] }
0x1878   :  { %12351 = vrcp.f32 %v6412_v45  ;;  %v6413_v60 = vadd.f32 1.0, %v12348_v23  ;;  %v10965_v45 = vpack.c.bf16 %v6648_v40, %v6644_v47  ;;  %v6643_v23 = vld [vmem:[#allocation11 + $0x8d0] sm:$0xff] }
0x1879   :  { %v6679_v40 = vld [vmem:[#allocation11 + $0x9f0] sm:$0xff] }
0x187a   :  { %12353 = vrcp.f32 %v6413_v60  ;;  %v6654_v60 = vld [vmem:[#allocation11 + $0x928] sm:$0xff] }
0x1881   :  { %v12350_v37 = vpop.eup %12349 }
0x1882   :  { %v6422_v18 = vmul.f32 %v12350_v37, %v12346_v35  ;;  %v12352_v7 = vpop.eup %12351  ;;  %v10935_v35 = vpack.c.bf16 %v6645_v15, %v6641_v16  ;;  %v6647_v37 = vld [vmem:[#allocation11 + $0x8f0] sm:$0xff]  ;;  %v6683_v15 = vld [vmem:[#allocation11 + $0xa08] sm:$0xff] }
0x1883   :  { %v6421_v50 = vmul.f32 %v12352_v7, %v14334_v17  ;;  %v6638_v17 = vld [vmem:[#allocation11 + $0x8a8] sm:$0xff] }
0x1884   :  { %v12354_v4 = vpop.eup %12353  ;;  %v10929_v39 = vpack.c.bf16 %v6638_v17, %v6634_v0  ;;  %v6650_v7 = vld [vmem:[#allocation11 + $0x908] sm:$0xff]  ;;  %v6669_v0 = vld [vmem:[#allocation11 + $0x9a0] sm:$0xff] }
0x1885   :  { %v14376_v41 = vadd.f32 %v6422_v18, %v6421_v50  ;;  %v10967_v18 = vpack.c.bf16 %v6647_v37, %v6643_v23  ;;  %v6652_v50 = vld [vmem:[#allocation11 + $0x918] sm:$0xff] }
0x1886   :  { %v6685_v23 = vld [vmem:[#allocation11 + $0xa18] sm:$0xff] }
0x1887   :  { %12355 = vtanh.f32 %v14376_v41  ;;  %v6689_v37 = vld [vmem:[#allocation11 + $0xa38] sm:$0xff] }
0x1891   :  { %v12356_v46 = vpop.eup %12355 }
0x1892   :  { %v6425_v57 = vmul.f32 %v12356_v46, %v12354_v4  ;;  %v10937_v4 = vpack.c.bf16 %v6654_v60, %v6650_v7  ;;  %v6656_v46 = vld [vmem:[#allocation11 + $0x938] sm:$0xff] }
0x1893   :  { %v10969_v38 = vpack.c.bf16 %v6656_v46, %v6652_v50 }
0x1894   :  { %6426 = vst.msk [vmem:[#allocation2 + $0x30] sm:$0xff] %vm954_vm1, %v6425_v57  ;;  %6497 = vmatmul.mubr.f32.vlgmr.msra.gmra.mrb[46].mxu0 %v6425_v57  ;;  %6568 = vmatmul.mubr.f32.vlgmr.msra.gmra.mrb[54].mxu1 %v6425_v57 }
0x1895   :  { %6427 = vst.msk [vmem:[#allocation2 + $0x8] sm:$0xff] %vm957_vm2, %v6425_v57  ;;  %6833 = vmatprep.mubr.f32.mxu0 %v14974_v52  ;;  %6946 = vmatprep.mubr.f32.mxu1 %v14974_v52  ;;  %v6649_v57 = vld [vmem:[#allocation11 + $0x900] sm:$0xff] }
0x1896   :  { %10924 = vmatpush1.bf16.msra.mxu0 %v10923_v30  ;;  %10956 = vmatpush1.bf16.msra.mxu1 %v10955_v3  ;;  %v10939_v19 = vpack.c.bf16 %v6653_v12, %v6649_v57  ;;  %v6660_v30 = vld [vmem:[#allocation11 + $0x958] sm:$0xff]  ;;  %v6657_v3 = vld [vmem:[#allocation11 + $0x940] sm:$0xff] }
0x1897   :  { %10926 = vmatprep.subr.bf16.mxu0 %v10925_v32  ;;  %10958 = vmatprep.subr.bf16.mxu1 %v10957_v8  ;;  %v10973_v1 = vpack.c.bf16 %v6664_v58, %v6660_v30  ;;  %v10943_v61 = vpack.c.bf16 %v6661_v51, %v6657_v3  ;;  %v6659_v32 = vld [vmem:[#allocation11 + $0x950] sm:$0xff]  ;;  %v6670_v8 = vld [vmem:[#allocation11 + $0x9a8] sm:$0xff] }
0x1898   :  { %v10975_v48 = vpack.c.bf16 %v6663_v59, %v6659_v32  ;;  %v10945_v42 = vpack.c.bf16 %v6670_v8, %v6666_v5  ;;  %v6682_v59 = vld [vmem:[#allocation11 + $0xa00] sm:$0xff]  ;;  %v6691_v5 = vld [vmem:[#allocation11 + $0xa48] sm:$0xff] }
0x1899   :  { %v6695_v8 = vld [vmem:[#allocation11 + $0xa68] sm:$0xff] }
0x189a   :  { %10928 = vmatpush1.bf16.msra.mxu0 %v10927_v31  ;;  %10960 = vmatpush1.bf16.msra.mxu1 %v10959_v20  ;;  %v6668_v31 = vld [vmem:[#allocation11 + $0x998] sm:$0xff]  ;;  %v6665_v20 = vld [vmem:[#allocation11 + $0x980] sm:$0xff] }
0x189b   :  { %10930 = vmatprep.subr.bf16.mxu0 %v10929_v39  ;;  %10962 = vmatprep.subr.bf16.mxu1 %v10961_v29  ;;  %v10977_v17 = vpack.c.bf16 %v6672_v22, %v6668_v31  ;;  %v10947_v36 = vpack.c.bf16 %v6669_v0, %v6665_v20  ;;  %v6667_v39 = vld [vmem:[#allocation11 + $0x990] sm:$0xff]  ;;  %v6678_v29 = vld [vmem:[#allocation11 + $0x9e8] sm:$0xff]  ;;  %v10989_v20 = vpack.c.bf16 %v6695_v8, %v6691_v5  ;;  %v6690_v0 = vld [vmem:[#allocation11 + $0xa40] sm:$0xff] }
0x189c   :  { %v10979_v55 = vpack.c.bf16 %v6671_v54, %v6667_v39  ;;  %v10949_v27 = vpack.c.bf16 %v6678_v29, %v6674_v56  ;;  %v6684_v31 = vld [vmem:[#allocation11 + $0xa10] sm:$0xff]  ;;  %v6697_v54 = vld [vmem:[#allocation11 + $0xa78] sm:$0xff]  ;;  %v6699_v56 = vld [vmem:[#allocation11 + $0xa88] sm:$0xff] }
0x189d   :  { %v6703_v29 = vld [vmem:[#allocation11 + $0xaa8] sm:$0xff]  ;;  %v6725_v5 = vld [vmem:[#allocation11 + $0xb58] sm:$0xff] }
0x189e   :  { %10932 = vmatpush1.bf16.msra.mxu0 %v10931_v63  ;;  %10964 = vmatpush1.bf16.msra.mxu1 %v10963_v13  ;;  %v6676_v63 = vld [vmem:[#allocation11 + $0x9d8] sm:$0xff]  ;;  %v6673_v13 = vld [vmem:[#allocation11 + $0x9c0] sm:$0xff] }
0x189f   :  { %10934 = vmatprep.subr.bf16.mxu0 %v10933_v11  ;;  %10966 = vmatprep.subr.bf16.mxu1 %v10965_v45  ;;  %v10981_v25 = vpack.c.bf16 %v6680_v10, %v6676_v63  ;;  %v10951_v47 = vpack.c.bf16 %v6677_v24, %v6673_v13  ;;  %v6675_v11 = vld [vmem:[#allocation11 + $0x9d0] sm:$0xff]  ;;  %v6687_v45 = vld [vmem:[#allocation11 + $0xa28] sm:$0xff]  ;;  %v6698_v24 = vld [vmem:[#allocation11 + $0xa80] sm:$0xff] }
0x18a0   :  { %v10983_v16 = vpack.c.bf16 %v6679_v40, %v6675_v11  ;;  %v6696_v63 = vld [vmem:[#allocation11 + $0xa70] sm:$0xff]  ;;  %v14396_v10 = vld [vmem:[#allocation2 + $0x8] sm:$0xff]  ;;  %v6701_v40 = vld [vmem:[#allocation11 + $0xa98] sm:$0xff] }
0x18a2   :  { %10936 = vmatpush1.bf16.msra.mxu0 %v10935_v35  ;;  %10968 = vmatpush1.bf16.msra.mxu1 %v10967_v18  ;;  %v10985_v35 = vpack.c.bf16 %v6687_v45, %v6683_v15  ;;  %v11017_v18 = vpack.c.bf16 %v6689_v37, %v6685_v23  ;;  %v6700_v15 = vld [vmem:[#allocation11 + $0xa90] sm:$0xff]  ;;  %v6711_v23 = vld [vmem:[#allocation11 + $0xae8] sm:$0xff] }
0x18a3   :  { %10938 = vmatprep.subr.bf16.mxu0 %v10937_v4  ;;  %10970 = vmatprep.subr.bf16.mxu1 %v10969_v38  ;;  %v6704_v45 = vld [vmem:[#allocation11 + $0xab0] sm:$0xff] }
0x18a6   :  { %10940 = vmatpush1.bf16.msra.mxu0 %v10939_v19  ;;  %10972 = vmatpush1.bf16.msra.mxu1 %v10971_v62 }
0x18a7   :  { %10942 = vmatprep.subr.bf16.mxu0 %v10941_v28  ;;  %10974 = vmatprep.subr.bf16.mxu1 %v10973_v1 }
0x18aa   :  { %10944 = vmatpush1.bf16.msra.mxu0 %v10943_v61  ;;  %10976 = vmatpush1.bf16.msra.mxu1 %v10975_v48  ;;  %v6686_v48 = vld [vmem:[#allocation11 + $0xa20] sm:$0xff] }
0x18ab   :  { %10946 = vmatprep.subr.bf16.mxu0 %v10945_v42  ;;  %10978 = vmatprep.subr.bf16.mxu1 %v10977_v17  ;;  %v6688_v42 = vld [vmem:[#allocation11 + $0xa30] sm:$0xff]  ;;  %v10987_v22 = vpack.c.bf16 %v6686_v48, %v6682_v59  ;;  %v6693_v17 = vld [vmem:[#allocation11 + $0xa58] sm:$0xff]  ;;  %v6722_v48 = vld [vmem:[#allocation11 + $0xb40] sm:$0xff] }
0x18ac   :  { %v11019_v39 = vpack.c.bf16 %v6688_v42, %v6684_v31  ;;  %v11021_v13 = vpack.c.bf16 %v6697_v54, %v6693_v17  ;;  %v6726_v42 = vld [vmem:[#allocation11 + $0xb60] sm:$0xff]  ;;  %v6735_v17 = vld [vmem:[#allocation11 + $0xba8] sm:$0xff] }
0x18ad   :  { %v11007_v54 = vpack.c.bf16 %v6726_v42, %v6722_v48  ;;  %v7303_v42 = vld [vmem:[#allocation12 + $0x688] sm:$0xff] }
0x18ae   :  { %10948 = vmatpush1.bf16.msra.mxu0 %v10947_v36  ;;  %10980 = vmatpush1.bf16.msra.mxu1 %v10979_v55  ;;  %v6692_v55 = vld [vmem:[#allocation11 + $0xa50] sm:$0xff] }
0x18af   :  { %10950 = vmatprep.subr.bf16.mxu0 %v10949_v27  ;;  %10982 = vmatprep.subr.bf16.mxu1 %v10981_v25  ;;  %v6702_v25 = vld [vmem:[#allocation11 + $0xaa0] sm:$0xff]  ;;  %v11023_v11 = vpack.c.bf16 %v6696_v63, %v6692_v55 }
0x18b0   :  { %v10995_v37 = vpack.c.bf16 %v6702_v25, %v6698_v24  ;;  %v6737_v24 = vld [vmem:[#allocation11 + $0xbb8] sm:$0xff]  ;;  %v6732_v25 = vld [vmem:[#allocation11 + $0xb90] sm:$0xff] }
0x18b2   :  { %10952 = vmatpush1.bf16.msra.mxu0 %v10951_v47  ;;  %10984 = vmatpush1.bf16.msra.mxu1 %v10983_v16  ;;  %v10993_v47 = vpack.c.bf16 %v6703_v29, %v6699_v56  ;;  %v6705_v16 = vld [vmem:[#allocation11 + $0xab8] sm:$0xff]  ;;  %v6730_v56 = vld [vmem:[#allocation11 + $0xb80] sm:$0xff] }
0x18b3   :  { %10986 = vmatprep.subr.bf16.mxu0 %v10985_v35  ;;  %11018 = vmatprep.subr.bf16.mxu1 %v11017_v18  ;;  %v6707_v35 = vld [vmem:[#allocation11 + $0xac8] sm:$0xff]  ;;  %v14402_v18 = vld [vmem:[#allocation2 + $0x10] sm:$0xff]  ;;  %v6733_v29 = vld [vmem:[#allocation11 + $0xb98] sm:$0xff] }
0x1967   :  { %v6498_v7 = vpop.f32.mrb[46].mxu0  ;;  %v6569_v60 = vpop.f32.mrb[54].mxu1 }
0x1968   :  { %v11675_v50 = vadd.f32 %v6498_v7, %v14099_v53  ;;  %v6500_v4 = vpop.f32.mrb[47].mxu0  ;;  %v6571_v46 = vpop.f32.mrb[55].mxu1  ;;  %v11691_v19 = vadd.f32 %v6569_v60, %v14107_v26  ;;  %v11025_v7 = vpack.c.bf16 %v6705_v16, %v6701_v40  ;;  %v6706_v60 = vld [vmem:[#allocation11 + $0xac0] sm:$0xff]  ;;  %v6743_v40 = vld [vmem:[#allocation11 + $0xbe8] sm:$0xff]  ;;  %v14426_v16 = vld [vmem:[#allocation2 + $0x30] sm:$0xff] }
0x1969   :  { %v11676_v57 = vadd.f32 %v6500_v4, %v14102_v44  ;;  %v11692_v49 = vadd.f32 %v6571_v46, %v14110_v33  ;;  %v11027_v4 = vpack.c.bf16 %v6704_v45, %v6700_v15  ;;  %v10997_v46 = vpack.c.bf16 %v6711_v23, %v6707_v35  ;;  %v6741_v35 = vld [vmem:[#allocation11 + $0xbd8] sm:$0xff] }
0x196a   :  { %v9017_v12 = vmul.f32 -1.442695, %v11675_v50  ;;  %v9019_v21 = vmul.f32 -1.442695, %v11691_v19  ;;  %v6710_v50 = vld [vmem:[#allocation11 + $0xae0] sm:$0xff]  ;;  %v6712_v19 = vld [vmem:[#allocation11 + $0xaf0] sm:$0xff]  ;;  %v11041_v45 = vpack.c.bf16 %v6737_v24, %v6733_v29 }
0x196b   :  { %v9018_v38 = vmul.f32 -1.442695, %v11676_v57  ;;  %v6709_v57 = vld [vmem:[#allocation11 + $0xad8] sm:$0xff]  ;;  %v7315_v24 = vld [vmem:[#allocation12 + $0x6e8] sm:$0xff] }
0x196c   :  { %12357 = vpow2.f32 %v9017_v12  ;;  %v6713_v12 = vld [vmem:[#allocation11 + $0xaf8] sm:$0xff] }
0x196d   :  { %12359 = vpow2.f32 %v9018_v38  ;;  %v6708_v38 = vld [vmem:[#allocation11 + $0xad0] sm:$0xff]  ;;  %v6745_v23 = vld [vmem:[#allocation11 + $0xbf8] sm:$0xff] }
0x196e   :  { %12361 = vtanh.f32 %v11692_v49  ;;  %v6715_v49 = vld [vmem:[#allocation11 + $0xb08] sm:$0xff]  ;;  %v7309_v29 = vld [vmem:[#allocation12 + $0x6b8] sm:$0xff] }
0x196f   :  { %12363 = vpow2.f32 %v9019_v21  ;;  %v6719_v21 = vld [vmem:[#allocation11 + $0xb28] sm:$0xff] }
0x1976   :  { %v12358_v62 = vpop.eup %12357 }
0x1977   :  { %v6591_v6 = vadd.f32 1.0, %v12358_v62  ;;  %v12360_v2 = vpop.eup %12359  ;;  %v14408_v62 = vld [vmem:[#allocation2 + $0x18] sm:$0xff] }
0x1978   :  { %v6592_v53 = vadd.f32 1.0, %v12360_v2  ;;  %v12362_v30 = vpop.eup %12361  ;;  %v11029_v2 = vpack.c.bf16 %v6713_v12, %v6709_v57  ;;  %v7287_v57 = vld [vmem:[#allocation12 + $0x608] sm:$0xff] }
0x1979   :  { %12365 = vrcp.f32 %v6591_v6  ;;  %v12364_v28 = vpop.eup %12363  ;;  %v10999_v6 = vpack.c.bf16 %v6710_v50, %v6706_v60  ;;  %v6738_v60 = vld [vmem:[#allocation11 + $0xbc0] sm:$0xff]  ;;  %v7291_v12 = vld [vmem:[#allocation12 + $0x628] sm:$0xff] }
0x197a   :  { %12367 = vrcp.f32 %v6592_v53  ;;  %v6593_v51 = vadd.f32 1.0, %v12364_v28  ;;  %v6714_v53 = vld [vmem:[#allocation11 + $0xb00] sm:$0xff]  ;;  %v11031_v28 = vpack.c.bf16 %v6712_v19, %v6708_v38  ;;  %v11045_v38 = vpack.c.bf16 %v6745_v23, %v6741_v35  ;;  %v7289_v19 = vld [vmem:[#allocation12 + $0x618] sm:$0xff]  ;;  %v7312_v23 = vld [vmem:[#allocation12 + $0x6d0] sm:$0xff] }
0x197b   :  { %v6742_v50 = vld [vmem:[#allocation11 + $0xbe0] sm:$0xff]  ;;  %v7317_v35 = vld [vmem:[#allocation12 + $0x6f8] sm:$0xff] }
0x197c   :  { %12369 = vrcp.f32 %v6593_v51  ;;  %v6716_v51 = vld [vmem:[#allocation11 + $0xb10] sm:$0xff] }
0x1983   :  { %v12366_v44 = vpop.eup %12365 }
0x1984   :  { %v6602_v58 = vmul.f32 %v12366_v44, %v12362_v30  ;;  %v12368_v3 = vpop.eup %12367  ;;  %v6718_v30 = vld [vmem:[#allocation11 + $0xb20] sm:$0xff]  ;;  %v11001_v44 = vpack.c.bf16 %v6719_v21, %v6715_v49  ;;  %v7293_v49 = vld [vmem:[#allocation12 + $0x638] sm:$0xff]  ;;  %v11015_v21 = vpack.c.bf16 %v6742_v50, %v6738_v60  ;;  %v7323_v60 = vld [vmem:[#allocation12 + $0x728] sm:$0xff] }
0x1985   :  { %v6601_v1 = vmul.f32 %v12368_v3, %v14376_v41  ;;  %v6694_v41 = vld [vmem:[#allocation11 + $0xa60] sm:$0xff]  ;;  %v6721_v3 = vld [vmem:[#allocation11 + $0xb38] sm:$0xff] }
0x1986   :  { %v12370_v33 = vpop.eup %12369  ;;  %v10991_v27 = vpack.c.bf16 %v6694_v41, %v6690_v0  ;;  %v6728_v0 = vld [vmem:[#allocation11 + $0xb70] sm:$0xff]  ;;  %v6731_v41 = vld [vmem:[#allocation11 + $0xb88] sm:$0xff] }
0x1987   :  { %v6603_v26 = vadd.f32 %v6602_v58, %v6601_v1  ;;  %v6717_v58 = vld [vmem:[#allocation11 + $0xb18] sm:$0xff]  ;;  %v6720_v1 = vld [vmem:[#allocation11 + $0xb30] sm:$0xff] }
0x1988   :  { %v11033_v59 = vpack.c.bf16 %v6721_v3, %v6717_v58  ;;  %v11035_v8 = vpack.c.bf16 %v6720_v1, %v6716_v51  ;;  %v7295_v58 = vld [vmem:[#allocation12 + $0x648] sm:$0xff]  ;;  %v7288_v51 = vld [vmem:[#allocation12 + $0x610] sm:$0xff] }
0x1989   :  { %12371 = vtanh.f32 %v6603_v26  ;;  %v6723_v26 = vld [vmem:[#allocation11 + $0xb48] sm:$0xff]  ;;  %v7292_v1 = vld [vmem:[#allocation12 + $0x630] sm:$0xff] }
0x198a   :  { %v7299_v3 = vld [vmem:[#allocation12 + $0x668] sm:$0xff]  ;;  %v14448_v48 = vpack.c.bf16 %v7292_v1, %v7288_v51  ;;  %v7329_v51 = vld [vmem:[#allocation12 + $0x758] sm:$0xff] }
0x1993   :  { %v12372_v61 = vpop.eup %12371 }
0x1994   :  { %v6605_v32 = vmul.f32 %v12372_v61, %v12370_v33  ;;  %v6727_v33 = vld [vmem:[#allocation11 + $0xb68] sm:$0xff]  ;;  %v14414_v61 = vld [vmem:[#allocation2 + $0x20] sm:$0xff] }
0x1995   :  { %v11005_v31 = vpack.c.bf16 %v6727_v33, %v6723_v26  ;;  %v14446_v33 = vpack.c.bf16 %v7299_v3, %v7295_v58  ;;  %v7326_v3 = vld [vmem:[#allocation12 + $0x740] sm:$0xff] }
0x1996   :  { %6606 = vst.msk [vmem:[#allocation2 + $0x38] sm:$0xff] %vm954_vm1, %v6605_v32 }
0x1997   :  { %6607 = vst.msk [vmem:[#allocation2] sm:$0xff] %vm957_vm2, %v6605_v32  ;;  %v11003_v32 = vpack.c.bf16 %v6718_v30, %v6714_v53  ;;  %v14434_v53 = vpack.c.bf16 %v7291_v12, %v7287_v57  ;;  %v14438_v30 = vpack.c.bf16 %v7293_v49, %v7289_v19  ;;  %v7322_v57 = vld [vmem:[#allocation12 + $0x720] sm:$0xff]  ;;  %v7325_v19 = vld [vmem:[#allocation12 + $0x738] sm:$0xff]  ;;  %v7320_v49 = vld [vmem:[#allocation12 + $0x710] sm:$0xff] }
0x199e   :  { %v14390_v36 = vld [vmem:[#allocation2] sm:$0xff] }
0x199f   :  { %6834 = vmatmul.mubr.f32.vlgmr.msra.gmra.mrb[48].mxu0 %v14390_v36  ;;  %6947 = vmatmul.mubr.f32.vlgmr.msra.gmra.mrb[56].mxu1 %v14390_v36 }
0x19a0   :  { %10988 = vmatpush1.bf16.msra.mxu0 %v10987_v22  ;;  %6839 = vmatprep.mubr.f32.mxu0 %v14974_v52  ;;  %v6729_v22 = vld [vmem:[#allocation11 + $0xb78] sm:$0xff] }
0x19a1   :  { %6952 = vmatprep.mubr.f32.mxu1 %v14974_v52  ;;  %10990 = vmatprep.subr.bf16.mxu0 %v10989_v20  ;;  %v6724_v20 = vld [vmem:[#allocation11 + $0xb50] sm:$0xff]  ;;  %v11037_v55 = vpack.c.bf16 %v6729_v22, %v6725_v5  ;;  %v7297_v5 = vld [vmem:[#allocation12 + $0x658] sm:$0xff]  ;;  %v7307_v22 = vld [vmem:[#allocation12 + $0x6a8] sm:$0xff] }
0x19a2   :  { %11020 = vmatpush1.bf16.msra.mxu1 %v11019_v39  ;;  %v14420_v39 = vld [vmem:[#allocation2 + $0x28] sm:$0xff]  ;;  %v11039_v63 = vpack.c.bf16 %v6728_v0, %v6724_v20  ;;  %v7300_v20 = vld [vmem:[#allocation12 + $0x670] sm:$0xff] }
0x19a3   :  { %6840 = vmatmul.mubr.f32.gmra.mrb[50].mxu0 %v14396_v10  ;;  %6953 = vmatmul.mubr.f32.gmra.mrb[58].mxu1 %v14396_v10 }
0x19a4   :  { %10992 = vmatpush1.bf16.msra.mxu0 %v10991_v27  ;;  %6845 = vmatprep.mubr.f32.mxu0 %v14974_v52  ;;  %v11009_v27 = vpack.c.bf16 %v6735_v17, %v6731_v41  ;;  %v7302_v17 = vld [vmem:[#allocation12 + $0x680] sm:$0xff] }
0x19a5   :  { %6958 = vmatprep.mubr.f32.mxu1 %v14974_v52  ;;  %11022 = vmatprep.subr.bf16.mxu1 %v11021_v13  ;;  %v6734_v13 = vld [vmem:[#allocation11 + $0xba0] sm:$0xff] }
0x19a6   :  { %10994 = vmatprep.subr.bf16.mxu0 %v10993_v47  ;;  %11024 = vmatpush1.bf16.msra.mxu1 %v11023_v11  ;;  %v6736_v47 = vld [vmem:[#allocation11 + $0xbb0] sm:$0xff]  ;;  %v6739_v11 = vld [vmem:[#allocation11 + $0xbc8] sm:$0xff]  ;;  %v11011_v15 = vpack.c.bf16 %v6734_v13, %v6730_v56  ;;  %v7305_v56 = vld [vmem:[#allocation12 + $0x698] sm:$0xff] }
0x19a7   :  { %6846 = vmatmul.mubr.f32.gmra.mrb[52].mxu0 %v14402_v18  ;;  %6959 = vmatmul.mubr.f32.gmra.mrb[60].mxu1 %v14402_v18  ;;  %v7311_v13 = vld [vmem:[#allocation12 + $0x6c8] sm:$0xff] }
0x19a8   :  { %10996 = vmatpush1.bf16.msra.mxu0 %v10995_v37  ;;  %6851 = vmatprep.mubr.f32.mxu0 %v14974_v52  ;;  %v11043_v37 = vpack.c.bf16 %v6736_v47, %v6732_v25  ;;  %v14473_v47 = vpack.c.bf16 %v7309_v29, %v7305_v56  ;;  %v7338_v29 = vld [vmem:[#allocation12 + $0x7a0] sm:$0xff] }
0x19a9   :  { %6964 = vmatprep.mubr.f32.mxu1 %v14974_v52  ;;  %11026 = vmatprep.subr.bf16.mxu1 %v11025_v7  ;;  %v11013_v7 = vpack.c.bf16 %v6743_v40, %v6739_v11  ;;  %v7310_v11 = vld [vmem:[#allocation12 + $0x6c0] sm:$0xff] }
0x19aa   :  { %11028 = vmatpush1.bf16.msra.mxu1 %v11027_v4  ;;  %10998 = vmatprep.subr.bf16.mxu0 %v10997_v46  ;;  %v6740_v4 = vld [vmem:[#allocation11 + $0xbd0] sm:$0xff]  ;;  %v7314_v40 = vld [vmem:[#allocation12 + $0x6e0] sm:$0xff] }
0x19ab   :  { %6852 = vmatmul.mubr.f32.gmra.mrb[54].mxu0 %v14408_v62  ;;  %6965 = vmatmul.mubr.f32.gmra.mrb[62].mxu1 %v14408_v62  ;;  %v6744_v46 = vld [vmem:[#allocation11 + $0xbf0] sm:$0xff]  ;;  %v14487_v50 = vpack.c.bf16 %v7314_v40, %v7310_v11  ;;  %v7347_v11 = vld [vmem:[#allocation12 + $0x7e8] sm:$0xff] }
0x19ac   :  { %6857 = vmatprep.mubr.f32.mxu0 %v14974_v52  ;;  %6970 = vmatprep.mubr.f32.mxu1 %v14974_v52 }
0x19ad   :  { %11000 = vmatpush1.bf16.msra.mxu0 %v10999_v6  ;;  %11030 = vmatprep.subr.bf16.mxu1 %v11029_v2  ;;  %v14432_v6 = vld [vmem:[#allocation2 + $0x38] sm:$0xff]  ;;  %v11047_v2 = vpack.c.bf16 %v6744_v46, %v6740_v4  ;;  %v7318_v46 = vld [vmem:[#allocation12 + $0x700] sm:$0xff] }
0x19ae   :  { %11032 = vmatpush1.bf16.msra.mxu1 %v11031_v28  ;;  %11002 = vmatprep.subr.bf16.mxu0 %v11001_v44  ;;  %v7286_v28 = vld [vmem:[#allocation12 + $0x600] sm:$0xff] }
0x19af   :  { %6858 = vmatmul.mubr.f32.gmra.mrb[56].mxu0 %v14414_v61  ;;  %6971 = vmatmul.mubr.f32.gmra.mrb[64].mxu1 %v14414_v61  ;;  %v7290_v44 = vld [vmem:[#allocation12 + $0x620] sm:$0xff] }
0x19b0   :  { %6863 = vmatprep.mubr.f32.mxu0 %v14974_v52  ;;  %6976 = vmatprep.mubr.f32.mxu1 %v14974_v52  ;;  %v14444_v26 = vpack.c.bf16 %v7290_v44, %v7286_v28  ;;  %v7331_v28 = vld [vmem:[#allocation12 + $0x768] sm:$0xff]  ;;  %v14503_v44 = vpack.c.bf16 %v7322_v57, %v7318_v46  ;;  %v7344_v46 = vld [vmem:[#allocation12 + $0x7d0] sm:$0xff] }
0x19b1   :  { %11004 = vmatpush1.bf16.msra.mxu0 %v11003_v32  ;;  %11034 = vmatprep.subr.bf16.mxu1 %v11033_v59  ;;  %v7294_v32 = vld [vmem:[#allocation12 + $0x640] sm:$0xff]  ;;  %v7348_v57 = vld [vmem:[#allocation12 + $0x7f0] sm:$0xff] }
0x19b2   :  { %11036 = vmatpush1.bf16.msra.mxu1 %v11035_v8  ;;  %11006 = vmatprep.subr.bf16.mxu0 %v11005_v31  ;;  %v7298_v59 = vld [vmem:[#allocation12 + $0x660] sm:$0xff]  ;;  %v7301_v8 = vld [vmem:[#allocation12 + $0x678] sm:$0xff]  ;;  %v7296_v31 = vld [vmem:[#allocation12 + $0x650] sm:$0xff] }
0x19b3   :  { %6864 = vmatmul.mubr.f32.gmra.mrb[58].mxu0 %v14420_v39  ;;  %6977 = vmatmul.mubr.f32.gmra.mrb[66].mxu1 %v14420_v39  ;;  %v14454_v0 = vpack.c.bf16 %v7298_v59, %v7294_v32  ;;  %v14458_v41 = vpack.c.bf16 %v7301_v8, %v7297_v5  ;;  %v7330_v32 = vld [vmem:[#allocation12 + $0x760] sm:$0xff]  ;;  %v7333_v59 = vld [vmem:[#allocation12 + $0x778] sm:$0xff]  ;;  %v7328_v5 = vld [vmem:[#allocation12 + $0x750] sm:$0xff] }
0x19b4   :  { %6869 = vmatprep.mubr.f32.mxu0 %v14974_v52  ;;  %6982 = vmatprep.mubr.f32.mxu1 %v14974_v52  ;;  %v7332_v8 = vld [vmem:[#allocation12 + $0x770] sm:$0xff] }
0x19b5   :  { %11008 = vmatpush1.bf16.msra.mxu0 %v11007_v54  ;;  %11038 = vmatprep.subr.bf16.mxu1 %v11037_v55  ;;  %v7306_v54 = vld [vmem:[#allocation12 + $0x6a0] sm:$0xff]  ;;  %v14463_v55 = vpack.c.bf16 %v7300_v20, %v7296_v31  ;;  %v7335_v31 = vld [vmem:[#allocation12 + $0x788] sm:$0xff]  ;;  %v14521_v20 = vpack.c.bf16 %v7333_v59, %v7329_v51 }
0x19b6   :  { %11040 = vmatpush1.bf16.msra.mxu1 %v11039_v63  ;;  %11010 = vmatprep.subr.bf16.mxu0 %v11009_v27  ;;  %v7304_v63 = vld [vmem:[#allocation12 + $0x690] sm:$0xff]  ;;  %v14469_v25 = vpack.c.bf16 %v7306_v54, %v7302_v17  ;;  %v7334_v17 = vld [vmem:[#allocation12 + $0x780] sm:$0xff]  ;;  %v7337_v54 = vld [vmem:[#allocation12 + $0x798] sm:$0xff] }
0x19b7   :  { %6870 = vmatmul.mubr.f32.gmra.mrb[60].mxu0 %v14426_v16  ;;  %6983 = vmatmul.mubr.f32.gmra.mrb[68].mxu1 %v14426_v16  ;;  %v7308_v27 = vld [vmem:[#allocation12 + $0x6b0] sm:$0xff]  ;;  %v14535_v40 = vpack.c.bf16 %v7338_v29, %v7334_v17 }
0x19b8   :  { %6875 = vmatprep.mubr.f32.mxu0 %v14974_v52  ;;  %6988 = vmatprep.mubr.f32.mxu1 %v14974_v52 }
0x19b9   :  { %11012 = vmatpush1.bf16.msra.mxu0 %v11011_v15  ;;  %11042 = vmatprep.subr.bf16.mxu1 %v11041_v45  ;;  %v14479_v15 = vpack.c.bf16 %v7315_v24, %v7311_v13  ;;  %v7313_v45 = vld [vmem:[#allocation12 + $0x6d8] sm:$0xff]  ;;  %v7340_v13 = vld [vmem:[#allocation12 + $0x7b0] sm:$0xff]  ;;  %v7343_v24 = vld [vmem:[#allocation12 + $0x7c8] sm:$0xff] }
0x19ba   :  { %11044 = vmatpush1.bf16.msra.mxu1 %v11043_v37  ;;  %11014 = vmatprep.subr.bf16.mxu0 %v11013_v7  ;;  %v7316_v37 = vld [vmem:[#allocation12 + $0x6f0] sm:$0xff]  ;;  %v7319_v7 = vld [vmem:[#allocation12 + $0x708] sm:$0xff]  ;;  %v14489_v4 = vpack.c.bf16 %v7317_v35, %v7313_v45  ;;  %v7345_v35 = vld [vmem:[#allocation12 + $0x7d8] sm:$0xff] }
0x19bb   :  { %6876 = vmatmul.mubr.f32.gmra.mrb[62].mxu0 %v14432_v6  ;;  %6989 = vmatmul.mubr.f32.gmra.mrb[70].mxu1 %v14432_v6  ;;  %v14495_v12 = vpack.c.bf16 %v7323_v60, %v7319_v7  ;;  %v7342_v7 = vld [vmem:[#allocation12 + $0x7c0] sm:$0xff] }
0x19bc   :  { %11046 = vmatprep.subr.bf16.mxu1 %v11045_v38  ;;  %7091 = vmatprep.mubr.f32.mxu0 %v14974_v52  ;;  %v7321_v38 = vld [vmem:[#allocation12 + $0x718] sm:$0xff]  ;;  %v7346_v60 = vld [vmem:[#allocation12 + $0x7e0] sm:$0xff] }
0x19bd   :  { %11016 = vmatpush1.bf16.msra.mxu0 %v11015_v21  ;;  %7204 = vmatprep.mubr.f32.mxu1 %v14974_v52  ;;  %v7324_v21 = vld [vmem:[#allocation12 + $0x730] sm:$0xff]  ;;  %v14505_v58 = vpack.c.bf16 %v7325_v19, %v7321_v38  ;;  %v14553_v19 = vpack.c.bf16 %v7346_v60, %v7342_v7 }
0x19be   :  { %11048 = vmatpush1.bf16.msra.mxu1 %v11047_v2  ;;  %11050 = vmatprep.subr.bf16.mxu0 %v14434_v53  ;;  %v7327_v2 = vld [vmem:[#allocation12 + $0x748] sm:$0xff] }
0x19bf   :  { %11082 = vmatprep.subr.bf16.mxu1 %v14438_v30  ;;  %v14511_v1 = vpack.c.bf16 %v7331_v28, %v7327_v2 }
0x19c3   :  { %7092 = vmatmul.mubr.f32.vlgmr.msra.gmra.mrb[62].mxu0 %v14390_v36  ;;  %7205 = vmatmul.mubr.f32.vlgmr.msra.gmra.mrb[70].mxu1 %v14390_v36  ;;  %v14461_v36 = vpack.c.bf16 %v7307_v22, %v7303_v42  ;;  %v7339_v42 = vld [vmem:[#allocation12 + $0x7a8] sm:$0xff]  ;;  %v14519_v22 = vpack.c.bf16 %v7330_v32, %v7326_v3 }
0x19c4   :  { %11052 = vmatpush1.bf16.msra.mxu0 %v14444_v26  ;;  %7097 = vmatprep.mubr.f32.mxu0 %v14974_v52  ;;  %v14527_v56 = vpack.c.bf16 %v7339_v42, %v7335_v31 }
0x19c5   :  { %7210 = vmatprep.mubr.f32.mxu1 %v14974_v52  ;;  %11054 = vmatprep.subr.bf16.mxu0 %v14446_v33 }
0x19c6   :  { %11084 = vmatpush1.bf16.msra.mxu1 %v14448_v48 }
0x19c7   :  { %7098 = vmatmul.mubr.f32.gmra.mrb[60].mxu0 %v14396_v10  ;;  %7211 = vmatmul.mubr.f32.gmra.mrb[68].mxu1 %v14396_v10  ;;  %v14477_v10 = vpack.c.bf16 %v7308_v27, %v7304_v63  ;;  %v7341_v63 = vld [vmem:[#allocation12 + $0x7b8] sm:$0xff]  ;;  %v7336_v27 = vld [vmem:[#allocation12 + $0x790] sm:$0xff] }
0x19c8   :  { %11056 = vmatpush1.bf16.msra.mxu0 %v14454_v0  ;;  %7103 = vmatprep.mubr.f32.mxu0 %v14974_v52  ;;  %v14537_v45 = vpack.c.bf16 %v7341_v63, %v7337_v54 }
0x19c9   :  { %7216 = vmatprep.mubr.f32.mxu1 %v14974_v52  ;;  %11086 = vmatprep.subr.bf16.mxu1 %v14458_v41 }
0x19ca   :  { %11058 = vmatprep.subr.bf16.mxu0 %v14461_v36  ;;  %11088 = vmatpush1.bf16.msra.mxu1 %v14463_v55 }
0x19cb   :  { %7104 = vmatmul.mubr.f32.gmra.mrb[58].mxu0 %v14402_v18  ;;  %7217 = vmatmul.mubr.f32.gmra.mrb[66].mxu1 %v14402_v18  ;;  %v14493_v18 = vpack.c.bf16 %v7316_v37, %v7312_v23  ;;  %v7349_v23 = vld [vmem:[#allocation12 + $0x7f8] sm:$0xff]  ;;  %v14543_v37 = vpack.c.bf16 %v7347_v11, %v7343_v24 }
0x19cc   :  { %11060 = vmatpush1.bf16.msra.mxu0 %v14469_v25  ;;  %7109 = vmatprep.mubr.f32.mxu0 %v14974_v52  ;;  %v14549_v38 = vpack.c.bf16 %v7349_v23, %v7345_v35 }
0x19cd   :  { %7222 = vmatprep.mubr.f32.mxu1 %v14974_v52  ;;  %11090 = vmatprep.subr.bf16.mxu1 %v14473_v47 }
0x19ce   :  { %11092 = vmatpush1.bf16.msra.mxu1 %v14477_v10  ;;  %11062 = vmatprep.subr.bf16.mxu0 %v14479_v15 }
0x19cf   :  { %7110 = vmatmul.mubr.f32.gmra.mrb[56].mxu0 %v14408_v62  ;;  %7223 = vmatmul.mubr.f32.gmra.mrb[64].mxu1 %v14408_v62  ;;  %v14509_v62 = vpack.c.bf16 %v7324_v21, %v7320_v49  ;;  %v14557_v49 = vpack.c.bf16 %v7348_v57, %v7344_v46 }
0x19d0   :  { %7115 = vmatprep.mubr.f32.mxu0 %v14974_v52  ;;  %7228 = vmatprep.mubr.f32.mxu1 %v14974_v52 }
0x19d1   :  { %11064 = vmatpush1.bf16.msra.mxu0 %v14487_v50  ;;  %11094 = vmatprep.subr.bf16.mxu1 %v14489_v4 }
0x19d2   :  { %11096 = vmatpush1.bf16.msra.mxu1 %v14493_v18  ;;  %11066 = vmatprep.subr.bf16.mxu0 %v14495_v12 }
0x19d3   :  { %7116 = vmatmul.mubr.f32.gmra.mrb[54].mxu0 %v14414_v61  ;;  %7229 = vmatmul.mubr.f32.gmra.mrb[62].mxu1 %v14414_v61  ;;  %v14525_v61 = vpack.c.bf16 %v7332_v8, %v7328_v5 }
0x19d4   :  { %7121 = vmatprep.mubr.f32.mxu0 %v14974_v52  ;;  %7234 = vmatprep.mubr.f32.mxu1 %v14974_v52 }
0x19d5   :  { %11068 = vmatpush1.bf16.msra.mxu0 %v14503_v44  ;;  %11098 = vmatprep.subr.bf16.mxu1 %v14505_v58 }
0x19d6   :  { %11100 = vmatpush1.bf16.msra.mxu1 %v14509_v62  ;;  %11070 = vmatprep.subr.bf16.mxu0 %v14511_v1 }
0x19d7   :  { %7122 = vmatmul.mubr.f32.gmra.mrb[52].mxu0 %v14420_v39  ;;  %7235 = vmatmul.mubr.f32.gmra.mrb[60].mxu1 %v14420_v39  ;;  %v14541_v39 = vpack.c.bf16 %v7340_v13, %v7336_v27 }
0x19d8   :  { %7127 = vmatprep.mubr.f32.mxu0 %v14974_v52  ;;  %7240 = vmatprep.mubr.f32.mxu1 %v14974_v52 }
0x19d9   :  { %11072 = vmatpush1.bf16.msra.mxu0 %v14519_v22  ;;  %11102 = vmatprep.subr.bf16.mxu1 %v14521_v20 }
0x19da   :  { %11104 = vmatpush1.bf16.msra.mxu1 %v14525_v61  ;;  %11074 = vmatprep.subr.bf16.mxu0 %v14527_v56 }
0x19db   :  { %7128 = vmatmul.mubr.f32.gmra.mrb[50].mxu0 %v14426_v16  ;;  %7241 = vmatmul.mubr.f32.gmra.mrb[58].mxu1 %v14426_v16  ;;  %v6747_v16 = vld [vmem:[#allocation14 + $0xc] sm:$0xf] }
0x19dc   :  { %7133 = vmatprep.mubr.f32.mxu0 %v14974_v52  ;;  %7246 = vmatprep.mubr.f32.mxu1 %v14974_v52  ;;  %v14608_v21 = vrot.slane %v6747_v16, %v13070_v9  ;;  %v14613_v31 = vrot.slane %v6747_v16, %v14975_v43 }
0x19dd   :  { %11076 = vmatpush1.bf16.msra.mxu0 %v14535_v40  ;;  %11106 = vmatprep.subr.bf16.mxu1 %v14537_v45 }
0x19de   :  { %11108 = vmatpush1.bf16.msra.mxu1 %v14541_v39  ;;  %11078 = vmatprep.subr.bf16.mxu0 %v14543_v37 }
0x19df   :  { %7134 = vmatmul.mubr.f32.gmra.mrb[48].mxu0 %v14432_v6  ;;  %7247 = vmatmul.mubr.f32.gmra.mrb[56].mxu1 %v14432_v6  ;;  %v14605_v6 = vrot.slane %v6747_v16, %v13072_v14  ;;  %v14616_v14 = vrot.slane %v6747_v16, %v14976_v34 }
0x19e0   :  { %11110 = vmatprep.subr.bf16.mxu1 %v14549_v38  ;;  %7418 = vmatprep.mubr.f32.mxu0 %v14974_v52 }
0x19e1   :  { %11080 = vmatpush1.bf16.msra.mxu0 %v14553_v19  ;;  %7489 = vmatprep.mubr.f32.mxu1 %v14974_v52 }
0x19e2   :  { %11112 = vmatpush1.bf16.msra.mxu1 %v14557_v49  ;;  %11114 = vmatprep.subr.bf16.mxu0 %v14434_v53 }
0x19e3   :  { %11146 = vmatprep.subr.bf16.mxu1 %v14438_v30 }
0x19e7   :  { %7419 = vmatmul.mubr.f32.vlgmr.msra.gmra.mrb[48].mxu0 %v14974_v52  ;;  %7490 = vmatmul.mubr.f32.vlgmr.msra.gmra.mrb[56].mxu1 %v14974_v52 }
0x19e8   :  { %11116 = vmatpush1.bf16.msra.mxu0 %v14444_v26  ;;  %11148 = vmatpush1.bf16.msra.mxu1 %v14448_v48 }
0x19e9   :  { %11118 = vmatprep.subr.bf16.mxu0 %v14446_v33  ;;  %11150 = vmatprep.subr.bf16.mxu1 %v14458_v41 }
0x19ea   :  { %7598 = vmatprep.mubr.f32.mxu0 %v14974_v52  ;;  %7669 = vmatprep.mubr.f32.mxu1 %v14974_v52 }
0x19ec   :  { %11120 = vmatpush1.bf16.msra.mxu0 %v14454_v0  ;;  %11152 = vmatpush1.bf16.msra.mxu1 %v14463_v55 }
0x19ed   :  { %11122 = vmatprep.subr.bf16.mxu0 %v14461_v36  ;;  %11154 = vmatprep.subr.bf16.mxu1 %v14473_v47 }
0x19f0   :  { %11124 = vmatpush1.bf16.msra.mxu0 %v14469_v25  ;;  %11156 = vmatpush1.bf16.msra.mxu1 %v14477_v10 }
0x19f1   :  { %11126 = vmatprep.subr.bf16.mxu0 %v14479_v15  ;;  %11158 = vmatprep.subr.bf16.mxu1 %v14489_v4 }
0x19f4   :  { %11128 = vmatpush1.bf16.msra.mxu0 %v14487_v50  ;;  %11160 = vmatpush1.bf16.msra.mxu1 %v14493_v18 }
0x19f5   :  { %11130 = vmatprep.subr.bf16.mxu0 %v14495_v12  ;;  %11162 = vmatprep.subr.bf16.mxu1 %v14505_v58 }
0x19f8   :  { %11132 = vmatpush1.bf16.msra.mxu0 %v14503_v44  ;;  %11164 = vmatpush1.bf16.msra.mxu1 %v14509_v62 }
0x19f9   :  { %11134 = vmatprep.subr.bf16.mxu0 %v14511_v1  ;;  %11166 = vmatprep.subr.bf16.mxu1 %v14521_v20 }
0x19fc   :  { %11136 = vmatpush1.bf16.msra.mxu0 %v14519_v22  ;;  %11168 = vmatpush1.bf16.msra.mxu1 %v14525_v61 }
0x19fd   :  { %11138 = vmatprep.subr.bf16.mxu0 %v14527_v56  ;;  %11170 = vmatprep.subr.bf16.mxu1 %v14537_v45 }
0x1a00   :  { %11140 = vmatpush1.bf16.msra.mxu0 %v14535_v40  ;;  %11172 = vmatpush1.bf16.msra.mxu1 %v14541_v39 }
0x1a01   :  { %11142 = vmatprep.subr.bf16.mxu0 %v14543_v37  ;;  %11174 = vmatprep.subr.bf16.mxu1 %v14549_v38 }
0x1a04   :  { %11144 = vmatpush1.bf16.msra.mxu0 %v14553_v19  ;;  %11176 = vmatpush1.bf16.msra.mxu1 %v14557_v49 }
0x1a05   :  { %11178 = vmatprep.subr.bf16.mxu0 %v14434_v53  ;;  %11210 = vmatprep.subr.bf16.mxu1 %v14438_v30 }
0x1aba   :  { %v7420_v2 = vpop.f32.mrb[48].mxu0  ;;  %v7491_v28 = vpop.f32.mrb[56].mxu1 }
0x1abb   :  { %v11693_v3 = vadd.f32 %v7420_v2, %v14605_v6  ;;  %v7422_v51 = vpop.f32.mrb[49].mxu0  ;;  %v7493_v32 = vpop.f32.mrb[57].mxu1  ;;  %v11709_v9 = vadd.f32 %v7491_v28, %v14613_v31 }
0x1abc   :  { %v11694_v59 = vadd.f32 %v7422_v51, %v14608_v21  ;;  %v11710_v42 = vadd.f32 %v7493_v32, %v14616_v14 }
0x1abd   :  { %v9020_v5 = vmul.f32 -1.442695, %v11693_v3  ;;  %v9022_v17 = vmul.f32 -1.442695, %v11709_v9 }
0x1abe   :  { %v9021_v8 = vmul.f32 -1.442695, %v11694_v59 }
0x1abf   :  { %12373 = vpow2.f32 %v9020_v5 }
0x1ac0   :  { %12375 = vpow2.f32 %v9021_v8 }
0x1ac1   :  { %12377 = vtanh.f32 %v11710_v42 }
0x1ac2   :  { %12379 = vpow2.f32 %v9022_v17 }
0x1ac9   :  { %v12374_v54 = vpop.eup %12373 }
0x1aca   :  { %v7513_v29 = vadd.f32 1.0, %v12374_v54  ;;  %v12376_v63 = vpop.eup %12375 }
0x1acb   :  { %v7514_v27 = vadd.f32 1.0, %v12376_v63  ;;  %v12378_v13 = vpop.eup %12377 }
0x1acc   :  { %12381 = vrcp.f32 %v7513_v29  ;;  %v12380_v43 = vpop.eup %12379 }
0x1acd   :  { %12383 = vrcp.f32 %v7514_v27  ;;  %v7515_v34 = vadd.f32 1.0, %v12380_v43 }
0x1acf   :  { %12385 = vrcp.f32 %v7515_v34 }
0x1ad6   :  { %v12382_v24 = vpop.eup %12381 }
0x1ad7   :  { %v7524_v11 = vmul.f32 %v12382_v24, %v12378_v13  ;;  %v12384_v35 = vpop.eup %12383 }
0x1ad8   :  { %v7523_v23 = vmul.f32 0.0, %v12384_v35 }
0x1ad9   :  { %v12386_v60 = vpop.eup %12385 }
0x1ada   :  { %v14620_v7 = vadd.f32 %v7524_v11, %v7523_v23 }
0x1adc   :  { %12387 = vtanh.f32 %v14620_v7 }
0x1ae6   :  { %v12388_v46 = vpop.eup %12387 }
0x1ae7   :  { %v7527_v57 = vmul.f32 %v12388_v46, %v12386_v60 }
0x1ae9   :  { %7528 = vst.msk [vmem:[#allocation3] sm:$0xff] %vm954_vm1, %v7527_v57  ;;  %7599 = vmatmul.mubr.f32.vlgmr.msra.gmra.mrb[50].mxu0 %v7527_v57  ;;  %7670 = vmatmul.mubr.f32.vlgmr.msra.gmra.mrb[58].mxu1 %v7527_v57 }
0x1aea   :  { %7529 = vst.msk [vmem:[#allocation3 + $0x38] sm:$0xff] %vm957_vm2, %v7527_v57  ;;  %11180 = vmatpush1.bf16.msra.mxu0 %v14444_v26  ;;  %11212 = vmatpush1.bf16.msra.mxu1 %v14448_v48 }
0x1aeb   :  { %11182 = vmatprep.subr.bf16.mxu0 %v14446_v33  ;;  %11214 = vmatprep.subr.bf16.mxu1 %v14458_v41 }
0x1aec   :  { %7778 = vmatprep.mubr.f32.mxu0 %v14974_v52  ;;  %7849 = vmatprep.mubr.f32.mxu1 %v14974_v52 }
0x1aee   :  { %11184 = vmatpush1.bf16.msra.mxu0 %v14454_v0  ;;  %11216 = vmatpush1.bf16.msra.mxu1 %v14463_v55 }
0x1aef   :  { %11186 = vmatprep.subr.bf16.mxu0 %v14461_v36  ;;  %11218 = vmatprep.subr.bf16.mxu1 %v14473_v47 }
0x1af2   :  { %11188 = vmatpush1.bf16.msra.mxu0 %v14469_v25  ;;  %11220 = vmatpush1.bf16.msra.mxu1 %v14477_v10 }
0x1af3   :  { %11190 = vmatprep.subr.bf16.mxu0 %v14479_v15  ;;  %11222 = vmatprep.subr.bf16.mxu1 %v14489_v4 }
0x1af6   :  { %11192 = vmatpush1.bf16.msra.mxu0 %v14487_v50  ;;  %11224 = vmatpush1.bf16.msra.mxu1 %v14493_v18 }
0x1af7   :  { %11194 = vmatprep.subr.bf16.mxu0 %v14495_v12  ;;  %11226 = vmatprep.subr.bf16.mxu1 %v14505_v58 }
0x1afa   :  { %11196 = vmatpush1.bf16.msra.mxu0 %v14503_v44  ;;  %11228 = vmatpush1.bf16.msra.mxu1 %v14509_v62 }
0x1afb   :  { %11198 = vmatprep.subr.bf16.mxu0 %v14511_v1  ;;  %11230 = vmatprep.subr.bf16.mxu1 %v14521_v20 }
0x1afe   :  { %11200 = vmatpush1.bf16.msra.mxu0 %v14519_v22  ;;  %11232 = vmatpush1.bf16.msra.mxu1 %v14525_v61 }
0x1aff   :  { %11202 = vmatprep.subr.bf16.mxu0 %v14527_v56  ;;  %11234 = vmatprep.subr.bf16.mxu1 %v14537_v45 }
0x1b02   :  { %11204 = vmatpush1.bf16.msra.mxu0 %v14535_v40  ;;  %11236 = vmatpush1.bf16.msra.mxu1 %v14541_v39 }
0x1b03   :  { %11206 = vmatprep.subr.bf16.mxu0 %v14543_v37  ;;  %11238 = vmatprep.subr.bf16.mxu1 %v14549_v38 }
0x1b06   :  { %11208 = vmatpush1.bf16.msra.mxu0 %v14553_v19  ;;  %11240 = vmatpush1.bf16.msra.mxu1 %v14557_v49 }
0x1b07   :  { %11242 = vmatprep.subr.bf16.mxu0 %v14434_v53  ;;  %11274 = vmatprep.subr.bf16.mxu1 %v14438_v30 }
0x1bbc   :  { %v7600_v16 = vpop.f32.mrb[50].mxu0  ;;  %v7671_v2 = vpop.f32.mrb[58].mxu1 }
0x1bbd   :  { %v11695_v28 = vadd.f32 %v7600_v16, %v14605_v6  ;;  %v7602_v3 = vpop.f32.mrb[51].mxu0  ;;  %v7673_v51 = vpop.f32.mrb[59].mxu1  ;;  %v11711_v8 = vadd.f32 %v7671_v2, %v14613_v31 }
0x1bbe   :  { %v11696_v32 = vadd.f32 %v7602_v3, %v14608_v21  ;;  %v11712_v9 = vadd.f32 %v7673_v51, %v14616_v14 }
0x1bbf   :  { %v9023_v59 = vmul.f32 -1.442695, %v11695_v28  ;;  %v9025_v42 = vmul.f32 -1.442695, %v11711_v8 }
0x1bc0   :  { %v9024_v5 = vmul.f32 -1.442695, %v11696_v32 }
0x1bc1   :  { %12389 = vpow2.f32 %v9023_v59 }
0x1bc2   :  { %12391 = vpow2.f32 %v9024_v5 }
0x1bc3   :  { %12393 = vtanh.f32 %v11712_v9 }
0x1bc4   :  { %12395 = vpow2.f32 %v9025_v42 }
0x1bcb   :  { %v12390_v17 = vpop.eup %12389 }
0x1bcc   :  { %v7693_v54 = vadd.f32 1.0, %v12390_v17  ;;  %v12392_v29 = vpop.eup %12391 }
0x1bcd   :  { %v7694_v63 = vadd.f32 1.0, %v12392_v29  ;;  %v12394_v27 = vpop.eup %12393 }
0x1bce   :  { %12397 = vrcp.f32 %v7693_v54  ;;  %v12396_v13 = vpop.eup %12395 }
0x1bcf   :  { %12399 = vrcp.f32 %v7694_v63  ;;  %v7695_v35 = vadd.f32 1.0, %v12396_v13 }
0x1bd1   :  { %12401 = vrcp.f32 %v7695_v35 }
0x1bd8   :  { %v12398_v43 = vpop.eup %12397 }
0x1bd9   :  { %v7704_v24 = vmul.f32 %v12398_v43, %v12394_v27  ;;  %v12400_v11 = vpop.eup %12399 }
0x1bda   :  { %v7703_v34 = vmul.f32 %v12400_v11, %v14620_v7 }
0x1bdb   :  { %v12402_v60 = vpop.eup %12401 }
0x1bdc   :  { %v14664_v23 = vadd.f32 %v7704_v24, %v7703_v34 }
0x1bde   :  { %12403 = vtanh.f32 %v14664_v23 }
0x1be8   :  { %v12404_v46 = vpop.eup %12403 }
0x1be9   :  { %v7707_v57 = vmul.f32 %v12404_v46, %v12402_v60 }
0x1beb   :  { %7779 = vmatmul.mubr.f32.vlgmr.msra.gmra.mrb[52].mxu0 %v7707_v57  ;;  %7708 = vst.msk [vmem:[#allocation3 + $0x8] sm:$0xff] %vm954_vm1, %v7707_v57  ;;  %7850 = vmatmul.mubr.f32.vlgmr.msra.gmra.mrb[60].mxu1 %v7707_v57 }
0x1bec   :  { %7709 = vst.msk [vmem:[#allocation3 + $0x30] sm:$0xff] %vm957_vm2, %v7707_v57  ;;  %11244 = vmatpush1.bf16.msra.mxu0 %v14444_v26  ;;  %11276 = vmatpush1.bf16.msra.mxu1 %v14448_v48 }
0x1bed   :  { %11246 = vmatprep.subr.bf16.mxu0 %v14446_v33  ;;  %11278 = vmatprep.subr.bf16.mxu1 %v14458_v41 }
0x1bee   :  { %7958 = vmatprep.mubr.f32.mxu0 %v14974_v52  ;;  %8029 = vmatprep.mubr.f32.mxu1 %v14974_v52 }
0x1bf0   :  { %11248 = vmatpush1.bf16.msra.mxu0 %v14454_v0  ;;  %11280 = vmatpush1.bf16.msra.mxu1 %v14463_v55 }
0x1bf1   :  { %11250 = vmatprep.subr.bf16.mxu0 %v14461_v36  ;;  %11282 = vmatprep.subr.bf16.mxu1 %v14473_v47 }
0x1bf4   :  { %11252 = vmatpush1.bf16.msra.mxu0 %v14469_v25  ;;  %11284 = vmatpush1.bf16.msra.mxu1 %v14477_v10 }
0x1bf5   :  { %11254 = vmatprep.subr.bf16.mxu0 %v14479_v15  ;;  %11286 = vmatprep.subr.bf16.mxu1 %v14489_v4 }
0x1bf8   :  { %11256 = vmatpush1.bf16.msra.mxu0 %v14487_v50  ;;  %11288 = vmatpush1.bf16.msra.mxu1 %v14493_v18 }
0x1bf9   :  { %11258 = vmatprep.subr.bf16.mxu0 %v14495_v12  ;;  %11290 = vmatprep.subr.bf16.mxu1 %v14505_v58 }
0x1bfc   :  { %11260 = vmatpush1.bf16.msra.mxu0 %v14503_v44  ;;  %11292 = vmatpush1.bf16.msra.mxu1 %v14509_v62 }
0x1bfd   :  { %11262 = vmatprep.subr.bf16.mxu0 %v14511_v1  ;;  %11294 = vmatprep.subr.bf16.mxu1 %v14521_v20 }
0x1c00   :  { %11264 = vmatpush1.bf16.msra.mxu0 %v14519_v22  ;;  %11296 = vmatpush1.bf16.msra.mxu1 %v14525_v61 }
0x1c01   :  { %11266 = vmatprep.subr.bf16.mxu0 %v14527_v56  ;;  %11298 = vmatprep.subr.bf16.mxu1 %v14537_v45 }
0x1c04   :  { %11268 = vmatpush1.bf16.msra.mxu0 %v14535_v40  ;;  %11300 = vmatpush1.bf16.msra.mxu1 %v14541_v39 }
0x1c05   :  { %11270 = vmatprep.subr.bf16.mxu0 %v14543_v37  ;;  %11302 = vmatprep.subr.bf16.mxu1 %v14549_v38 }
0x1c08   :  { %11272 = vmatpush1.bf16.msra.mxu0 %v14553_v19  ;;  %11304 = vmatpush1.bf16.msra.mxu1 %v14557_v49 }
0x1c09   :  { %11306 = vmatprep.subr.bf16.mxu0 %v14434_v53  ;;  %11338 = vmatprep.subr.bf16.mxu1 %v14438_v30 }
0x1cbe   :  { %v7780_v7 = vpop.f32.mrb[52].mxu0  ;;  %v7851_v16 = vpop.f32.mrb[60].mxu1 }
0x1cbf   :  { %v11697_v2 = vadd.f32 %v7780_v7, %v14605_v6  ;;  %v7782_v28 = vpop.f32.mrb[53].mxu0  ;;  %v7853_v3 = vpop.f32.mrb[61].mxu1  ;;  %v11713_v5 = vadd.f32 %v7851_v16, %v14613_v31 }
0x1cc0   :  { %v11698_v51 = vadd.f32 %v7782_v28, %v14608_v21  ;;  %v11714_v8 = vadd.f32 %v7853_v3, %v14616_v14 }
0x1cc1   :  { %v9026_v32 = vmul.f32 -1.442695, %v11697_v2  ;;  %v9028_v9 = vmul.f32 -1.442695, %v11713_v5 }
0x1cc2   :  { %v9027_v59 = vmul.f32 -1.442695, %v11698_v51 }
0x1cc3   :  { %12405 = vpow2.f32 %v9026_v32 }
0x1cc4   :  { %12407 = vpow2.f32 %v9027_v59 }
0x1cc5   :  { %12409 = vtanh.f32 %v11714_v8 }
0x1cc6   :  { %12411 = vpow2.f32 %v9028_v9 }
0x1ccd   :  { %v12406_v42 = vpop.eup %12405 }
0x1cce   :  { %v7873_v17 = vadd.f32 1.0, %v12406_v42  ;;  %v12408_v54 = vpop.eup %12407 }
0x1ccf   :  { %v7874_v29 = vadd.f32 1.0, %v12408_v54  ;;  %v12410_v63 = vpop.eup %12409 }
0x1cd0   :  { %12413 = vrcp.f32 %v7873_v17  ;;  %v12412_v27 = vpop.eup %12411 }
0x1cd1   :  { %12415 = vrcp.f32 %v7874_v29  ;;  %v7875_v11 = vadd.f32 1.0, %v12412_v27 }
0x1cd3   :  { %12417 = vrcp.f32 %v7875_v11 }
0x1cda   :  { %v12414_v13 = vpop.eup %12413 }
0x1cdb   :  { %v7884_v43 = vmul.f32 %v12414_v13, %v12410_v63  ;;  %v12416_v24 = vpop.eup %12415 }
0x1cdc   :  { %v7883_v35 = vmul.f32 %v12416_v24, %v14664_v23 }
0x1cdd   :  { %v12418_v60 = vpop.eup %12417 }
0x1cde   :  { %v14708_v34 = vadd.f32 %v7884_v43, %v7883_v35 }
0x1ce0   :  { %12419 = vtanh.f32 %v14708_v34 }
0x1cea   :  { %v12420_v46 = vpop.eup %12419 }
0x1ceb   :  { %v7887_v57 = vmul.f32 %v12420_v46, %v12418_v60 }
0x1ced   :  { %7959 = vmatmul.mubr.f32.vlgmr.msra.gmra.mrb[54].mxu0 %v7887_v57  ;;  %7888 = vst.msk [vmem:[#allocation3 + $0x10] sm:$0xff] %vm954_vm1, %v7887_v57  ;;  %8030 = vmatmul.mubr.f32.vlgmr.msra.gmra.mrb[62].mxu1 %v7887_v57 }
0x1cee   :  { %7889 = vst.msk [vmem:[#allocation3 + $0x28] sm:$0xff] %vm957_vm2, %v7887_v57  ;;  %11308 = vmatpush1.bf16.msra.mxu0 %v14444_v26  ;;  %11340 = vmatpush1.bf16.msra.mxu1 %v14448_v48 }
0x1cef   :  { %11310 = vmatprep.subr.bf16.mxu0 %v14446_v33  ;;  %11342 = vmatprep.subr.bf16.mxu1 %v14458_v41 }
0x1cf0   :  { %8138 = vmatprep.mubr.f32.mxu0 %v14974_v52  ;;  %8209 = vmatprep.mubr.f32.mxu1 %v14974_v52 }
0x1cf2   :  { %11312 = vmatpush1.bf16.msra.mxu0 %v14454_v0  ;;  %11344 = vmatpush1.bf16.msra.mxu1 %v14463_v55 }
0x1cf3   :  { %11314 = vmatprep.subr.bf16.mxu0 %v14461_v36  ;;  %11346 = vmatprep.subr.bf16.mxu1 %v14473_v47 }
0x1cf6   :  { %11316 = vmatpush1.bf16.msra.mxu0 %v14469_v25  ;;  %11348 = vmatpush1.bf16.msra.mxu1 %v14477_v10 }
0x1cf7   :  { %11318 = vmatprep.subr.bf16.mxu0 %v14479_v15  ;;  %11350 = vmatprep.subr.bf16.mxu1 %v14489_v4 }
0x1cfa   :  { %11320 = vmatpush1.bf16.msra.mxu0 %v14487_v50  ;;  %11352 = vmatpush1.bf16.msra.mxu1 %v14493_v18 }
0x1cfb   :  { %11322 = vmatprep.subr.bf16.mxu0 %v14495_v12  ;;  %11354 = vmatprep.subr.bf16.mxu1 %v14505_v58 }
0x1cfe   :  { %11324 = vmatpush1.bf16.msra.mxu0 %v14503_v44  ;;  %11356 = vmatpush1.bf16.msra.mxu1 %v14509_v62 }
0x1cff   :  { %11326 = vmatprep.subr.bf16.mxu0 %v14511_v1  ;;  %11358 = vmatprep.subr.bf16.mxu1 %v14521_v20 }
0x1d02   :  { %11328 = vmatpush1.bf16.msra.mxu0 %v14519_v22  ;;  %11360 = vmatpush1.bf16.msra.mxu1 %v14525_v61 }
0x1d03   :  { %11330 = vmatprep.subr.bf16.mxu0 %v14527_v56  ;;  %11362 = vmatprep.subr.bf16.mxu1 %v14537_v45 }
0x1d06   :  { %11332 = vmatpush1.bf16.msra.mxu0 %v14535_v40  ;;  %11364 = vmatpush1.bf16.msra.mxu1 %v14541_v39 }
0x1d07   :  { %11334 = vmatprep.subr.bf16.mxu0 %v14543_v37  ;;  %11366 = vmatprep.subr.bf16.mxu1 %v14549_v38 }
0x1d0a   :  { %11336 = vmatpush1.bf16.msra.mxu0 %v14553_v19  ;;  %11368 = vmatpush1.bf16.msra.mxu1 %v14557_v49 }
0x1d0b   :  { %11370 = vmatprep.subr.bf16.mxu0 %v14434_v53  ;;  %11402 = vmatprep.subr.bf16.mxu1 %v14438_v30 }
0x1dc0   :  { %v7960_v23 = vpop.f32.mrb[54].mxu0  ;;  %v8031_v7 = vpop.f32.mrb[62].mxu1 }
0x1dc1   :  { %v11699_v16 = vadd.f32 %v7960_v23, %v14605_v6  ;;  %v7962_v2 = vpop.f32.mrb[55].mxu0  ;;  %v8033_v28 = vpop.f32.mrb[63].mxu1  ;;  %v11715_v59 = vadd.f32 %v8031_v7, %v14613_v31 }
0x1dc2   :  { %v11700_v3 = vadd.f32 %v7962_v2, %v14608_v21  ;;  %v11716_v5 = vadd.f32 %v8033_v28, %v14616_v14 }
0x1dc3   :  { %v9029_v51 = vmul.f32 -1.442695, %v11699_v16  ;;  %v9031_v8 = vmul.f32 -1.442695, %v11715_v59 }
0x1dc4   :  { %v9030_v32 = vmul.f32 -1.442695, %v11700_v3 }
0x1dc5   :  { %12421 = vpow2.f32 %v9029_v51 }
0x1dc6   :  { %12423 = vpow2.f32 %v9030_v32 }
0x1dc7   :  { %12425 = vtanh.f32 %v11716_v5 }
0x1dc8   :  { %12427 = vpow2.f32 %v9031_v8 }
0x1dcf   :  { %v12422_v9 = vpop.eup %12421 }
0x1dd0   :  { %v8053_v42 = vadd.f32 1.0, %v12422_v9  ;;  %v12424_v17 = vpop.eup %12423 }
0x1dd1   :  { %v8054_v54 = vadd.f32 1.0, %v12424_v17  ;;  %v12426_v29 = vpop.eup %12425 }
0x1dd2   :  { %12429 = vrcp.f32 %v8053_v42  ;;  %v12428_v63 = vpop.eup %12427 }
0x1dd3   :  { %12431 = vrcp.f32 %v8054_v54  ;;  %v8055_v24 = vadd.f32 1.0, %v12428_v63 }
0x1dd5   :  { %12433 = vrcp.f32 %v8055_v24 }
0x1ddc   :  { %v12430_v27 = vpop.eup %12429 }
0x1ddd   :  { %v8064_v13 = vmul.f32 %v12430_v27, %v12426_v29  ;;  %v12432_v43 = vpop.eup %12431 }
0x1dde   :  { %v8063_v11 = vmul.f32 %v12432_v43, %v14708_v34 }
0x1ddf   :  { %v12434_v60 = vpop.eup %12433 }
0x1de0   :  { %v14752_v35 = vadd.f32 %v8064_v13, %v8063_v11 }
0x1de2   :  { %12435 = vtanh.f32 %v14752_v35 }
0x1dec   :  { %v12436_v46 = vpop.eup %12435 }
0x1ded   :  { %v8067_v57 = vmul.f32 %v12436_v46, %v12434_v60 }
0x1def   :  { %8139 = vmatmul.mubr.f32.vlgmr.msra.gmra.mrb[56].mxu0 %v8067_v57  ;;  %8068 = vst.msk [vmem:[#allocation3 + $0x18] sm:$0xff] %vm954_vm1, %v8067_v57  ;;  %8210 = vmatmul.mubr.f32.vlgmr.msra.gmra.mrb[64].mxu1 %v8067_v57 }
0x1df0   :  { %8069 = vst.msk [vmem:[#allocation3 + $0x20] sm:$0xff] %vm957_vm2, %v8067_v57  ;;  %11372 = vmatpush1.bf16.msra.mxu0 %v14444_v26  ;;  %11404 = vmatpush1.bf16.msra.mxu1 %v14448_v48 }
0x1df1   :  { %11374 = vmatprep.subr.bf16.mxu0 %v14446_v33  ;;  %11406 = vmatprep.subr.bf16.mxu1 %v14458_v41 }
0x1df2   :  { %8318 = vmatprep.mubr.f32.mxu0 %v14974_v52  ;;  %8389 = vmatprep.mubr.f32.mxu1 %v14974_v52 }
0x1df4   :  { %11376 = vmatpush1.bf16.msra.mxu0 %v14454_v0  ;;  %11408 = vmatpush1.bf16.msra.mxu1 %v14463_v55 }
0x1df5   :  { %11378 = vmatprep.subr.bf16.mxu0 %v14461_v36  ;;  %11410 = vmatprep.subr.bf16.mxu1 %v14473_v47 }
0x1df8   :  { %11380 = vmatpush1.bf16.msra.mxu0 %v14469_v25  ;;  %11412 = vmatpush1.bf16.msra.mxu1 %v14477_v10 }
0x1df9   :  { %11382 = vmatprep.subr.bf16.mxu0 %v14479_v15  ;;  %11414 = vmatprep.subr.bf16.mxu1 %v14489_v4 }
0x1dfc   :  { %11384 = vmatpush1.bf16.msra.mxu0 %v14487_v50  ;;  %11416 = vmatpush1.bf16.msra.mxu1 %v14493_v18 }
0x1dfd   :  { %11386 = vmatprep.subr.bf16.mxu0 %v14495_v12  ;;  %11418 = vmatprep.subr.bf16.mxu1 %v14505_v58 }
0x1e00   :  { %11388 = vmatpush1.bf16.msra.mxu0 %v14503_v44  ;;  %11420 = vmatpush1.bf16.msra.mxu1 %v14509_v62 }
0x1e01   :  { %11390 = vmatprep.subr.bf16.mxu0 %v14511_v1  ;;  %11422 = vmatprep.subr.bf16.mxu1 %v14521_v20 }
0x1e04   :  { %11392 = vmatpush1.bf16.msra.mxu0 %v14519_v22  ;;  %11424 = vmatpush1.bf16.msra.mxu1 %v14525_v61 }
0x1e05   :  { %11394 = vmatprep.subr.bf16.mxu0 %v14527_v56  ;;  %11426 = vmatprep.subr.bf16.mxu1 %v14537_v45 }
0x1e08   :  { %11396 = vmatpush1.bf16.msra.mxu0 %v14535_v40  ;;  %11428 = vmatpush1.bf16.msra.mxu1 %v14541_v39 }
0x1e09   :  { %11398 = vmatprep.subr.bf16.mxu0 %v14543_v37  ;;  %11430 = vmatprep.subr.bf16.mxu1 %v14549_v38 }
0x1e0c   :  { %11400 = vmatpush1.bf16.msra.mxu0 %v14553_v19  ;;  %11432 = vmatpush1.bf16.msra.mxu1 %v14557_v49 }
0x1e0d   :  { %11434 = vmatprep.subr.bf16.mxu0 %v14434_v53  ;;  %11466 = vmatprep.subr.bf16.mxu1 %v14438_v30 }
0x1ec2   :  { %v8140_v34 = vpop.f32.mrb[56].mxu0  ;;  %v8211_v23 = vpop.f32.mrb[64].mxu1 }
0x1ec3   :  { %v11701_v7 = vadd.f32 %v8140_v34, %v14605_v6  ;;  %v8142_v16 = vpop.f32.mrb[57].mxu0  ;;  %v8213_v2 = vpop.f32.mrb[65].mxu1  ;;  %v11717_v32 = vadd.f32 %v8211_v23, %v14613_v31 }
0x1ec4   :  { %v11702_v28 = vadd.f32 %v8142_v16, %v14608_v21  ;;  %v11718_v59 = vadd.f32 %v8213_v2, %v14616_v14 }
0x1ec5   :  { %v9032_v3 = vmul.f32 -1.442695, %v11701_v7  ;;  %v9034_v5 = vmul.f32 -1.442695, %v11717_v32 }
0x1ec6   :  { %v9033_v51 = vmul.f32 -1.442695, %v11702_v28 }
0x1ec7   :  { %12437 = vpow2.f32 %v9032_v3 }
0x1ec8   :  { %12439 = vpow2.f32 %v9033_v51 }
0x1ec9   :  { %12441 = vtanh.f32 %v11718_v59 }
0x1eca   :  { %12443 = vpow2.f32 %v9034_v5 }
0x1ed1   :  { %v12438_v8 = vpop.eup %12437 }
0x1ed2   :  { %v8233_v9 = vadd.f32 1.0, %v12438_v8  ;;  %v12440_v42 = vpop.eup %12439 }
0x1ed3   :  { %v8234_v17 = vadd.f32 1.0, %v12440_v42  ;;  %v12442_v54 = vpop.eup %12441 }
0x1ed4   :  { %12445 = vrcp.f32 %v8233_v9  ;;  %v12444_v29 = vpop.eup %12443 }
0x1ed5   :  { %12447 = vrcp.f32 %v8234_v17  ;;  %v8235_v43 = vadd.f32 1.0, %v12444_v29 }
0x1ed7   :  { %12449 = vrcp.f32 %v8235_v43 }
0x1ede   :  { %v12446_v63 = vpop.eup %12445 }
0x1edf   :  { %v8244_v27 = vmul.f32 %v12446_v63, %v12442_v54  ;;  %v12448_v13 = vpop.eup %12447 }
0x1ee0   :  { %v8243_v24 = vmul.f32 %v12448_v13, %v14752_v35 }
0x1ee1   :  { %v12450_v60 = vpop.eup %12449 }
0x1ee2   :  { %v14796_v11 = vadd.f32 %v8244_v27, %v8243_v24 }
0x1ee4   :  { %12451 = vtanh.f32 %v14796_v11 }
0x1eee   :  { %v12452_v46 = vpop.eup %12451 }
0x1eef   :  { %v8247_v57 = vmul.f32 %v12452_v46, %v12450_v60  ;;  %v8794_v46 = vld [vmem:[%s14963_s5 + $0x18] sm:$0xff] }
0x1ef1   :  { %8248 = vst.msk [vmem:[#allocation3 + $0x20] sm:$0xff] %vm954_vm1, %v8247_v57  ;;  %8319 = vmatmul.mubr.f32.vlgmr.msra.gmra.mrb[58].mxu0 %v8247_v57  ;;  %8390 = vmatmul.mubr.f32.vlgmr.msra.gmra.mrb[66].mxu1 %v8247_v57 }
0x1ef2   :  { %8249 = vst.msk [vmem:[#allocation3 + $0x18] sm:$0xff] %vm957_vm2, %v8247_v57  ;;  %11436 = vmatpush1.bf16.msra.mxu0 %v14444_v26  ;;  %11468 = vmatpush1.bf16.msra.mxu1 %v14448_v48 }
0x1ef3   :  { %11438 = vmatprep.subr.bf16.mxu0 %v14446_v33  ;;  %11470 = vmatprep.subr.bf16.mxu1 %v14458_v41 }
0x1ef4   :  { %8498 = vmatprep.mubr.f32.mxu0 %v14974_v52  ;;  %8569 = vmatprep.mubr.f32.mxu1 %v14974_v52 }
0x1ef6   :  { %11440 = vmatpush1.bf16.msra.mxu0 %v14454_v0  ;;  %11472 = vmatpush1.bf16.msra.mxu1 %v14463_v55 }
0x1ef7   :  { %11442 = vmatprep.subr.bf16.mxu0 %v14461_v36  ;;  %11474 = vmatprep.subr.bf16.mxu1 %v14473_v47 }
0x1efa   :  { %11444 = vmatpush1.bf16.msra.mxu0 %v14469_v25  ;;  %11476 = vmatpush1.bf16.msra.mxu1 %v14477_v10 }
0x1efb   :  { %11446 = vmatprep.subr.bf16.mxu0 %v14479_v15  ;;  %11478 = vmatprep.subr.bf16.mxu1 %v14489_v4 }
0x1efe   :  { %11448 = vmatpush1.bf16.msra.mxu0 %v14487_v50  ;;  %11480 = vmatpush1.bf16.msra.mxu1 %v14493_v18 }
0x1eff   :  { %11450 = vmatprep.subr.bf16.mxu0 %v14495_v12  ;;  %11482 = vmatprep.subr.bf16.mxu1 %v14505_v58 }
0x1f02   :  { %11452 = vmatpush1.bf16.msra.mxu0 %v14503_v44  ;;  %11484 = vmatpush1.bf16.msra.mxu1 %v14509_v62 }
0x1f03   :  { %11454 = vmatprep.subr.bf16.mxu0 %v14511_v1  ;;  %11486 = vmatprep.subr.bf16.mxu1 %v14521_v20 }
0x1f06   :  { %11456 = vmatpush1.bf16.msra.mxu0 %v14519_v22  ;;  %11488 = vmatpush1.bf16.msra.mxu1 %v14525_v61 }
0x1f07   :  { %11458 = vmatprep.subr.bf16.mxu0 %v14527_v56  ;;  %11490 = vmatprep.subr.bf16.mxu1 %v14537_v45 }
0x1f0a   :  { %11460 = vmatpush1.bf16.msra.mxu0 %v14535_v40  ;;  %11492 = vmatpush1.bf16.msra.mxu1 %v14541_v39 }
0x1f0b   :  { %11462 = vmatprep.subr.bf16.mxu0 %v14543_v37  ;;  %11494 = vmatprep.subr.bf16.mxu1 %v14549_v38 }
0x1f0e   :  { %11464 = vmatpush1.bf16.msra.mxu0 %v14553_v19  ;;  %11496 = vmatpush1.bf16.msra.mxu1 %v14557_v49 }
0x1f0f   :  { %11498 = vmatprep.subr.bf16.mxu0 %v14434_v53  ;;  %11530 = vmatprep.subr.bf16.mxu1 %v14438_v30 }
0x1fc4   :  { %v8320_v35 = vpop.f32.mrb[58].mxu0  ;;  %v8391_v34 = vpop.f32.mrb[66].mxu1 }
0x1fc5   :  { %v11703_v23 = vadd.f32 %v8320_v35, %v14605_v6  ;;  %v8322_v7 = vpop.f32.mrb[59].mxu0  ;;  %v8393_v16 = vpop.f32.mrb[67].mxu1  ;;  %v11719_v51 = vadd.f32 %v8391_v34, %v14613_v31  ;;  %v8795_v35 = vld [vmem:[%s14963_s5 + $0x20] sm:$0xff]  ;;  %v8796_v34 = vld [vmem:[%s14963_s5 + $0x28] sm:$0xff] }
0x1fc6   :  { %v11704_v2 = vadd.f32 %v8322_v7, %v14608_v21  ;;  %v11720_v32 = vadd.f32 %v8393_v16, %v14616_v14  ;;  %v8797_v7 = vld [vmem:[%s14963_s5 + $0x30] sm:$0xff]  ;;  %v8798_v16 = vld [vmem:[%s14963_s5 + $0x38] sm:$0xff] }
0x1fc7   :  { %v9035_v28 = vmul.f32 -1.442695, %v11703_v23  ;;  %v9037_v59 = vmul.f32 -1.442695, %v11719_v51  ;;  %v11568_v23 = vpack.c.bf16 %v8796_v34, %v8795_v35 }
0x1fc8   :  { %v9036_v3 = vmul.f32 -1.442695, %v11704_v2  ;;  %v11571_v2 = vpack.c.bf16 %v8798_v16, %v8797_v7 }
0x1fc9   :  { %12453 = vpow2.f32 %v9035_v28  ;;  %v8799_v28 = vld [vmem:[%s14963_s5 + $0x40] sm:$0xff] }
0x1fca   :  { %12455 = vpow2.f32 %v9036_v3  ;;  %v8800_v3 = vld [vmem:[%s14963_s5 + $0x48] sm:$0xff] }
0x1fcb   :  { %12457 = vtanh.f32 %v11720_v32  ;;  %v11574_v51 = vpack.c.bf16 %v8800_v3, %v8799_v28  ;;  %v8801_v32 = vld [vmem:[%s14963_s5 + $0x50] sm:$0xff] }
0x1fcc   :  { %12459 = vpow2.f32 %v9037_v59  ;;  %v8802_v59 = vld [vmem:[%s14963_s5 + $0x58] sm:$0xff] }
0x1fd3   :  { %v12454_v53 = vpop.eup %12453 }
0x1fd4   :  { %v8413_v5 = vadd.f32 1.0, %v12454_v53  ;;  %v12456_v30 = vpop.eup %12455  ;;  %v11577_v53 = vpack.c.bf16 %v8802_v59, %v8801_v32 }
0x1fd5   :  { %v8414_v8 = vadd.f32 1.0, %v12456_v30  ;;  %v12458_v9 = vpop.eup %12457  ;;  %v8804_v30 = vld [vmem:[%s14963_s5 + $0x68] sm:$0xff] }
0x1fd6   :  { %12461 = vrcp.f32 %v8413_v5  ;;  %v12460_v42 = vpop.eup %12459  ;;  %v8803_v5 = vld [vmem:[%s14963_s5 + $0x60] sm:$0xff] }
0x1fd7   :  { %12463 = vrcp.f32 %v8414_v8  ;;  %v8415_v63 = vadd.f32 1.0, %v12460_v42  ;;  %v11580_v8 = vpack.c.bf16 %v8804_v30, %v8803_v5  ;;  %v8806_v42 = vld [vmem:[%s14963_s5 + $0x78] sm:$0xff] }
0x1fd9   :  { %12465 = vrcp.f32 %v8415_v63 }
0x1fe0   :  { %v12462_v17 = vpop.eup %12461 }
0x1fe1   :  { %v8424_v54 = vmul.f32 %v12462_v17, %v12458_v9  ;;  %v12464_v29 = vpop.eup %12463  ;;  %v8805_v9 = vld [vmem:[%s14963_s5 + $0x70] sm:$0xff] }
0x1fe2   :  { %v8423_v27 = vmul.f32 %v12464_v29, %v14796_v11  ;;  %v8793_v11 = vld [vmem:[%s14963_s5 + $0x10] sm:$0xff]  ;;  %v11583_v17 = vpack.c.bf16 %v8806_v42, %v8805_v9 }
0x1fe3   :  { %v12466_v43 = vpop.eup %12465  ;;  %v11565_v57 = vpack.c.bf16 %v8794_v46, %v8793_v11 }
0x1fe4   :  { %v14840_v13 = vadd.f32 %v8424_v54, %v8423_v27 }
0x1fe6   :  { %12467 = vtanh.f32 %v14840_v13 }
0x1ff0   :  { %v12468_v24 = vpop.eup %12467 }
0x1ff1   :  { %v8427_v60 = vmul.f32 %v12468_v24, %v12466_v43 }
0x1ff3   :  { %8428 = vst.msk [vmem:[#allocation3 + $0x28] sm:$0xff] %vm954_vm1, %v8427_v60  ;;  %8499 = vmatmul.mubr.f32.vlgmr.msra.gmra.mrb[60].mxu0 %v8427_v60  ;;  %8570 = vmatmul.mubr.f32.vlgmr.msra.gmra.mrb[68].mxu1 %v8427_v60 }
0x1ff4   :  { %8429 = vst.msk [vmem:[#allocation3 + $0x10] sm:$0xff] %vm957_vm2, %v8427_v60  ;;  %11500 = vmatpush1.bf16.msra.mxu0 %v14444_v26  ;;  %11532 = vmatpush1.bf16.msra.mxu1 %v14448_v48 }
0x1ff5   :  { %11502 = vmatprep.subr.bf16.mxu0 %v14446_v33  ;;  %11534 = vmatprep.subr.bf16.mxu1 %v14458_v41 }
0x1ff6   :  { %8678 = vmatprep.mubr.f32.mxu0 %v14974_v52  ;;  %8749 = vmatprep.mubr.f32.mxu1 %v14974_v52 }
0x1ff8   :  { %11504 = vmatpush1.bf16.msra.mxu0 %v14454_v0  ;;  %11536 = vmatpush1.bf16.msra.mxu1 %v14463_v55 }
0x1ff9   :  { %11506 = vmatprep.subr.bf16.mxu0 %v14461_v36  ;;  %11538 = vmatprep.subr.bf16.mxu1 %v14473_v47 }
0x1ffc   :  { %11508 = vmatpush1.bf16.msra.mxu0 %v14469_v25  ;;  %11540 = vmatpush1.bf16.msra.mxu1 %v14477_v10 }
0x1ffd   :  { %11510 = vmatprep.subr.bf16.mxu0 %v14479_v15  ;;  %11542 = vmatprep.subr.bf16.mxu1 %v14489_v4 }
0x2000   :  { %11512 = vmatpush1.bf16.msra.mxu0 %v14487_v50  ;;  %11544 = vmatpush1.bf16.msra.mxu1 %v14493_v18 }
0x2001   :  { %11514 = vmatprep.subr.bf16.mxu0 %v14495_v12  ;;  %11546 = vmatprep.subr.bf16.mxu1 %v14505_v58 }
0x2004   :  { %11516 = vmatpush1.bf16.msra.mxu0 %v14503_v44  ;;  %11548 = vmatpush1.bf16.msra.mxu1 %v14509_v62 }
0x2005   :  { %11518 = vmatprep.subr.bf16.mxu0 %v14511_v1  ;;  %11550 = vmatprep.subr.bf16.mxu1 %v14521_v20 }
0x2008   :  { %11520 = vmatpush1.bf16.msra.mxu0 %v14519_v22  ;;  %11552 = vmatpush1.bf16.msra.mxu1 %v14525_v61 }
0x2009   :  { %11522 = vmatprep.subr.bf16.mxu0 %v14527_v56  ;;  %11554 = vmatprep.subr.bf16.mxu1 %v14537_v45 }
0x200c   :  { %11524 = vmatpush1.bf16.msra.mxu0 %v14535_v40  ;;  %11556 = vmatpush1.bf16.msra.mxu1 %v14541_v39 }
0x200d   :  { %11526 = vmatprep.subr.bf16.mxu0 %v14543_v37  ;;  %11558 = vmatprep.subr.bf16.mxu1 %v14549_v38  ;;  %v8791_v37 = vld [vmem:[%s14963_s5] sm:$0xff]  ;;  %v8792_v38 = vld [vmem:[%s14963_s5 + $0x8] sm:$0xff]  ;;  %s12684_s5 = smov [#allocation17]  }
0x200e   :  { %s8904_s29 = sshll.u32 %s12684_s5, 4  ;;  %s8905_s29 = int_to_ptr.vmem [resolvable:$true] %s8904_s29 }
0x200f   :  { %s12637_s30 = scalar_lea.vmem %s8905_s29, 128  ;;  %p12642_p7 = scmp.lt.s32.totalorder %s8905_s29, %s8905_s29 }
0x2010   :  { %11528 = vmatpush1.bf16.msra.mxu0 %v14553_v19  ;;  %11560 = vmatpush1.bf16.msra.mxu1 %v14557_v49  ;;  %v11562_v19 = vpack.c.bf16 %v8792_v38, %v8791_v37  ;;  %v12682_v49 = vmov 0.0|0.0   ;;  %p12638_p6 = scmp.ne.s32.totalorder %s8905_s29, %s12637_s30  ;;  %p12643_p8 = scmp.lt.s32.totalorder %s12637_s30, %s12637_s30 }
0x2011   :  { %11561 = vmatprep.subr.bf16.mxu0 %v12682_v49 }
0x2012   :  { %p12644_p9 = por %p12643_p8, %p12642_p7 }
0x2014   :  { %p12645_p10 = pnand %p12644_p9, %p12638_p6 }
0x20c6   :  { %v8500_v26 = vpop.f32.mrb[60].mxu0  ;;  %v8571_v33 = vpop.f32.mrb[68].mxu1 }
0x20c7   :  { %v11705_v48 = vadd.f32 %v8500_v26, %v14605_v6  ;;  %v8502_v0 = vpop.f32.mrb[61].mxu0  ;;  %v8573_v41 = vpop.f32.mrb[69].mxu1  ;;  %v11721_v47 = vadd.f32 %v8571_v33, %v14613_v31 }
0x20c8   :  { %v11706_v36 = vadd.f32 %v8502_v0, %v14608_v21  ;;  %v11722_v10 = vadd.f32 %v8573_v41, %v14616_v14 }
0x20c9   :  { %v9038_v55 = vmul.f32 -1.442695, %v11705_v48  ;;  %v9040_v15 = vmul.f32 -1.442695, %v11721_v47 }
0x20ca   :  { %v9039_v25 = vmul.f32 -1.442695, %v11706_v36 }
0x20cb   :  { %12469 = vpow2.f32 %v9038_v55 }
0x20cc   :  { %12471 = vpow2.f32 %v9039_v25 }
0x20cd   :  { %12473 = vtanh.f32 %v11722_v10 }
0x20ce   :  { %12475 = vpow2.f32 %v9040_v15 }
0x20d5   :  { %v12470_v50 = vpop.eup %12469 }
0x20d6   :  { %v8593_v4 = vadd.f32 1.0, %v12470_v50  ;;  %v12472_v18 = vpop.eup %12471 }
0x20d7   :  { %v8594_v12 = vadd.f32 1.0, %v12472_v18  ;;  %v12474_v44 = vpop.eup %12473 }
0x20d8   :  { %12477 = vrcp.f32 %v8593_v4  ;;  %v12476_v58 = vpop.eup %12475 }
0x20d9   :  { %12479 = vrcp.f32 %v8594_v12  ;;  %v8595_v20 = vadd.f32 1.0, %v12476_v58  ;;  %v9044_v12 = vld [vmem:[#allocation15] ss:$0 sm:$0xff] }
0x20db   :  { %12481 = vrcp.f32 %v8595_v20 }
0x20e2   :  { %v12478_v62 = vpop.eup %12477 }
0x20e3   :  { %v8604_v1 = vmul.f32 %v12478_v62, %v12474_v44  ;;  %v12480_v22 = vpop.eup %12479 }
0x20e4   :  { %v8603_v61 = vmul.f32 %v12480_v22, %v14840_v13 }
0x20e5   :  { %v12482_v40 = vpop.eup %12481 }
0x20e6   :  { %v14882_v56 = vadd.f32 %v8604_v1, %v8603_v61 }
0x20e8   :  { %12483 = vtanh.f32 %v14882_v56 }
0x20f2   :  { %v12484_v45 = vpop.eup %12483 }
0x20f3   :  { %v8607_v39 = vmul.f32 %v12484_v45, %v12482_v40 }
0x20f5   :  { %8608 = vst.msk [vmem:[#allocation3 + $0x30] sm:$0xff] %vm954_vm1, %v8607_v39  ;;  %8679 = vmatmul.mubr.f32.vlgmr.msra.gmra.mrb[62].mxu0 %v8607_v39  ;;  %8750 = vmatmul.mubr.f32.vlgmr.msra.gmra.mrb[70].mxu1 %v8607_v39 }
0x20f6   :  { %8609 = vst.msk [vmem:[#allocation3 + $0x8] sm:$0xff] %vm957_vm2, %v8607_v39  ;;  %11563 = vmatpush3.bf16.msra.mxu0 %v11562_v19  ;;  %9094 = vmatprep.mubr.msk.f32.mxu0 %vm12683_vm3, %v14974_v52 }
0x20f7   :  { %11564 = vmatprep.subr.bf16.mxu0 %v12682_v49 }
0x20fa   :  { %11566 = vmatpush3.bf16.msra.mxu0 %v11565_v57 }
0x20fb   :  { %11567 = vmatprep.subr.bf16.mxu0 %v12682_v49 }
0x20fe   :  { %11569 = vmatpush3.bf16.msra.mxu0 %v11568_v23 }
0x20ff   :  { %11570 = vmatprep.subr.bf16.mxu0 %v12682_v49 }
0x2102   :  { %11572 = vmatpush3.bf16.msra.mxu0 %v11571_v2 }
0x2103   :  { %11573 = vmatprep.subr.bf16.mxu0 %v12682_v49 }
0x2106   :  { %11575 = vmatpush3.bf16.msra.mxu0 %v11574_v51 }
0x2107   :  { %11576 = vmatprep.subr.bf16.mxu0 %v12682_v49 }
0x210a   :  { %11578 = vmatpush3.bf16.msra.mxu0 %v11577_v53 }
0x210b   :  { %11579 = vmatprep.subr.bf16.mxu0 %v12682_v49 }
0x210e   :  { %11581 = vmatpush3.bf16.msra.mxu0 %v11580_v8 }
0x210f   :  { %11582 = vmatprep.subr.bf16.mxu0 %v12682_v49 }
0x2112   :  { %11584 = vmatpush3.bf16.msra.mxu0 %v11583_v17 }
0x21c8   :  { %v8680_v54 = vpop.f32.mrb[62].mxu0  ;;  %v8751_v29 = vpop.f32.mrb[70].mxu1 }
0x21c9   :  { %v11707_v63 = vadd.f32 %v8680_v54, %v14605_v6  ;;  %v8682_v27 = vpop.f32.mrb[63].mxu0  ;;  %v8753_v13 = vpop.f32.mrb[71].mxu1  ;;  %v11723_v26 = vadd.f32 %v8751_v29, %v14613_v31 }
0x21ca   :  { %v11708_v43 = vadd.f32 %v8682_v27, %v14608_v21  ;;  %v11724_v33 = vadd.f32 %v8753_v13, %v14616_v14 }
0x21cb   :  { %v9041_v24 = vmul.f32 -1.442695, %v11707_v63  ;;  %v9043_v48 = vmul.f32 -1.442695, %v11723_v26 }
0x21cc   :  { %v9042_v60 = vmul.f32 -1.442695, %v11708_v43 }
0x21cd   :  { %12485 = vpow2.f32 %v9041_v24 }
0x21ce   :  { %12487 = vpow2.f32 %v9042_v60 }
0x21cf   :  { %12489 = vtanh.f32 %v11724_v33 }
0x21d0   :  { %12491 = vpow2.f32 %v9043_v48 }
0x21d7   :  { %v12486_v52 = vpop.eup %12485 }
0x21d8   :  { %v8773_v0 = vadd.f32 1.0, %v12486_v52  ;;  %v12488_v41 = vpop.eup %12487 }
0x21d9   :  { %v8774_v6 = vadd.f32 1.0, %v12488_v41  ;;  %v12490_v36 = vpop.eup %12489 }
0x21da   :  { %12493 = vrcp.f32 %v8773_v0  ;;  %v12492_v55 = vpop.eup %12491 }
0x21db   :  { %12495 = vrcp.f32 %v8774_v6  ;;  %v8775_v10 = vadd.f32 1.0, %v12492_v55 }
0x21dd   :  { %12497 = vrcp.f32 %v8775_v10 }
0x21e4   :  { %v12494_v21 = vpop.eup %12493 }
0x21e5   :  { %v8784_v25 = vmul.f32 %v12494_v21, %v12490_v36  ;;  %v12496_v47 = vpop.eup %12495 }
0x21e6   :  { %v8783_v15 = vmul.f32 %v12496_v47, %v14882_v56 }
0x21e7   :  { %v12498_v14 = vpop.eup %12497 }
0x21e8   :  { %v8785_v31 = vadd.f32 %v8784_v25, %v8783_v15 }
0x21ea   :  { %12499 = vtanh.f32 %v8785_v31 }
0x21f4   :  { %v12500_v50 = vpop.eup %12499 }
0x21f5   :  { %v8787_v4 = vmul.f32 %v12500_v50, %v12498_v14 }
0x21f7   :  { %8788 = vst.msk [vmem:[#allocation3 + $0x38] sm:$0xff] %vm954_vm1, %v8787_v4 }
0x21f8   :  { %8789 = vst.msk [vmem:[#allocation3] sm:$0xff] %vm957_vm2, %v8787_v4 }
0x21fe   :  { %v8790_v18 = vld [vmem:[#allocation3 + $0x38] sm:$0xff] }
0x21ff   :  { %9095 = vmatmul.mubr.f32.vlgmr.msra.gmra.mrb[64].mxu0 %v8790_v18 }
0x22d2   :  { %v8880_v44 = vpop.f32.mrb[64].mxu0 }
0x22d3   :  { %v8881_v58 = vadd.f32 %v9044_v12, %v8880_v44  ;;  %v9096_v62 = vpop.f32.mrb[65].mxu0 }
0x22d5   :  { %v8885_v1 = vsel %vm8884_vm4, %v8881_v58, -inf }
0x22d6   :  { %8886 = vmax.xlane.f32.xlu0 %v8885_v1 }
0x2363   :  { %v8887_v22 = vpop.xlane.xlu0 %8886 }
0x2364   :  { %v8888_v20 = vsub.f32 %v8881_v58, %v8887_v22 }
0x2366   :  { %v8889_v61 = vmul.f32 1.442695, %v8888_v20 }
0x2368   :  { %12501 = vpow2.f32 %v8889_v61 }
0x2372   :  { %v12502_v56 = vpop.eup %12501 }
0x2373   :  { %v8891_v40 = vsel %vm8884_vm4, %v12502_v56, 0.0 }
0x2374   :  { %8892 = vadd.xlane.f32.xlu0 %v8891_v40 }
0x2401   :  { %v8893_v45 = vpop.xlane.xlu0 %8892 }
0x2402   :  { %12503 = vlog2.f32 %v8893_v45 }
0x240c   :  { %v12504_v39 = vpop.eup %12503 }
0x240d   :  { %v8895_v37 = vmul.f32 0.6931472, %v12504_v39 }
0x240f   :  { %v8896_v38 = vsub.f32 %v8888_v20, %v8895_v37 }
0x2411   :  { %8897 = vst.msk [vmem:[#allocation17] sm:$0xff] %vm8884_vm4, %v8896_v38 }
0x2412   :  { %12648 = shalt.err (!%p12645_p10)
}
0x2413   :  { %s12649_s10 = scalar_lea.hbm %s14965_s7, 128 }
0x2414   :  { %p12650_p11 = scmp.ne.s32.totalorder %s14965_s7, %s12649_s10  ;;  %p12653_p12 = scmp.lt.u32.totalorder %s12649_s10, %s14965_s7 }
0x2416   :  { %p12655_p13 = pnand %p12653_p12, %p12650_p11 }
0x2418   :  { %12658 = shalt.err (!%p12655_p13)
}
0x2419   :  { %8907 = dma.vmem_to_hbm [thread:$0]  %s8905_s29, 128, %s14965_s7, [#allocation8]  }
0x241a   :  { %12667 = dma.done.wait [#allocation8], 128  }
0x241b   :  { %12668 = vsyncadd [#allocation8], 4294967168 }
0x241c   :  { %8911 = vsyncpa [#allocation7], 1 }
0x241d   :  { %8912 = vsyncpa [#allocation10], 1 }
0x241e   :  { %8913 = vsyncpa [#allocation13], 1 }
0x241f   :  { %8914 = vsyncpa [#allocation16], 1 }
0x2420   :  { %8915 = vsyncpa [#allocation8], 1 }

</bundles_post_ra>
